<compile_context>
chip_gen: v7x
topology: tpu7x:2x2x1
jax: 0.10.0
libtpu: 0.0.40
codegen_flags: <defaults>
</compile_context>

<pallas_src>
import math
import numpy as np

import jax
import jax.numpy as jnp
from jax import lax
from jax.experimental import pallas as pl
from jax.experimental.pallas import tpu as pltpu

INPUT_SIZE = 1
HIDDEN = 128          # module's real hidden size; 4H = 512 is lane/vreg aligned
NUM_LAYERS = 2        # hard-coded as two explicit bidirectional layers below
OUTPUT_SIZE = 1
SEQ_LEN = 8
NEG_SLOPE = 0.01      # nn.LeakyReLU default


def _bilstm_layer(gxf_ref, gxb_ref, w_ref, w_row0, T,
                  diag_mask, gate_scale, gate_off):
    """One bidirectional layer, forward + backward fused in a single unrolled loop.

    gxf_ref : (T, 4H) hoisted input projections, forward direction, time order.
    gxb_ref : (T, 4H) hoisted input projections, backward direction, stored in
              REVERSE time order (row i <-> output time T-1-i), so both directions
              read row i at step i.
    w_ref   : big weight ref; rows [w_row0, w_row0 + 2H) hold the vertically
              stacked recurrent weights [Whh_f^T ; Whh_b^T] -> (2H, 4H).
    Returns (hf_steps, hb_steps): Python lists of (1, H) values;
      hf_steps[i] = forward hidden at time i,
      hb_steps[i] = backward hidden at time T-1-i.
    """
    H = HIDDEN
    h = jnp.zeros((2, H), jnp.float32)     # row 0: h_fwd, row 1: h_bwd
    c = jnp.zeros((2, H), jnp.float32)
    hf_steps, hb_steps = [], []

    for i in range(T):                      # fully unrolled (T is small and static)
        # Block-diagonal LHS [[h_f, 0], [0, h_b]] so ONE matmul serves both
        # directions with K = 2H (full MXU height on v6e/v7x).
        lhs = jnp.concatenate([h, h], axis=1) * diag_mask              # (2, 2H)
        w = w_ref[pl.ds(w_row0, 2 * H), :]                             # (2H, 4H)
        gates = jnp.dot(lhs, w, preferred_element_type=jnp.float32)    # (2, 4H)
        gx = jnp.concatenate([gxf_ref[pl.ds(i, 1), :],
                              gxb_ref[pl.ds(i, 1), :]], axis=0)        # (2, 4H)
        gates = gates + gx

        # Joint nonlinearities for both directions:
        #   sigmoid(x) = 0.5 * (1 + tanh(x / 2))  for i/f/o,  tanh(x) for g,
        # realized as one tanh pass plus a per-gate affine (gate_scale/gate_off).
        t = jnp.tanh(gates * gate_scale)
        act = t * gate_scale + gate_off                                # (2, 4H)
        i_g = act[:, 0 * H:1 * H]
        f_g = act[:, 1 * H:2 * H]
        g_g = act[:, 2 * H:3 * H]
        o_g = act[:, 3 * H:4 * H]
        c = f_g * c + i_g * g_g
        h = o_g * jnp.tanh(c)                                          # (2, H)

        hf_steps.append(h[0:1, :])
        hb_steps.append(h[1:2, :])
    return hf_steps, hb_steps


def bilstm_kernel(x2_ref, w_big_ref, fc1t_ref, small_ref, out_ref,
                  gxf_ref, gxb_ref):
    H = HIDDEN
    T = x2_ref.shape[0]

    # ---- in-kernel constants (no extra DMAs) -------------------------------
    col4 = lax.broadcasted_iota(jnp.int32, (1, 4 * H), 1)
    is_g = (col4 >= 2 * H) & (col4 < 3 * H)          # g-gate columns use plain tanh
    gate_scale = jnp.where(is_g, 1.0, 0.5).astype(jnp.float32)    # (1, 4H)
    gate_off = jnp.where(is_g, 0.0, 0.5).astype(jnp.float32)      # (1, 4H)
    col2 = lax.broadcasted_iota(jnp.int32, (2, 2 * H), 1)
    row2 = lax.broadcasted_iota(jnp.int32, (2, 2 * H), 0)
    diag_mask = ((col2 >= H) == (row2 >= 1)).astype(jnp.float32)  # (2, 2H)

    # ---- small packed params ------------------------------------------------
    w0f_row = small_ref[0:1, :]          # layer-0 fwd W_ih^T (input size 1 -> one row)
    w0b_row = small_ref[1:2, :]
    b0f = small_ref[2:3, :]
    b0b = small_ref[3:4, :]
    b1f = small_ref[4:5, :]
    b1b = small_ref[5:6, :]
    fc1_b = small_ref[6:7, 0:H]          # (1, H)
    fc2_b = small_ref[6:7, H:H + 1]      # (1, 1)
    fc2_row = small_ref[7:8, 0:H]        # (1, H)

    # ---- layer 0: hoisted input projections (input size 1 -> VPU broadcast) -
    x2 = x2_ref[...]                      # (T, 2): col 0 = x, col 1 = x reversed in time
    xf = x2[:, 0:1]
    xr = x2[:, 1:2]
    gxf_ref[...] = xf * w0f_row + b0f     # (T, 4H), time order
    gxb_ref[...] = xr * w0b_row + b0b     # (T, 4H), reverse-time order
    hf0, hb0 = _bilstm_layer(gxf_ref, gxb_ref, w_big_ref, 0, T,
                             diag_mask, gate_scale, gate_off)

    # ---- layer 1: projections as single K=2H matmuls on the (T, 2H) outputs -
    l0 = jnp.concatenate([jnp.concatenate(hf0, axis=0),
                          jnp.concatenate(hb0[::-1], axis=0)], axis=1)     # (T, 2H)
    l0_rev = jnp.concatenate([jnp.concatenate(hf0[::-1], axis=0),
                              jnp.concatenate(hb0, axis=0)], axis=1)       # (T, 2H) = flip(l0)
    w1f = w_big_ref[pl.ds(4 * H, 2 * H), :]                                # (2H, 4H)
    w1b = w_big_ref[pl.ds(6 * H, 2 * H), :]
    gxf_ref[...] = jnp.dot(l0, w1f, preferred_element_type=jnp.float32) + b1f
    gxb_ref[...] = jnp.dot(l0_rev, w1b, preferred_element_type=jnp.float32) + b1b
    hf1, hb1 = _bilstm_layer(gxf_ref, gxb_ref, w_big_ref, 2 * H, T,
                             diag_mask, gate_scale, gate_off)

    # ---- fc1 (single K=2H matmul) -> LeakyReLU -> fc2 as a lane reduction ---
    l1 = jnp.concatenate([jnp.concatenate(hf1, axis=0),
                          jnp.concatenate(hb1[::-1], axis=0)], axis=1)     # (T, 2H)
    y = jnp.dot(l1, fc1t_ref[...], preferred_element_type=jnp.float32) + fc1_b  # (T, H)
    y = jnp.where(y > 0, y, NEG_SLOPE * y)
    out_ref[...] = jnp.sum(y * fc2_row, axis=-1, keepdims=True) + fc2_b    # (T, 1)


def bilstm_forward(x, packed):
    """x: (T, 1) float32.  packed: [w_big (1024,512), fc1t (256,128), small (8,512)]."""
    assert x.shape[1] == INPUT_SIZE == 1
    T = x.shape[0]
    # Pack forward and time-reversed input into one tiny (T, 2) array (1 DMA).
    x2 = jnp.concatenate([x, x[::-1]], axis=1).astype(jnp.float32)
    vmem = pl.BlockSpec(memory_space=pltpu.MemorySpace.VMEM)
    return pl.pallas_call(
        bilstm_kernel,
        out_shape=jax.ShapeDtypeStruct((T, OUTPUT_SIZE), jnp.float32),
        in_specs=[vmem, vmem, vmem, vmem],
        out_specs=vmem,
        scratch_shapes=[
            pltpu.VMEM((T, 4 * HIDDEN), jnp.float32),   # gx fwd (reused by both layers)
            pltpu.VMEM((T, 4 * HIDDEN), jnp.float32),   # gx bwd, reverse-time order
        ],
    )(x2, *packed)


# ---------------------------------------------------------------------------
# Deterministic PyTorch-style parameter init (uniform(-1/sqrt(H), 1/sqrt(H)))
# in native PyTorch layout; kernel layout is derived by pack_kernel_params.
# ---------------------------------------------------------------------------
def init_raw_params(key):
    H = HIDDEN
    bound = 1.0 / math.sqrt(H)

    def uni(k, shape):
        return jax.random.uniform(k, shape, jnp.float32, -bound, bound)

    lstm = []
    in_sizes = [INPUT_SIZE, INPUT_SIZE, 2 * H, 2 * H]   # l0 fwd, l0 bwd, l1 fwd, l1 bwd
    for in_sz in in_sizes:
        key, k1, k2, k3, k4 = jax.random.split(key, 5)
        lstm.append((uni(k1, (4 * H, in_sz)),    # w_ih (PyTorch layout)
                     uni(k2, (4 * H, H)),        # w_hh
                     uni(k3, (4 * H,)),          # b_ih
                     uni(k4, (4 * H,))))         # b_hh
    key, k1, k2, k3, k4 = jax.random.split(key, 5)
    fc = (uni(k1, (H, 2 * H)), uni(k2, (H,)),
          uni(k3, (OUTPUT_SIZE, H)), uni(k4, (OUTPUT_SIZE,)))
    return lstm, fc


def pack_kernel_params(raw):
    """Pack all module parameters into 3 device arrays (few, large DMAs)."""
    (l0f, l0b, l1f, l1b), (fc1_w, fc1_b, fc2_w, fc2_b) = raw
    H = HIDDEN

    def tdir(p):
        w_ih, w_hh, b_ih, b_hh = p
        return w_ih.T, w_hh.T, (b_ih + b_hh).reshape(1, 4 * H)

    w0f_ih, w0f_hh, b0f = tdir(l0f)        # w0*_ih: (1, 4H)   w*_hh: (H, 4H)
    w0b_ih, w0b_hh, b0b = tdir(l0b)
    w1f_ih, w1f_hh, b1f = tdir(l1f)        # w1*_ih: (2H, 4H)
    w1b_ih, w1b_hh, b1b = tdir(l1b)

    # Big weight slab: rows [0:2H)  = layer-0 [Whh_f^T ; Whh_b^T]
    #                  rows [2H:4H) = layer-1 [Whh_f^T ; Whh_b^T]
    #                  rows [4H:6H) = layer-1 fwd W_ih^T
    #                  rows [6H:8H) = layer-1 bwd W_ih^T
    w_big = jnp.concatenate([w0f_hh, w0b_hh, w1f_hh, w1b_hh, w1f_ih, w1b_ih],
                            axis=0)                              # (8H, 4H) = (1024, 512)
    fc1t = fc1_w.T                                               # (2H, H)  = (256, 128)

    small = jnp.zeros((8, 4 * H), jnp.float32)
    small = small.at[0:1, :].set(w0f_ih)
    small = small.at[1:2, :].set(w0b_ih)
    small = small.at[2:3, :].set(b0f)
    small = small.at[3:4, :].set(b0b)
    small = small.at[4:5, :].set(b1f)
    small = small.at[5:6, :].set(b1b)
    small = small.at[6, 0:H].set(fc1_b)
    small = small.at[6, H].set(fc2_b[0])
    small = small.at[7, 0:H].set(fc2_w.reshape(H))
    return [w_big, fc1t, small]


# ---------------------------------------------------------------------------
# Pure-JAX reference (same math, PyTorch semantics) for a correctness check
# ---------------------------------------------------------------------------
def _ref_lstm_dir(xs, w_ih, w_hh, b_ih, b_hh, reverse):
    T = xs.shape[0]
    H = HIDDEN
    w_ih_t, w_hh_t, b = w_ih.T, w_hh.T, (b_ih + b_hh).reshape(1, 4 * H)
    h = jnp.zeros((1, H), jnp.float32)
    c = jnp.zeros((1, H), jnp.float32)
    hs = [None] * T
    order = range(T - 1, -1, -1) if reverse else range(T)
    for t in order:
        gates = xs[t:t + 1] @ w_ih_t + h @ w_hh_t + b
        i = jax.nn.sigmoid(gates[:, 0:H])
        f = jax.nn.sigmoid(gates[:, H:2 * H])
        g = jnp.tanh(gates[:, 2 * H:3 * H])
        o = jax.nn.sigmoid(gates[:, 3 * H:4 * H])
        c = f * c + i * g
        h = o * jnp.tanh(c)
        hs[t] = h
    return jnp.concatenate(hs, axis=0)


def reference_forward(x, raw):
    (l0f, l0b, l1f, l1b), (fc1_w, fc1_b, fc2_w, fc2_b) = raw
    l0 = jnp.concatenate([_ref_lstm_dir(x, *l0f, reverse=False),
                          _ref_lstm_dir(x, *l0b, reverse=True)], axis=1)
    l1 = jnp.concatenate([_ref_lstm_dir(l0, *l1f, reverse=False),
                          _ref_lstm_dir(l0, *l1b, reverse=True)], axis=1)
    y = l1 @ fc1_w.T + fc1_b
    y = jnp.where(y > 0, y, NEG_SLOPE * y)
    return y @ fc2_w.T + fc2_b


if __name__ == "__main__":
    key = jax.random.PRNGKey(0)
    key, xk = jax.random.split(key)
    x = jax.random.normal(xk, (SEQ_LEN, INPUT_SIZE), jnp.float32)

    raw = init_raw_params(key)
    kparams = pack_kernel_params(raw)

    out = jax.block_until_ready(bilstm_forward(x, kparams))
    ref = jax.block_until_ready(reference_forward(x, raw))

    assert out.shape == (SEQ_LEN, OUTPUT_SIZE)
    np.testing.assert_allclose(np.asarray(out), np.asarray(ref), rtol=1e-3, atol=1e-3)

    print("KERNEL_OK")
</pallas_src>

<mosaic_0001>
module attributes {stable_mosaic.version = 11 : i64} {
  func.func @bilstm_kernel(%arg0: memref<8x2xf32, #tpu.memory_space<vmem>>, %arg1: memref<1024x512xf32, #tpu.memory_space<vmem>>, %arg2: memref<256x128xf32, #tpu.memory_space<vmem>>, %arg3: memref<8x512xf32, #tpu.memory_space<vmem>>, %arg4: memref<8x1xf32, #tpu.memory_space<vmem>>, %arg5: memref<8x512xf32, #tpu.memory_space<vmem>>, %arg6: memref<8x512xf32, #tpu.memory_space<vmem>>) attributes {dimension_semantics = [], scalar_prefetch = 0 : i64, scratch_operands = 2 : i64, tpu.core_type = #tpu.core_type<tc>} {
    %0 = tpu.iota {dimensions = array<i32: 1>} : vector<1x512xi32>
    %c256_i32 = arith.constant 256 : i32
    %1 = vector.broadcast %c256_i32 : i32 to vector<1x512xi32>
    %2 = arith.cmpi sge, %0, %1 : vector<1x512xi32>
    %c384_i32 = arith.constant 384 : i32
    %3 = vector.broadcast %c384_i32 : i32 to vector<1x512xi32>
    %4 = arith.cmpi slt, %0, %3 : vector<1x512xi32>
    %5 = arith.andi %2, %4 : vector<1x512xi1>
    %cst = arith.constant 1.000000e+00 : f32
    %cst_0 = arith.constant 5.000000e-01 : f32
    %6 = vector.broadcast %cst : f32 to vector<1x512xf32>
    %7 = vector.broadcast %cst_0 : f32 to vector<1x512xf32>
    %8 = arith.select %5, %6, %7 : vector<1x512xi1>, vector<1x512xf32>
    %cst_1 = arith.constant 0.000000e+00 : f32
    %cst_2 = arith.constant 5.000000e-01 : f32
    %9 = vector.broadcast %cst_1 : f32 to vector<1x512xf32>
    %10 = vector.broadcast %cst_2 : f32 to vector<1x512xf32>
    %11 = arith.select %5, %9, %10 : vector<1x512xi1>, vector<1x512xf32>
    %12 = tpu.iota {dimensions = array<i32: 1>} : vector<2x256xi32>
    %13 = tpu.iota {dimensions = array<i32: 0>} : vector<2x256xi32>
    %c128_i32 = arith.constant 128 : i32
    %14 = vector.broadcast %c128_i32 : i32 to vector<2x256xi32>
    %15 = arith.cmpi sge, %12, %14 : vector<2x256xi32>
    %c1_i32 = arith.constant 1 : i32
    %16 = vector.broadcast %c1_i32 : i32 to vector<2x256xi32>
    %17 = arith.cmpi sge, %13, %16 : vector<2x256xi32>
    %18 = arith.xori %15, %17 : vector<2x256xi1>
    %cst_3 = arith.constant dense<true> : vector<2x256xi1>
    %19 = arith.xori %18, %cst_3 : vector<2x256xi1>
    %20 = arith.extui %19 : vector<2x256xi1> to vector<2x256xi32>
    %21 = arith.sitofp %20 : vector<2x256xi32> to vector<2x256xf32>
    %c0 = arith.constant 0 : index
    %c0_4 = arith.constant 0 : index
    %22 = vector.load %arg3[%c0, %c0_4] : memref<8x512xf32, #tpu.memory_space<vmem>>, vector<1x512xf32>
    %c1 = arith.constant 1 : index
    %c0_5 = arith.constant 0 : index
    %23 = vector.load %arg3[%c1, %c0_5] : memref<8x512xf32, #tpu.memory_space<vmem>>, vector<1x512xf32>
    %c2 = arith.constant 2 : index
    %c0_6 = arith.constant 0 : index
    %24 = vector.load %arg3[%c2, %c0_6] : memref<8x512xf32, #tpu.memory_space<vmem>>, vector<1x512xf32>
    %c3 = arith.constant 3 : index
    %c0_7 = arith.constant 0 : index
    %25 = vector.load %arg3[%c3, %c0_7] : memref<8x512xf32, #tpu.memory_space<vmem>>, vector<1x512xf32>
    %c4 = arith.constant 4 : index
    %c0_8 = arith.constant 0 : index
    %26 = vector.load %arg3[%c4, %c0_8] : memref<8x512xf32, #tpu.memory_space<vmem>>, vector<1x512xf32>
    %c5 = arith.constant 5 : index
    %c0_9 = arith.constant 0 : index
    %27 = vector.load %arg3[%c5, %c0_9] : memref<8x512xf32, #tpu.memory_space<vmem>>, vector<1x512xf32>
    %c6 = arith.constant 6 : index
    %c0_10 = arith.constant 0 : index
    %28 = vector.load %arg3[%c6, %c0_10] : memref<8x512xf32, #tpu.memory_space<vmem>>, vector<1x128xf32>
    %c6_11 = arith.constant 6 : index
    %c128 = arith.constant 128 : index
    %29 = vector.load %arg3[%c6_11, %c128] : memref<8x512xf32, #tpu.memory_space<vmem>>, vector<1x1xf32>
    %c7 = arith.constant 7 : index
    %c0_12 = arith.constant 0 : index
    %30 = vector.load %arg3[%c7, %c0_12] : memref<8x512xf32, #tpu.memory_space<vmem>>, vector<1x128xf32>
    %c0_13 = arith.constant 0 : index
    %c0_14 = arith.constant 0 : index
    %31 = vector.load %arg0[%c0_13, %c0_14] : memref<8x2xf32, #tpu.memory_space<vmem>>, vector<8x2xf32>
    %32 = vector.extract_strided_slice %31 {offsets = [0, 0], sizes = [8, 1], strides = [1, 1]} : vector<8x2xf32> to vector<8x1xf32>
    %33 = vector.extract_strided_slice %31 {offsets = [0, 1], sizes = [8, 1], strides = [1, 1]} : vector<8x2xf32> to vector<8x1xf32>
    %34 = vector.broadcast %32 : vector<8x1xf32> to vector<8x512xf32>
    %35 = vector.broadcast %22 : vector<1x512xf32> to vector<8x512xf32>
    %36 = arith.mulf %34, %35 : vector<8x512xf32>
    %37 = vector.broadcast %24 : vector<1x512xf32> to vector<8x512xf32>
    %38 = arith.addf %36, %37 : vector<8x512xf32>
    %c0_15 = arith.constant 0 : index
    %c0_16 = arith.constant 0 : index
    %39 = vector.load %arg5[%c0_15, %c0_16] : memref<8x512xf32, #tpu.memory_space<vmem>>, vector<8x512xf32>
    tpu.vector_store %arg5[%c0_15, %c0_16], %38 {strides = array<i32>} : memref<8x512xf32, #tpu.memory_space<vmem>>, vector<8x512xf32>,
    %40 = vector.broadcast %33 : vector<8x1xf32> to vector<8x512xf32>
    %41 = vector.broadcast %23 : vector<1x512xf32> to vector<8x512xf32>
    %42 = arith.mulf %40, %41 : vector<8x512xf32>
    %43 = vector.broadcast %25 : vector<1x512xf32> to vector<8x512xf32>
    %44 = arith.addf %42, %43 : vector<8x512xf32>
    %c0_17 = arith.constant 0 : index
    %c0_18 = arith.constant 0 : index
    %45 = vector.load %arg6[%c0_17, %c0_18] : memref<8x512xf32, #tpu.memory_space<vmem>>, vector<8x512xf32>
    tpu.vector_store %arg6[%c0_17, %c0_18], %44 {strides = array<i32>} : memref<8x512xf32, #tpu.memory_space<vmem>>, vector<8x512xf32>,
    %cst_19 = arith.constant 0.000000e+00 : f32
    %46 = vector.broadcast %cst_19 : f32 to vector<2x128xf32>
    %cst_20 = arith.constant 0.000000e+00 : f32
    %47 = vector.broadcast %cst_20 : f32 to vector<2x128xf32>
    %48 = tpu.concatenate %46, %46 in 1 : vector<2x128xf32>, vector<2x128xf32> -> vector<2x256xf32>
    %49 = arith.mulf %48, %21 : vector<2x256xf32>
    %c0_21 = arith.constant 0 : index
    %c0_22 = arith.constant 0 : index
    %50 = vector.load %arg1[%c0_21, %c0_22] : memref<1024x512xf32, #tpu.memory_space<vmem>>, vector<256x512xf32>
    %cst_23 = arith.constant dense<0.000000e+00> : vector<2x512xf32>
    %51 = tpu.matmul %49, %50, %cst_23 {dimension_numbers = #tpu.dot_dimension_numbers<[1], [0], [0], [1], [0, 0, 1, 1], [], []>} : vector<2x256xf32>, vector<256x512xf32>, vector<2x512xf32> -> vector<2x512xf32>
    %c0_24 = arith.constant 0 : index
    %c0_25 = arith.constant 0 : index
    %52 = vector.load %arg5[%c0_24, %c0_25] : memref<8x512xf32, #tpu.memory_space<vmem>>, vector<1x512xf32>
    %c0_26 = arith.constant 0 : index
    %c0_27 = arith.constant 0 : index
    %53 = vector.load %arg6[%c0_26, %c0_27] : memref<8x512xf32, #tpu.memory_space<vmem>>, vector<1x512xf32>
    %54 = tpu.concatenate %52, %53 in 0 : vector<1x512xf32>, vector<1x512xf32> -> vector<2x512xf32>
    %55 = arith.addf %51, %54 : vector<2x512xf32>
    %56 = vector.broadcast %8 : vector<1x512xf32> to vector<2x512xf32>
    %57 = arith.mulf %55, %56 : vector<2x512xf32>
    %58 = math.tanh %57 : vector<2x512xf32>
    %59 = vector.broadcast %8 : vector<1x512xf32> to vector<2x512xf32>
    %60 = arith.mulf %58, %59 : vector<2x512xf32>
    %61 = vector.broadcast %11 : vector<1x512xf32> to vector<2x512xf32>
    %62 = arith.addf %60, %61 : vector<2x512xf32>
    %63 = vector.extract_strided_slice %62 {offsets = [0, 0], sizes = [2, 128], strides = [1, 1]} : vector<2x512xf32> to vector<2x128xf32>
    %64 = vector.extract_strided_slice %62 {offsets = [0, 128], sizes = [2, 128], strides = [1, 1]} : vector<2x512xf32> to vector<2x128xf32>
    %65 = vector.extract_strided_slice %62 {offsets = [0, 256], sizes = [2, 128], strides = [1, 1]} : vector<2x512xf32> to vector<2x128xf32>
    %66 = vector.extract_strided_slice %62 {offsets = [0, 384], sizes = [2, 128], strides = [1, 1]} : vector<2x512xf32> to vector<2x128xf32>
    %67 = arith.mulf %64, %47 : vector<2x128xf32>
    %68 = arith.mulf %63, %65 : vector<2x128xf32>
    %69 = arith.addf %67, %68 : vector<2x128xf32>
    %70 = math.tanh %69 : vector<2x128xf32>
    %71 = arith.mulf %66, %70 : vector<2x128xf32>
    %72 = vector.extract_strided_slice %71 {offsets = [0, 0], sizes = [1, 128], strides = [1, 1]} : vector<2x128xf32> to vector<1x128xf32>
    %73 = vector.extract_strided_slice %71 {offsets = [1, 0], sizes = [1, 128], strides = [1, 1]} : vector<2x128xf32> to vector<1x128xf32>
    %74 = tpu.concatenate %71, %71 in 1 : vector<2x128xf32>, vector<2x128xf32> -> vector<2x256xf32>
    %75 = arith.mulf %74, %21 : vector<2x256xf32>
    %c0_28 = arith.constant 0 : index
    %c0_29 = arith.constant 0 : index
    %76 = vector.load %arg1[%c0_28, %c0_29] : memref<1024x512xf32, #tpu.memory_space<vmem>>, vector<256x512xf32>
    %cst_30 = arith.constant dense<0.000000e+00> : vector<2x512xf32>
    %77 = tpu.matmul %75, %76, %cst_30 {dimension_numbers = #tpu.dot_dimension_numbers<[1], [0], [0], [1], [0, 0, 1, 1], [], []>} : vector<2x256xf32>, vector<256x512xf32>, vector<2x512xf32> -> vector<2x512xf32>
    %c1_31 = arith.constant 1 : index
    %c0_32 = arith.constant 0 : index
    %78 = vector.load %arg5[%c1_31, %c0_32] : memref<8x512xf32, #tpu.memory_space<vmem>>, vector<1x512xf32>
    %c1_33 = arith.constant 1 : index
    %c0_34 = arith.constant 0 : index
    %79 = vector.load %arg6[%c1_33, %c0_34] : memref<8x512xf32, #tpu.memory_space<vmem>>, vector<1x512xf32>
    %80 = tpu.concatenate %78, %79 in 0 : vector<1x512xf32>, vector<1x512xf32> -> vector<2x512xf32>
    %81 = arith.addf %77, %80 : vector<2x512xf32>
    %82 = vector.broadcast %8 : vector<1x512xf32> to vector<2x512xf32>
    %83 = arith.mulf %81, %82 : vector<2x512xf32>
    %84 = math.tanh %83 : vector<2x512xf32>
    %85 = vector.broadcast %8 : vector<1x512xf32> to vector<2x512xf32>
    %86 = arith.mulf %84, %85 : vector<2x512xf32>
    %87 = vector.broadcast %11 : vector<1x512xf32> to vector<2x512xf32>
    %88 = arith.addf %86, %87 : vector<2x512xf32>
    %89 = vector.extract_strided_slice %88 {offsets = [0, 0], sizes = [2, 128], strides = [1, 1]} : vector<2x512xf32> to vector<2x128xf32>
    %90 = vector.extract_strided_slice %88 {offsets = [0, 128], sizes = [2, 128], strides = [1, 1]} : vector<2x512xf32> to vector<2x128xf32>
    %91 = vector.extract_strided_slice %88 {offsets = [0, 256], sizes = [2, 128], strides = [1, 1]} : vector<2x512xf32> to vector<2x128xf32>
    %92 = vector.extract_strided_slice %88 {offsets = [0, 384], sizes = [2, 128], strides = [1, 1]} : vector<2x512xf32> to vector<2x128xf32>
    %93 = arith.mulf %90, %69 : vector<2x128xf32>
    %94 = arith.mulf %89, %91 : vector<2x128xf32>
    %95 = arith.addf %93, %94 : vector<2x128xf32>
    %96 = math.tanh %95 : vector<2x128xf32>
    %97 = arith.mulf %92, %96 : vector<2x128xf32>
    %98 = vector.extract_strided_slice %97 {offsets = [0, 0], sizes = [1, 128], strides = [1, 1]} : vector<2x128xf32> to vector<1x128xf32>
    %99 = vector.extract_strided_slice %97 {offsets = [1, 0], sizes = [1, 128], strides = [1, 1]} : vector<2x128xf32> to vector<1x128xf32>
    %100 = tpu.concatenate %97, %97 in 1 : vector<2x128xf32>, vector<2x128xf32> -> vector<2x256xf32>
    %101 = arith.mulf %100, %21 : vector<2x256xf32>
    %c0_35 = arith.constant 0 : index
    %c0_36 = arith.constant 0 : index
    %102 = vector.load %arg1[%c0_35, %c0_36] : memref<1024x512xf32, #tpu.memory_space<vmem>>, vector<256x512xf32>
    %cst_37 = arith.constant dense<0.000000e+00> : vector<2x512xf32>
    %103 = tpu.matmul %101, %102, %cst_37 {dimension_numbers = #tpu.dot_dimension_numbers<[1], [0], [0], [1], [0, 0, 1, 1], [], []>} : vector<2x256xf32>, vector<256x512xf32>, vector<2x512xf32> -> vector<2x512xf32>
    %c2_38 = arith.constant 2 : index
    %c0_39 = arith.constant 0 : index
    %104 = vector.load %arg5[%c2_38, %c0_39] : memref<8x512xf32, #tpu.memory_space<vmem>>, vector<1x512xf32>
    %c2_40 = arith.constant 2 : index
    %c0_41 = arith.constant 0 : index
    %105 = vector.load %arg6[%c2_40, %c0_41] : memref<8x512xf32, #tpu.memory_space<vmem>>, vector<1x512xf32>
    %106 = tpu.concatenate %104, %105 in 0 : vector<1x512xf32>, vector<1x512xf32> -> vector<2x512xf32>
    %107 = arith.addf %103, %106 : vector<2x512xf32>
    %108 = vector.broadcast %8 : vector<1x512xf32> to vector<2x512xf32>
    %109 = arith.mulf %107, %108 : vector<2x512xf32>
    %110 = math.tanh %109 : vector<2x512xf32>
    %111 = vector.broadcast %8 : vector<1x512xf32> to vector<2x512xf32>
    %112 = arith.mulf %110, %111 : vector<2x512xf32>
    %113 = vector.broadcast %11 : vector<1x512xf32> to vector<2x512xf32>
    %114 = arith.addf %112, %113 : vector<2x512xf32>
    %115 = vector.extract_strided_slice %114 {offsets = [0, 0], sizes = [2, 128], strides = [1, 1]} : vector<2x512xf32> to vector<2x128xf32>
    %116 = vector.extract_strided_slice %114 {offsets = [0, 128], sizes = [2, 128], strides = [1, 1]} : vector<2x512xf32> to vector<2x128xf32>
    %117 = vector.extract_strided_slice %114 {offsets = [0, 256], sizes = [2, 128], strides = [1, 1]} : vector<2x512xf32> to vector<2x128xf32>
    %118 = vector.extract_strided_slice %114 {offsets = [0, 384], sizes = [2, 128], strides = [1, 1]} : vector<2x512xf32> to vector<2x128xf32>
    %119 = arith.mulf %116, %95 : vector<2x128xf32>
    %120 = arith.mulf %115, %117 : vector<2x128xf32>
    %121 = arith.addf %119, %120 : vector<2x128xf32>
    %122 = math.tanh %121 : vector<2x128xf32>
    %123 = arith.mulf %118, %122 : vector<2x128xf32>
    %124 = vector.extract_strided_slice %123 {offsets = [0, 0], sizes = [1, 128], strides = [1, 1]} : vector<2x128xf32> to vector<1x128xf32>
    %125 = vector.extract_strided_slice %123 {offsets = [1, 0], sizes = [1, 128], strides = [1, 1]} : vector<2x128xf32> to vector<1x128xf32>
    %126 = tpu.concatenate %123, %123 in 1 : vector<2x128xf32>, vector<2x128xf32> -> vector<2x256xf32>
    %127 = arith.mulf %126, %21 : vector<2x256xf32>
    %c0_42 = arith.constant 0 : index
    %c0_43 = arith.constant 0 : index
    %128 = vector.load %arg1[%c0_42, %c0_43] : memref<1024x512xf32, #tpu.memory_space<vmem>>, vector<256x512xf32>
    %cst_44 = arith.constant dense<0.000000e+00> : vector<2x512xf32>
    %129 = tpu.matmul %127, %128, %cst_44 {dimension_numbers = #tpu.dot_dimension_numbers<[1], [0], [0], [1], [0, 0, 1, 1], [], []>} : vector<2x256xf32>, vector<256x512xf32>, vector<2x512xf32> -> vector<2x512xf32>
    %c3_45 = arith.constant 3 : index
    %c0_46 = arith.constant 0 : index
    %130 = vector.load %arg5[%c3_45, %c0_46] : memref<8x512xf32, #tpu.memory_space<vmem>>, vector<1x512xf32>
    %c3_47 = arith.constant 3 : index
    %c0_48 = arith.constant 0 : index
    %131 = vector.load %arg6[%c3_47, %c0_48] : memref<8x512xf32, #tpu.memory_space<vmem>>, vector<1x512xf32>
    %132 = tpu.concatenate %130, %131 in 0 : vector<1x512xf32>, vector<1x512xf32> -> vector<2x512xf32>
    %133 = arith.addf %129, %132 : vector<2x512xf32>
    %134 = vector.broadcast %8 : vector<1x512xf32> to vector<2x512xf32>
    %135 = arith.mulf %133, %134 : vector<2x512xf32>
    %136 = math.tanh %135 : vector<2x512xf32>
    %137 = vector.broadcast %8 : vector<1x512xf32> to vector<2x512xf32>
    %138 = arith.mulf %136, %137 : vector<2x512xf32>
    %139 = vector.broadcast %11 : vector<1x512xf32> to vector<2x512xf32>
    %140 = arith.addf %138, %139 : vector<2x512xf32>
    %141 = vector.extract_strided_slice %140 {offsets = [0, 0], sizes = [2, 128], strides = [1, 1]} : vector<2x512xf32> to vector<2x128xf32>
    %142 = vector.extract_strided_slice %140 {offsets = [0, 128], sizes = [2, 128], strides = [1, 1]} : vector<2x512xf32> to vector<2x128xf32>
    %143 = vector.extract_strided_slice %140 {offsets = [0, 256], sizes = [2, 128], strides = [1, 1]} : vector<2x512xf32> to vector<2x128xf32>
    %144 = vector.extract_strided_slice %140 {offsets = [0, 384], sizes = [2, 128], strides = [1, 1]} : vector<2x512xf32> to vector<2x128xf32>
    %145 = arith.mulf %142, %121 : vector<2x128xf32>
    %146 = arith.mulf %141, %143 : vector<2x128xf32>
    %147 = arith.addf %145, %146 : vector<2x128xf32>
    %148 = math.tanh %147 : vector<2x128xf32>
    %149 = arith.mulf %144, %148 : vector<2x128xf32>
    %150 = vector.extract_strided_slice %149 {offsets = [0, 0], sizes = [1, 128], strides = [1, 1]} : vector<2x128xf32> to vector<1x128xf32>
    %151 = vector.extract_strided_slice %149 {offsets = [1, 0], sizes = [1, 128], strides = [1, 1]} : vector<2x128xf32> to vector<1x128xf32>
    %152 = tpu.concatenate %149, %149 in 1 : vector<2x128xf32>, vector<2x128xf32> -> vector<2x256xf32>
    %153 = arith.mulf %152, %21 : vector<2x256xf32>
    %c0_49 = arith.constant 0 : index
    %c0_50 = arith.constant 0 : index
    %154 = vector.load %arg1[%c0_49, %c0_50] : memref<1024x512xf32, #tpu.memory_space<vmem>>, vector<256x512xf32>
    %cst_51 = arith.constant dense<0.000000e+00> : vector<2x512xf32>
    %155 = tpu.matmul %153, %154, %cst_51 {dimension_numbers = #tpu.dot_dimension_numbers<[1], [0], [0], [1], [0, 0, 1, 1], [], []>} : vector<2x256xf32>, vector<256x512xf32>, vector<2x512xf32> -> vector<2x512xf32>
    %c4_52 = arith.constant 4 : index
    %c0_53 = arith.constant 0 : index
    %156 = vector.load %arg5[%c4_52, %c0_53] : memref<8x512xf32, #tpu.memory_space<vmem>>, vector<1x512xf32>
    %c4_54 = arith.constant 4 : index
    %c0_55 = arith.constant 0 : index
    %157 = vector.load %arg6[%c4_54, %c0_55] : memref<8x512xf32, #tpu.memory_space<vmem>>, vector<1x512xf32>
    %158 = tpu.concatenate %156, %157 in 0 : vector<1x512xf32>, vector<1x512xf32> -> vector<2x512xf32>
    %159 = arith.addf %155, %158 : vector<2x512xf32>
    %160 = vector.broadcast %8 : vector<1x512xf32> to vector<2x512xf32>
    %161 = arith.mulf %159, %160 : vector<2x512xf32>
    %162 = math.tanh %161 : vector<2x512xf32>
    %163 = vector.broadcast %8 : vector<1x512xf32> to vector<2x512xf32>
    %164 = arith.mulf %162, %163 : vector<2x512xf32>
    %165 = vector.broadcast %11 : vector<1x512xf32> to vector<2x512xf32>
    %166 = arith.addf %164, %165 : vector<2x512xf32>
    %167 = vector.extract_strided_slice %166 {offsets = [0, 0], sizes = [2, 128], strides = [1, 1]} : vector<2x512xf32> to vector<2x128xf32>
    %168 = vector.extract_strided_slice %166 {offsets = [0, 128], sizes = [2, 128], strides = [1, 1]} : vector<2x512xf32> to vector<2x128xf32>
    %169 = vector.extract_strided_slice %166 {offsets = [0, 256], sizes = [2, 128], strides = [1, 1]} : vector<2x512xf32> to vector<2x128xf32>
    %170 = vector.extract_strided_slice %166 {offsets = [0, 384], sizes = [2, 128], strides = [1, 1]} : vector<2x512xf32> to vector<2x128xf32>
    %171 = arith.mulf %168, %147 : vector<2x128xf32>
    %172 = arith.mulf %167, %169 : vector<2x128xf32>
    %173 = arith.addf %171, %172 : vector<2x128xf32>
    %174 = math.tanh %173 : vector<2x128xf32>
    %175 = arith.mulf %170, %174 : vector<2x128xf32>
    %176 = vector.extract_strided_slice %175 {offsets = [0, 0], sizes = [1, 128], strides = [1, 1]} : vector<2x128xf32> to vector<1x128xf32>
    %177 = vector.extract_strided_slice %175 {offsets = [1, 0], sizes = [1, 128], strides = [1, 1]} : vector<2x128xf32> to vector<1x128xf32>
    %178 = tpu.concatenate %175, %175 in 1 : vector<2x128xf32>, vector<2x128xf32> -> vector<2x256xf32>
    %179 = arith.mulf %178, %21 : vector<2x256xf32>
    %c0_56 = arith.constant 0 : index
    %c0_57 = arith.constant 0 : index
    %180 = vector.load %arg1[%c0_56, %c0_57] : memref<1024x512xf32, #tpu.memory_space<vmem>>, vector<256x512xf32>
    %cst_58 = arith.constant dense<0.000000e+00> : vector<2x512xf32>
    %181 = tpu.matmul %179, %180, %cst_58 {dimension_numbers = #tpu.dot_dimension_numbers<[1], [0], [0], [1], [0, 0, 1, 1], [], []>} : vector<2x256xf32>, vector<256x512xf32>, vector<2x512xf32> -> vector<2x512xf32>
    %c5_59 = arith.constant 5 : index
    %c0_60 = arith.constant 0 : index
    %182 = vector.load %arg5[%c5_59, %c0_60] : memref<8x512xf32, #tpu.memory_space<vmem>>, vector<1x512xf32>
    %c5_61 = arith.constant 5 : index
    %c0_62 = arith.constant 0 : index
    %183 = vector.load %arg6[%c5_61, %c0_62] : memref<8x512xf32, #tpu.memory_space<vmem>>, vector<1x512xf32>
    %184 = tpu.concatenate %182, %183 in 0 : vector<1x512xf32>, vector<1x512xf32> -> vector<2x512xf32>
    %185 = arith.addf %181, %184 : vector<2x512xf32>
    %186 = vector.broadcast %8 : vector<1x512xf32> to vector<2x512xf32>
    %187 = arith.mulf %185, %186 : vector<2x512xf32>
    %188 = math.tanh %187 : vector<2x512xf32>
    %189 = vector.broadcast %8 : vector<1x512xf32> to vector<2x512xf32>
    %190 = arith.mulf %188, %189 : vector<2x512xf32>
    %191 = vector.broadcast %11 : vector<1x512xf32> to vector<2x512xf32>
    %192 = arith.addf %190, %191 : vector<2x512xf32>
    %193 = vector.extract_strided_slice %192 {offsets = [0, 0], sizes = [2, 128], strides = [1, 1]} : vector<2x512xf32> to vector<2x128xf32>
    %194 = vector.extract_strided_slice %192 {offsets = [0, 128], sizes = [2, 128], strides = [1, 1]} : vector<2x512xf32> to vector<2x128xf32>
    %195 = vector.extract_strided_slice %192 {offsets = [0, 256], sizes = [2, 128], strides = [1, 1]} : vector<2x512xf32> to vector<2x128xf32>
    %196 = vector.extract_strided_slice %192 {offsets = [0, 384], sizes = [2, 128], strides = [1, 1]} : vector<2x512xf32> to vector<2x128xf32>
    %197 = arith.mulf %194, %173 : vector<2x128xf32>
    %198 = arith.mulf %193, %195 : vector<2x128xf32>
    %199 = arith.addf %197, %198 : vector<2x128xf32>
    %200 = math.tanh %199 : vector<2x128xf32>
    %201 = arith.mulf %196, %200 : vector<2x128xf32>
    %202 = vector.extract_strided_slice %201 {offsets = [0, 0], sizes = [1, 128], strides = [1, 1]} : vector<2x128xf32> to vector<1x128xf32>
    %203 = vector.extract_strided_slice %201 {offsets = [1, 0], sizes = [1, 128], strides = [1, 1]} : vector<2x128xf32> to vector<1x128xf32>
    %204 = tpu.concatenate %201, %201 in 1 : vector<2x128xf32>, vector<2x128xf32> -> vector<2x256xf32>
    %205 = arith.mulf %204, %21 : vector<2x256xf32>
    %c0_63 = arith.constant 0 : index
    %c0_64 = arith.constant 0 : index
    %206 = vector.load %arg1[%c0_63, %c0_64] : memref<1024x512xf32, #tpu.memory_space<vmem>>, vector<256x512xf32>
    %cst_65 = arith.constant dense<0.000000e+00> : vector<2x512xf32>
    %207 = tpu.matmul %205, %206, %cst_65 {dimension_numbers = #tpu.dot_dimension_numbers<[1], [0], [0], [1], [0, 0, 1, 1], [], []>} : vector<2x256xf32>, vector<256x512xf32>, vector<2x512xf32> -> vector<2x512xf32>
    %c6_66 = arith.constant 6 : index
    %c0_67 = arith.constant 0 : index
    %208 = vector.load %arg5[%c6_66, %c0_67] : memref<8x512xf32, #tpu.memory_space<vmem>>, vector<1x512xf32>
    %c6_68 = arith.constant 6 : index
    %c0_69 = arith.constant 0 : index
    %209 = vector.load %arg6[%c6_68, %c0_69] : memref<8x512xf32, #tpu.memory_space<vmem>>, vector<1x512xf32>
    %210 = tpu.concatenate %208, %209 in 0 : vector<1x512xf32>, vector<1x512xf32> -> vector<2x512xf32>
    %211 = arith.addf %207, %210 : vector<2x512xf32>
    %212 = vector.broadcast %8 : vector<1x512xf32> to vector<2x512xf32>
    %213 = arith.mulf %211, %212 : vector<2x512xf32>
    %214 = math.tanh %213 : vector<2x512xf32>
    %215 = vector.broadcast %8 : vector<1x512xf32> to vector<2x512xf32>
    %216 = arith.mulf %214, %215 : vector<2x512xf32>
    %217 = vector.broadcast %11 : vector<1x512xf32> to vector<2x512xf32>
    %218 = arith.addf %216, %217 : vector<2x512xf32>
    %219 = vector.extract_strided_slice %218 {offsets = [0, 0], sizes = [2, 128], strides = [1, 1]} : vector<2x512xf32> to vector<2x128xf32>
    %220 = vector.extract_strided_slice %218 {offsets = [0, 128], sizes = [2, 128], strides = [1, 1]} : vector<2x512xf32> to vector<2x128xf32>
    %221 = vector.extract_strided_slice %218 {offsets = [0, 256], sizes = [2, 128], strides = [1, 1]} : vector<2x512xf32> to vector<2x128xf32>
    %222 = vector.extract_strided_slice %218 {offsets = [0, 384], sizes = [2, 128], strides = [1, 1]} : vector<2x512xf32> to vector<2x128xf32>
    %223 = arith.mulf %220, %199 : vector<2x128xf32>
    %224 = arith.mulf %219, %221 : vector<2x128xf32>
    %225 = arith.addf %223, %224 : vector<2x128xf32>
    %226 = math.tanh %225 : vector<2x128xf32>
    %227 = arith.mulf %222, %226 : vector<2x128xf32>
    %228 = vector.extract_strided_slice %227 {offsets = [0, 0], sizes = [1, 128], strides = [1, 1]} : vector<2x128xf32> to vector<1x128xf32>
    %229 = vector.extract_strided_slice %227 {offsets = [1, 0], sizes = [1, 128], strides = [1, 1]} : vector<2x128xf32> to vector<1x128xf32>
    %230 = tpu.concatenate %227, %227 in 1 : vector<2x128xf32>, vector<2x128xf32> -> vector<2x256xf32>
    %231 = arith.mulf %230, %21 : vector<2x256xf32>
    %c0_70 = arith.constant 0 : index
    %c0_71 = arith.constant 0 : index
    %232 = vector.load %arg1[%c0_70, %c0_71] : memref<1024x512xf32, #tpu.memory_space<vmem>>, vector<256x512xf32>
    %cst_72 = arith.constant dense<0.000000e+00> : vector<2x512xf32>
    %233 = tpu.matmul %231, %232, %cst_72 {dimension_numbers = #tpu.dot_dimension_numbers<[1], [0], [0], [1], [0, 0, 1, 1], [], []>} : vector<2x256xf32>, vector<256x512xf32>, vector<2x512xf32> -> vector<2x512xf32>
    %c7_73 = arith.constant 7 : index
    %c0_74 = arith.constant 0 : index
    %234 = vector.load %arg5[%c7_73, %c0_74] : memref<8x512xf32, #tpu.memory_space<vmem>>, vector<1x512xf32>
    %c7_75 = arith.constant 7 : index
    %c0_76 = arith.constant 0 : index
    %235 = vector.load %arg6[%c7_75, %c0_76] : memref<8x512xf32, #tpu.memory_space<vmem>>, vector<1x512xf32>
    %236 = tpu.concatenate %234, %235 in 0 : vector<1x512xf32>, vector<1x512xf32> -> vector<2x512xf32>
    %237 = arith.addf %233, %236 : vector<2x512xf32>
    %238 = vector.broadcast %8 : vector<1x512xf32> to vector<2x512xf32>
    %239 = arith.mulf %237, %238 : vector<2x512xf32>
    %240 = math.tanh %239 : vector<2x512xf32>
    %241 = vector.broadcast %8 : vector<1x512xf32> to vector<2x512xf32>
    %242 = arith.mulf %240, %241 : vector<2x512xf32>
    %243 = vector.broadcast %11 : vector<1x512xf32> to vector<2x512xf32>
    %244 = arith.addf %242, %243 : vector<2x512xf32>
    %245 = vector.extract_strided_slice %244 {offsets = [0, 0], sizes = [2, 128], strides = [1, 1]} : vector<2x512xf32> to vector<2x128xf32>
    %246 = vector.extract_strided_slice %244 {offsets = [0, 128], sizes = [2, 128], strides = [1, 1]} : vector<2x512xf32> to vector<2x128xf32>
    %247 = vector.extract_strided_slice %244 {offsets = [0, 256], sizes = [2, 128], strides = [1, 1]} : vector<2x512xf32> to vector<2x128xf32>
    %248 = vector.extract_strided_slice %244 {offsets = [0, 384], sizes = [2, 128], strides = [1, 1]} : vector<2x512xf32> to vector<2x128xf32>
    %249 = arith.mulf %246, %225 : vector<2x128xf32>
    %250 = arith.mulf %245, %247 : vector<2x128xf32>
    %251 = arith.addf %249, %250 : vector<2x128xf32>
    %252 = math.tanh %251 : vector<2x128xf32>
    %253 = arith.mulf %248, %252 : vector<2x128xf32>
    %254 = vector.extract_strided_slice %253 {offsets = [0, 0], sizes = [1, 128], strides = [1, 1]} : vector<2x128xf32> to vector<1x128xf32>
    %255 = vector.extract_strided_slice %253 {offsets = [1, 0], sizes = [1, 128], strides = [1, 1]} : vector<2x128xf32> to vector<1x128xf32>
    %256 = tpu.concatenate %72, %98, %124, %150, %176, %202, %228, %254 in 0 : vector<1x128xf32>, vector<1x128xf32>, vector<1x128xf32>, vector<1x128xf32>, vector<1x128xf32>, vector<1x128xf32>, vector<1x128xf32>, vector<1x128xf32> -> vector<8x128xf32>
    %257 = tpu.concatenate %255, %229, %203, %177, %151, %125, %99, %73 in 0 : vector<1x128xf32>, vector<1x128xf32>, vector<1x128xf32>, vector<1x128xf32>, vector<1x128xf32>, vector<1x128xf32>, vector<1x128xf32>, vector<1x128xf32> -> vector<8x128xf32>
    %258 = tpu.concatenate %256, %257 in 1 : vector<8x128xf32>, vector<8x128xf32> -> vector<8x256xf32>
    %259 = tpu.concatenate %254, %228, %202, %176, %150, %124, %98, %72 in 0 : vector<1x128xf32>, vector<1x128xf32>, vector<1x128xf32>, vector<1x128xf32>, vector<1x128xf32>, vector<1x128xf32>, vector<1x128xf32>, vector<1x128xf32> -> vector<8x128xf32>
    %260 = tpu.concatenate %73, %99, %125, %151, %177, %203, %229, %255 in 0 : vector<1x128xf32>, vector<1x128xf32>, vector<1x128xf32>, vector<1x128xf32>, vector<1x128xf32>, vector<1x128xf32>, vector<1x128xf32>, vector<1x128xf32> -> vector<8x128xf32>
    %261 = tpu.concatenate %259, %260 in 1 : vector<8x128xf32>, vector<8x128xf32> -> vector<8x256xf32>
    %c512 = arith.constant 512 : index
    %c0_77 = arith.constant 0 : index
    %262 = vector.load %arg1[%c512, %c0_77] : memref<1024x512xf32, #tpu.memory_space<vmem>>, vector<256x512xf32>
    %c768 = arith.constant 768 : index
    %c0_78 = arith.constant 0 : index
    %263 = vector.load %arg1[%c768, %c0_78] : memref<1024x512xf32, #tpu.memory_space<vmem>>, vector<256x512xf32>
    %cst_79 = arith.constant dense<0.000000e+00> : vector<8x512xf32>
    %264 = tpu.matmul %258, %262, %cst_79 {dimension_numbers = #tpu.dot_dimension_numbers<[1], [0], [0], [1], [0, 0, 1, 1], [], []>} : vector<8x256xf32>, vector<256x512xf32>, vector<8x512xf32> -> vector<8x512xf32>
    %265 = vector.broadcast %26 : vector<1x512xf32> to vector<8x512xf32>
    %266 = arith.addf %264, %265 : vector<8x512xf32>
    %c0_80 = arith.constant 0 : index
    %c0_81 = arith.constant 0 : index
    %267 = vector.load %arg5[%c0_80, %c0_81] : memref<8x512xf32, #tpu.memory_space<vmem>>, vector<8x512xf32>
    tpu.vector_store %arg5[%c0_80, %c0_81], %266 {strides = array<i32>} : memref<8x512xf32, #tpu.memory_space<vmem>>, vector<8x512xf32>,
    %cst_82 = arith.constant dense<0.000000e+00> : vector<8x512xf32>
    %268 = tpu.matmul %261, %263, %cst_82 {dimension_numbers = #tpu.dot_dimension_numbers<[1], [0], [0], [1], [0, 0, 1, 1], [], []>} : vector<8x256xf32>, vector<256x512xf32>, vector<8x512xf32> -> vector<8x512xf32>
    %269 = vector.broadcast %27 : vector<1x512xf32> to vector<8x512xf32>
    %270 = arith.addf %268, %269 : vector<8x512xf32>
    %c0_83 = arith.constant 0 : index
    %c0_84 = arith.constant 0 : index
    %271 = vector.load %arg6[%c0_83, %c0_84] : memref<8x512xf32, #tpu.memory_space<vmem>>, vector<8x512xf32>
    tpu.vector_store %arg6[%c0_83, %c0_84], %270 {strides = array<i32>} : memref<8x512xf32, #tpu.memory_space<vmem>>, vector<8x512xf32>,
    %cst_85 = arith.constant 0.000000e+00 : f32
    %272 = vector.broadcast %cst_85 : f32 to vector<2x128xf32>
    %cst_86 = arith.constant 0.000000e+00 : f32
    %273 = vector.broadcast %cst_86 : f32 to vector<2x128xf32>
    %274 = tpu.concatenate %272, %272 in 1 : vector<2x128xf32>, vector<2x128xf32> -> vector<2x256xf32>
    %275 = arith.mulf %274, %21 : vector<2x256xf32>
    %c256 = arith.constant 256 : index
    %c0_87 = arith.constant 0 : index
    %276 = vector.load %arg1[%c256, %c0_87] : memref<1024x512xf32, #tpu.memory_space<vmem>>, vector<256x512xf32>
    %cst_88 = arith.constant dense<0.000000e+00> : vector<2x512xf32>
    %277 = tpu.matmul %275, %276, %cst_88 {dimension_numbers = #tpu.dot_dimension_numbers<[1], [0], [0], [1], [0, 0, 1, 1], [], []>} : vector<2x256xf32>, vector<256x512xf32>, vector<2x512xf32> -> vector<2x512xf32>
    %c0_89 = arith.constant 0 : index
    %c0_90 = arith.constant 0 : index
    %278 = vector.load %arg5[%c0_89, %c0_90] : memref<8x512xf32, #tpu.memory_space<vmem>>, vector<1x512xf32>
    %c0_91 = arith.constant 0 : index
    %c0_92 = arith.constant 0 : index
    %279 = vector.load %arg6[%c0_91, %c0_92] : memref<8x512xf32, #tpu.memory_space<vmem>>, vector<1x512xf32>
    %280 = tpu.concatenate %278, %279 in 0 : vector<1x512xf32>, vector<1x512xf32> -> vector<2x512xf32>
    %281 = arith.addf %277, %280 : vector<2x512xf32>
    %282 = vector.broadcast %8 : vector<1x512xf32> to vector<2x512xf32>
    %283 = arith.mulf %281, %282 : vector<2x512xf32>
    %284 = math.tanh %283 : vector<2x512xf32>
    %285 = vector.broadcast %8 : vector<1x512xf32> to vector<2x512xf32>
    %286 = arith.mulf %284, %285 : vector<2x512xf32>
    %287 = vector.broadcast %11 : vector<1x512xf32> to vector<2x512xf32>
    %288 = arith.addf %286, %287 : vector<2x512xf32>
    %289 = vector.extract_strided_slice %288 {offsets = [0, 0], sizes = [2, 128], strides = [1, 1]} : vector<2x512xf32> to vector<2x128xf32>
    %290 = vector.extract_strided_slice %288 {offsets = [0, 128], sizes = [2, 128], strides = [1, 1]} : vector<2x512xf32> to vector<2x128xf32>
    %291 = vector.extract_strided_slice %288 {offsets = [0, 256], sizes = [2, 128], strides = [1, 1]} : vector<2x512xf32> to vector<2x128xf32>
    %292 = vector.extract_strided_slice %288 {offsets = [0, 384], sizes = [2, 128], strides = [1, 1]} : vector<2x512xf32> to vector<2x128xf32>
    %293 = arith.mulf %290, %273 : vector<2x128xf32>
    %294 = arith.mulf %289, %291 : vector<2x128xf32>
    %295 = arith.addf %293, %294 : vector<2x128xf32>
    %296 = math.tanh %295 : vector<2x128xf32>
    %297 = arith.mulf %292, %296 : vector<2x128xf32>
    %298 = vector.extract_strided_slice %297 {offsets = [0, 0], sizes = [1, 128], strides = [1, 1]} : vector<2x128xf32> to vector<1x128xf32>
    %299 = vector.extract_strided_slice %297 {offsets = [1, 0], sizes = [1, 128], strides = [1, 1]} : vector<2x128xf32> to vector<1x128xf32>
    %300 = tpu.concatenate %297, %297 in 1 : vector<2x128xf32>, vector<2x128xf32> -> vector<2x256xf32>
    %301 = arith.mulf %300, %21 : vector<2x256xf32>
    %c256_93 = arith.constant 256 : index
    %c0_94 = arith.constant 0 : index
    %302 = vector.load %arg1[%c256_93, %c0_94] : memref<1024x512xf32, #tpu.memory_space<vmem>>, vector<256x512xf32>
    %cst_95 = arith.constant dense<0.000000e+00> : vector<2x512xf32>
    %303 = tpu.matmul %301, %302, %cst_95 {dimension_numbers = #tpu.dot_dimension_numbers<[1], [0], [0], [1], [0, 0, 1, 1], [], []>} : vector<2x256xf32>, vector<256x512xf32>, vector<2x512xf32> -> vector<2x512xf32>
    %c1_96 = arith.constant 1 : index
    %c0_97 = arith.constant 0 : index
    %304 = vector.load %arg5[%c1_96, %c0_97] : memref<8x512xf32, #tpu.memory_space<vmem>>, vector<1x512xf32>
    %c1_98 = arith.constant 1 : index
    %c0_99 = arith.constant 0 : index
    %305 = vector.load %arg6[%c1_98, %c0_99] : memref<8x512xf32, #tpu.memory_space<vmem>>, vector<1x512xf32>
    %306 = tpu.concatenate %304, %305 in 0 : vector<1x512xf32>, vector<1x512xf32> -> vector<2x512xf32>
    %307 = arith.addf %303, %306 : vector<2x512xf32>
    %308 = vector.broadcast %8 : vector<1x512xf32> to vector<2x512xf32>
    %309 = arith.mulf %307, %308 : vector<2x512xf32>
    %310 = math.tanh %309 : vector<2x512xf32>
    %311 = vector.broadcast %8 : vector<1x512xf32> to vector<2x512xf32>
    %312 = arith.mulf %310, %311 : vector<2x512xf32>
    %313 = vector.broadcast %11 : vector<1x512xf32> to vector<2x512xf32>
    %314 = arith.addf %312, %313 : vector<2x512xf32>
    %315 = vector.extract_strided_slice %314 {offsets = [0, 0], sizes = [2, 128], strides = [1, 1]} : vector<2x512xf32> to vector<2x128xf32>
    %316 = vector.extract_strided_slice %314 {offsets = [0, 128], sizes = [2, 128], strides = [1, 1]} : vector<2x512xf32> to vector<2x128xf32>
    %317 = vector.extract_strided_slice %314 {offsets = [0, 256], sizes = [2, 128], strides = [1, 1]} : vector<2x512xf32> to vector<2x128xf32>
    %318 = vector.extract_strided_slice %314 {offsets = [0, 384], sizes = [2, 128], strides = [1, 1]} : vector<2x512xf32> to vector<2x128xf32>
    %319 = arith.mulf %316, %295 : vector<2x128xf32>
    %320 = arith.mulf %315, %317 : vector<2x128xf32>
    %321 = arith.addf %319, %320 : vector<2x128xf32>
    %322 = math.tanh %321 : vector<2x128xf32>
    %323 = arith.mulf %318, %322 : vector<2x128xf32>
    %324 = vector.extract_strided_slice %323 {offsets = [0, 0], sizes = [1, 128], strides = [1, 1]} : vector<2x128xf32> to vector<1x128xf32>
    %325 = vector.extract_strided_slice %323 {offsets = [1, 0], sizes = [1, 128], strides = [1, 1]} : vector<2x128xf32> to vector<1x128xf32>
    %326 = tpu.concatenate %323, %323 in 1 : vector<2x128xf32>, vector<2x128xf32> -> vector<2x256xf32>
    %327 = arith.mulf %326, %21 : vector<2x256xf32>
    %c256_100 = arith.constant 256 : index
    %c0_101 = arith.constant 0 : index
    %328 = vector.load %arg1[%c256_100, %c0_101] : memref<1024x512xf32, #tpu.memory_space<vmem>>, vector<256x512xf32>
    %cst_102 = arith.constant dense<0.000000e+00> : vector<2x512xf32>
    %329 = tpu.matmul %327, %328, %cst_102 {dimension_numbers = #tpu.dot_dimension_numbers<[1], [0], [0], [1], [0, 0, 1, 1], [], []>} : vector<2x256xf32>, vector<256x512xf32>, vector<2x512xf32> -> vector<2x512xf32>
    %c2_103 = arith.constant 2 : index
    %c0_104 = arith.constant 0 : index
    %330 = vector.load %arg5[%c2_103, %c0_104] : memref<8x512xf32, #tpu.memory_space<vmem>>, vector<1x512xf32>
    %c2_105 = arith.constant 2 : index
    %c0_106 = arith.constant 0 : index
    %331 = vector.load %arg6[%c2_105, %c0_106] : memref<8x512xf32, #tpu.memory_space<vmem>>, vector<1x512xf32>
    %332 = tpu.concatenate %330, %331 in 0 : vector<1x512xf32>, vector<1x512xf32> -> vector<2x512xf32>
    %333 = arith.addf %329, %332 : vector<2x512xf32>
    %334 = vector.broadcast %8 : vector<1x512xf32> to vector<2x512xf32>
    %335 = arith.mulf %333, %334 : vector<2x512xf32>
    %336 = math.tanh %335 : vector<2x512xf32>
    %337 = vector.broadcast %8 : vector<1x512xf32> to vector<2x512xf32>
    %338 = arith.mulf %336, %337 : vector<2x512xf32>
    %339 = vector.broadcast %11 : vector<1x512xf32> to vector<2x512xf32>
    %340 = arith.addf %338, %339 : vector<2x512xf32>
    %341 = vector.extract_strided_slice %340 {offsets = [0, 0], sizes = [2, 128], strides = [1, 1]} : vector<2x512xf32> to vector<2x128xf32>
    %342 = vector.extract_strided_slice %340 {offsets = [0, 128], sizes = [2, 128], strides = [1, 1]} : vector<2x512xf32> to vector<2x128xf32>
    %343 = vector.extract_strided_slice %340 {offsets = [0, 256], sizes = [2, 128], strides = [1, 1]} : vector<2x512xf32> to vector<2x128xf32>
    %344 = vector.extract_strided_slice %340 {offsets = [0, 384], sizes = [2, 128], strides = [1, 1]} : vector<2x512xf32> to vector<2x128xf32>
    %345 = arith.mulf %342, %321 : vector<2x128xf32>
    %346 = arith.mulf %341, %343 : vector<2x128xf32>
    %347 = arith.addf %345, %346 : vector<2x128xf32>
    %348 = math.tanh %347 : vector<2x128xf32>
    %349 = arith.mulf %344, %348 : vector<2x128xf32>
    %350 = vector.extract_strided_slice %349 {offsets = [0, 0], sizes = [1, 128], strides = [1, 1]} : vector<2x128xf32> to vector<1x128xf32>
    %351 = vector.extract_strided_slice %349 {offsets = [1, 0], sizes = [1, 128], strides = [1, 1]} : vector<2x128xf32> to vector<1x128xf32>
    %352 = tpu.concatenate %349, %349 in 1 : vector<2x128xf32>, vector<2x128xf32> -> vector<2x256xf32>
    %353 = arith.mulf %352, %21 : vector<2x256xf32>
    %c256_107 = arith.constant 256 : index
    %c0_108 = arith.constant 0 : index
    %354 = vector.load %arg1[%c256_107, %c0_108] : memref<1024x512xf32, #tpu.memory_space<vmem>>, vector<256x512xf32>
    %cst_109 = arith.constant dense<0.000000e+00> : vector<2x512xf32>
    %355 = tpu.matmul %353, %354, %cst_109 {dimension_numbers = #tpu.dot_dimension_numbers<[1], [0], [0], [1], [0, 0, 1, 1], [], []>} : vector<2x256xf32>, vector<256x512xf32>, vector<2x512xf32> -> vector<2x512xf32>
    %c3_110 = arith.constant 3 : index
    %c0_111 = arith.constant 0 : index
    %356 = vector.load %arg5[%c3_110, %c0_111] : memref<8x512xf32, #tpu.memory_space<vmem>>, vector<1x512xf32>
    %c3_112 = arith.constant 3 : index
    %c0_113 = arith.constant 0 : index
    %357 = vector.load %arg6[%c3_112, %c0_113] : memref<8x512xf32, #tpu.memory_space<vmem>>, vector<1x512xf32>
    %358 = tpu.concatenate %356, %357 in 0 : vector<1x512xf32>, vector<1x512xf32> -> vector<2x512xf32>
    %359 = arith.addf %355, %358 : vector<2x512xf32>
    %360 = vector.broadcast %8 : vector<1x512xf32> to vector<2x512xf32>
    %361 = arith.mulf %359, %360 : vector<2x512xf32>
    %362 = math.tanh %361 : vector<2x512xf32>
    %363 = vector.broadcast %8 : vector<1x512xf32> to vector<2x512xf32>
    %364 = arith.mulf %362, %363 : vector<2x512xf32>
    %365 = vector.broadcast %11 : vector<1x512xf32> to vector<2x512xf32>
    %366 = arith.addf %364, %365 : vector<2x512xf32>
    %367 = vector.extract_strided_slice %366 {offsets = [0, 0], sizes = [2, 128], strides = [1, 1]} : vector<2x512xf32> to vector<2x128xf32>
    %368 = vector.extract_strided_slice %366 {offsets = [0, 128], sizes = [2, 128], strides = [1, 1]} : vector<2x512xf32> to vector<2x128xf32>
    %369 = vector.extract_strided_slice %366 {offsets = [0, 256], sizes = [2, 128], strides = [1, 1]} : vector<2x512xf32> to vector<2x128xf32>
    %370 = vector.extract_strided_slice %366 {offsets = [0, 384], sizes = [2, 128], strides = [1, 1]} : vector<2x512xf32> to vector<2x128xf32>
    %371 = arith.mulf %368, %347 : vector<2x128xf32>
    %372 = arith.mulf %367, %369 : vector<2x128xf32>
    %373 = arith.addf %371, %372 : vector<2x128xf32>
    %374 = math.tanh %373 : vector<2x128xf32>
    %375 = arith.mulf %370, %374 : vector<2x128xf32>
    %376 = vector.extract_strided_slice %375 {offsets = [0, 0], sizes = [1, 128], strides = [1, 1]} : vector<2x128xf32> to vector<1x128xf32>
    %377 = vector.extract_strided_slice %375 {offsets = [1, 0], sizes = [1, 128], strides = [1, 1]} : vector<2x128xf32> to vector<1x128xf32>
    %378 = tpu.concatenate %375, %375 in 1 : vector<2x128xf32>, vector<2x128xf32> -> vector<2x256xf32>
    %379 = arith.mulf %378, %21 : vector<2x256xf32>
    %c256_114 = arith.constant 256 : index
    %c0_115 = arith.constant 0 : index
    %380 = vector.load %arg1[%c256_114, %c0_115] : memref<1024x512xf32, #tpu.memory_space<vmem>>, vector<256x512xf32>
    %cst_116 = arith.constant dense<0.000000e+00> : vector<2x512xf32>
    %381 = tpu.matmul %379, %380, %cst_116 {dimension_numbers = #tpu.dot_dimension_numbers<[1], [0], [0], [1], [0, 0, 1, 1], [], []>} : vector<2x256xf32>, vector<256x512xf32>, vector<2x512xf32> -> vector<2x512xf32>
    %c4_117 = arith.constant 4 : index
    %c0_118 = arith.constant 0 : index
    %382 = vector.load %arg5[%c4_117, %c0_118] : memref<8x512xf32, #tpu.memory_space<vmem>>, vector<1x512xf32>
    %c4_119 = arith.constant 4 : index
    %c0_120 = arith.constant 0 : index
    %383 = vector.load %arg6[%c4_119, %c0_120] : memref<8x512xf32, #tpu.memory_space<vmem>>, vector<1x512xf32>
    %384 = tpu.concatenate %382, %383 in 0 : vector<1x512xf32>, vector<1x512xf32> -> vector<2x512xf32>
    %385 = arith.addf %381, %384 : vector<2x512xf32>
    %386 = vector.broadcast %8 : vector<1x512xf32> to vector<2x512xf32>
    %387 = arith.mulf %385, %386 : vector<2x512xf32>
    %388 = math.tanh %387 : vector<2x512xf32>
    %389 = vector.broadcast %8 : vector<1x512xf32> to vector<2x512xf32>
    %390 = arith.mulf %388, %389 : vector<2x512xf32>
    %391 = vector.broadcast %11 : vector<1x512xf32> to vector<2x512xf32>
    %392 = arith.addf %390, %391 : vector<2x512xf32>
    %393 = vector.extract_strided_slice %392 {offsets = [0, 0], sizes = [2, 128], strides = [1, 1]} : vector<2x512xf32> to vector<2x128xf32>
    %394 = vector.extract_strided_slice %392 {offsets = [0, 128], sizes = [2, 128], strides = [1, 1]} : vector<2x512xf32> to vector<2x128xf32>
    %395 = vector.extract_strided_slice %392 {offsets = [0, 256], sizes = [2, 128], strides = [1, 1]} : vector<2x512xf32> to vector<2x128xf32>
    %396 = vector.extract_strided_slice %392 {offsets = [0, 384], sizes = [2, 128], strides = [1, 1]} : vector<2x512xf32> to vector<2x128xf32>
    %397 = arith.mulf %394, %373 : vector<2x128xf32>
    %398 = arith.mulf %393, %395 : vector<2x128xf32>
    %399 = arith.addf %397, %398 : vector<2x128xf32>
    %400 = math.tanh %399 : vector<2x128xf32>
    %401 = arith.mulf %396, %400 : vector<2x128xf32>
    %402 = vector.extract_strided_slice %401 {offsets = [0, 0], sizes = [1, 128], strides = [1, 1]} : vector<2x128xf32> to vector<1x128xf32>
    %403 = vector.extract_strided_slice %401 {offsets = [1, 0], sizes = [1, 128], strides = [1, 1]} : vector<2x128xf32> to vector<1x128xf32>
    %404 = tpu.concatenate %401, %401 in 1 : vector<2x128xf32>, vector<2x128xf32> -> vector<2x256xf32>
    %405 = arith.mulf %404, %21 : vector<2x256xf32>
    %c256_121 = arith.constant 256 : index
    %c0_122 = arith.constant 0 : index
    %406 = vector.load %arg1[%c256_121, %c0_122] : memref<1024x512xf32, #tpu.memory_space<vmem>>, vector<256x512xf32>
    %cst_123 = arith.constant dense<0.000000e+00> : vector<2x512xf32>
    %407 = tpu.matmul %405, %406, %cst_123 {dimension_numbers = #tpu.dot_dimension_numbers<[1], [0], [0], [1], [0, 0, 1, 1], [], []>} : vector<2x256xf32>, vector<256x512xf32>, vector<2x512xf32> -> vector<2x512xf32>
    %c5_124 = arith.constant 5 : index
    %c0_125 = arith.constant 0 : index
    %408 = vector.load %arg5[%c5_124, %c0_125] : memref<8x512xf32, #tpu.memory_space<vmem>>, vector<1x512xf32>
    %c5_126 = arith.constant 5 : index
    %c0_127 = arith.constant 0 : index
    %409 = vector.load %arg6[%c5_126, %c0_127] : memref<8x512xf32, #tpu.memory_space<vmem>>, vector<1x512xf32>
    %410 = tpu.concatenate %408, %409 in 0 : vector<1x512xf32>, vector<1x512xf32> -> vector<2x512xf32>
    %411 = arith.addf %407, %410 : vector<2x512xf32>
    %412 = vector.broadcast %8 : vector<1x512xf32> to vector<2x512xf32>
    %413 = arith.mulf %411, %412 : vector<2x512xf32>
    %414 = math.tanh %413 : vector<2x512xf32>
    %415 = vector.broadcast %8 : vector<1x512xf32> to vector<2x512xf32>
    %416 = arith.mulf %414, %415 : vector<2x512xf32>
    %417 = vector.broadcast %11 : vector<1x512xf32> to vector<2x512xf32>
    %418 = arith.addf %416, %417 : vector<2x512xf32>
    %419 = vector.extract_strided_slice %418 {offsets = [0, 0], sizes = [2, 128], strides = [1, 1]} : vector<2x512xf32> to vector<2x128xf32>
    %420 = vector.extract_strided_slice %418 {offsets = [0, 128], sizes = [2, 128], strides = [1, 1]} : vector<2x512xf32> to vector<2x128xf32>
    %421 = vector.extract_strided_slice %418 {offsets = [0, 256], sizes = [2, 128], strides = [1, 1]} : vector<2x512xf32> to vector<2x128xf32>
    %422 = vector.extract_strided_slice %418 {offsets = [0, 384], sizes = [2, 128], strides = [1, 1]} : vector<2x512xf32> to vector<2x128xf32>
    %423 = arith.mulf %420, %399 : vector<2x128xf32>
    %424 = arith.mulf %419, %421 : vector<2x128xf32>
    %425 = arith.addf %423, %424 : vector<2x128xf32>
    %426 = math.tanh %425 : vector<2x128xf32>
    %427 = arith.mulf %422, %426 : vector<2x128xf32>
    %428 = vector.extract_strided_slice %427 {offsets = [0, 0], sizes = [1, 128], strides = [1, 1]} : vector<2x128xf32> to vector<1x128xf32>
    %429 = vector.extract_strided_slice %427 {offsets = [1, 0], sizes = [1, 128], strides = [1, 1]} : vector<2x128xf32> to vector<1x128xf32>
    %430 = tpu.concatenate %427, %427 in 1 : vector<2x128xf32>, vector<2x128xf32> -> vector<2x256xf32>
    %431 = arith.mulf %430, %21 : vector<2x256xf32>
    %c256_128 = arith.constant 256 : index
    %c0_129 = arith.constant 0 : index
    %432 = vector.load %arg1[%c256_128, %c0_129] : memref<1024x512xf32, #tpu.memory_space<vmem>>, vector<256x512xf32>
    %cst_130 = arith.constant dense<0.000000e+00> : vector<2x512xf32>
    %433 = tpu.matmul %431, %432, %cst_130 {dimension_numbers = #tpu.dot_dimension_numbers<[1], [0], [0], [1], [0, 0, 1, 1], [], []>} : vector<2x256xf32>, vector<256x512xf32>, vector<2x512xf32> -> vector<2x512xf32>
    %c6_131 = arith.constant 6 : index
    %c0_132 = arith.constant 0 : index
    %434 = vector.load %arg5[%c6_131, %c0_132] : memref<8x512xf32, #tpu.memory_space<vmem>>, vector<1x512xf32>
    %c6_133 = arith.constant 6 : index
    %c0_134 = arith.constant 0 : index
    %435 = vector.load %arg6[%c6_133, %c0_134] : memref<8x512xf32, #tpu.memory_space<vmem>>, vector<1x512xf32>
    %436 = tpu.concatenate %434, %435 in 0 : vector<1x512xf32>, vector<1x512xf32> -> vector<2x512xf32>
    %437 = arith.addf %433, %436 : vector<2x512xf32>
    %438 = vector.broadcast %8 : vector<1x512xf32> to vector<2x512xf32>
    %439 = arith.mulf %437, %438 : vector<2x512xf32>
    %440 = math.tanh %439 : vector<2x512xf32>
    %441 = vector.broadcast %8 : vector<1x512xf32> to vector<2x512xf32>
    %442 = arith.mulf %440, %441 : vector<2x512xf32>
    %443 = vector.broadcast %11 : vector<1x512xf32> to vector<2x512xf32>
    %444 = arith.addf %442, %443 : vector<2x512xf32>
    %445 = vector.extract_strided_slice %444 {offsets = [0, 0], sizes = [2, 128], strides = [1, 1]} : vector<2x512xf32> to vector<2x128xf32>
    %446 = vector.extract_strided_slice %444 {offsets = [0, 128], sizes = [2, 128], strides = [1, 1]} : vector<2x512xf32> to vector<2x128xf32>
    %447 = vector.extract_strided_slice %444 {offsets = [0, 256], sizes = [2, 128], strides = [1, 1]} : vector<2x512xf32> to vector<2x128xf32>
    %448 = vector.extract_strided_slice %444 {offsets = [0, 384], sizes = [2, 128], strides = [1, 1]} : vector<2x512xf32> to vector<2x128xf32>
    %449 = arith.mulf %446, %425 : vector<2x128xf32>
    %450 = arith.mulf %445, %447 : vector<2x128xf32>
    %451 = arith.addf %449, %450 : vector<2x128xf32>
    %452 = math.tanh %451 : vector<2x128xf32>
    %453 = arith.mulf %448, %452 : vector<2x128xf32>
    %454 = vector.extract_strided_slice %453 {offsets = [0, 0], sizes = [1, 128], strides = [1, 1]} : vector<2x128xf32> to vector<1x128xf32>
    %455 = vector.extract_strided_slice %453 {offsets = [1, 0], sizes = [1, 128], strides = [1, 1]} : vector<2x128xf32> to vector<1x128xf32>
    %456 = tpu.concatenate %453, %453 in 1 : vector<2x128xf32>, vector<2x128xf32> -> vector<2x256xf32>
    %457 = arith.mulf %456, %21 : vector<2x256xf32>
    %c256_135 = arith.constant 256 : index
    %c0_136 = arith.constant 0 : index
    %458 = vector.load %arg1[%c256_135, %c0_136] : memref<1024x512xf32, #tpu.memory_space<vmem>>, vector<256x512xf32>
    %cst_137 = arith.constant dense<0.000000e+00> : vector<2x512xf32>
    %459 = tpu.matmul %457, %458, %cst_137 {dimension_numbers = #tpu.dot_dimension_numbers<[1], [0], [0], [1], [0, 0, 1, 1], [], []>} : vector<2x256xf32>, vector<256x512xf32>, vector<2x512xf32> -> vector<2x512xf32>
    %c7_138 = arith.constant 7 : index
    %c0_139 = arith.constant 0 : index
    %460 = vector.load %arg5[%c7_138, %c0_139] : memref<8x512xf32, #tpu.memory_space<vmem>>, vector<1x512xf32>
    %c7_140 = arith.constant 7 : index
    %c0_141 = arith.constant 0 : index
    %461 = vector.load %arg6[%c7_140, %c0_141] : memref<8x512xf32, #tpu.memory_space<vmem>>, vector<1x512xf32>
    %462 = tpu.concatenate %460, %461 in 0 : vector<1x512xf32>, vector<1x512xf32> -> vector<2x512xf32>
    %463 = arith.addf %459, %462 : vector<2x512xf32>
    %464 = vector.broadcast %8 : vector<1x512xf32> to vector<2x512xf32>
    %465 = arith.mulf %463, %464 : vector<2x512xf32>
    %466 = math.tanh %465 : vector<2x512xf32>
    %467 = vector.broadcast %8 : vector<1x512xf32> to vector<2x512xf32>
    %468 = arith.mulf %466, %467 : vector<2x512xf32>
    %469 = vector.broadcast %11 : vector<1x512xf32> to vector<2x512xf32>
    %470 = arith.addf %468, %469 : vector<2x512xf32>
    %471 = vector.extract_strided_slice %470 {offsets = [0, 0], sizes = [2, 128], strides = [1, 1]} : vector<2x512xf32> to vector<2x128xf32>
    %472 = vector.extract_strided_slice %470 {offsets = [0, 128], sizes = [2, 128], strides = [1, 1]} : vector<2x512xf32> to vector<2x128xf32>
    %473 = vector.extract_strided_slice %470 {offsets = [0, 256], sizes = [2, 128], strides = [1, 1]} : vector<2x512xf32> to vector<2x128xf32>
    %474 = vector.extract_strided_slice %470 {offsets = [0, 384], sizes = [2, 128], strides = [1, 1]} : vector<2x512xf32> to vector<2x128xf32>
    %475 = arith.mulf %472, %451 : vector<2x128xf32>
    %476 = arith.mulf %471, %473 : vector<2x128xf32>
    %477 = arith.addf %475, %476 : vector<2x128xf32>
    %478 = math.tanh %477 : vector<2x128xf32>
    %479 = arith.mulf %474, %478 : vector<2x128xf32>
    %480 = vector.extract_strided_slice %479 {offsets = [0, 0], sizes = [1, 128], strides = [1, 1]} : vector<2x128xf32> to vector<1x128xf32>
    %481 = vector.extract_strided_slice %479 {offsets = [1, 0], sizes = [1, 128], strides = [1, 1]} : vector<2x128xf32> to vector<1x128xf32>
    %482 = tpu.concatenate %298, %324, %350, %376, %402, %428, %454, %480 in 0 : vector<1x128xf32>, vector<1x128xf32>, vector<1x128xf32>, vector<1x128xf32>, vector<1x128xf32>, vector<1x128xf32>, vector<1x128xf32>, vector<1x128xf32> -> vector<8x128xf32>
    %483 = tpu.concatenate %481, %455, %429, %403, %377, %351, %325, %299 in 0 : vector<1x128xf32>, vector<1x128xf32>, vector<1x128xf32>, vector<1x128xf32>, vector<1x128xf32>, vector<1x128xf32>, vector<1x128xf32>, vector<1x128xf32> -> vector<8x128xf32>
    %484 = tpu.concatenate %482, %483 in 1 : vector<8x128xf32>, vector<8x128xf32> -> vector<8x256xf32>
    %c0_142 = arith.constant 0 : index
    %c0_143 = arith.constant 0 : index
    %485 = vector.load %arg2[%c0_142, %c0_143] : memref<256x128xf32, #tpu.memory_space<vmem>>, vector<256x128xf32>
    %cst_144 = arith.constant dense<0.000000e+00> : vector<8x128xf32>
    %486 = tpu.matmul %484, %485, %cst_144 {dimension_numbers = #tpu.dot_dimension_numbers<[1], [0], [0], [1], [0, 0, 1, 1], [], []>} : vector<8x256xf32>, vector<256x128xf32>, vector<8x128xf32> -> vector<8x128xf32>
    %487 = vector.broadcast %28 : vector<1x128xf32> to vector<8x128xf32>
    %488 = arith.addf %486, %487 : vector<8x128xf32>
    %cst_145 = arith.constant 0.000000e+00 : f32
    %489 = vector.broadcast %cst_145 : f32 to vector<8x128xf32>
    %490 = arith.cmpf ogt, %488, %489 : vector<8x128xf32>
    %cst_146 = arith.constant 0.00999999977 : f32
    %491 = vector.broadcast %cst_146 : f32 to vector<8x128xf32>
    %492 = arith.mulf %491, %488 : vector<8x128xf32>
    %493 = arith.select %490, %488, %492 : vector<8x128xi1>, vector<8x128xf32>
    %494 = vector.broadcast %30 : vector<1x128xf32> to vector<8x128xf32>
    %495 = arith.mulf %493, %494 : vector<8x128xf32>
    %cst_147 = arith.constant dense<0.000000e+00> : vector<8xf32>
    %496 = vector.multi_reduction <add>, %495, %cst_147 [1] : vector<8x128xf32> to vector<8xf32>
    %497 = vector.shape_cast %496 : vector<8xf32> to vector<8x1xf32>
    %498 = vector.broadcast %29 : vector<1x1xf32> to vector<8x1xf32>
    %499 = arith.addf %497, %498 : vector<8x1xf32>
    %c0_148 = arith.constant 0 : index
    %c0_149 = arith.constant 0 : index
    %500 = vector.load %arg4[%c0_148, %c0_149] : memref<8x1xf32, #tpu.memory_space<vmem>>, vector<8x1xf32>
    tpu.vector_store %arg4[%c0_148, %c0_149], %499 {strides = array<i32>} : memref<8x1xf32, #tpu.memory_space<vmem>>, vector<8x1xf32>,
    return
  }
}

</mosaic_0001>

<bundles_post_ra>
// kernel: tpu_custom_call.1
= control target key start
LH: loop header
LB: loop body
LE: loop exit
PB: predicated region body
PF: predicated region fallthrough
CT: control target
= control target key end

     0   :  { %9 = vsyncpa [#allocation5], 0  ;;  %s9253_s0 = inlined_call_operand.vmem [shape: f32[8,2], index: 0, kind: input, shape index: {}]   ;;  %s9254_s1 = inlined_call_operand.hbm [shape: f32[1024,512], index: 1, kind: input, shape index: {}]   ;;  %s9255_s2 = inlined_call_operand.hbm [shape: f32[256,128], index: 2, kind: input, shape index: {}]   ;;  %s9256_s3 = inlined_call_operand.hbm [shape: f32[8,512], index: 3, kind: input, shape index: {}]   ;;  %s9257_s4 = inlined_call_operand.vmem [shape: f32[8,1], index: 4, kind: output, shape index: {}]  }
   0x1   :  { %10 = vsyncpa [#allocation7], 0  ;;  %s7362_s15 = smov [#allocation6]   ;;  %s7292_s19 = scalar_lea.hbm %s9255_s2, 4096 }
   0x2   :  { %s30_s16 = sshll.u32 %s7362_s15, 4  ;;  %p7293_p0 = scmp.ne.s32.totalorder %s9255_s2, %s7292_s19  ;;  %s31_s16 = int_to_ptr.vmem [resolvable:$true] %s30_s16 }
   0x3   :  { %p7296_p1 = scmp.lt.u32.totalorder %s7292_s19, %s9255_s2 }
   0x5   :  { %p7298_p2 = pnand %p7296_p1, %p7293_p0 }
   0x7   :  { %7301 = shalt.err (!%p7298_p2)
}
   0x8   :  { %s7302_s24 = scalar_lea.vmem %s31_s16, 4096  ;;  %p7307_p4 = scmp.lt.s32.totalorder %s31_s16, %s31_s16 }
   0x9   :  { %p7303_p3 = scmp.ne.s32.totalorder %s31_s16, %s7302_s24  ;;  %p7308_p5 = scmp.lt.s32.totalorder %s7302_s24, %s7302_s24 }
   0xb   :  { %p7309_p6 = por %p7308_p5, %p7307_p4 }
   0xd   :  { %p7310_p7 = pnand %p7309_p6, %p7303_p3 }
   0xf   :  { %7313 = shalt.err (!%p7310_p7)
}
  0x10   :  { %s7363_s25 = smov 128   ;;  %s7364_s26 = smov 8  }
  0x11   :  { %36 = dma.hbm_to_vmem [thread:$0]  %s9255_s2, 4096, %s31_s16, [#allocation7], %s7363_s25, %s7363_s25, %s7364_s26  }
  0x12   :  { %s7365_s29 = smov [#allocation4]   ;;  %s7314_s7 = scalar_lea.hbm %s9254_s1, 65536 }
  0x13   :  { %s18_s30 = sshll.u32 %s7365_s29, 4  ;;  %p7315_p8 = scmp.ne.s32.totalorder %s9254_s1, %s7314_s7  ;;  %s19_s30 = int_to_ptr.vmem [resolvable:$true] %s18_s30 }
  0x14   :  { %p7318_p9 = scmp.lt.u32.totalorder %s7314_s7, %s9254_s1 }
  0x16   :  { %p7320_p10 = pnand %p7318_p9, %p7315_p8 }
  0x18   :  { %7323 = shalt.err (!%p7320_p10)
}
  0x19   :  { %s7324_s12 = scalar_lea.vmem %s19_s30, 65536  ;;  %p7329_p12 = scmp.lt.s32.totalorder %s19_s30, %s19_s30 }
  0x1a   :  { %p7325_p11 = scmp.ne.s32.totalorder %s19_s30, %s7324_s12  ;;  %p7330_p13 = scmp.lt.s32.totalorder %s7324_s12, %s7324_s12 }
  0x1c   :  { %p7331_p0 = por %p7330_p13, %p7329_p12 }
  0x1e   :  { %p7332_p1 = pnand %p7331_p0, %p7325_p11 }
  0x20   :  { %7335 = shalt.err (!%p7332_p1)
}
  0x21   :  { %s7366_s2 = smov 512   ;;  %s7367_s13 = smov 32  }
  0x22   :  { %24 = dma.hbm_to_vmem [thread:$0]  %s9254_s1, 65536, %s19_s30, [#allocation5], %s7366_s2, %s7366_s2, %s7367_s13  }
  0x23   :  { %s7368_s16 = smov [#allocation8]   ;;  %s7336_s20 = scalar_lea.hbm %s9256_s3, 512 }
  0x24   :  { %s43_s17 = sshll.u32 %s7368_s16, 4  ;;  %p7337_p2 = scmp.ne.s32.totalorder %s9256_s3, %s7336_s20  ;;  %s44_s17 = int_to_ptr.vmem [resolvable:$true] %s43_s17 }
  0x25   :  { %p7340_p3 = scmp.lt.u32.totalorder %s7336_s20, %s9256_s3 }
  0x27   :  { %p7342_p4 = pnand %p7340_p3, %p7337_p2 }
  0x29   :  { %7345 = shalt.err (!%p7342_p4)
}
  0x2a   :  { %s7346_s25 = scalar_lea.vmem %s44_s17, 512  ;;  %p7351_p6 = scmp.lt.s32.totalorder %s44_s17, %s44_s17 }
  0x2b   :  { %p7347_p5 = scmp.ne.s32.totalorder %s44_s17, %s7346_s25  ;;  %p7352_p7 = scmp.lt.s32.totalorder %s7346_s25, %s7346_s25 }
  0x2d   :  { %p7353_p8 = por %p7352_p7, %p7351_p6 }
  0x2f   :  { %p7354_p9 = pnand %p7353_p8, %p7347_p5 }
  0x31   :  { %7357 = shalt.err (!%p7354_p9)
}
  0x32   :  { %46 = dma.hbm_to_vmem [thread:$0]  %s9256_s3, 512, %s44_s17, [#allocation7]  }
  0x33   :  { %7358 = dma.done.wait [#allocation5], 65536  }
  0x34   :  { %7359 = vsyncadd [#allocation5], 4294901760 }
  0x35   :  { %7360 = dma.done.wait [#allocation7], 4608  }
  0x36   :  { %7361 = vsyncadd [#allocation7], 4294962688  ;;  %v81_v0 = vlaneseq  ;;  %v7369_v1 = vmov 0   ;;  %vm7370_vm1 = vmmov 1   ;;  %v229_v3 = vld [vmem:[#allocation4 + $0x8] sm:$0xff]  ;;  %v231_v5 = vld [vmem:[#allocation4 + $0x18] sm:$0xff] }
  0x37   :  { %7130 = vset.pattern.permute.xlu0 %v7369_v1  ;;  %v233_v4 = vld [vmem:[#allocation4 + $0x28] sm:$0xff]  ;;  %v7371_v6 = vmov 0.0   ;;  %v235_v9 = vld [vmem:[#allocation4 + $0x38] sm:$0xff]  ;;  %v228_v10 = vld [vmem:[#allocation4] sm:$0xff]  ;;  %vm400_vm5 = vcmask 1040384   ;;  %vm2095_vm6 = vcmask 1041408  }
  0x38   :  { %v7434_v2 = vshrl.u32 %v81_v0, 7  ;;  %v7444_v8 = vpack.c.bf16 %v233_v4, %v229_v3  ;;  %v232_v11 = vld [vmem:[#allocation4 + $0x20] sm:$0xff]  ;;  %v7449_v13 = vpack.c.bf16 %v235_v9, %v231_v5  ;;  %v230_v15 = vld [vmem:[#allocation4 + $0x10] sm:$0xff]  ;;  %v237_v17 = vld [vmem:[#allocation4 + $0x48] sm:$0xff]  ;;  %vm2097_vm7 = vcmask 1042432  }
  0x39   :  { %v7451_v14 = vpack.c.bf16 %v232_v11, %v228_v10  ;;  %v234_v16 = vld [vmem:[#allocation4 + $0x30] sm:$0xff]  ;;  %v241_v19 = vld [vmem:[#allocation4 + $0x68] sm:$0xff]  ;;  %v239_v20 = vld [vmem:[#allocation4 + $0x58] sm:$0xff]  ;;  %vm2099_vm8 = vcmask 1043456   ;;  %vm2101_vm9 = vcmask 1044480   ;;  %vm2103_vm10 = vcmask 1045504  }
  0x3a   :  { %9448 = vst [vmem:[#allocation11_spill] sm:$0xff] %v7434_v2  ;;  %vm85_vm0 = vcmp.ge.s32.totalorder %v7434_v2, 1  ;;  %9450 = vst [vmem:[#allocation13_spill] sm:$0xff] %v7444_v8  ;;  %4784 = vmatprep.subr.bf16.mxu0 %v7444_v8  ;;  %v7454_v18 = vpack.c.bf16 %v234_v16, %v230_v15  ;;  %v243_v21 = vld [vmem:[#allocation4 + $0x78] sm:$0xff]  ;;  %4848 = vmatprep.subr.bf16.mxu1 %v7449_v13  ;;  %v7459_v22 = vpack.c.bf16 %v241_v19, %v237_v17  ;;  %v236_v24 = vld [vmem:[#allocation4 + $0x40] sm:$0xff]  ;;  %vm2105_vm11 = vcmask 1046528  }
  0x3b   :  { %vm87_vm2 = vmxor %vm7370_vm1, %vm85_vm0  ;;  %9452 = vst [vmem:[#allocation15_spill] sm:$0xff] %v7449_v13  ;;  %4786 = vmatpush1.bf16.msra.mxu0 %v7451_v14  ;;  %v7461_v23 = vpack.c.bf16 %v243_v21, %v239_v20  ;;  %v240_v25 = vld [vmem:[#allocation4 + $0x60] sm:$0xff]  ;;  %v238_v26 = vld [vmem:[#allocation4 + $0x50] sm:$0xff]  ;;  %vm4738_vm13 = vcmask 7168  }
  0x3c   :  { %vm89_vm3 = vmxor %vm87_vm2, %vm7370_vm1  ;;  %4850 = vmatpush1.bf16.msra.mxu1 %v7454_v18  ;;  %v7464_v27 = vpack.c.bf16 %v240_v25, %v236_v24  ;;  %v242_v28 = vld [vmem:[#allocation4 + $0x70] sm:$0xff]  ;;  %v245_v29 = vld [vmem:[#allocation4 + $0x88] sm:$0xff]  ;;  %4788 = vmatprep.subr.bf16.mxu0 %v7459_v22 }
  0x3d   :  { %v7442_v7 = vsel %vm89_vm3, 1.0, %v7371_v6  ;;  %v249_v30 = vld [vmem:[#allocation4 + $0xa8] sm:$0xff]  ;;  %4852 = vmatprep.subr.bf16.mxu1 %v7461_v23  ;;  %v7469_v31 = vpack.c.bf16 %v242_v28, %v238_v26  ;;  %v247_v33 = vld [vmem:[#allocation4 + $0x98] sm:$0xff]  ;;  %v244_v35 = vld [vmem:[#allocation4 + $0x80] sm:$0xff] }
  0x3e   :  { %9449 = vst [vmem:[#allocation12_spill] sm:$0xff] %v7442_v7  ;;  %v7447_v12 = vmul.f32 0.0, %v7442_v7  ;;  %v7471_v32 = vpack.c.bf16 %v249_v30, %v245_v29  ;;  %v251_v34 = vld [vmem:[#allocation4 + $0xb8] sm:$0xff]  ;;  %v248_v37 = vld [vmem:[#allocation4 + $0xa0] sm:$0xff]  ;;  %v246_v38 = vld [vmem:[#allocation4 + $0x90] sm:$0xff] }
  0x3f   :  { %v7473_v36 = vpack.c.bf16 %v251_v34, %v247_v33  ;;  %v250_v39 = vld [vmem:[#allocation4 + $0xb0] sm:$0xff]  ;;  %4790 = vmatpush1.bf16.msra.mxu0 %v7464_v27  ;;  %v7476_v40 = vpack.c.bf16 %v248_v37, %v244_v35  ;;  %v253_v41 = vld [vmem:[#allocation4 + $0xc8] sm:$0xff]  ;;  %v255_v43 = vld [vmem:[#allocation4 + $0xd8] sm:$0xff] }
  0x40   :  { %9451 = vst [vmem:[#allocation14_spill] sm:$0xff] %v7447_v12  ;;  %469 = vmatprep.mubr.f32.mxu0 %v7447_v12  ;;  %540 = vmatprep.mubr.f32.mxu1 %v7447_v12  ;;  %v257_v42 = vld [vmem:[#allocation4 + $0xe8] sm:$0xff]  ;;  %v7480_v44 = vpack.c.bf16 %v250_v39, %v246_v38  ;;  %v259_v46 = vld [vmem:[#allocation4 + $0xf8] sm:$0xff]  ;;  %v252_v47 = vld [vmem:[#allocation4 + $0xc0] sm:$0xff] }
  0x41   :  { %4854 = vmatpush1.bf16.msra.mxu1 %v7469_v31  ;;  %4792 = vmatprep.subr.bf16.mxu0 %v7471_v32  ;;  %v7482_v45 = vpack.c.bf16 %v257_v42, %v253_v41  ;;  %v256_v48 = vld [vmem:[#allocation4 + $0xe0] sm:$0xff]  ;;  %v7485_v49 = vpack.c.bf16 %v259_v46, %v255_v43  ;;  %v254_v50 = vld [vmem:[#allocation4 + $0xd0] sm:$0xff]  ;;  %v261_v52 = vld [vmem:[#allocation4 + $0x108] sm:$0xff] }
  0x42   :  { %4856 = vmatprep.subr.bf16.mxu1 %v7473_v36  ;;  %v258_v51 = vld [vmem:[#allocation4 + $0xf0] sm:$0xff]  ;;  %v265_v53 = vld [vmem:[#allocation4 + $0x128] sm:$0xff]  ;;  %v263_v54 = vld [vmem:[#allocation4 + $0x118] sm:$0xff]  ;;  %v7488_v56 = vpack.c.bf16 %v256_v48, %v252_v47 }
  0x43   :  { %v267_v55 = vld [vmem:[#allocation4 + $0x138] sm:$0xff]  ;;  %4794 = vmatpush1.bf16.msra.mxu0 %v7476_v40  ;;  %v7492_v57 = vpack.c.bf16 %v258_v51, %v254_v50  ;;  %v7494_v58 = vpack.c.bf16 %v265_v53, %v261_v52  ;;  %v260_v59 = vld [vmem:[#allocation4 + $0x100] sm:$0xff]  ;;  %v262_v61 = vld [vmem:[#allocation4 + $0x110] sm:$0xff] }
  0x44   :  { %4796 = vmatprep.subr.bf16.mxu0 %v7482_v45  ;;  %v264_v60 = vld [vmem:[#allocation4 + $0x120] sm:$0xff]  ;;  %v7497_v62 = vpack.c.bf16 %v267_v55, %v263_v54  ;;  %v266_v63 = vld [vmem:[#allocation4 + $0x130] sm:$0xff]  ;;  %v269_v0 = vld [vmem:[#allocation4 + $0x148] sm:$0xff] }
  0x45   :  { %4858 = vmatpush1.bf16.msra.mxu1 %v7480_v44  ;;  %v273_v1 = vld [vmem:[#allocation4 + $0x168] sm:$0xff]  ;;  %v271_v3 = vld [vmem:[#allocation4 + $0x158] sm:$0xff]  ;;  %v7500_v5 = vpack.c.bf16 %v264_v60, %v260_v59  ;;  %v7504_v9 = vpack.c.bf16 %v266_v63, %v262_v61  ;;  %v268_v11 = vld [vmem:[#allocation4 + $0x140] sm:$0xff] }
  0x46   :  { %4860 = vmatprep.subr.bf16.mxu1 %v7485_v49  ;;  %v275_v4 = vld [vmem:[#allocation4 + $0x178] sm:$0xff]  ;;  %v7506_v10 = vpack.c.bf16 %v273_v1, %v269_v0  ;;  %v272_v15 = vld [vmem:[#allocation4 + $0x160] sm:$0xff]  ;;  %v270_v16 = vld [vmem:[#allocation4 + $0x150] sm:$0xff] }
  0x47   :  { %4798 = vmatpush1.bf16.msra.mxu0 %v7488_v56  ;;  %v7509_v17 = vpack.c.bf16 %v275_v4, %v271_v3  ;;  %v274_v19 = vld [vmem:[#allocation4 + $0x170] sm:$0xff]  ;;  %v277_v20 = vld [vmem:[#allocation4 + $0x188] sm:$0xff]  ;;  %v279_v24 = vld [vmem:[#allocation4 + $0x198] sm:$0xff]  ;;  %v7512_v26 = vpack.c.bf16 %v272_v15, %v268_v11 }
  0x48   :  { %4800 = vmatprep.subr.bf16.mxu0 %v7494_v58  ;;  %v281_v21 = vld [vmem:[#allocation4 + $0x1a8] sm:$0xff]  ;;  %v283_v25 = vld [vmem:[#allocation4 + $0x1b8] sm:$0xff]  ;;  %v7516_v28 = vpack.c.bf16 %v274_v19, %v270_v16  ;;  %v276_v30 = vld [vmem:[#allocation4 + $0x180] sm:$0xff] }
  0x49   :  { %4862 = vmatpush1.bf16.msra.mxu1 %v7492_v57  ;;  %v7518_v29 = vpack.c.bf16 %v281_v21, %v277_v20  ;;  %v280_v33 = vld [vmem:[#allocation4 + $0x1a0] sm:$0xff]  ;;  %v278_v34 = vld [vmem:[#allocation4 + $0x190] sm:$0xff]  ;;  %v7521_v35 = vpack.c.bf16 %v283_v25, %v279_v24  ;;  %v285_v38 = vld [vmem:[#allocation4 + $0x1c8] sm:$0xff] }
  0x4a   :  { %4864 = vmatprep.subr.bf16.mxu1 %v7497_v62  ;;  %v282_v37 = vld [vmem:[#allocation4 + $0x1b0] sm:$0xff]  ;;  %v289_v39 = vld [vmem:[#allocation4 + $0x1e8] sm:$0xff]  ;;  %v287_v41 = vld [vmem:[#allocation4 + $0x1d8] sm:$0xff]  ;;  %v7524_v43 = vpack.c.bf16 %v280_v33, %v276_v30 }
  0x4b   :  { %4802 = vmatpush1.bf16.msra.mxu0 %v7500_v5  ;;  %v291_v42 = vld [vmem:[#allocation4 + $0x1f8] sm:$0xff]  ;;  %v7528_v46 = vpack.c.bf16 %v282_v37, %v278_v34  ;;  %v7530_v47 = vpack.c.bf16 %v289_v39, %v285_v38  ;;  %v284_v48 = vld [vmem:[#allocation4 + $0x1c0] sm:$0xff]  ;;  %v286_v51 = vld [vmem:[#allocation4 + $0x1d0] sm:$0xff] }
  0x4c   :  { %4804 = vmatprep.subr.bf16.mxu0 %v7506_v10  ;;  %v288_v50 = vld [vmem:[#allocation4 + $0x1e0] sm:$0xff]  ;;  %v7533_v52 = vpack.c.bf16 %v291_v42, %v287_v41  ;;  %v290_v53 = vld [vmem:[#allocation4 + $0x1f0] sm:$0xff]  ;;  %v293_v54 = vld [vmem:[#allocation4 + $0x208] sm:$0xff] }
  0x4d   :  { %4866 = vmatpush1.bf16.msra.mxu1 %v7504_v9  ;;  %v297_v55 = vld [vmem:[#allocation4 + $0x228] sm:$0xff]  ;;  %v295_v59 = vld [vmem:[#allocation4 + $0x218] sm:$0xff]  ;;  %v7536_v61 = vpack.c.bf16 %v288_v50, %v284_v48  ;;  %v7540_v63 = vpack.c.bf16 %v290_v53, %v286_v51  ;;  %v292_v1 = vld [vmem:[#allocation4 + $0x200] sm:$0xff] }
  0x4e   :  { %4868 = vmatprep.subr.bf16.mxu1 %v7509_v17  ;;  %v299_v60 = vld [vmem:[#allocation4 + $0x238] sm:$0xff]  ;;  %v7542_v0 = vpack.c.bf16 %v297_v55, %v293_v54  ;;  %v296_v3 = vld [vmem:[#allocation4 + $0x220] sm:$0xff]  ;;  %v294_v4 = vld [vmem:[#allocation4 + $0x210] sm:$0xff] }
  0x4f   :  { %4806 = vmatpush1.bf16.msra.mxu0 %v7512_v26  ;;  %v7545_v11 = vpack.c.bf16 %v299_v60, %v295_v59  ;;  %v298_v15 = vld [vmem:[#allocation4 + $0x230] sm:$0xff]  ;;  %v301_v16 = vld [vmem:[#allocation4 + $0x248] sm:$0xff]  ;;  %v303_v20 = vld [vmem:[#allocation4 + $0x258] sm:$0xff]  ;;  %v7548_v24 = vpack.c.bf16 %v296_v3, %v292_v1 }
  0x50   :  { %4808 = vmatprep.subr.bf16.mxu0 %v7518_v29  ;;  %v305_v19 = vld [vmem:[#allocation4 + $0x268] sm:$0xff]  ;;  %v307_v21 = vld [vmem:[#allocation4 + $0x278] sm:$0xff]  ;;  %v7552_v25 = vpack.c.bf16 %v298_v15, %v294_v4  ;;  %v300_v33 = vld [vmem:[#allocation4 + $0x240] sm:$0xff] }
  0x51   :  { %4870 = vmatpush1.bf16.msra.mxu1 %v7516_v28  ;;  %v7554_v30 = vpack.c.bf16 %v305_v19, %v301_v16  ;;  %v304_v34 = vld [vmem:[#allocation4 + $0x260] sm:$0xff]  ;;  %v302_v37 = vld [vmem:[#allocation4 + $0x250] sm:$0xff]  ;;  %v7557_v38 = vpack.c.bf16 %v307_v21, %v303_v20  ;;  %v309_v41 = vld [vmem:[#allocation4 + $0x288] sm:$0xff] }
  0x52   :  { %4872 = vmatprep.subr.bf16.mxu1 %v7521_v35  ;;  %v306_v39 = vld [vmem:[#allocation4 + $0x270] sm:$0xff]  ;;  %v313_v42 = vld [vmem:[#allocation4 + $0x2a8] sm:$0xff]  ;;  %v311_v48 = vld [vmem:[#allocation4 + $0x298] sm:$0xff]  ;;  %v7560_v51 = vpack.c.bf16 %v304_v34, %v300_v33 }
  0x53   :  { %4810 = vmatpush1.bf16.msra.mxu0 %v7524_v43  ;;  %9453 = vst [vmem:[#allocation16_spill] sm:$0xff] %v7554_v30  ;;  %9454 = vst [vmem:[#allocation17_spill] sm:$0xff] %v7557_v38  ;;  %v315_v50 = vld [vmem:[#allocation4 + $0x2b8] sm:$0xff]  ;;  %v7564_v53 = vpack.c.bf16 %v306_v39, %v302_v37  ;;  %v7566_v54 = vpack.c.bf16 %v313_v42, %v309_v41  ;;  %v308_v55 = vld [vmem:[#allocation4 + $0x280] sm:$0xff] }
  0x54   :  { %4812 = vmatprep.subr.bf16.mxu0 %v7530_v47  ;;  %9455 = vst [vmem:[#allocation18_spill] sm:$0xff] %v7560_v51  ;;  %v312_v59 = vld [vmem:[#allocation4 + $0x2a0] sm:$0xff]  ;;  %v310_v60 = vld [vmem:[#allocation4 + $0x290] sm:$0xff]  ;;  %v7569_v1 = vpack.c.bf16 %v315_v50, %v311_v48  ;;  %v317_v4 = vld [vmem:[#allocation4 + $0x2c8] sm:$0xff] }
  0x55   :  { %4874 = vmatpush1.bf16.msra.mxu1 %v7528_v46  ;;  %9456 = vst [vmem:[#allocation19_spill] sm:$0xff] %v7564_v53  ;;  %9457 = vst [vmem:[#allocation20_spill] sm:$0xff] %v7566_v54  ;;  %v314_v3 = vld [vmem:[#allocation4 + $0x2b0] sm:$0xff]  ;;  %v321_v15 = vld [vmem:[#allocation4 + $0x2e8] sm:$0xff]  ;;  %v7572_v20 = vpack.c.bf16 %v312_v59, %v308_v55 }
  0x56   :  { %4876 = vmatprep.subr.bf16.mxu1 %v7533_v52  ;;  %9458 = vst [vmem:[#allocation21_spill] sm:$0xff] %v7569_v1  ;;  %v319_v16 = vld [vmem:[#allocation4 + $0x2d8] sm:$0xff]  ;;  %v316_v21 = vld [vmem:[#allocation4 + $0x2c0] sm:$0xff]  ;;  %v7576_v33 = vpack.c.bf16 %v314_v3, %v310_v60  ;;  %v7578_v34 = vpack.c.bf16 %v321_v15, %v317_v4  ;;  %v318_v39 = vld [vmem:[#allocation4 + $0x2d0] sm:$0xff] }
  0x57   :  { %4814 = vmatpush1.bf16.msra.mxu0 %v7536_v61  ;;  %v323_v19 = vld [vmem:[#allocation4 + $0x2f8] sm:$0xff]  ;;  %9459 = vst [vmem:[#allocation22_spill] sm:$0xff] %v7572_v20  ;;  %v320_v37 = vld [vmem:[#allocation4 + $0x2e0] sm:$0xff]  ;;  %v322_v41 = vld [vmem:[#allocation4 + $0x2f0] sm:$0xff] }
  0x58   :  { %4816 = vmatprep.subr.bf16.mxu0 %v7542_v0  ;;  %9460 = vst [vmem:[#allocation23_spill] sm:$0xff] %v7576_v33  ;;  %9461 = vst [vmem:[#allocation24_spill] sm:$0xff] %v7578_v34  ;;  %v7581_v42 = vpack.c.bf16 %v323_v19, %v319_v16  ;;  %v325_v48 = vld [vmem:[#allocation4 + $0x308] sm:$0xff]  ;;  %v327_v55 = vld [vmem:[#allocation4 + $0x318] sm:$0xff]  ;;  %v7593_v4 = vpack.c.bf16 %v320_v37, %v316_v21  ;;  %v7597_v15 = vpack.c.bf16 %v322_v41, %v318_v39  ;;  %v7372_v39 = vmov 1  }
  0x59   :  { %4878 = vmatpush1.bf16.msra.mxu1 %v7540_v63  ;;  %v329_v50 = vld [vmem:[#allocation4 + $0x328] sm:$0xff]  ;;  %vm88_vm4 = vmxor %vm85_vm0, %vm7370_vm1  ;;  %v331_v59 = vld [vmem:[#allocation4 + $0x338] sm:$0xff] }
  0x5a   :  { %4880 = vmatprep.subr.bf16.mxu1 %v7545_v11  ;;  %9462 = vst [vmem:[#allocation25_spill] sm:$0xff] %v7581_v42  ;;  %v7587_v60 = vsel %vm88_vm4, 1.0, %v7371_v6  ;;  %v108_v3 = vld [vmem:[%s9253_s0] sm:$0xff]  ;;  %9464 = vst [vmem:[#allocation27_spill] sm:$0xff] %v7593_v4  ;;  %v7599_v16 = vpack.c.bf16 %v329_v50, %v325_v48  ;;  %v326_v12 = vld [vmem:[#allocation4 + $0x310] sm:$0xff]  ;;  %v7602_v7 = vpack.c.bf16 %v331_v59, %v327_v55 }
  0x5b   :  { %4818 = vmatpush1.bf16.msra.mxu0 %v7548_v24  ;;  %9463 = vst [vmem:[#allocation26_spill] sm:$0xff] %v7587_v60  ;;  %111 = vperm.xlu0 %7130, %v108_v3   ;;  %9465 = vst [vmem:[#allocation28_spill] sm:$0xff] %v7597_v15  ;;  %v324_v19 = vld [vmem:[#allocation4 + $0x300] sm:$0xff]  ;;  %v330_v2 = vld [vmem:[#allocation4 + $0x330] sm:$0xff] }
  0x5c   :  { %4820 = vmatprep.subr.bf16.mxu0 %v7554_v30  ;;  %9466 = vst [vmem:[#allocation29_spill] sm:$0xff] %v7599_v16  ;;  %v328_v6 = vld [vmem:[#allocation4 + $0x320] sm:$0xff]  ;;  %9467 = vst [vmem:[#allocation30_spill] sm:$0xff] %v7602_v7  ;;  %v337_v21 = vld [vmem:[#allocation4 + $0x368] sm:$0xff]  ;;  %v7609_v41 = vpack.c.bf16 %v330_v2, %v326_v12 }
  0x5d   :  { %4882 = vmatpush1.bf16.msra.mxu1 %v7552_v25  ;;  %v335_v37 = vld [vmem:[#allocation4 + $0x358] sm:$0xff]  ;;  %v332_v50 = vld [vmem:[#allocation4 + $0x340] sm:$0xff]  ;;  %v334_v59 = vld [vmem:[#allocation4 + $0x350] sm:$0xff] }
  0x5e   :  { %4884 = vmatprep.subr.bf16.mxu1 %v7557_v38  ;;  %9469 = vst [vmem:[#allocation32_spill] sm:$0xff] %v7609_v41  ;;  %v336_v55 = vld [vmem:[#allocation4 + $0x360] sm:$0xff] }
  0x5f   :  { %4822 = vmatpush1.bf16.msra.mxu0 %v7560_v51  ;;  %7131 = vset.pattern.permute.xlu0 %v7372_v39  ;;  %v343_v39 = vld [vmem:[#allocation4 + $0x398] sm:$0xff] }
  0x60   :  { %4824 = vmatprep.subr.bf16.mxu0 %v7566_v54  ;;  %169 = vperm.xlu0 %7131, %v108_v3  }
  0x61   :  { %4886 = vmatpush1.bf16.msra.mxu1 %v7564_v53 }
  0x62   :  { %4888 = vmatprep.subr.bf16.mxu1 %v7569_v1  ;;  %v339_v1 = vld [vmem:[#allocation4 + $0x378] sm:$0xff] }
  0x63   :  { %4826 = vmatpush1.bf16.msra.mxu0 %v7572_v20  ;;  %v333_v20 = vld [vmem:[#allocation4 + $0x348] sm:$0xff] }
  0x64   :  { %4828 = vmatprep.subr.bf16.mxu0 %v7578_v34  ;;  %v7611_v48 = vpack.c.bf16 %v337_v21, %v333_v20  ;;  %v347_v34 = vld [vmem:[#allocation4 + $0x3b8] sm:$0xff]  ;;  %v344_v20 = vld [vmem:[#allocation4 + $0x3a0] sm:$0xff]  ;;  %v342_v21 = vld [vmem:[#allocation4 + $0x390] sm:$0xff] }
  0x65   :  { %4890 = vmatpush1.bf16.msra.mxu1 %v7576_v33  ;;  %v7605_v33 = vpack.c.bf16 %v328_v6, %v324_v19  ;;  %v341_v19 = vld [vmem:[#allocation4 + $0x388] sm:$0xff]  ;;  %v7626_v3 = vpack.c.bf16 %v347_v34, %v343_v39  ;;  %v352_v34 = vld [vmem:[#allocation4 + $0x3e0] sm:$0xff]  ;;  %v350_v39 = vld [vmem:[#allocation4 + $0x3d0] sm:$0xff] }
  0x66   :  { %4892 = vmatprep.subr.bf16.mxu1 %v7581_v42  ;;  %9470 = vst [vmem:[#allocation33_spill] sm:$0xff] %v7611_v48  ;;  %v7614_v42 = vpack.c.bf16 %v339_v1, %v335_v37  ;;  %v345_v6 = vld [vmem:[#allocation4 + $0x3a8] sm:$0xff]  ;;  %v340_v1 = vld [vmem:[#allocation4 + $0x380] sm:$0xff]  ;;  %v346_v37 = vld [vmem:[#allocation4 + $0x3b0] sm:$0xff] }
  0x67   :  { %4830 = vmatpush1.bf16.msra.mxu0 %v7593_v4  ;;  %9468 = vst [vmem:[#allocation31_spill] sm:$0xff] %v7605_v33  ;;  %v338_v4 = vld [vmem:[#allocation4 + $0x370] sm:$0xff]  ;;  %v7623_v12 = vpack.c.bf16 %v345_v6, %v341_v19  ;;  %9475 = vst [vmem:[#allocation38_spill] sm:$0xff] %v7626_v3  ;;  %v348_v19 = vld [vmem:[#allocation4 + $0x3c0] sm:$0xff] }
  0x68   :  { %4832 = vmatprep.subr.bf16.mxu0 %v7599_v16  ;;  %9471 = vst [vmem:[#allocation34_spill] sm:$0xff] %v7614_v42  ;;  %v7617_v16 = vpack.c.bf16 %v336_v55, %v332_v50  ;;  %v7621_v2 = vpack.c.bf16 %v338_v4, %v334_v59  ;;  %v351_v50 = vld [vmem:[#allocation4 + $0x3d8] sm:$0xff]  ;;  %v7633_v4 = vpack.c.bf16 %v346_v37, %v342_v21  ;;  %v9485_v21 = vld [vmem:[#allocation23_spill] sm:$0xff]  ;;  %v9486_v37 = vld [vmem:[#allocation24_spill] sm:$0xff] }
  0x69   :  { %4894 = vmatpush1.bf16.msra.mxu1 %v7597_v15  ;;  %9474 = vst [vmem:[#allocation37_spill] sm:$0xff] %v7623_v12  ;;  %v355_v55 = vld [vmem:[#allocation4 + $0x3f8] sm:$0xff] }
  0x6a   :  { %4896 = vmatprep.subr.bf16.mxu1 %v7602_v7  ;;  %9472 = vst [vmem:[#allocation35_spill] sm:$0xff] %v7617_v16  ;;  %9473 = vst [vmem:[#allocation36_spill] sm:$0xff] %v7621_v2  ;;  %v349_v7 = vld [vmem:[#allocation4 + $0x3c8] sm:$0xff]  ;;  %v7638_v6 = vpack.c.bf16 %v355_v55, %v351_v50  ;;  %v9487_v50 = vld [vmem:[#allocation25_spill] sm:$0xff] }
  0x6b   :  { %4834 = vmatpush1.bf16.msra.mxu0 %v7605_v33  ;;  %v353_v33 = vld [vmem:[#allocation4 + $0x3e8] sm:$0xff]  ;;  %9477 = vst [vmem:[#allocation40_spill] sm:$0xff] %v7633_v4  ;;  %v9488_v55 = vld [vmem:[#allocation27_spill] sm:$0xff] }
  0x6c   :  { %4836 = vmatprep.subr.bf16.mxu0 %v7611_v48  ;;  %v7635_v59 = vpack.c.bf16 %v353_v33, %v349_v7  ;;  %9479 = vst [vmem:[#allocation42_spill] sm:$0xff] %v7638_v6  ;;  %v7649_v7 = vmul.f32 0.0, %v7587_v60  ;;  %v9483_v33 = vld [vmem:[#allocation21_spill] sm:$0xff] }
  0x6d   :  { %4898 = vmatpush1.bf16.msra.mxu1 %v7609_v41  ;;  %v7629_v41 = vpack.c.bf16 %v344_v20, %v340_v1  ;;  %v7641_v1 = vpack.c.bf16 %v352_v34, %v348_v19  ;;  %v9489_v19 = vld [vmem:[#allocation29_spill] sm:$0xff]  ;;  %v9490_v34 = vld [vmem:[#allocation30_spill] sm:$0xff] }
  0x6e   :  { %4900 = vmatprep.subr.bf16.mxu1 %v7614_v42  ;;  %9478 = vst [vmem:[#allocation41_spill] sm:$0xff] %v7635_v59  ;;  %v354_v42 = vld [vmem:[#allocation4 + $0x3f0] sm:$0xff]  ;;  %9482 = vst [vmem:[#allocation45_spill] sm:$0xff] %v7649_v7 }
  0x6f   :  { %4838 = vmatpush1.bf16.msra.mxu0 %v7617_v16  ;;  %9476 = vst [vmem:[#allocation39_spill] sm:$0xff] %v7629_v41  ;;  %9480 = vst [vmem:[#allocation43_spill] sm:$0xff] %v7641_v1  ;;  %v7645_v20 = vpack.c.bf16 %v354_v42, %v350_v39  ;;  %v9484_v42 = vld [vmem:[#allocation22_spill] sm:$0xff]  ;;  %v9491_v39 = vld [vmem:[#allocation31_spill] sm:$0xff] }
  0x70   :  { %4840 = vmatprep.subr.bf16.mxu0 %v7623_v12 }
  0x71   :  { %4902 = vmatpush1.bf16.msra.mxu1 %v7621_v2  ;;  %9481 = vst [vmem:[#allocation44_spill] sm:$0xff] %v7645_v20 }
  0x72   :  { %4904 = vmatprep.subr.bf16.mxu1 %v7626_v3 }
  0x73   :  { %4842 = vmatpush1.bf16.msra.mxu0 %v7629_v41 }
  0x74   :  { %4844 = vmatprep.subr.bf16.mxu0 %v7635_v59 }
  0x75   :  { %4906 = vmatpush1.bf16.msra.mxu1 %v7633_v4 }
  0x76   :  { %4908 = vmatprep.subr.bf16.mxu1 %v7638_v6 }
  0x77   :  { %4846 = vmatpush1.bf16.msra.mxu0 %v7641_v1 }
  0x78   :  { %4912 = vmatprep.subr.bf16.mxu0 %v7444_v8 }
  0x79   :  { %4910 = vmatpush1.bf16.msra.mxu1 %v7645_v20 }
  0x7a   :  { %4976 = vmatprep.subr.bf16.mxu1 %v7449_v13  ;;  %470 = vmatmul.mubr.f32.vlgmr.msra.gmra.mrb[0].mxu0 %v7649_v7 }
  0x7b   :  { %4914 = vmatpush1.bf16.msra.mxu0 %v7451_v14 }
  0x7c   :  { %541 = vmatmul.mubr.f32.vlgmr.msra.gmra.mrb[0].mxu1 %v7649_v7  ;;  %4916 = vmatprep.subr.bf16.mxu0 %v7459_v22  ;;  %v9492_v7 = vld [vmem:[#allocation32_spill] sm:$0xff] }
  0x7d   :  { %4978 = vmatpush1.bf16.msra.mxu1 %v7454_v18 }
  0x7e   :  { %4980 = vmatprep.subr.bf16.mxu1 %v7461_v23 }
  0x7f   :  { %4918 = vmatpush1.bf16.msra.mxu0 %v7464_v27 }
  0x80   :  { %4920 = vmatprep.subr.bf16.mxu0 %v7471_v32 }
  0x81   :  { %4982 = vmatpush1.bf16.msra.mxu1 %v7469_v31 }
  0x82   :  { %4984 = vmatprep.subr.bf16.mxu1 %v7473_v36 }
  0x83   :  { %4922 = vmatpush1.bf16.msra.mxu0 %v7476_v40 }
  0x84   :  { %4924 = vmatprep.subr.bf16.mxu0 %v7482_v45 }
  0x85   :  { %4986 = vmatpush1.bf16.msra.mxu1 %v7480_v44 }
  0x86   :  { %4988 = vmatprep.subr.bf16.mxu1 %v7485_v49 }
  0x87   :  { %4926 = vmatpush1.bf16.msra.mxu0 %v7488_v56 }
  0x88   :  { %4928 = vmatprep.subr.bf16.mxu0 %v7494_v58 }
  0x89   :  { %4990 = vmatpush1.bf16.msra.mxu1 %v7492_v57 }
  0x8a   :  { %4992 = vmatprep.subr.bf16.mxu1 %v7497_v62 }
  0x8b   :  { %4930 = vmatpush1.bf16.msra.mxu0 %v7500_v5 }
  0x8c   :  { %4932 = vmatprep.subr.bf16.mxu0 %v7506_v10 }
  0x8d   :  { %4994 = vmatpush1.bf16.msra.mxu1 %v7504_v9 }
  0x8e   :  { %4996 = vmatprep.subr.bf16.mxu1 %v7509_v17 }
  0x8f   :  { %4934 = vmatpush1.bf16.msra.mxu0 %v7512_v26 }
  0x90   :  { %4936 = vmatprep.subr.bf16.mxu0 %v7518_v29 }
  0x91   :  { %4998 = vmatpush1.bf16.msra.mxu1 %v7516_v28 }
  0x92   :  { %5000 = vmatprep.subr.bf16.mxu1 %v7521_v35 }
  0x93   :  { %4938 = vmatpush1.bf16.msra.mxu0 %v7524_v43 }
  0x94   :  { %4940 = vmatprep.subr.bf16.mxu0 %v7530_v47 }
  0x95   :  { %5002 = vmatpush1.bf16.msra.mxu1 %v7528_v46 }
  0x96   :  { %5004 = vmatprep.subr.bf16.mxu1 %v7533_v52 }
  0x97   :  { %4942 = vmatpush1.bf16.msra.mxu0 %v7536_v61 }
  0x98   :  { %4944 = vmatprep.subr.bf16.mxu0 %v7542_v0 }
  0x99   :  { %5006 = vmatpush1.bf16.msra.mxu1 %v7540_v63 }
  0x9a   :  { %5008 = vmatprep.subr.bf16.mxu1 %v7545_v11 }
  0x9b   :  { %4946 = vmatpush1.bf16.msra.mxu0 %v7548_v24 }
  0x9c   :  { %4948 = vmatprep.subr.bf16.mxu0 %v7554_v30 }
  0x9d   :  { %5010 = vmatpush1.bf16.msra.mxu1 %v7552_v25 }
  0x9e   :  { %5012 = vmatprep.subr.bf16.mxu1 %v7557_v38 }
  0x9f   :  { %4950 = vmatpush1.bf16.msra.mxu0 %v7560_v51 }
  0xa0   :  { %4952 = vmatprep.subr.bf16.mxu0 %v7566_v54 }
  0xa1   :  { %5014 = vmatpush1.bf16.msra.mxu1 %v7564_v53 }
  0xa2   :  { %5016 = vmatprep.subr.bf16.mxu1 %v9483_v33 }
  0xa3   :  { %4954 = vmatpush1.bf16.msra.mxu0 %v9484_v42  ;;  %v9493_v42 = vld [vmem:[#allocation34_spill] sm:$0xff] }
  0xa4   :  { %4956 = vmatprep.subr.bf16.mxu0 %v9486_v37 }
  0xa5   :  { %5018 = vmatpush1.bf16.msra.mxu1 %v9485_v21 }
  0xa6   :  { %5020 = vmatprep.subr.bf16.mxu1 %v9487_v50  ;;  %v100_v50 = vld [vmem:[#allocation8 + $0x3] ss:$8 sm:$0xf] }
  0xa7   :  { %4958 = vmatpush1.bf16.msra.mxu0 %v9488_v55 }
  0xa8   :  { %4960 = vmatprep.subr.bf16.mxu0 %v9489_v19 }
  0xa9   :  { %5022 = vmatpush1.bf16.msra.mxu1 %v7597_v15 }
  0xaa   :  { %5024 = vmatprep.subr.bf16.mxu1 %v9490_v34 }
  0xab   :  { %4962 = vmatpush1.bf16.msra.mxu0 %v9491_v39 }
  0xac   :  { %4964 = vmatprep.subr.bf16.mxu0 %v7611_v48 }
  0xad   :  { %5026 = vmatpush1.bf16.msra.mxu1 %v9492_v7 }
  0xae   :  { %5028 = vmatprep.subr.bf16.mxu1 %v9493_v42 }
  0xaf   :  { %4966 = vmatpush1.bf16.msra.mxu0 %v7617_v16 }
  0xb0   :  { %4968 = vmatprep.subr.bf16.mxu0 %v7623_v12 }
  0xb1   :  { %5030 = vmatpush1.bf16.msra.mxu1 %v7621_v2  ;;  %v9494_v2 = vld [vmem:[#allocation11_spill] sm:$0xff] }
  0xb2   :  { %5032 = vmatprep.subr.bf16.mxu1 %v7626_v3  ;;  %v7722_v12 = vsub.s32 0, %v9494_v2  ;;  %v7725_v3 = vsub.s32 1, %v9494_v2 }
  0xb3   :  { %4970 = vmatpush1.bf16.msra.mxu0 %v7629_v41 }
  0xb4   :  { %4972 = vmatprep.subr.bf16.mxu0 %v7635_v59  ;;  %9495 = vst [vmem:[#allocation11_spill] sm:$0xff] %v7722_v12  ;;  %9496 = vst [vmem:[#allocation46_spill] sm:$0xff] %v7725_v3  ;;  %v7731_v59 = vsub.s32 3, %v9494_v2 }
  0xb5   :  { %5034 = vmatpush1.bf16.msra.mxu1 %v7633_v4  ;;  %v7728_v4 = vsub.s32 2, %v9494_v2  ;;  %v96_v2 = vld [vmem:[#allocation8 + $0x1] ss:$8 sm:$0xf] }
  0xb6   :  { %5036 = vmatprep.subr.bf16.mxu1 %v7638_v6  ;;  %9498 = vst [vmem:[#allocation48_spill] sm:$0xff] %v7731_v59  ;;  %v94_v6 = vld [vmem:[#allocation8] ss:$8 sm:$0xf]  ;;  %v176_v37 = vrot.slane %v96_v2, %v7722_v12  ;;  %v180_v21 = vrot.slane %v96_v2, %v7725_v3  ;;  %v188_v33 = vrot.slane %v96_v2, %v7731_v59 }
  0xb7   :  { %4974 = vmatpush1.bf16.msra.mxu0 %v7641_v1  ;;  %9497 = vst [vmem:[#allocation47_spill] sm:$0xff] %v7728_v4  ;;  %v98_v1 = vld [vmem:[#allocation8 + $0x2] ss:$8 sm:$0xf]  ;;  %v130_v41 = vrot.slane %v94_v6, %v7731_v59 }
  0xb8   :  { %5040 = vmatprep.subr.bf16.mxu0 %v7444_v8  ;;  %v122_v8 = vrot.slane %v94_v6, %v7725_v3  ;;  %v143_v16 = vrot.slane %v98_v1, %v7722_v12  ;;  %v147_v42 = vrot.slane %v98_v1, %v7725_v3  ;;  %v151_v48 = vrot.slane %v98_v1, %v7728_v4 }
  0xb9   :  { %5038 = vmatpush1.bf16.msra.mxu1 %v7645_v20  ;;  %v118_v20 = vrot.slane %v94_v6, %v7722_v12  ;;  %v155_v7 = vrot.slane %v98_v1, %v7731_v59  ;;  %v213_v1 = vrot.slane %v100_v50, %v7731_v59 }
  0xba   :  { %5104 = vmatprep.subr.bf16.mxu1 %v7449_v13  ;;  %v126_v13 = vrot.slane %v94_v6, %v7728_v4  ;;  %v184_v6 = vrot.slane %v96_v2, %v7728_v4 }
  0xda   :  { %v112_v39 = vpop.permute.xlu0 %111 }
  0xdb   :  { %v135_v34 = vmul.f32 %v118_v20, %v112_v39  ;;  %v136_v19 = vmul.f32 %v122_v8, %v112_v39  ;;  %v137_v15 = vmul.f32 %v126_v13, %v112_v39  ;;  %v138_v55 = vmul.f32 %v130_v41, %v112_v39 }
  0xdc   :  { %v201_v8 = vrot.slane %v100_v50, %v7722_v12  ;;  %v205_v13 = vrot.slane %v100_v50, %v7725_v3  ;;  %v209_v41 = vrot.slane %v100_v50, %v7728_v4 }
  0xdd   :  { %v160_v54 = vadd.f32 %v143_v16, %v135_v34  ;;  %v161_v53 = vadd.f32 %v147_v42, %v136_v19  ;;  %v162_v51 = vadd.f32 %v151_v48, %v137_v15  ;;  %v163_v38 = vadd.f32 %v155_v7, %v138_v55 }
  0xdf   :  { %164 = vst [vmem:[#allocation2] sm:$0xff] %v160_v54  ;;  %165 = vst [vmem:[#allocation2 + $0x8] sm:$0xff] %v161_v53  ;;  %v170_v20 = vpop.permute.xlu0 %169 }
  0xe0   :  { %166 = vst [vmem:[#allocation2 + $0x10] sm:$0xff] %v162_v51  ;;  %167 = vst [vmem:[#allocation2 + $0x18] sm:$0xff] %v163_v38  ;;  %v193_v39 = vmul.f32 %v176_v37, %v170_v20  ;;  %v194_v30 = vmul.f32 %v180_v21, %v170_v20  ;;  %v195_v2 = vmul.f32 %v184_v6, %v170_v20 }
  0xe1   :  { %v196_v16 = vmul.f32 %v188_v33, %v170_v20 }
  0xe2   :  { %v218_v42 = vadd.f32 %v201_v8, %v193_v39  ;;  %v219_v15 = vadd.f32 %v205_v13, %v194_v30  ;;  %v220_v48 = vadd.f32 %v209_v41, %v195_v2 }
  0xe3   :  { %v221_v54 = vadd.f32 %v213_v1, %v196_v16 }
  0xe4   :  { %222 = vst [vmem:[#allocation3] sm:$0xff] %v218_v42  ;;  %223 = vst [vmem:[#allocation3 + $0x8] sm:$0xff] %v219_v15 }
  0xe5   :  { %224 = vst [vmem:[#allocation3 + $0x10] sm:$0xff] %v220_v48  ;;  %225 = vst [vmem:[#allocation3 + $0x18] sm:$0xff] %v221_v54 }
  0xe7   :  { %v356_v38 = vld [vmem:[#allocation2] ss:$8 sm:$0xf] }
  0xe8   :  { %v362_v53 = vrot.slane %v356_v38, %v7722_v12  ;;  %v366_v37 = vrot.slane %v356_v38, %v7725_v3  ;;  %v370_v50 = vrot.slane %v356_v38, %v7728_v4  ;;  %v374_v2 = vrot.slane %v356_v38, %v7731_v59 }
  0xec   :  { %v357_v51 = vld [vmem:[#allocation3] ss:$8 sm:$0xf] }
  0xed   :  { %v383_v7 = vrot.slane %v357_v51, %v7722_v12  ;;  %v387_v21 = vrot.slane %v357_v51, %v7725_v3  ;;  %v391_v55 = vrot.slane %v357_v51, %v7728_v4  ;;  %v395_v16 = vrot.slane %v357_v51, %v7731_v59 }
  0xef   :  { %v401_v33 = vsel %vm400_vm5, %v362_v53, %v383_v7  ;;  %v402_v6 = vsel %vm400_vm5, %v366_v37, %v387_v21  ;;  %v403_v20 = vsel %vm400_vm5, %v370_v50, %v391_v55  ;;  %v404_v15 = vsel %vm400_vm5, %v374_v2, %v395_v16  ;;  %v9502_v2 = vld [vmem:[#allocation17_spill] sm:$0xff]  ;;  %v9503_v16 = vld [vmem:[#allocation18_spill] sm:$0xff] }
 0x14d   :  { %v471_v30 = vpop.f32.mrb[0].mxu0 }
 0x14e   :  { %v472_v19 = vadd.f32 %v471_v30, %v401_v33  ;;  %v473_v8 = vpop.f32.mrb[1].mxu0 }
 0x14f   :  { %v542_v34 = vpop.f32.mrb[0].mxu1  ;;  %v474_v13 = vadd.f32 %v473_v8, %v402_v6 }
 0x150   :  { %v544_v41 = vpop.f32.mrb[1].mxu1  ;;  %v547_v1 = vmul.f32 0.5, %v472_v19  ;;  %v543_v42 = vadd.f32 %v542_v34, %v403_v20 }
 0x151   :  { %v548_v39 = vmul.f32 0.5, %v474_v13  ;;  %v545_v48 = vadd.f32 %v544_v41, %v404_v15  ;;  %v9500_v41 = vld [vmem:[#allocation12_spill] sm:$0xff] }
 0x152   :  { %7132 = vtanh.f32 %v547_v1  ;;  %v9505_v15 = vld [vmem:[#allocation20_spill] sm:$0xff] }
 0x153   :  { %7134 = vtanh.f32 %v548_v39  ;;  %v550_v54 = vmul.f32 0.5, %v545_v48  ;;  %v9501_v39 = vld [vmem:[#allocation16_spill] sm:$0xff]  ;;  %v9506_v48 = vld [vmem:[#allocation21_spill] sm:$0xff] }
 0x154   :  { %7136 = vtanh.f32 %v543_v42  ;;  %v9504_v42 = vld [vmem:[#allocation19_spill] sm:$0xff] }
 0x155   :  { %7138 = vtanh.f32 %v550_v54  ;;  %v9507_v54 = vld [vmem:[#allocation22_spill] sm:$0xff] }
 0x15c   :  { %v7133_v53 = vpop.eup %7132 }
 0x15d   :  { %v7135_v7 = vpop.eup %7134  ;;  %v555_v37 = vmul.f32 0.5, %v7133_v53  ;;  %v9508_v53 = vld [vmem:[#allocation23_spill] sm:$0xff] }
 0x15e   :  { %v556_v21 = vmul.f32 0.5, %v7135_v7  ;;  %v7137_v30 = vpop.eup %7136  ;;  %v9509_v7 = vld [vmem:[#allocation24_spill] sm:$0xff] }
 0x15f   :  { %v559_v33 = vadd.f32 0.5, %v555_v37  ;;  %v7139_v51 = vpop.eup %7138  ;;  %v9510_v37 = vld [vmem:[#allocation25_spill] sm:$0xff] }
 0x160   :  { %v560_v50 = vadd.f32 0.5, %v556_v21  ;;  %v558_v34 = vmul.f32 0.5, %v7139_v51  ;;  %v9511_v21 = vld [vmem:[#allocation27_spill] sm:$0xff]  ;;  %v9517_v51 = vld [vmem:[#allocation33_spill] sm:$0xff] }
 0x161   :  { %v564_v55 = vmul.f32 %v7137_v30, %v559_v33  ;;  %v9512_v33 = vld [vmem:[#allocation28_spill] sm:$0xff]  ;;  %v9513_v30 = vld [vmem:[#allocation29_spill] sm:$0xff] }
 0x162   :  { %v563_v38 = vmul.f32 0.0, %v560_v50  ;;  %v562_v6 = vadd.f32 0.5, %v558_v34  ;;  %v9514_v50 = vld [vmem:[#allocation30_spill] sm:$0xff] }
 0x163   :  { %v9518_v34 = vld [vmem:[#allocation34_spill] sm:$0xff] }
 0x164   :  { %v7761_v19 = vadd.f32 %v564_v55, %v563_v38  ;;  %v9515_v55 = vld [vmem:[#allocation31_spill] sm:$0xff]  ;;  %v9516_v38 = vld [vmem:[#allocation32_spill] sm:$0xff] }
 0x166   :  { %7140 = vtanh.f32 %v7761_v19 }
 0x170   :  { %v7141_v8 = vpop.eup %7140 }
 0x171   :  { %v7764_v13 = vmul.f32 %v7141_v8, %v562_v6  ;;  %v9519_v6 = vld [vmem:[#allocation35_spill] sm:$0xff]  ;;  %v9520_v8 = vld [vmem:[#allocation36_spill] sm:$0xff] }
 0x173   :  { %9499 = vst [vmem:[#allocation49_spill] sm:$0xff] %v7764_v13  ;;  %v569_v1 = vmul.f32 %v9500_v41, %v7764_v13  ;;  %v568_v20 = vmul.f32 %v7587_v60, %v7764_v13  ;;  %v9523_v13 = vld [vmem:[#allocation39_spill] sm:$0xff] }
 0x175   :  { %684 = vmatprep.mubr.f32.mxu0 %v569_v1  ;;  %755 = vmatprep.mubr.f32.mxu1 %v569_v1  ;;  %v9521_v1 = vld [vmem:[#allocation37_spill] sm:$0xff] }
 0x176   :  { %685 = vmatmul.mubr.f32.vlgmr.msra.gmra.mrb[2].mxu0 %v568_v20  ;;  %756 = vmatmul.mubr.f32.vlgmr.msra.gmra.mrb[2].mxu1 %v568_v20  ;;  %v9522_v20 = vld [vmem:[#allocation38_spill] sm:$0xff] }
 0x177   :  { %5042 = vmatpush1.bf16.msra.mxu0 %v7451_v14  ;;  %5106 = vmatpush1.bf16.msra.mxu1 %v7454_v18 }
 0x178   :  { %5044 = vmatprep.subr.bf16.mxu0 %v7459_v22  ;;  %5108 = vmatprep.subr.bf16.mxu1 %v7461_v23 }
 0x17b   :  { %5046 = vmatpush1.bf16.msra.mxu0 %v7464_v27  ;;  %5110 = vmatpush1.bf16.msra.mxu1 %v7469_v31 }
 0x17c   :  { %5048 = vmatprep.subr.bf16.mxu0 %v7471_v32  ;;  %5112 = vmatprep.subr.bf16.mxu1 %v7473_v36 }
 0x17f   :  { %5050 = vmatpush1.bf16.msra.mxu0 %v7476_v40  ;;  %5114 = vmatpush1.bf16.msra.mxu1 %v7480_v44 }
 0x180   :  { %5052 = vmatprep.subr.bf16.mxu0 %v7482_v45  ;;  %5116 = vmatprep.subr.bf16.mxu1 %v7485_v49 }
 0x183   :  { %5054 = vmatpush1.bf16.msra.mxu0 %v7488_v56  ;;  %5118 = vmatpush1.bf16.msra.mxu1 %v7492_v57 }
 0x184   :  { %5056 = vmatprep.subr.bf16.mxu0 %v7494_v58  ;;  %5120 = vmatprep.subr.bf16.mxu1 %v7497_v62 }
 0x187   :  { %5058 = vmatpush1.bf16.msra.mxu0 %v7500_v5  ;;  %5122 = vmatpush1.bf16.msra.mxu1 %v7504_v9 }
 0x188   :  { %5060 = vmatprep.subr.bf16.mxu0 %v7506_v10  ;;  %5124 = vmatprep.subr.bf16.mxu1 %v7509_v17 }
 0x18b   :  { %5062 = vmatpush1.bf16.msra.mxu0 %v7512_v26  ;;  %5126 = vmatpush1.bf16.msra.mxu1 %v7516_v28 }
 0x18c   :  { %5064 = vmatprep.subr.bf16.mxu0 %v7518_v29  ;;  %5128 = vmatprep.subr.bf16.mxu1 %v7521_v35 }
 0x18f   :  { %5066 = vmatpush1.bf16.msra.mxu0 %v7524_v43  ;;  %5130 = vmatpush1.bf16.msra.mxu1 %v7528_v46 }
 0x190   :  { %5068 = vmatprep.subr.bf16.mxu0 %v7530_v47  ;;  %5132 = vmatprep.subr.bf16.mxu1 %v7533_v52 }
 0x193   :  { %5070 = vmatpush1.bf16.msra.mxu0 %v7536_v61  ;;  %5134 = vmatpush1.bf16.msra.mxu1 %v7540_v63 }
 0x194   :  { %5072 = vmatprep.subr.bf16.mxu0 %v7542_v0  ;;  %5136 = vmatprep.subr.bf16.mxu1 %v7545_v11 }
 0x197   :  { %5074 = vmatpush1.bf16.msra.mxu0 %v7548_v24  ;;  %5138 = vmatpush1.bf16.msra.mxu1 %v7552_v25 }
 0x198   :  { %5076 = vmatprep.subr.bf16.mxu0 %v9501_v39  ;;  %5140 = vmatprep.subr.bf16.mxu1 %v9502_v2 }
 0x19b   :  { %5078 = vmatpush1.bf16.msra.mxu0 %v9503_v16  ;;  %5142 = vmatpush1.bf16.msra.mxu1 %v9504_v42 }
 0x19c   :  { %5080 = vmatprep.subr.bf16.mxu0 %v9505_v15  ;;  %5144 = vmatprep.subr.bf16.mxu1 %v9506_v48 }
 0x19f   :  { %5082 = vmatpush1.bf16.msra.mxu0 %v9507_v54  ;;  %5146 = vmatpush1.bf16.msra.mxu1 %v9508_v53 }
 0x1a0   :  { %5084 = vmatprep.subr.bf16.mxu0 %v9509_v7  ;;  %5148 = vmatprep.subr.bf16.mxu1 %v9510_v37 }
 0x1a3   :  { %5086 = vmatpush1.bf16.msra.mxu0 %v9511_v21  ;;  %5150 = vmatpush1.bf16.msra.mxu1 %v9512_v33 }
 0x1a4   :  { %5088 = vmatprep.subr.bf16.mxu0 %v9513_v30  ;;  %5152 = vmatprep.subr.bf16.mxu1 %v9514_v50  ;;  %v9524_v30 = vld [vmem:[#allocation40_spill] sm:$0xff]  ;;  %v9525_v50 = vld [vmem:[#allocation41_spill] sm:$0xff] }
 0x1a7   :  { %5090 = vmatpush1.bf16.msra.mxu0 %v9515_v55  ;;  %5154 = vmatpush1.bf16.msra.mxu1 %v9516_v38  ;;  %v9526_v55 = vld [vmem:[#allocation42_spill] sm:$0xff]  ;;  %v9527_v38 = vld [vmem:[#allocation43_spill] sm:$0xff] }
 0x1a8   :  { %5092 = vmatprep.subr.bf16.mxu0 %v9517_v51  ;;  %5156 = vmatprep.subr.bf16.mxu1 %v9518_v34  ;;  %v9528_v51 = vld [vmem:[#allocation44_spill] sm:$0xff]  ;;  %v9529_v34 = vld [vmem:[#allocation13_spill] sm:$0xff] }
 0x1ab   :  { %5094 = vmatpush1.bf16.msra.mxu0 %v9519_v6  ;;  %5158 = vmatpush1.bf16.msra.mxu1 %v9520_v8  ;;  %v9530_v6 = vld [vmem:[#allocation15_spill] sm:$0xff] }
 0x1ac   :  { %5096 = vmatprep.subr.bf16.mxu0 %v9521_v1  ;;  %5160 = vmatprep.subr.bf16.mxu1 %v9522_v20  ;;  %v571_v8 = vld [vmem:[#allocation2 + $0x1] ss:$8 sm:$0xf] }
 0x1ad   :  { %v573_v1 = vld [vmem:[#allocation3 + $0x1] ss:$8 sm:$0xf]  ;;  %v578_v20 = vrot.slane %v571_v8, %v7722_v12 }
 0x1af   :  { %5098 = vmatpush1.bf16.msra.mxu0 %v9523_v13  ;;  %5162 = vmatpush1.bf16.msra.mxu1 %v9524_v30  ;;  %v599_v13 = vrot.slane %v573_v1, %v7722_v12  ;;  %v582_v30 = vrot.slane %v571_v8, %v7725_v3 }
 0x1b0   :  { %5100 = vmatprep.subr.bf16.mxu0 %v9525_v50  ;;  %5164 = vmatprep.subr.bf16.mxu1 %v9526_v55  ;;  %v603_v50 = vrot.slane %v573_v1, %v7725_v3  ;;  %v590_v3 = vrot.slane %v571_v8, %v7731_v59 }
 0x1b1   :  { %v616_v55 = vsel %vm400_vm5, %v578_v20, %v599_v13  ;;  %v611_v13 = vrot.slane %v573_v1, %v7731_v59 }
 0x1b3   :  { %5102 = vmatpush1.bf16.msra.mxu0 %v9527_v38  ;;  %5166 = vmatpush1.bf16.msra.mxu1 %v9528_v51  ;;  %v586_v38 = vrot.slane %v571_v8, %v7728_v4  ;;  %v607_v51 = vrot.slane %v573_v1, %v7728_v4  ;;  %v619_v4 = vsel %vm400_vm5, %v590_v3, %v611_v13  ;;  %v9534_v1 = vld [vmem:[#allocation22_spill] sm:$0xff]  ;;  %v9535_v13 = vld [vmem:[#allocation23_spill] sm:$0xff] }
 0x1b4   :  { %5168 = vmatprep.subr.bf16.mxu0 %v9529_v34  ;;  %5232 = vmatprep.subr.bf16.mxu1 %v9530_v6  ;;  %v617_v6 = vsel %vm400_vm5, %v582_v30, %v603_v50 }
 0x1b5   :  { %v618_v12 = vsel %vm400_vm5, %v586_v38, %v607_v51 }
 0x249   :  { %v686_v33 = vpop.f32.mrb[2].mxu0  ;;  %v757_v34 = vpop.f32.mrb[2].mxu1 }
 0x24a   :  { %v687_v21 = vadd.f32 %v686_v33, %v616_v55  ;;  %v688_v37 = vpop.f32.mrb[3].mxu0  ;;  %v759_v7 = vpop.f32.mrb[3].mxu1  ;;  %v758_v20 = vadd.f32 %v757_v34, %v618_v12  ;;  %v9533_v34 = vld [vmem:[#allocation21_spill] sm:$0xff] }
 0x24b   :  { %v689_v53 = vadd.f32 %v688_v37, %v617_v6  ;;  %v760_v33 = vadd.f32 %v759_v7, %v619_v4 }
 0x24c   :  { %v762_v54 = vmul.f32 0.5, %v687_v21 }
 0x24d   :  { %v763_v48 = vmul.f32 0.5, %v689_v53  ;;  %v765_v55 = vmul.f32 0.5, %v760_v33  ;;  %v9537_v33 = vld [vmem:[#allocation25_spill] sm:$0xff] }
 0x24e   :  { %7142 = vtanh.f32 %v762_v54 }
 0x24f   :  { %7144 = vtanh.f32 %v763_v48 }
 0x250   :  { %7146 = vtanh.f32 %v758_v20  ;;  %v9536_v20 = vld [vmem:[#allocation24_spill] sm:$0xff] }
 0x251   :  { %7148 = vtanh.f32 %v765_v55  ;;  %v9538_v55 = vld [vmem:[#allocation27_spill] sm:$0xff] }
 0x258   :  { %v7143_v30 = vpop.eup %7142 }
 0x259   :  { %v7145_v50 = vpop.eup %7144  ;;  %v770_v15 = vmul.f32 0.5, %v7143_v30  ;;  %v9539_v30 = vld [vmem:[#allocation28_spill] sm:$0xff] }
 0x25a   :  { %v771_v37 = vmul.f32 0.5, %v7145_v50  ;;  %v7147_v38 = vpop.eup %7146  ;;  %v9540_v50 = vld [vmem:[#allocation29_spill] sm:$0xff] }
 0x25b   :  { %v774_v21 = vadd.f32 0.5, %v770_v15  ;;  %v7149_v12 = vpop.eup %7148 }
 0x25c   :  { %v775_v53 = vadd.f32 0.5, %v771_v37  ;;  %v773_v3 = vmul.f32 0.5, %v7149_v12  ;;  %v9541_v37 = vld [vmem:[#allocation30_spill] sm:$0xff]  ;;  %v9547_v12 = vld [vmem:[#allocation36_spill] sm:$0xff] }
 0x25d   :  { %v779_v51 = vmul.f32 %v7147_v38, %v774_v21  ;;  %v9542_v21 = vld [vmem:[#allocation31_spill] sm:$0xff]  ;;  %v9543_v38 = vld [vmem:[#allocation32_spill] sm:$0xff] }
 0x25e   :  { %v778_v6 = vmul.f32 %v775_v53, %v7761_v19  ;;  %v777_v48 = vadd.f32 0.5, %v773_v3  ;;  %v9532_v19 = vld [vmem:[#allocation20_spill] sm:$0xff]  ;;  %v9544_v53 = vld [vmem:[#allocation33_spill] sm:$0xff] }
 0x25f   :  { %v9548_v3 = vld [vmem:[#allocation37_spill] sm:$0xff] }
 0x260   :  { %v7847_v8 = vadd.f32 %v779_v51, %v778_v6  ;;  %v9545_v51 = vld [vmem:[#allocation34_spill] sm:$0xff]  ;;  %v9546_v6 = vld [vmem:[#allocation35_spill] sm:$0xff] }
 0x262   :  { %7150 = vtanh.f32 %v7847_v8 }
 0x26c   :  { %v7151_v4 = vpop.eup %7150 }
 0x26d   :  { %v7850_v54 = vmul.f32 %v7151_v4, %v777_v48  ;;  %v9549_v48 = vld [vmem:[#allocation38_spill] sm:$0xff]  ;;  %v9550_v4 = vld [vmem:[#allocation39_spill] sm:$0xff] }
 0x26f   :  { %9531 = vst [vmem:[#allocation16_spill] sm:$0xff] %v7850_v54  ;;  %v784_v7 = vmul.f32 %v9500_v41, %v7850_v54  ;;  %v783_v15 = vmul.f32 %v7587_v60, %v7850_v54 }
 0x271   :  { %899 = vmatprep.mubr.f32.mxu0 %v784_v7  ;;  %970 = vmatprep.mubr.f32.mxu1 %v784_v7  ;;  %v9551_v7 = vld [vmem:[#allocation40_spill] sm:$0xff] }
 0x272   :  { %900 = vmatmul.mubr.f32.vlgmr.msra.gmra.mrb[4].mxu0 %v783_v15  ;;  %971 = vmatmul.mubr.f32.vlgmr.msra.gmra.mrb[4].mxu1 %v783_v15  ;;  %v9552_v15 = vld [vmem:[#allocation41_spill] sm:$0xff] }
 0x273   :  { %5170 = vmatpush1.bf16.msra.mxu0 %v7451_v14  ;;  %5234 = vmatpush1.bf16.msra.mxu1 %v7454_v18 }
 0x274   :  { %5172 = vmatprep.subr.bf16.mxu0 %v7459_v22  ;;  %5236 = vmatprep.subr.bf16.mxu1 %v7461_v23 }
 0x277   :  { %5174 = vmatpush1.bf16.msra.mxu0 %v7464_v27  ;;  %5238 = vmatpush1.bf16.msra.mxu1 %v7469_v31 }
 0x278   :  { %5176 = vmatprep.subr.bf16.mxu0 %v7471_v32  ;;  %5240 = vmatprep.subr.bf16.mxu1 %v7473_v36 }
 0x27b   :  { %5178 = vmatpush1.bf16.msra.mxu0 %v7476_v40  ;;  %5242 = vmatpush1.bf16.msra.mxu1 %v7480_v44 }
 0x27c   :  { %5180 = vmatprep.subr.bf16.mxu0 %v7482_v45  ;;  %5244 = vmatprep.subr.bf16.mxu1 %v7485_v49 }
 0x27f   :  { %5182 = vmatpush1.bf16.msra.mxu0 %v7488_v56  ;;  %5246 = vmatpush1.bf16.msra.mxu1 %v7492_v57 }
 0x280   :  { %5184 = vmatprep.subr.bf16.mxu0 %v7494_v58  ;;  %5248 = vmatprep.subr.bf16.mxu1 %v7497_v62 }
 0x283   :  { %5186 = vmatpush1.bf16.msra.mxu0 %v7500_v5  ;;  %5250 = vmatpush1.bf16.msra.mxu1 %v7504_v9 }
 0x284   :  { %5188 = vmatprep.subr.bf16.mxu0 %v7506_v10  ;;  %5252 = vmatprep.subr.bf16.mxu1 %v7509_v17 }
 0x287   :  { %5190 = vmatpush1.bf16.msra.mxu0 %v7512_v26  ;;  %5254 = vmatpush1.bf16.msra.mxu1 %v7516_v28 }
 0x288   :  { %5192 = vmatprep.subr.bf16.mxu0 %v7518_v29  ;;  %5256 = vmatprep.subr.bf16.mxu1 %v7521_v35 }
 0x28b   :  { %5194 = vmatpush1.bf16.msra.mxu0 %v7524_v43  ;;  %5258 = vmatpush1.bf16.msra.mxu1 %v7528_v46 }
 0x28c   :  { %5196 = vmatprep.subr.bf16.mxu0 %v7530_v47  ;;  %5260 = vmatprep.subr.bf16.mxu1 %v7533_v52 }
 0x28f   :  { %5198 = vmatpush1.bf16.msra.mxu0 %v7536_v61  ;;  %5262 = vmatpush1.bf16.msra.mxu1 %v7540_v63 }
 0x290   :  { %5200 = vmatprep.subr.bf16.mxu0 %v7542_v0  ;;  %5264 = vmatprep.subr.bf16.mxu1 %v7545_v11 }
 0x293   :  { %5202 = vmatpush1.bf16.msra.mxu0 %v7548_v24  ;;  %5266 = vmatpush1.bf16.msra.mxu1 %v7552_v25 }
 0x294   :  { %5204 = vmatprep.subr.bf16.mxu0 %v9501_v39  ;;  %5268 = vmatprep.subr.bf16.mxu1 %v9502_v2 }
 0x297   :  { %5206 = vmatpush1.bf16.msra.mxu0 %v9503_v16  ;;  %5270 = vmatpush1.bf16.msra.mxu1 %v9504_v42 }
 0x298   :  { %5208 = vmatprep.subr.bf16.mxu0 %v9532_v19  ;;  %5272 = vmatprep.subr.bf16.mxu1 %v9533_v34 }
 0x29b   :  { %5210 = vmatpush1.bf16.msra.mxu0 %v9534_v1  ;;  %5274 = vmatpush1.bf16.msra.mxu1 %v9535_v13 }
 0x29c   :  { %5212 = vmatprep.subr.bf16.mxu0 %v9536_v20  ;;  %5276 = vmatprep.subr.bf16.mxu1 %v9537_v33 }
 0x29f   :  { %5214 = vmatpush1.bf16.msra.mxu0 %v9538_v55  ;;  %5278 = vmatpush1.bf16.msra.mxu1 %v9539_v30 }
 0x2a0   :  { %5216 = vmatprep.subr.bf16.mxu0 %v9540_v50  ;;  %5280 = vmatprep.subr.bf16.mxu1 %v9541_v37  ;;  %v9558_v37 = vld [vmem:[#allocation11_spill] sm:$0xff]  ;;  %v9559_v50 = vld [vmem:[#allocation46_spill] sm:$0xff] }
 0x2a3   :  { %5218 = vmatpush1.bf16.msra.mxu0 %v9542_v21  ;;  %5282 = vmatpush1.bf16.msra.mxu1 %v9543_v38  ;;  %v9553_v21 = vld [vmem:[#allocation42_spill] sm:$0xff]  ;;  %v9554_v38 = vld [vmem:[#allocation43_spill] sm:$0xff] }
 0x2a4   :  { %5220 = vmatprep.subr.bf16.mxu0 %v9544_v53  ;;  %5284 = vmatprep.subr.bf16.mxu1 %v9545_v51  ;;  %v9555_v53 = vld [vmem:[#allocation44_spill] sm:$0xff]  ;;  %v9556_v51 = vld [vmem:[#allocation13_spill] sm:$0xff] }
 0x2a7   :  { %5222 = vmatpush1.bf16.msra.mxu0 %v9546_v6  ;;  %5286 = vmatpush1.bf16.msra.mxu1 %v9547_v12  ;;  %v9557_v6 = vld [vmem:[#allocation15_spill] sm:$0xff] }
 0x2a8   :  { %5224 = vmatprep.subr.bf16.mxu0 %v9548_v3  ;;  %5288 = vmatprep.subr.bf16.mxu1 %v9549_v48  ;;  %v786_v12 = vld [vmem:[#allocation2 + $0x2] ss:$8 sm:$0xf] }
 0x2a9   :  { %v788_v3 = vld [vmem:[#allocation3 + $0x2] ss:$8 sm:$0xf]  ;;  %v793_v48 = vrot.slane %v786_v12, %v9558_v37 }
 0x2ab   :  { %5226 = vmatpush1.bf16.msra.mxu0 %v9550_v4  ;;  %5290 = vmatpush1.bf16.msra.mxu1 %v9551_v7  ;;  %v814_v4 = vrot.slane %v788_v3, %v9558_v37  ;;  %v797_v7 = vrot.slane %v786_v12, %v9559_v50 }
 0x2ac   :  { %5228 = vmatprep.subr.bf16.mxu0 %v9552_v15  ;;  %5292 = vmatprep.subr.bf16.mxu1 %v9553_v21  ;;  %v818_v15 = vrot.slane %v788_v3, %v9559_v50  ;;  %v805_v50 = vrot.slane %v786_v12, %v7731_v59 }
 0x2ad   :  { %v831_v21 = vsel %vm400_vm5, %v793_v48, %v814_v4  ;;  %v826_v48 = vrot.slane %v788_v3, %v7731_v59 }
 0x2af   :  { %5230 = vmatpush1.bf16.msra.mxu0 %v9554_v38  ;;  %5294 = vmatpush1.bf16.msra.mxu1 %v9555_v53  ;;  %v9560_v38 = vld [vmem:[#allocation47_spill] sm:$0xff] }
 0x2b0   :  { %5296 = vmatprep.subr.bf16.mxu0 %v9556_v51  ;;  %5360 = vmatprep.subr.bf16.mxu1 %v9557_v6  ;;  %v801_v55 = vrot.slane %v786_v12, %v9560_v38  ;;  %v822_v53 = vrot.slane %v788_v3, %v9560_v38  ;;  %v832_v6 = vsel %vm400_vm5, %v797_v7, %v818_v15 }
 0x2b1   :  { %v834_v38 = vsel %vm400_vm5, %v805_v50, %v826_v48 }
 0x2b2   :  { %v833_v37 = vsel %vm400_vm5, %v801_v55, %v822_v53 }
 0x345   :  { %v901_v30 = vpop.f32.mrb[4].mxu0  ;;  %v972_v51 = vpop.f32.mrb[4].mxu1 }
 0x346   :  { %v902_v33 = vadd.f32 %v901_v30, %v831_v21  ;;  %v903_v20 = vpop.f32.mrb[5].mxu0  ;;  %v974_v13 = vpop.f32.mrb[5].mxu1  ;;  %v973_v4 = vadd.f32 %v972_v51, %v833_v37  ;;  %v2074_v37 = vrot.slane %v7850_v54, 7  ;;  %v9562_v51 = vld [vmem:[#allocation49_spill] sm:$0xff] }
 0x347   :  { %v904_v1 = vadd.f32 %v903_v20, %v832_v6  ;;  %v975_v30 = vadd.f32 %v974_v13, %v834_v38 }
 0x348   :  { %v977_v34 = vmul.f32 0.5, %v902_v33 }
 0x349   :  { %v978_v19 = vmul.f32 0.5, %v904_v1  ;;  %v980_v21 = vmul.f32 0.5, %v975_v30 }
 0x34a   :  { %7152 = vtanh.f32 %v977_v34 }
 0x34b   :  { %7154 = vtanh.f32 %v978_v19 }
 0x34c   :  { %7156 = vtanh.f32 %v973_v4  ;;  %v2094_v4 = vsel %vm400_vm5, %v9562_v51, %v2074_v37  ;;  %v9573_v37 = vld [vmem:[#allocation30_spill] sm:$0xff] }
 0x34d   :  { %7158 = vtanh.f32 %v980_v21 }
 0x354   :  { %v7153_v7 = vpop.eup %7152 }
 0x355   :  { %v7155_v15 = vpop.eup %7154  ;;  %v985_v42 = vmul.f32 0.5, %v7153_v7 }
 0x356   :  { %v986_v20 = vmul.f32 0.5, %v7155_v15  ;;  %v7157_v55 = vpop.eup %7156 }
 0x357   :  { %v989_v33 = vadd.f32 0.5, %v985_v42  ;;  %v7159_v19 = vpop.eup %7158  ;;  %v9338_v42 = vrot.slane %v9562_v51, 1  ;;  %v9581_v51 = vld [vmem:[#allocation38_spill] sm:$0xff] }
 0x358   :  { %v990_v1 = vadd.f32 0.5, %v986_v20  ;;  %v988_v34 = vmul.f32 0.5, %v7159_v19  ;;  %v9563_v20 = vld [vmem:[#allocation19_spill] sm:$0xff]  ;;  %v9569_v19 = vld [vmem:[#allocation25_spill] sm:$0xff] }
 0x359   :  { %v994_v53 = vmul.f32 %v7157_v55, %v989_v33  ;;  %v2156_v7 = vsel %vm400_vm5, %v9338_v42, %v7850_v54  ;;  %v9564_v33 = vld [vmem:[#allocation20_spill] sm:$0xff]  ;;  %v9565_v55 = vld [vmem:[#allocation21_spill] sm:$0xff]  ;;  %v9582_v54 = vld [vmem:[#allocation39_spill] sm:$0xff] }
 0x35a   :  { %v993_v6 = vmul.f32 %v990_v1, %v7847_v8  ;;  %v992_v50 = vadd.f32 0.5, %v988_v34  ;;  %v9566_v1 = vld [vmem:[#allocation22_spill] sm:$0xff]  ;;  %v9570_v34 = vld [vmem:[#allocation27_spill] sm:$0xff]  ;;  %v9580_v42 = vld [vmem:[#allocation37_spill] sm:$0xff] }
 0x35c   :  { %v7933_v12 = vadd.f32 %v994_v53, %v993_v6  ;;  %v9567_v53 = vld [vmem:[#allocation23_spill] sm:$0xff]  ;;  %v9568_v6 = vld [vmem:[#allocation24_spill] sm:$0xff] }
 0x35e   :  { %7160 = vtanh.f32 %v7933_v12 }
 0x368   :  { %v7161_v13 = vpop.eup %7160 }
 0x369   :  { %v7937_v38 = vmul.f32 %v7161_v13, %v992_v50  ;;  %v9571_v50 = vld [vmem:[#allocation28_spill] sm:$0xff]  ;;  %v9572_v13 = vld [vmem:[#allocation29_spill] sm:$0xff] }
 0x36b   :  { %9561 = vst [vmem:[#allocation17_spill] sm:$0xff] %v7937_v38  ;;  %v999_v3 = vmul.f32 %v9500_v41, %v7937_v38  ;;  %v998_v8 = vmul.f32 %v7587_v60, %v7937_v38  ;;  %v2077_v48 = vrot.slane %v7937_v38, 6  ;;  %v2146_v30 = vrot.slane %v7937_v38, 7  ;;  %v9583_v38 = vld [vmem:[#allocation40_spill] sm:$0xff] }
 0x36d   :  { %1114 = vmatprep.mubr.f32.mxu0 %v999_v3  ;;  %1185 = vmatprep.mubr.f32.mxu1 %v999_v3  ;;  %v7949_v21 = vsel %vm2095_vm6, %v2094_v4, %v2077_v48  ;;  %v7956_v15 = vsel %vm2095_vm6, %v2156_v7, %v2146_v30  ;;  %v9574_v3 = vld [vmem:[#allocation31_spill] sm:$0xff]  ;;  %v9576_v48 = vld [vmem:[#allocation33_spill] sm:$0xff]  ;;  %v9577_v4 = vld [vmem:[#allocation34_spill] sm:$0xff] }
 0x36e   :  { %1115 = vmatmul.mubr.f32.vlgmr.msra.gmra.mrb[6].mxu0 %v998_v8  ;;  %1186 = vmatmul.mubr.f32.vlgmr.msra.gmra.mrb[6].mxu1 %v998_v8  ;;  %v9575_v8 = vld [vmem:[#allocation32_spill] sm:$0xff]  ;;  %v9578_v30 = vld [vmem:[#allocation35_spill] sm:$0xff] }
 0x36f   :  { %5298 = vmatpush1.bf16.msra.mxu0 %v7451_v14  ;;  %5362 = vmatpush1.bf16.msra.mxu1 %v7454_v18  ;;  %v9579_v7 = vld [vmem:[#allocation36_spill] sm:$0xff] }
 0x370   :  { %5300 = vmatprep.subr.bf16.mxu0 %v7459_v22  ;;  %5364 = vmatprep.subr.bf16.mxu1 %v7461_v23 }
 0x373   :  { %5302 = vmatpush1.bf16.msra.mxu0 %v7464_v27  ;;  %5366 = vmatpush1.bf16.msra.mxu1 %v7469_v31 }
 0x374   :  { %5304 = vmatprep.subr.bf16.mxu0 %v7471_v32  ;;  %5368 = vmatprep.subr.bf16.mxu1 %v7473_v36 }
 0x377   :  { %5306 = vmatpush1.bf16.msra.mxu0 %v7476_v40  ;;  %5370 = vmatpush1.bf16.msra.mxu1 %v7480_v44 }
 0x378   :  { %5308 = vmatprep.subr.bf16.mxu0 %v7482_v45  ;;  %5372 = vmatprep.subr.bf16.mxu1 %v7485_v49 }
 0x37b   :  { %5310 = vmatpush1.bf16.msra.mxu0 %v7488_v56  ;;  %5374 = vmatpush1.bf16.msra.mxu1 %v7492_v57 }
 0x37c   :  { %5312 = vmatprep.subr.bf16.mxu0 %v7494_v58  ;;  %5376 = vmatprep.subr.bf16.mxu1 %v7497_v62 }
 0x37f   :  { %5314 = vmatpush1.bf16.msra.mxu0 %v7500_v5  ;;  %5378 = vmatpush1.bf16.msra.mxu1 %v7504_v9 }
 0x380   :  { %5316 = vmatprep.subr.bf16.mxu0 %v7506_v10  ;;  %5380 = vmatprep.subr.bf16.mxu1 %v7509_v17 }
 0x383   :  { %5318 = vmatpush1.bf16.msra.mxu0 %v7512_v26  ;;  %5382 = vmatpush1.bf16.msra.mxu1 %v7516_v28 }
 0x384   :  { %5320 = vmatprep.subr.bf16.mxu0 %v7518_v29  ;;  %5384 = vmatprep.subr.bf16.mxu1 %v7521_v35 }
 0x387   :  { %5322 = vmatpush1.bf16.msra.mxu0 %v7524_v43  ;;  %5386 = vmatpush1.bf16.msra.mxu1 %v7528_v46 }
 0x388   :  { %5324 = vmatprep.subr.bf16.mxu0 %v7530_v47  ;;  %5388 = vmatprep.subr.bf16.mxu1 %v7533_v52 }
 0x38b   :  { %5326 = vmatpush1.bf16.msra.mxu0 %v7536_v61  ;;  %5390 = vmatpush1.bf16.msra.mxu1 %v7540_v63 }
 0x38c   :  { %5328 = vmatprep.subr.bf16.mxu0 %v7542_v0  ;;  %5392 = vmatprep.subr.bf16.mxu1 %v7545_v11 }
 0x38f   :  { %5330 = vmatpush1.bf16.msra.mxu0 %v7548_v24  ;;  %5394 = vmatpush1.bf16.msra.mxu1 %v7552_v25 }
 0x390   :  { %5332 = vmatprep.subr.bf16.mxu0 %v9501_v39  ;;  %5396 = vmatprep.subr.bf16.mxu1 %v9502_v2 }
 0x393   :  { %5334 = vmatpush1.bf16.msra.mxu0 %v9503_v16  ;;  %5398 = vmatpush1.bf16.msra.mxu1 %v9563_v20 }
 0x394   :  { %5336 = vmatprep.subr.bf16.mxu0 %v9564_v33  ;;  %5400 = vmatprep.subr.bf16.mxu1 %v9565_v55 }
 0x397   :  { %5338 = vmatpush1.bf16.msra.mxu0 %v9566_v1  ;;  %5402 = vmatpush1.bf16.msra.mxu1 %v9567_v53 }
 0x398   :  { %5340 = vmatprep.subr.bf16.mxu0 %v9568_v6  ;;  %5404 = vmatprep.subr.bf16.mxu1 %v9569_v19 }
 0x39b   :  { %5342 = vmatpush1.bf16.msra.mxu0 %v9570_v34  ;;  %5406 = vmatpush1.bf16.msra.mxu1 %v9571_v50  ;;  %v9591_v50 = vld [vmem:[#allocation46_spill] sm:$0xff] }
 0x39c   :  { %5344 = vmatprep.subr.bf16.mxu0 %v9572_v13  ;;  %5408 = vmatprep.subr.bf16.mxu1 %v9573_v37  ;;  %v9584_v37 = vld [vmem:[#allocation41_spill] sm:$0xff]  ;;  %v9590_v13 = vld [vmem:[#allocation11_spill] sm:$0xff] }
 0x39f   :  { %5346 = vmatpush1.bf16.msra.mxu0 %v9574_v3  ;;  %5410 = vmatpush1.bf16.msra.mxu1 %v9575_v8  ;;  %v9585_v3 = vld [vmem:[#allocation42_spill] sm:$0xff]  ;;  %v9586_v8 = vld [vmem:[#allocation43_spill] sm:$0xff] }
 0x3a0   :  { %5348 = vmatprep.subr.bf16.mxu0 %v9576_v48  ;;  %5412 = vmatprep.subr.bf16.mxu1 %v9577_v4  ;;  %v9587_v48 = vld [vmem:[#allocation44_spill] sm:$0xff]  ;;  %v9588_v4 = vld [vmem:[#allocation13_spill] sm:$0xff] }
 0x3a3   :  { %5350 = vmatpush1.bf16.msra.mxu0 %v9578_v30  ;;  %5414 = vmatpush1.bf16.msra.mxu1 %v9579_v7  ;;  %v9589_v30 = vld [vmem:[#allocation15_spill] sm:$0xff] }
 0x3a4   :  { %5352 = vmatprep.subr.bf16.mxu0 %v9580_v42  ;;  %5416 = vmatprep.subr.bf16.mxu1 %v9581_v51  ;;  %v1001_v7 = vld [vmem:[#allocation2 + $0x3] ss:$8 sm:$0xf] }
 0x3a5   :  { %v1003_v42 = vld [vmem:[#allocation3 + $0x3] ss:$8 sm:$0xf]  ;;  %v1008_v51 = vrot.slane %v1001_v7, %v9590_v13 }
 0x3a7   :  { %5354 = vmatpush1.bf16.msra.mxu0 %v9582_v54  ;;  %5418 = vmatpush1.bf16.msra.mxu1 %v9583_v38  ;;  %v1029_v54 = vrot.slane %v1003_v42, %v9590_v13  ;;  %v1012_v38 = vrot.slane %v1001_v7, %v9591_v50 }
 0x3a8   :  { %5356 = vmatprep.subr.bf16.mxu0 %v9584_v37  ;;  %5420 = vmatprep.subr.bf16.mxu1 %v9585_v3  ;;  %v1033_v37 = vrot.slane %v1003_v42, %v9591_v50  ;;  %v1020_v50 = vrot.slane %v1001_v7, %v7731_v59 }
 0x3a9   :  { %v1046_v3 = vsel %vm400_vm5, %v1008_v51, %v1029_v54  ;;  %v1041_v54 = vrot.slane %v1003_v42, %v7731_v59 }
 0x3ab   :  { %5358 = vmatpush1.bf16.msra.mxu0 %v9586_v8  ;;  %5422 = vmatpush1.bf16.msra.mxu1 %v9587_v48  ;;  %v9592_v8 = vld [vmem:[#allocation47_spill] sm:$0xff] }
 0x3ac   :  { %5424 = vmatprep.subr.bf16.mxu0 %v9588_v4  ;;  %5488 = vmatprep.subr.bf16.mxu1 %v9589_v30  ;;  %v1016_v19 = vrot.slane %v1001_v7, %v9592_v8  ;;  %v1037_v48 = vrot.slane %v1003_v42, %v9592_v8  ;;  %v1047_v30 = vsel %vm400_vm5, %v1012_v38, %v1033_v37 }
 0x3ad   :  { %v1049_v8 = vsel %vm400_vm5, %v1020_v50, %v1041_v54 }
 0x3ae   :  { %v1048_v13 = vsel %vm400_vm5, %v1016_v19, %v1037_v48 }
 0x441   :  { %v1116_v34 = vpop.f32.mrb[6].mxu0  ;;  %v1187_v4 = vpop.f32.mrb[6].mxu1 }
 0x442   :  { %v1117_v6 = vadd.f32 %v1116_v34, %v1046_v3  ;;  %v1118_v53 = vpop.f32.mrb[7].mxu0  ;;  %v1189_v1 = vpop.f32.mrb[7].mxu1  ;;  %v1188_v51 = vadd.f32 %v1187_v4, %v1048_v13 }
 0x443   :  { %v1119_v55 = vadd.f32 %v1118_v53, %v1047_v30  ;;  %v1190_v34 = vadd.f32 %v1189_v1, %v1049_v8 }
 0x444   :  { %v1192_v33 = vmul.f32 0.5, %v1117_v6 }
 0x445   :  { %v1193_v20 = vmul.f32 0.5, %v1119_v55  ;;  %v1195_v3 = vmul.f32 0.5, %v1190_v34  ;;  %v9597_v34 = vld [vmem:[#allocation21_spill] sm:$0xff] }
 0x446   :  { %7162 = vtanh.f32 %v1192_v33 }
 0x447   :  { %7164 = vtanh.f32 %v1193_v20 }
 0x448   :  { %7166 = vtanh.f32 %v1188_v51  ;;  %v9596_v51 = vld [vmem:[#allocation20_spill] sm:$0xff] }
 0x449   :  { %7168 = vtanh.f32 %v1195_v3  ;;  %v9598_v3 = vld [vmem:[#allocation22_spill] sm:$0xff] }
 0x450   :  { %v7163_v38 = vpop.eup %7162 }
 0x451   :  { %v7165_v37 = vpop.eup %7164  ;;  %v1200_v16 = vmul.f32 0.5, %v7163_v38  ;;  %v9599_v38 = vld [vmem:[#allocation23_spill] sm:$0xff] }
 0x452   :  { %v1201_v53 = vmul.f32 0.5, %v7165_v37  ;;  %v7167_v19 = vpop.eup %7166  ;;  %v9600_v37 = vld [vmem:[#allocation24_spill] sm:$0xff] }
 0x453   :  { %v1204_v6 = vadd.f32 0.5, %v1200_v16  ;;  %v7169_v20 = vpop.eup %7168 }
 0x454   :  { %v1205_v55 = vadd.f32 0.5, %v1201_v53  ;;  %v1203_v33 = vmul.f32 0.5, %v7169_v20  ;;  %v9601_v53 = vld [vmem:[#allocation25_spill] sm:$0xff]  ;;  %v9607_v20 = vld [vmem:[#allocation32_spill] sm:$0xff] }
 0x455   :  { %v1209_v48 = vmul.f32 %v7167_v19, %v1204_v6  ;;  %v9602_v6 = vld [vmem:[#allocation27_spill] sm:$0xff]  ;;  %v9603_v19 = vld [vmem:[#allocation28_spill] sm:$0xff] }
 0x456   :  { %v1208_v30 = vmul.f32 %v1205_v55, %v7933_v12  ;;  %v1207_v50 = vadd.f32 0.5, %v1203_v33  ;;  %v9604_v55 = vld [vmem:[#allocation29_spill] sm:$0xff] }
 0x457   :  { %v9608_v33 = vld [vmem:[#allocation33_spill] sm:$0xff] }
 0x458   :  { %v8035_v42 = vadd.f32 %v1209_v48, %v1208_v30  ;;  %v9605_v48 = vld [vmem:[#allocation30_spill] sm:$0xff]  ;;  %v9606_v30 = vld [vmem:[#allocation31_spill] sm:$0xff] }
 0x45a   :  { %7170 = vtanh.f32 %v8035_v42 }
 0x464   :  { %v7171_v1 = vpop.eup %7170 }
 0x465   :  { %v8038_v13 = vmul.f32 %v7171_v1, %v1207_v50  ;;  %v9609_v50 = vld [vmem:[#allocation34_spill] sm:$0xff]  ;;  %v9610_v1 = vld [vmem:[#allocation35_spill] sm:$0xff] }
 0x467   :  { %9593 = vst [vmem:[#allocation50_spill] sm:$0xff] %v8038_v13  ;;  %v1214_v8 = vmul.f32 %v9500_v41, %v8038_v13  ;;  %v1213_v16 = vmul.f32 %v7587_v60, %v8038_v13  ;;  %v9348_v4 = vrot.slane %v8038_v13, 5  ;;  %v2148_v12 = vrot.slane %v8038_v13, 6  ;;  %v9615_v13 = vld [vmem:[#allocation40_spill] sm:$0xff] }
 0x469   :  { %1329 = vmatprep.mubr.f32.mxu0 %v1214_v8  ;;  %1400 = vmatprep.mubr.f32.mxu1 %v1214_v8  ;;  %v8050_v7 = vsel %vm2097_vm7, %v7949_v21, %v9348_v4  ;;  %v8054_v54 = vsel %vm2097_vm7, %v7956_v15, %v2148_v12  ;;  %v9594_v21 = vld [vmem:[#allocation18_spill] sm:$0xff]  ;;  %v9595_v15 = vld [vmem:[#allocation19_spill] sm:$0xff]  ;;  %v9611_v8 = vld [vmem:[#allocation36_spill] sm:$0xff] }
 0x46a   :  { %1330 = vmatmul.mubr.f32.vlgmr.msra.gmra.mrb[8].mxu0 %v1213_v16  ;;  %1401 = vmatmul.mubr.f32.vlgmr.msra.gmra.mrb[8].mxu1 %v1213_v16  ;;  %v9612_v16 = vld [vmem:[#allocation37_spill] sm:$0xff]  ;;  %v9613_v12 = vld [vmem:[#allocation38_spill] sm:$0xff]  ;;  %v9614_v4 = vld [vmem:[#allocation39_spill] sm:$0xff] }
 0x46b   :  { %5426 = vmatpush1.bf16.msra.mxu0 %v7451_v14  ;;  %5490 = vmatpush1.bf16.msra.mxu1 %v7454_v18 }
 0x46c   :  { %5428 = vmatprep.subr.bf16.mxu0 %v7459_v22  ;;  %5492 = vmatprep.subr.bf16.mxu1 %v7461_v23 }
 0x46f   :  { %5430 = vmatpush1.bf16.msra.mxu0 %v7464_v27  ;;  %5494 = vmatpush1.bf16.msra.mxu1 %v7469_v31 }
 0x470   :  { %5432 = vmatprep.subr.bf16.mxu0 %v7471_v32  ;;  %5496 = vmatprep.subr.bf16.mxu1 %v7473_v36 }
 0x473   :  { %5434 = vmatpush1.bf16.msra.mxu0 %v7476_v40  ;;  %5498 = vmatpush1.bf16.msra.mxu1 %v7480_v44 }
 0x474   :  { %5436 = vmatprep.subr.bf16.mxu0 %v7482_v45  ;;  %5500 = vmatprep.subr.bf16.mxu1 %v7485_v49 }
 0x477   :  { %5438 = vmatpush1.bf16.msra.mxu0 %v7488_v56  ;;  %5502 = vmatpush1.bf16.msra.mxu1 %v7492_v57 }
 0x478   :  { %5440 = vmatprep.subr.bf16.mxu0 %v7494_v58  ;;  %5504 = vmatprep.subr.bf16.mxu1 %v7497_v62 }
 0x47b   :  { %5442 = vmatpush1.bf16.msra.mxu0 %v7500_v5  ;;  %5506 = vmatpush1.bf16.msra.mxu1 %v7504_v9 }
 0x47c   :  { %5444 = vmatprep.subr.bf16.mxu0 %v7506_v10  ;;  %5508 = vmatprep.subr.bf16.mxu1 %v7509_v17 }
 0x47f   :  { %5446 = vmatpush1.bf16.msra.mxu0 %v7512_v26  ;;  %5510 = vmatpush1.bf16.msra.mxu1 %v7516_v28 }
 0x480   :  { %5448 = vmatprep.subr.bf16.mxu0 %v7518_v29  ;;  %5512 = vmatprep.subr.bf16.mxu1 %v7521_v35 }
 0x483   :  { %5450 = vmatpush1.bf16.msra.mxu0 %v7524_v43  ;;  %5514 = vmatpush1.bf16.msra.mxu1 %v7528_v46 }
 0x484   :  { %5452 = vmatprep.subr.bf16.mxu0 %v7530_v47  ;;  %5516 = vmatprep.subr.bf16.mxu1 %v7533_v52 }
 0x487   :  { %5454 = vmatpush1.bf16.msra.mxu0 %v7536_v61  ;;  %5518 = vmatpush1.bf16.msra.mxu1 %v7540_v63 }
 0x488   :  { %5456 = vmatprep.subr.bf16.mxu0 %v7542_v0  ;;  %5520 = vmatprep.subr.bf16.mxu1 %v7545_v11 }
 0x48b   :  { %5458 = vmatpush1.bf16.msra.mxu0 %v7548_v24  ;;  %5522 = vmatpush1.bf16.msra.mxu1 %v7552_v25 }
 0x48c   :  { %5460 = vmatprep.subr.bf16.mxu0 %v9501_v39  ;;  %5524 = vmatprep.subr.bf16.mxu1 %v9502_v2 }
 0x48f   :  { %5462 = vmatpush1.bf16.msra.mxu0 %v9594_v21  ;;  %5526 = vmatpush1.bf16.msra.mxu1 %v9595_v15 }
 0x490   :  { %5464 = vmatprep.subr.bf16.mxu0 %v9596_v51  ;;  %5528 = vmatprep.subr.bf16.mxu1 %v9597_v34 }
 0x493   :  { %5466 = vmatpush1.bf16.msra.mxu0 %v9598_v3  ;;  %5530 = vmatpush1.bf16.msra.mxu1 %v9599_v38 }
 0x494   :  { %5468 = vmatprep.subr.bf16.mxu0 %v9600_v37  ;;  %5532 = vmatprep.subr.bf16.mxu1 %v9601_v53 }
 0x497   :  { %5470 = vmatpush1.bf16.msra.mxu0 %v9602_v6  ;;  %5534 = vmatpush1.bf16.msra.mxu1 %v9603_v19  ;;  %v9623_v19 = vld [vmem:[#allocation46_spill] sm:$0xff] }
 0x498   :  { %5472 = vmatprep.subr.bf16.mxu0 %v9604_v55  ;;  %5536 = vmatprep.subr.bf16.mxu1 %v9605_v48  ;;  %v9616_v48 = vld [vmem:[#allocation41_spill] sm:$0xff]  ;;  %v9622_v55 = vld [vmem:[#allocation11_spill] sm:$0xff] }
 0x49b   :  { %5474 = vmatpush1.bf16.msra.mxu0 %v9606_v30  ;;  %5538 = vmatpush1.bf16.msra.mxu1 %v9607_v20  ;;  %v9617_v30 = vld [vmem:[#allocation42_spill] sm:$0xff]  ;;  %v9618_v20 = vld [vmem:[#allocation43_spill] sm:$0xff] }
 0x49c   :  { %5476 = vmatprep.subr.bf16.mxu0 %v9608_v33  ;;  %5540 = vmatprep.subr.bf16.mxu1 %v9609_v50  ;;  %v9619_v33 = vld [vmem:[#allocation44_spill] sm:$0xff]  ;;  %v9620_v50 = vld [vmem:[#allocation13_spill] sm:$0xff] }
 0x49f   :  { %5478 = vmatpush1.bf16.msra.mxu0 %v9610_v1  ;;  %5542 = vmatpush1.bf16.msra.mxu1 %v9611_v8  ;;  %v9621_v1 = vld [vmem:[#allocation15_spill] sm:$0xff] }
 0x4a0   :  { %5480 = vmatprep.subr.bf16.mxu0 %v9612_v16  ;;  %5544 = vmatprep.subr.bf16.mxu1 %v9613_v12  ;;  %v1216_v8 = vld [vmem:[#allocation2 + $0x4] ss:$8 sm:$0xf] }
 0x4a1   :  { %v1218_v16 = vld [vmem:[#allocation3 + $0x4] ss:$8 sm:$0xf]  ;;  %v1223_v12 = vrot.slane %v1216_v8, %v9622_v55 }
 0x4a3   :  { %5482 = vmatpush1.bf16.msra.mxu0 %v9614_v4  ;;  %5546 = vmatpush1.bf16.msra.mxu1 %v9615_v13  ;;  %v1244_v4 = vrot.slane %v1218_v16, %v9622_v55  ;;  %v1227_v13 = vrot.slane %v1216_v8, %v9623_v19 }
 0x4a4   :  { %5484 = vmatprep.subr.bf16.mxu0 %v9616_v48  ;;  %5548 = vmatprep.subr.bf16.mxu1 %v9617_v30  ;;  %v1248_v48 = vrot.slane %v1218_v16, %v9623_v19  ;;  %v1235_v19 = vrot.slane %v1216_v8, %v7731_v59 }
 0x4a5   :  { %v1261_v30 = vsel %vm400_vm5, %v1223_v12, %v1244_v4  ;;  %v1256_v4 = vrot.slane %v1218_v16, %v7731_v59 }
 0x4a7   :  { %5486 = vmatpush1.bf16.msra.mxu0 %v9618_v20  ;;  %5550 = vmatpush1.bf16.msra.mxu1 %v9619_v33  ;;  %v9624_v20 = vld [vmem:[#allocation47_spill] sm:$0xff] }
 0x4a8   :  { %5552 = vmatprep.subr.bf16.mxu0 %v9620_v50  ;;  %5616 = vmatprep.subr.bf16.mxu1 %v9621_v1  ;;  %v1231_v53 = vrot.slane %v1216_v8, %v9624_v20  ;;  %v1252_v33 = vrot.slane %v1218_v16, %v9624_v20  ;;  %v1262_v1 = vsel %vm400_vm5, %v1227_v13, %v1248_v48 }
 0x4a9   :  { %v1264_v20 = vsel %vm400_vm5, %v1235_v19, %v1256_v4 }
 0x4aa   :  { %v1263_v55 = vsel %vm400_vm5, %v1231_v53, %v1252_v33 }
 0x53d   :  { %v1331_v6 = vpop.f32.mrb[8].mxu0  ;;  %v1402_v50 = vpop.f32.mrb[8].mxu1 }
 0x53e   :  { %v1332_v37 = vadd.f32 %v1331_v6, %v1261_v30  ;;  %v1333_v38 = vpop.f32.mrb[9].mxu0  ;;  %v1404_v3 = vpop.f32.mrb[9].mxu1  ;;  %v1403_v12 = vadd.f32 %v1402_v50, %v1263_v55 }
 0x53f   :  { %v1334_v34 = vadd.f32 %v1333_v38, %v1262_v1  ;;  %v1405_v6 = vadd.f32 %v1404_v3, %v1264_v20 }
 0x540   :  { %v1407_v51 = vmul.f32 0.5, %v1332_v37 }
 0x541   :  { %v1408_v15 = vmul.f32 0.5, %v1334_v34  ;;  %v1410_v30 = vmul.f32 0.5, %v1405_v6  ;;  %v9629_v6 = vld [vmem:[#allocation21_spill] sm:$0xff] }
 0x542   :  { %7172 = vtanh.f32 %v1407_v51 }
 0x543   :  { %7174 = vtanh.f32 %v1408_v15 }
 0x544   :  { %7176 = vtanh.f32 %v1403_v12  ;;  %v9628_v12 = vld [vmem:[#allocation20_spill] sm:$0xff] }
 0x545   :  { %7178 = vtanh.f32 %v1410_v30  ;;  %v9630_v30 = vld [vmem:[#allocation22_spill] sm:$0xff] }
 0x54c   :  { %v7173_v13 = vpop.eup %7172 }
 0x54d   :  { %v7175_v48 = vpop.eup %7174  ;;  %v1415_v21 = vmul.f32 0.5, %v7173_v13  ;;  %v9631_v13 = vld [vmem:[#allocation23_spill] sm:$0xff] }
 0x54e   :  { %v1416_v38 = vmul.f32 0.5, %v7175_v48  ;;  %v7177_v53 = vpop.eup %7176  ;;  %v9632_v48 = vld [vmem:[#allocation24_spill] sm:$0xff] }
 0x54f   :  { %v1419_v37 = vadd.f32 0.5, %v1415_v21  ;;  %v7179_v15 = vpop.eup %7178 }
 0x550   :  { %v1420_v34 = vadd.f32 0.5, %v1416_v38  ;;  %v1418_v51 = vmul.f32 0.5, %v7179_v15  ;;  %v9633_v38 = vld [vmem:[#allocation25_spill] sm:$0xff]  ;;  %v9639_v15 = vld [vmem:[#allocation32_spill] sm:$0xff] }
 0x551   :  { %v1424_v33 = vmul.f32 %v7177_v53, %v1419_v37  ;;  %v9634_v37 = vld [vmem:[#allocation27_spill] sm:$0xff]  ;;  %v9635_v53 = vld [vmem:[#allocation28_spill] sm:$0xff] }
 0x552   :  { %v1423_v1 = vmul.f32 %v1420_v34, %v8035_v42  ;;  %v1422_v19 = vadd.f32 0.5, %v1418_v51  ;;  %v9636_v34 = vld [vmem:[#allocation29_spill] sm:$0xff] }
 0x553   :  { %v9640_v51 = vld [vmem:[#allocation33_spill] sm:$0xff] }
 0x554   :  { %v8133_v8 = vadd.f32 %v1424_v33, %v1423_v1  ;;  %v9637_v33 = vld [vmem:[#allocation30_spill] sm:$0xff]  ;;  %v9638_v1 = vld [vmem:[#allocation31_spill] sm:$0xff] }
 0x556   :  { %7180 = vtanh.f32 %v8133_v8 }
 0x560   :  { %v7181_v3 = vpop.eup %7180 }
 0x561   :  { %v8136_v55 = vmul.f32 %v7181_v3, %v1422_v19  ;;  %v9641_v19 = vld [vmem:[#allocation34_spill] sm:$0xff]  ;;  %v9642_v3 = vld [vmem:[#allocation35_spill] sm:$0xff] }
 0x563   :  { %9625 = vst [vmem:[#allocation51_spill] sm:$0xff] %v8136_v55  ;;  %v1429_v20 = vmul.f32 %v9500_v41, %v8136_v55  ;;  %v1428_v21 = vmul.f32 %v7587_v60, %v8136_v55  ;;  %v2083_v50 = vrot.slane %v8136_v55, 4  ;;  %v9354_v42 = vrot.slane %v8136_v55, 5  ;;  %v9647_v55 = vld [vmem:[#allocation40_spill] sm:$0xff] }
 0x565   :  { %1544 = vmatprep.mubr.f32.mxu0 %v1429_v20  ;;  %1615 = vmatprep.mubr.f32.mxu1 %v1429_v20  ;;  %v8146_v16 = vsel %vm2099_vm8, %v8050_v7, %v2083_v50  ;;  %v8152_v4 = vsel %vm2099_vm8, %v8054_v54, %v9354_v42  ;;  %v9626_v7 = vld [vmem:[#allocation18_spill] sm:$0xff]  ;;  %v9627_v54 = vld [vmem:[#allocation19_spill] sm:$0xff]  ;;  %v9643_v20 = vld [vmem:[#allocation36_spill] sm:$0xff] }
 0x566   :  { %1545 = vmatmul.mubr.f32.vlgmr.msra.gmra.mrb[10].mxu0 %v1428_v21  ;;  %1616 = vmatmul.mubr.f32.vlgmr.msra.gmra.mrb[10].mxu1 %v1428_v21  ;;  %v9644_v21 = vld [vmem:[#allocation37_spill] sm:$0xff]  ;;  %v9645_v50 = vld [vmem:[#allocation38_spill] sm:$0xff]  ;;  %v9646_v42 = vld [vmem:[#allocation39_spill] sm:$0xff] }
 0x567   :  { %5554 = vmatpush1.bf16.msra.mxu0 %v7451_v14  ;;  %5618 = vmatpush1.bf16.msra.mxu1 %v7454_v18 }
 0x568   :  { %5556 = vmatprep.subr.bf16.mxu0 %v7459_v22  ;;  %5620 = vmatprep.subr.bf16.mxu1 %v7461_v23 }
 0x56b   :  { %5558 = vmatpush1.bf16.msra.mxu0 %v7464_v27  ;;  %5622 = vmatpush1.bf16.msra.mxu1 %v7469_v31 }
 0x56c   :  { %5560 = vmatprep.subr.bf16.mxu0 %v7471_v32  ;;  %5624 = vmatprep.subr.bf16.mxu1 %v7473_v36 }
 0x56f   :  { %5562 = vmatpush1.bf16.msra.mxu0 %v7476_v40  ;;  %5626 = vmatpush1.bf16.msra.mxu1 %v7480_v44 }
 0x570   :  { %5564 = vmatprep.subr.bf16.mxu0 %v7482_v45  ;;  %5628 = vmatprep.subr.bf16.mxu1 %v7485_v49 }
 0x573   :  { %5566 = vmatpush1.bf16.msra.mxu0 %v7488_v56  ;;  %5630 = vmatpush1.bf16.msra.mxu1 %v7492_v57 }
 0x574   :  { %5568 = vmatprep.subr.bf16.mxu0 %v7494_v58  ;;  %5632 = vmatprep.subr.bf16.mxu1 %v7497_v62 }
 0x577   :  { %5570 = vmatpush1.bf16.msra.mxu0 %v7500_v5  ;;  %5634 = vmatpush1.bf16.msra.mxu1 %v7504_v9 }
 0x578   :  { %5572 = vmatprep.subr.bf16.mxu0 %v7506_v10  ;;  %5636 = vmatprep.subr.bf16.mxu1 %v7509_v17 }
 0x57b   :  { %5574 = vmatpush1.bf16.msra.mxu0 %v7512_v26  ;;  %5638 = vmatpush1.bf16.msra.mxu1 %v7516_v28 }
 0x57c   :  { %5576 = vmatprep.subr.bf16.mxu0 %v7518_v29  ;;  %5640 = vmatprep.subr.bf16.mxu1 %v7521_v35 }
 0x57f   :  { %5578 = vmatpush1.bf16.msra.mxu0 %v7524_v43  ;;  %5642 = vmatpush1.bf16.msra.mxu1 %v7528_v46 }
 0x580   :  { %5580 = vmatprep.subr.bf16.mxu0 %v7530_v47  ;;  %5644 = vmatprep.subr.bf16.mxu1 %v7533_v52 }
 0x583   :  { %5582 = vmatpush1.bf16.msra.mxu0 %v7536_v61  ;;  %5646 = vmatpush1.bf16.msra.mxu1 %v7540_v63 }
 0x584   :  { %5584 = vmatprep.subr.bf16.mxu0 %v7542_v0  ;;  %5648 = vmatprep.subr.bf16.mxu1 %v7545_v11 }
 0x587   :  { %5586 = vmatpush1.bf16.msra.mxu0 %v7548_v24  ;;  %5650 = vmatpush1.bf16.msra.mxu1 %v7552_v25 }
 0x588   :  { %5588 = vmatprep.subr.bf16.mxu0 %v9501_v39  ;;  %5652 = vmatprep.subr.bf16.mxu1 %v9502_v2 }
 0x58b   :  { %5590 = vmatpush1.bf16.msra.mxu0 %v9626_v7  ;;  %5654 = vmatpush1.bf16.msra.mxu1 %v9627_v54 }
 0x58c   :  { %5592 = vmatprep.subr.bf16.mxu0 %v9628_v12  ;;  %5656 = vmatprep.subr.bf16.mxu1 %v9629_v6 }
 0x58f   :  { %5594 = vmatpush1.bf16.msra.mxu0 %v9630_v30  ;;  %5658 = vmatpush1.bf16.msra.mxu1 %v9631_v13 }
 0x590   :  { %5596 = vmatprep.subr.bf16.mxu0 %v9632_v48  ;;  %5660 = vmatprep.subr.bf16.mxu1 %v9633_v38 }
 0x593   :  { %5598 = vmatpush1.bf16.msra.mxu0 %v9634_v37  ;;  %5662 = vmatpush1.bf16.msra.mxu1 %v9635_v53  ;;  %v9655_v53 = vld [vmem:[#allocation46_spill] sm:$0xff] }
 0x594   :  { %5600 = vmatprep.subr.bf16.mxu0 %v9636_v34  ;;  %5664 = vmatprep.subr.bf16.mxu1 %v9637_v33  ;;  %v9648_v33 = vld [vmem:[#allocation41_spill] sm:$0xff]  ;;  %v9654_v34 = vld [vmem:[#allocation11_spill] sm:$0xff] }
 0x597   :  { %5602 = vmatpush1.bf16.msra.mxu0 %v9638_v1  ;;  %5666 = vmatpush1.bf16.msra.mxu1 %v9639_v15  ;;  %v9649_v1 = vld [vmem:[#allocation42_spill] sm:$0xff]  ;;  %v9650_v15 = vld [vmem:[#allocation43_spill] sm:$0xff] }
 0x598   :  { %5604 = vmatprep.subr.bf16.mxu0 %v9640_v51  ;;  %5668 = vmatprep.subr.bf16.mxu1 %v9641_v19  ;;  %v9651_v51 = vld [vmem:[#allocation44_spill] sm:$0xff]  ;;  %v9652_v19 = vld [vmem:[#allocation13_spill] sm:$0xff] }
 0x59b   :  { %5606 = vmatpush1.bf16.msra.mxu0 %v9642_v3  ;;  %5670 = vmatpush1.bf16.msra.mxu1 %v9643_v20  ;;  %v9653_v3 = vld [vmem:[#allocation15_spill] sm:$0xff] }
 0x59c   :  { %5608 = vmatprep.subr.bf16.mxu0 %v9644_v21  ;;  %5672 = vmatprep.subr.bf16.mxu1 %v9645_v50  ;;  %v1431_v20 = vld [vmem:[#allocation2 + $0x5] ss:$8 sm:$0xf] }
 0x59d   :  { %v1433_v21 = vld [vmem:[#allocation3 + $0x5] ss:$8 sm:$0xf]  ;;  %v1438_v50 = vrot.slane %v1431_v20, %v9654_v34 }
 0x59f   :  { %5610 = vmatpush1.bf16.msra.mxu0 %v9646_v42  ;;  %5674 = vmatpush1.bf16.msra.mxu1 %v9647_v55  ;;  %v1459_v42 = vrot.slane %v1433_v21, %v9654_v34  ;;  %v1442_v55 = vrot.slane %v1431_v20, %v9655_v53 }
 0x5a0   :  { %5612 = vmatprep.subr.bf16.mxu0 %v9648_v33  ;;  %5676 = vmatprep.subr.bf16.mxu1 %v9649_v1  ;;  %v1463_v33 = vrot.slane %v1433_v21, %v9655_v53  ;;  %v1450_v53 = vrot.slane %v1431_v20, %v7731_v59 }
 0x5a1   :  { %v1476_v1 = vsel %vm400_vm5, %v1438_v50, %v1459_v42  ;;  %v1471_v42 = vrot.slane %v1433_v21, %v7731_v59 }
 0x5a3   :  { %5614 = vmatpush1.bf16.msra.mxu0 %v9650_v15  ;;  %5678 = vmatpush1.bf16.msra.mxu1 %v9651_v51  ;;  %v9656_v15 = vld [vmem:[#allocation47_spill] sm:$0xff] }
 0x5a4   :  { %5680 = vmatprep.subr.bf16.mxu0 %v9652_v19  ;;  %5744 = vmatprep.subr.bf16.mxu1 %v9653_v3  ;;  %v1446_v38 = vrot.slane %v1431_v20, %v9656_v15  ;;  %v1467_v51 = vrot.slane %v1433_v21, %v9656_v15  ;;  %v1477_v3 = vsel %vm400_vm5, %v1442_v55, %v1463_v33 }
 0x5a5   :  { %v1479_v15 = vsel %vm400_vm5, %v1450_v53, %v1471_v42 }
 0x5a6   :  { %v1478_v34 = vsel %vm400_vm5, %v1446_v38, %v1467_v51 }
 0x639   :  { %v1546_v37 = vpop.f32.mrb[10].mxu0  ;;  %v1617_v19 = vpop.f32.mrb[10].mxu1 }
 0x63a   :  { %v1547_v48 = vadd.f32 %v1546_v37, %v1476_v1  ;;  %v1548_v13 = vpop.f32.mrb[11].mxu0  ;;  %v1619_v30 = vpop.f32.mrb[11].mxu1  ;;  %v1618_v50 = vadd.f32 %v1617_v19, %v1478_v34 }
 0x63b   :  { %v1549_v6 = vadd.f32 %v1548_v13, %v1477_v3  ;;  %v1620_v37 = vadd.f32 %v1619_v30, %v1479_v15 }
 0x63c   :  { %v1622_v12 = vmul.f32 0.5, %v1547_v48 }
 0x63d   :  { %v1623_v54 = vmul.f32 0.5, %v1549_v6  ;;  %v1625_v1 = vmul.f32 0.5, %v1620_v37 }
 0x63e   :  { %7182 = vtanh.f32 %v1622_v12 }
 0x63f   :  { %7184 = vtanh.f32 %v1623_v54 }
 0x640   :  { %7186 = vtanh.f32 %v1618_v50 }
 0x641   :  { %7188 = vtanh.f32 %v1625_v1 }
 0x648   :  { %v7183_v55 = vpop.eup %7182 }
 0x649   :  { %v7185_v33 = vpop.eup %7184  ;;  %v1630_v7 = vmul.f32 0.5, %v7183_v55 }
 0x64a   :  { %v1631_v13 = vmul.f32 0.5, %v7185_v33  ;;  %v7187_v38 = vpop.eup %7186  ;;  %v9685_v33 = vld [vmem:[#allocation47_spill] sm:$0xff] }
 0x64b   :  { %v1634_v48 = vadd.f32 0.5, %v1630_v7  ;;  %v7189_v54 = vpop.eup %7188 }
 0x64c   :  { %v1635_v6 = vadd.f32 0.5, %v1631_v13  ;;  %v1633_v12 = vmul.f32 0.5, %v7189_v54 }
 0x64d   :  { %v1639_v51 = vmul.f32 %v7187_v38, %v1634_v48 }
 0x64e   :  { %v1638_v20 = vmul.f32 %v1635_v6, %v8133_v8  ;;  %v1637_v53 = vadd.f32 0.5, %v1633_v12 }
 0x650   :  { %v8231_v21 = vadd.f32 %v1639_v51, %v1638_v20 }
 0x652   :  { %7190 = vtanh.f32 %v8231_v21 }
 0x65c   :  { %v7191_v30 = vpop.eup %7190 }
 0x65d   :  { %v8234_v34 = vmul.f32 %v7191_v30, %v1637_v53 }
 0x65f   :  { %v1644_v15 = vmul.f32 %v9500_v41, %v8234_v34  ;;  %v1643_v7 = vmul.f32 %v7587_v60, %v8234_v34  ;;  %v2086_v19 = vrot.slane %v8234_v34, 3  ;;  %v2150_v8 = vrot.slane %v8234_v34, 4 }
 0x661   :  { %1759 = vmatprep.mubr.f32.mxu0 %v1644_v15  ;;  %1830 = vmatprep.mubr.f32.mxu1 %v1644_v15  ;;  %v8244_v3 = vsel %vm2101_vm9, %v8146_v16, %v2086_v19  ;;  %v8248_v42 = vsel %vm2101_vm9, %v8152_v4, %v2150_v8  ;;  %v9684_v4 = vld [vmem:[#allocation46_spill] sm:$0xff] }
 0x662   :  { %1760 = vmatmul.mubr.f32.vlgmr.msra.gmra.mrb[12].mxu0 %v1643_v7  ;;  %1831 = vmatmul.mubr.f32.vlgmr.msra.gmra.mrb[12].mxu1 %v1643_v7 }
 0x663   :  { %5682 = vmatpush1.bf16.msra.mxu0 %v7451_v14  ;;  %5746 = vmatpush1.bf16.msra.mxu1 %v7454_v18  ;;  %v9657_v14 = vld [vmem:[#allocation18_spill] sm:$0xff]  ;;  %v9658_v18 = vld [vmem:[#allocation19_spill] sm:$0xff] }
 0x664   :  { %5684 = vmatprep.subr.bf16.mxu0 %v7459_v22  ;;  %5748 = vmatprep.subr.bf16.mxu1 %v7461_v23  ;;  %v9659_v22 = vld [vmem:[#allocation20_spill] sm:$0xff]  ;;  %v9660_v23 = vld [vmem:[#allocation21_spill] sm:$0xff] }
 0x667   :  { %5686 = vmatpush1.bf16.msra.mxu0 %v7464_v27  ;;  %5750 = vmatpush1.bf16.msra.mxu1 %v7469_v31  ;;  %v9661_v27 = vld [vmem:[#allocation22_spill] sm:$0xff]  ;;  %v9662_v31 = vld [vmem:[#allocation23_spill] sm:$0xff] }
 0x668   :  { %5688 = vmatprep.subr.bf16.mxu0 %v7471_v32  ;;  %5752 = vmatprep.subr.bf16.mxu1 %v7473_v36  ;;  %v9663_v32 = vld [vmem:[#allocation24_spill] sm:$0xff]  ;;  %v9664_v36 = vld [vmem:[#allocation25_spill] sm:$0xff] }
 0x66b   :  { %5690 = vmatpush1.bf16.msra.mxu0 %v7476_v40  ;;  %5754 = vmatpush1.bf16.msra.mxu1 %v7480_v44  ;;  %v9665_v40 = vld [vmem:[#allocation27_spill] sm:$0xff]  ;;  %v9666_v44 = vld [vmem:[#allocation28_spill] sm:$0xff] }
 0x66c   :  { %5692 = vmatprep.subr.bf16.mxu0 %v7482_v45  ;;  %5756 = vmatprep.subr.bf16.mxu1 %v7485_v49  ;;  %v9667_v45 = vld [vmem:[#allocation29_spill] sm:$0xff]  ;;  %v9668_v49 = vld [vmem:[#allocation30_spill] sm:$0xff] }
 0x66f   :  { %5694 = vmatpush1.bf16.msra.mxu0 %v7488_v56  ;;  %5758 = vmatpush1.bf16.msra.mxu1 %v7492_v57  ;;  %v9669_v56 = vld [vmem:[#allocation31_spill] sm:$0xff]  ;;  %v9670_v57 = vld [vmem:[#allocation32_spill] sm:$0xff] }
 0x670   :  { %5696 = vmatprep.subr.bf16.mxu0 %v7494_v58  ;;  %5760 = vmatprep.subr.bf16.mxu1 %v7497_v62  ;;  %v9671_v58 = vld [vmem:[#allocation33_spill] sm:$0xff]  ;;  %v9672_v62 = vld [vmem:[#allocation34_spill] sm:$0xff] }
 0x673   :  { %5698 = vmatpush1.bf16.msra.mxu0 %v7500_v5  ;;  %5762 = vmatpush1.bf16.msra.mxu1 %v7504_v9  ;;  %v9673_v5 = vld [vmem:[#allocation35_spill] sm:$0xff]  ;;  %v9674_v9 = vld [vmem:[#allocation36_spill] sm:$0xff] }
 0x674   :  { %5700 = vmatprep.subr.bf16.mxu0 %v7506_v10  ;;  %5764 = vmatprep.subr.bf16.mxu1 %v7509_v17  ;;  %v9675_v10 = vld [vmem:[#allocation37_spill] sm:$0xff]  ;;  %v9676_v17 = vld [vmem:[#allocation38_spill] sm:$0xff] }
 0x677   :  { %5702 = vmatpush1.bf16.msra.mxu0 %v7512_v26  ;;  %5766 = vmatpush1.bf16.msra.mxu1 %v7516_v28  ;;  %v9677_v26 = vld [vmem:[#allocation39_spill] sm:$0xff]  ;;  %v9678_v28 = vld [vmem:[#allocation40_spill] sm:$0xff] }
 0x678   :  { %5704 = vmatprep.subr.bf16.mxu0 %v7518_v29  ;;  %5768 = vmatprep.subr.bf16.mxu1 %v7521_v35  ;;  %v9679_v29 = vld [vmem:[#allocation41_spill] sm:$0xff]  ;;  %v9680_v35 = vld [vmem:[#allocation42_spill] sm:$0xff] }
 0x67b   :  { %5706 = vmatpush1.bf16.msra.mxu0 %v7524_v43  ;;  %5770 = vmatpush1.bf16.msra.mxu1 %v7528_v46  ;;  %v9681_v43 = vld [vmem:[#allocation43_spill] sm:$0xff]  ;;  %v9682_v46 = vld [vmem:[#allocation44_spill] sm:$0xff] }
 0x67c   :  { %5708 = vmatprep.subr.bf16.mxu0 %v7530_v47  ;;  %5772 = vmatprep.subr.bf16.mxu1 %v7533_v52  ;;  %v2164_v47 = vld [vmem:[#allocation4 + $0x808] sm:$0xff] }
 0x67d   :  { %v2168_v52 = vld [vmem:[#allocation4 + $0x828] sm:$0xff] }
 0x67f   :  { %5710 = vmatpush1.bf16.msra.mxu0 %v7536_v61  ;;  %5774 = vmatpush1.bf16.msra.mxu1 %v7540_v63  ;;  %v2166_v61 = vld [vmem:[#allocation4 + $0x818] sm:$0xff]  ;;  %v5807_v63 = vpack.c.bf16 %v2168_v52, %v2164_v47 }
 0x680   :  { %5712 = vmatprep.subr.bf16.mxu0 %v7542_v0  ;;  %5776 = vmatprep.subr.bf16.mxu1 %v7545_v11  ;;  %v2170_v0 = vld [vmem:[#allocation4 + $0x838] sm:$0xff] }
 0x681   :  { %v5871_v11 = vpack.c.bf16 %v2170_v0, %v2166_v61  ;;  %v2175_v0 = vld [vmem:[#allocation4 + $0x860] sm:$0xff] }
 0x683   :  { %5714 = vmatpush1.bf16.msra.mxu0 %v7548_v24  ;;  %5778 = vmatpush1.bf16.msra.mxu1 %v7552_v25  ;;  %v1646_v24 = vld [vmem:[#allocation2 + $0x6] ss:$8 sm:$0xf] }
 0x684   :  { %5716 = vmatprep.subr.bf16.mxu0 %v9501_v39  ;;  %5780 = vmatprep.subr.bf16.mxu1 %v9502_v2  ;;  %v1648_v25 = vld [vmem:[#allocation3 + $0x6] ss:$8 sm:$0xf]  ;;  %v1657_v50 = vrot.slane %v1646_v24, %v9684_v4  ;;  %v1661_v13 = vrot.slane %v1646_v24, %v9685_v33  ;;  %v1665_v7 = vrot.slane %v1646_v24, %v7731_v59 }
 0x685   :  { %v9683_v39 = vld [vmem:[#allocation11_spill] sm:$0xff]  ;;  %v1678_v37 = vrot.slane %v1648_v25, %v9684_v4  ;;  %v1682_v48 = vrot.slane %v1648_v25, %v9685_v33  ;;  %v1686_v19 = vrot.slane %v1648_v25, %v7731_v59 }
 0x686   :  { %v1653_v2 = vrot.slane %v1646_v24, %v9683_v39  ;;  %v1674_v16 = vrot.slane %v1648_v25, %v9683_v39  ;;  %v2173_v25 = vld [vmem:[#allocation4 + $0x850] sm:$0xff] }
 0x687   :  { %5718 = vmatpush1.bf16.msra.mxu0 %v9657_v14  ;;  %5782 = vmatpush1.bf16.msra.mxu1 %v9658_v18  ;;  %v1692_v51 = vsel %vm400_vm5, %v1657_v50, %v1678_v37  ;;  %v1693_v30 = vsel %vm400_vm5, %v1661_v13, %v1682_v48  ;;  %v1694_v14 = vsel %vm400_vm5, %v1665_v7, %v1686_v19  ;;  %v2184_v50 = vld [vmem:[#allocation4 + $0x8a8] sm:$0xff]  ;;  %v2182_v37 = vld [vmem:[#allocation4 + $0x898] sm:$0xff]  ;;  %v2179_v48 = vld [vmem:[#allocation4 + $0x880] sm:$0xff] }
 0x688   :  { %5720 = vmatprep.subr.bf16.mxu0 %v9659_v22  ;;  %5784 = vmatprep.subr.bf16.mxu1 %v9660_v23  ;;  %v1691_v1 = vsel %vm400_vm5, %v1653_v2, %v1674_v16  ;;  %v2177_v2 = vld [vmem:[#allocation4 + $0x870] sm:$0xff]  ;;  %v2180_v16 = vld [vmem:[#allocation4 + $0x888] sm:$0xff] }
 0x689   :  { %v5877_v13 = vpack.c.bf16 %v2177_v2, %v2173_v25  ;;  %v2216_v25 = vld [vmem:[#allocation4 + $0x9a8] sm:$0xff]  ;;  %v2214_v2 = vld [vmem:[#allocation4 + $0x998] sm:$0xff] }
 0x68b   :  { %5722 = vmatpush1.bf16.msra.mxu0 %v9661_v27  ;;  %5786 = vmatpush1.bf16.msra.mxu1 %v9662_v31 }
 0x68c   :  { %5724 = vmatprep.subr.bf16.mxu0 %v9663_v32  ;;  %5788 = vmatprep.subr.bf16.mxu1 %v9664_v36 }
 0x68f   :  { %5726 = vmatpush1.bf16.msra.mxu0 %v9665_v40  ;;  %5790 = vmatpush1.bf16.msra.mxu1 %v9666_v44 }
 0x690   :  { %5728 = vmatprep.subr.bf16.mxu0 %v9667_v45  ;;  %5792 = vmatprep.subr.bf16.mxu1 %v9668_v49 }
 0x693   :  { %5730 = vmatpush1.bf16.msra.mxu0 %v9669_v56  ;;  %5794 = vmatpush1.bf16.msra.mxu1 %v9670_v57 }
 0x694   :  { %5732 = vmatprep.subr.bf16.mxu0 %v9671_v58  ;;  %5796 = vmatprep.subr.bf16.mxu1 %v9672_v62 }
 0x697   :  { %5734 = vmatpush1.bf16.msra.mxu0 %v9673_v5  ;;  %5798 = vmatpush1.bf16.msra.mxu1 %v9674_v9  ;;  %v2163_v5 = vld [vmem:[#allocation4 + $0x800] sm:$0xff] }
 0x698   :  { %5736 = vmatprep.subr.bf16.mxu0 %v9675_v10  ;;  %5800 = vmatprep.subr.bf16.mxu1 %v9676_v17  ;;  %v2167_v9 = vld [vmem:[#allocation4 + $0x820] sm:$0xff]  ;;  %v2165_v17 = vld [vmem:[#allocation4 + $0x810] sm:$0xff] }
 0x699   :  { %v5809_v52 = vpack.c.bf16 %v2167_v9, %v2163_v5  ;;  %v2197_v5 = vld [vmem:[#allocation4 + $0x910] sm:$0xff] }
 0x69b   :  { %5738 = vmatpush1.bf16.msra.mxu0 %v9677_v26  ;;  %5802 = vmatpush1.bf16.msra.mxu1 %v9678_v28  ;;  %v2169_v26 = vld [vmem:[#allocation4 + $0x830] sm:$0xff]  ;;  %v2172_v28 = vld [vmem:[#allocation4 + $0x848] sm:$0xff] }
 0x69c   :  { %5740 = vmatprep.subr.bf16.mxu0 %v9679_v29  ;;  %5804 = vmatprep.subr.bf16.mxu1 %v9680_v35  ;;  %v2176_v35 = vld [vmem:[#allocation4 + $0x868] sm:$0xff]  ;;  %v5873_v61 = vpack.c.bf16 %v2169_v26, %v2165_v17 }
 0x69d   :  { %v2204_v26 = vld [vmem:[#allocation4 + $0x948] sm:$0xff] }
 0x69f   :  { %5742 = vmatpush1.bf16.msra.mxu0 %v9681_v43  ;;  %5806 = vmatpush1.bf16.msra.mxu1 %v9682_v46  ;;  %v2174_v43 = vld [vmem:[#allocation4 + $0x858] sm:$0xff] }
 0x6a0   :  { %5808 = vmatprep.subr.bf16.mxu0 %v5807_v63  ;;  %5872 = vmatprep.subr.bf16.mxu1 %v5871_v11  ;;  %v2178_v46 = vld [vmem:[#allocation4 + $0x878] sm:$0xff]  ;;  %v2171_v63 = vld [vmem:[#allocation4 + $0x840] sm:$0xff]  ;;  %v5811_v11 = vpack.c.bf16 %v2176_v35, %v2172_v28  ;;  %v2208_v28 = vld [vmem:[#allocation4 + $0x968] sm:$0xff] }
 0x6a1   :  { %v5875_v24 = vpack.c.bf16 %v2178_v46, %v2174_v43  ;;  %v2206_v35 = vld [vmem:[#allocation4 + $0x958] sm:$0xff]  ;;  %v5827_v43 = vpack.c.bf16 %v2208_v28, %v2204_v26  ;;  %v2235_v26 = vld [vmem:[#allocation4 + $0xa40] sm:$0xff] }
 0x6a2   :  { %v2210_v46 = vld [vmem:[#allocation4 + $0x978] sm:$0xff]  ;;  %v2239_v28 = vld [vmem:[#allocation4 + $0xa60] sm:$0xff] }
 0x735   :  { %v1761_v55 = vpop.f32.mrb[12].mxu0  ;;  %v1832_v38 = vpop.f32.mrb[12].mxu1 }
 0x736   :  { %v1762_v6 = vadd.f32 %v1761_v55, %v1691_v1  ;;  %v1763_v20 = vpop.f32.mrb[13].mxu0  ;;  %v1834_v54 = vpop.f32.mrb[13].mxu1  ;;  %v1833_v8 = vadd.f32 %v1832_v38, %v1693_v30  ;;  %v2186_v1 = vld [vmem:[#allocation4 + $0x8b8] sm:$0xff]  ;;  %v5813_v55 = vpack.c.bf16 %v2175_v0, %v2171_v63  ;;  %v2183_v38 = vld [vmem:[#allocation4 + $0x8a0] sm:$0xff]  ;;  %v2205_v63 = vld [vmem:[#allocation4 + $0x950] sm:$0xff] }
 0x737   :  { %v1764_v12 = vadd.f32 %v1763_v20, %v1692_v51  ;;  %v1835_v18 = vadd.f32 %v1834_v54, %v1694_v14  ;;  %v5879_v51 = vpack.c.bf16 %v2186_v1, %v2182_v37  ;;  %v2181_v20 = vld [vmem:[#allocation4 + $0x890] sm:$0xff]  ;;  %v2190_v30 = vld [vmem:[#allocation4 + $0x8d8] sm:$0xff]  ;;  %v5817_v7 = vpack.c.bf16 %v2183_v38, %v2179_v48  ;;  %v2191_v14 = vld [vmem:[#allocation4 + $0x8e0] sm:$0xff] }
 0x738   :  { %v1837_v53 = vmul.f32 0.5, %v1762_v6  ;;  %v5815_v6 = vpack.c.bf16 %v2184_v50, %v2180_v16  ;;  %v2185_v54 = vld [vmem:[#allocation4 + $0x8b0] sm:$0xff]  ;;  %v2218_v50 = vld [vmem:[#allocation4 + $0x9b8] sm:$0xff]  ;;  %v2211_v37 = vld [vmem:[#allocation4 + $0x980] sm:$0xff] }
 0x739   :  { %v1838_v15 = vmul.f32 0.5, %v1764_v12  ;;  %v1840_v22 = vmul.f32 0.5, %v1835_v18  ;;  %v2188_v12 = vld [vmem:[#allocation4 + $0x8c8] sm:$0xff]  ;;  %v5881_v19 = vpack.c.bf16 %v2185_v54, %v2181_v20  ;;  %v2209_v0 = vld [vmem:[#allocation4 + $0x970] sm:$0xff]  ;;  %v2215_v1 = vld [vmem:[#allocation4 + $0x9a0] sm:$0xff] }
 0x73a   :  { %7192 = vtanh.f32 %v1837_v53  ;;  %v2192_v53 = vld [vmem:[#allocation4 + $0x8e8] sm:$0xff]  ;;  %v2213_v48 = vld [vmem:[#allocation4 + $0x990] sm:$0xff]  ;;  %v2222_v54 = vld [vmem:[#allocation4 + $0x9d8] sm:$0xff] }
 0x73b   :  { %7194 = vtanh.f32 %v1838_v15  ;;  %v2194_v15 = vld [vmem:[#allocation4 + $0x8f8] sm:$0xff]  ;;  %v5819_v18 = vpack.c.bf16 %v2192_v53, %v2188_v12  ;;  %v2217_v38 = vld [vmem:[#allocation4 + $0x9b0] sm:$0xff]  ;;  %v2224_v20 = vld [vmem:[#allocation4 + $0x9e8] sm:$0xff] }
 0x73c   :  { %7196 = vtanh.f32 %v1833_v8  ;;  %v2187_v8 = vld [vmem:[#allocation4 + $0x8c0] sm:$0xff]  ;;  %v2226_v53 = vld [vmem:[#allocation4 + $0x9f8] sm:$0xff] }
 0x73d   :  { %7198 = vtanh.f32 %v1840_v22  ;;  %v5883_v22 = vpack.c.bf16 %v2194_v15, %v2190_v30  ;;  %v2219_v30 = vld [vmem:[#allocation4 + $0x9c0] sm:$0xff] }
 0x73e   :  { %v2223_v15 = vld [vmem:[#allocation4 + $0x9e0] sm:$0xff] }
 0x744   :  { %v7193_v23 = vpop.eup %7192 }
 0x745   :  { %v7195_v27 = vpop.eup %7194  ;;  %v1845_v31 = vmul.f32 0.5, %v7193_v23  ;;  %v2189_v23 = vld [vmem:[#allocation4 + $0x8d0] sm:$0xff] }
 0x746   :  { %v1846_v32 = vmul.f32 0.5, %v7195_v27  ;;  %v7197_v40 = vpop.eup %7196  ;;  %v2193_v27 = vld [vmem:[#allocation4 + $0x8f0] sm:$0xff] }
 0x747   :  { %v1849_v36 = vadd.f32 0.5, %v1845_v31  ;;  %v7199_v57 = vpop.eup %7198  ;;  %v2196_v31 = vld [vmem:[#allocation4 + $0x908] sm:$0xff] }
 0x748   :  { %v1850_v44 = vadd.f32 0.5, %v1846_v32  ;;  %v1848_v58 = vmul.f32 0.5, %v7199_v57  ;;  %v2200_v32 = vld [vmem:[#allocation4 + $0x928] sm:$0xff] }
 0x749   :  { %v1854_v45 = vmul.f32 %v7197_v40, %v1849_v36  ;;  %v2198_v36 = vld [vmem:[#allocation4 + $0x918] sm:$0xff] }
 0x74a   :  { %v1853_v49 = vmul.f32 %v1850_v44, %v8231_v21  ;;  %v1852_v62 = vadd.f32 0.5, %v1848_v58  ;;  %v2202_v40 = vld [vmem:[#allocation4 + $0x938] sm:$0xff]  ;;  %v5821_v44 = vpack.c.bf16 %v2191_v14, %v2187_v8  ;;  %v2195_v58 = vld [vmem:[#allocation4 + $0x900] sm:$0xff]  ;;  %v2221_v8 = vld [vmem:[#allocation4 + $0x9d0] sm:$0xff] }
 0x74b   :  { %v5887_v57 = vpack.c.bf16 %v2202_v40, %v2198_v36  ;;  %v2225_v14 = vld [vmem:[#allocation4 + $0x9f0] sm:$0xff]  ;;  %v2227_v36 = vld [vmem:[#allocation4 + $0xa00] sm:$0xff] }
 0x74c   :  { %v8325_v56 = vadd.f32 %v1854_v45, %v1853_v49  ;;  %v5885_v45 = vpack.c.bf16 %v2193_v27, %v2189_v23  ;;  %v5823_v49 = vpack.c.bf16 %v2200_v32, %v2196_v31  ;;  %v2232_v23 = vld [vmem:[#allocation4 + $0xa28] sm:$0xff]  ;;  %v2230_v27 = vld [vmem:[#allocation4 + $0xa18] sm:$0xff]  ;;  %v2231_v40 = vld [vmem:[#allocation4 + $0xa20] sm:$0xff] }
 0x74d   :  { %v2234_v32 = vld [vmem:[#allocation4 + $0xa38] sm:$0xff] }
 0x74e   :  { %7200 = vtanh.f32 %v8325_v56 }
 0x758   :  { %v7201_v10 = vpop.eup %7200 }
 0x759   :  { %v8328_v29 = vmul.f32 %v7201_v10, %v1852_v62  ;;  %v2199_v62 = vld [vmem:[#allocation4 + $0x920] sm:$0xff]  ;;  %v2201_v10 = vld [vmem:[#allocation4 + $0x930] sm:$0xff] }
 0x75a   :  { %v5825_v9 = vpack.c.bf16 %v2199_v62, %v2195_v58  ;;  %v5889_v17 = vpack.c.bf16 %v2201_v10, %v2197_v5  ;;  %v2236_v62 = vld [vmem:[#allocation4 + $0xa48] sm:$0xff] }
 0x75b   :  { %v1859_v21 = vmul.f32 %v9500_v41, %v8328_v29  ;;  %v1858_v47 = vmul.f32 %v7587_v60, %v8328_v29  ;;  %v2240_v5 = vld [vmem:[#allocation4 + $0xa68] sm:$0xff] }
 0x75c   :  { %v5843_v10 = vpack.c.bf16 %v2240_v5, %v2236_v62  ;;  %v2267_v62 = vld [vmem:[#allocation4 + $0xb40] sm:$0xff]  ;;  %v2850_v60 = vld [vmem:[#allocation4 + $0x708] sm:$0xff] }
 0x75d   :  { %1974 = vmatprep.mubr.f32.mxu0 %v1859_v21  ;;  %2045 = vmatprep.mubr.f32.mxu1 %v1859_v21  ;;  %v2203_v21 = vld [vmem:[#allocation4 + $0x940] sm:$0xff]  ;;  %v2854_v41 = vld [vmem:[#allocation4 + $0x728] sm:$0xff] }
 0x75e   :  { %1975 = vmatmul.mubr.f32.vlgmr.msra.gmra.mrb[14].mxu0 %v1858_v47  ;;  %2046 = vmatmul.mubr.f32.vlgmr.msra.gmra.mrb[14].mxu1 %v1858_v47  ;;  %v2207_v47 = vld [vmem:[#allocation4 + $0x960] sm:$0xff] }
 0x75f   :  { %5810 = vmatpush1.bf16.msra.mxu0 %v5809_v52  ;;  %5874 = vmatpush1.bf16.msra.mxu1 %v5873_v61  ;;  %v5891_v52 = vpack.c.bf16 %v2210_v46, %v2206_v35  ;;  %v5829_v61 = vpack.c.bf16 %v2207_v47, %v2203_v21  ;;  %v2237_v46 = vld [vmem:[#allocation4 + $0xa50] sm:$0xff]  ;;  %v2271_v5 = vld [vmem:[#allocation4 + $0xb60] sm:$0xff] }
 0x760   :  { %5812 = vmatprep.subr.bf16.mxu0 %v5811_v11  ;;  %5876 = vmatprep.subr.bf16.mxu1 %v5875_v24  ;;  %v5893_v11 = vpack.c.bf16 %v2209_v0, %v2205_v63  ;;  %v2212_v24 = vld [vmem:[#allocation4 + $0x988] sm:$0xff]  ;;  %v2241_v21 = vld [vmem:[#allocation4 + $0xa70] sm:$0xff]  ;;  %v2246_v63 = vld [vmem:[#allocation4 + $0xa98] sm:$0xff] }
 0x761   :  { %v5831_v16 = vpack.c.bf16 %v2216_v25, %v2212_v24  ;;  %v5909_v47 = vpack.c.bf16 %v2241_v21, %v2237_v46  ;;  %v2243_v24 = vld [vmem:[#allocation4 + $0xa80] sm:$0xff]  ;;  %v2278_v46 = vld [vmem:[#allocation4 + $0xb98] sm:$0xff] }
 0x762   :  { %v2247_v25 = vld [vmem:[#allocation4 + $0xaa0] sm:$0xff] }
 0x763   :  { %5814 = vmatpush1.bf16.msra.mxu0 %v5813_v55  ;;  %5878 = vmatpush1.bf16.msra.mxu1 %v5877_v13  ;;  %v5895_v55 = vpack.c.bf16 %v2218_v50, %v2214_v2  ;;  %v5833_v13 = vpack.c.bf16 %v2215_v1, %v2211_v37  ;;  %v2245_v50 = vld [vmem:[#allocation4 + $0xa90] sm:$0xff] }
 0x764   :  { %5816 = vmatprep.subr.bf16.mxu0 %v5815_v6  ;;  %5880 = vmatprep.subr.bf16.mxu1 %v5879_v51  ;;  %v5897_v6 = vpack.c.bf16 %v2217_v38, %v2213_v48  ;;  %v2220_v51 = vld [vmem:[#allocation4 + $0x9c8] sm:$0xff]  ;;  %v2249_v37 = vld [vmem:[#allocation4 + $0xab0] sm:$0xff]  ;;  %v2254_v48 = vld [vmem:[#allocation4 + $0xad8] sm:$0xff] }
 0x765   :  { %v5835_v12 = vpack.c.bf16 %v2224_v20, %v2220_v51  ;;  %v5913_v1 = vpack.c.bf16 %v2249_v37, %v2245_v50  ;;  %v2251_v51 = vld [vmem:[#allocation4 + $0xac0] sm:$0xff]  ;;  %v2286_v50 = vld [vmem:[#allocation4 + $0xbd8] sm:$0xff] }
 0x766   :  { %v2255_v20 = vld [vmem:[#allocation4 + $0xae0] sm:$0xff]  ;;  %v2290_v37 = vld [vmem:[#allocation4 + $0xbf8] sm:$0xff] }
 0x767   :  { %5818 = vmatpush1.bf16.msra.mxu0 %v5817_v7  ;;  %5882 = vmatpush1.bf16.msra.mxu1 %v5881_v19  ;;  %v5899_v7 = vpack.c.bf16 %v2226_v53, %v2222_v54  ;;  %v5837_v19 = vpack.c.bf16 %v2223_v15, %v2219_v30  ;;  %v2253_v53 = vld [vmem:[#allocation4 + $0xad0] sm:$0xff] }
 0x768   :  { %5820 = vmatprep.subr.bf16.mxu0 %v5819_v18  ;;  %5884 = vmatprep.subr.bf16.mxu1 %v5883_v22  ;;  %v5901_v18 = vpack.c.bf16 %v2225_v14, %v2221_v8  ;;  %v2228_v22 = vld [vmem:[#allocation4 + $0xa08] sm:$0xff]  ;;  %v2257_v30 = vld [vmem:[#allocation4 + $0xaf0] sm:$0xff]  ;;  %v2262_v8 = vld [vmem:[#allocation4 + $0xb18] sm:$0xff] }
 0x769   :  { %v5839_v31 = vpack.c.bf16 %v2232_v23, %v2228_v22  ;;  %v5917_v15 = vpack.c.bf16 %v2257_v30, %v2253_v53  ;;  %v2259_v22 = vld [vmem:[#allocation4 + $0xb00] sm:$0xff]  ;;  %v2294_v53 = vld [vmem:[#allocation4 + $0xc18] sm:$0xff] }
 0x76a   :  { %v2263_v23 = vld [vmem:[#allocation4 + $0xb20] sm:$0xff] }
 0x76b   :  { %5822 = vmatpush1.bf16.msra.mxu0 %v5821_v44  ;;  %5886 = vmatpush1.bf16.msra.mxu1 %v5885_v45  ;;  %v5903_v44 = vpack.c.bf16 %v2234_v32, %v2230_v27  ;;  %v5841_v45 = vpack.c.bf16 %v2231_v40, %v2227_v36  ;;  %v2261_v32 = vld [vmem:[#allocation4 + $0xb10] sm:$0xff] }
 0x76c   :  { %5824 = vmatprep.subr.bf16.mxu0 %v5823_v49  ;;  %5888 = vmatprep.subr.bf16.mxu1 %v5887_v57  ;;  %v2229_v49 = vld [vmem:[#allocation4 + $0xa10] sm:$0xff] }
 0x76d   :  { %v2233_v57 = vld [vmem:[#allocation4 + $0xa30] sm:$0xff] }
 0x76e   :  { %v5905_v58 = vpack.c.bf16 %v2233_v57, %v2229_v49  ;;  %v2265_v36 = vld [vmem:[#allocation4 + $0xb30] sm:$0xff]  ;;  %v2270_v49 = vld [vmem:[#allocation4 + $0xb58] sm:$0xff] }
 0x76f   :  { %5826 = vmatpush1.bf16.msra.mxu0 %v5825_v9  ;;  %5890 = vmatpush1.bf16.msra.mxu1 %v5889_v17  ;;  %v2238_v9 = vld [vmem:[#allocation4 + $0xa58] sm:$0xff]  ;;  %v5921_v40 = vpack.c.bf16 %v2265_v36, %v2261_v32 }
 0x770   :  { %5828 = vmatprep.subr.bf16.mxu0 %v5827_v43  ;;  %5892 = vmatprep.subr.bf16.mxu1 %v5891_v52  ;;  %v2242_v17 = vld [vmem:[#allocation4 + $0xa78] sm:$0xff]  ;;  %v5845_v43 = vpack.c.bf16 %v2239_v28, %v2235_v26  ;;  %v2244_v52 = vld [vmem:[#allocation4 + $0xa88] sm:$0xff]  ;;  %v2273_v26 = vld [vmem:[#allocation4 + $0xb70] sm:$0xff] }
 0x771   :  { %v5907_v35 = vpack.c.bf16 %v2242_v17, %v2238_v9  ;;  %v2269_v17 = vld [vmem:[#allocation4 + $0xb50] sm:$0xff] }
 0x772   :  { %v5925_v28 = vpack.c.bf16 %v2273_v26, %v2269_v17 }
 0x773   :  { %5830 = vmatpush1.bf16.msra.mxu0 %v5829_v61  ;;  %5894 = vmatpush1.bf16.msra.mxu1 %v5893_v11  ;;  %v2248_v61 = vld [vmem:[#allocation4 + $0xaa8] sm:$0xff]  ;;  %v2250_v11 = vld [vmem:[#allocation4 + $0xab8] sm:$0xff] }
 0x774   :  { %5832 = vmatprep.subr.bf16.mxu0 %v5831_v16  ;;  %5896 = vmatprep.subr.bf16.mxu1 %v5895_v55  ;;  %v5847_v0 = vpack.c.bf16 %v2248_v61, %v2244_v52  ;;  %v5911_v2 = vpack.c.bf16 %v2250_v11, %v2246_v63  ;;  %v5849_v16 = vpack.c.bf16 %v2247_v25, %v2243_v24  ;;  %v2252_v55 = vld [vmem:[#allocation4 + $0xac8] sm:$0xff]  ;;  %v2275_v52 = vld [vmem:[#allocation4 + $0xb80] sm:$0xff]  ;;  %v2277_v11 = vld [vmem:[#allocation4 + $0xb90] sm:$0xff] }
 0x775   :  { %v2279_v61 = vld [vmem:[#allocation4 + $0xba0] sm:$0xff]  ;;  %v2281_v24 = vld [vmem:[#allocation4 + $0xbb0] sm:$0xff]  ;;  %v2284_v25 = vld [vmem:[#allocation4 + $0xbc8] sm:$0xff] }
 0x777   :  { %5834 = vmatpush1.bf16.msra.mxu0 %v5833_v13  ;;  %5898 = vmatpush1.bf16.msra.mxu1 %v5897_v6  ;;  %v2256_v13 = vld [vmem:[#allocation4 + $0xae8] sm:$0xff]  ;;  %v2258_v6 = vld [vmem:[#allocation4 + $0xaf8] sm:$0xff] }
 0x778   :  { %5836 = vmatprep.subr.bf16.mxu0 %v5835_v12  ;;  %5900 = vmatprep.subr.bf16.mxu1 %v5899_v7  ;;  %v5851_v38 = vpack.c.bf16 %v2256_v13, %v2252_v55  ;;  %v5915_v54 = vpack.c.bf16 %v2258_v6, %v2254_v48  ;;  %v5853_v12 = vpack.c.bf16 %v2255_v20, %v2251_v51  ;;  %v2260_v7 = vld [vmem:[#allocation4 + $0xb08] sm:$0xff]  ;;  %v2283_v13 = vld [vmem:[#allocation4 + $0xbc0] sm:$0xff]  ;;  %v2289_v51 = vld [vmem:[#allocation4 + $0xbf0] sm:$0xff] }
 0x779   :  { %v5931_v55 = vpack.c.bf16 %v2290_v37, %v2286_v50  ;;  %v2287_v48 = vld [vmem:[#allocation4 + $0xbe0] sm:$0xff] }
 0x77a   :  { %v5869_v6 = vpack.c.bf16 %v2287_v48, %v2283_v13  ;;  %v2125_v48 = vrot.slane %v8328_v29, 7 }
 0x77b   :  { %5838 = vmatpush1.bf16.msra.mxu0 %v5837_v19  ;;  %5902 = vmatpush1.bf16.msra.mxu1 %v5901_v18  ;;  %v2264_v19 = vld [vmem:[#allocation4 + $0xb28] sm:$0xff]  ;;  %v2266_v18 = vld [vmem:[#allocation4 + $0xb38] sm:$0xff] }
 0x77c   :  { %5840 = vmatprep.subr.bf16.mxu0 %v5839_v31  ;;  %5904 = vmatprep.subr.bf16.mxu1 %v5903_v44  ;;  %v5855_v14 = vpack.c.bf16 %v2264_v19, %v2260_v7  ;;  %v5919_v27 = vpack.c.bf16 %v2266_v18, %v2262_v8  ;;  %v5857_v31 = vpack.c.bf16 %v2263_v23, %v2259_v22  ;;  %v2268_v44 = vld [vmem:[#allocation4 + $0xb48] sm:$0xff] }
 0x77d   :  { %v1861_v19 = vld [vmem:[#allocation2 + $0x7] ss:$8 sm:$0xf] }
 0x77e   :  { %v1863_v8 = vld [vmem:[#allocation3 + $0x7] ss:$8 sm:$0xf]  ;;  %v1872_v22 = vrot.slane %v1861_v19, %v9684_v4  ;;  %v1876_v32 = vrot.slane %v1861_v19, %v9685_v33 }
 0x77f   :  { %5842 = vmatpush1.bf16.msra.mxu0 %v5841_v45  ;;  %5906 = vmatpush1.bf16.msra.mxu1 %v5905_v58  ;;  %v2272_v45 = vld [vmem:[#allocation4 + $0xb68] sm:$0xff]  ;;  %v2274_v58 = vld [vmem:[#allocation4 + $0xb78] sm:$0xff]  ;;  %v1889_v18 = vrot.slane %v1863_v8, %v9683_v39  ;;  %v1893_v23 = vrot.slane %v1863_v8, %v9684_v4  ;;  %v1897_v36 = vrot.slane %v1863_v8, %v9685_v33 }
 0x780   :  { %5844 = vmatprep.subr.bf16.mxu0 %v5843_v10  ;;  %5908 = vmatprep.subr.bf16.mxu1 %v5907_v35  ;;  %v5859_v57 = vpack.c.bf16 %v2272_v45, %v2268_v44  ;;  %v5923_v9 = vpack.c.bf16 %v2274_v58, %v2270_v49  ;;  %v5861_v10 = vpack.c.bf16 %v2271_v5, %v2267_v62  ;;  %v2276_v35 = vld [vmem:[#allocation4 + $0xb88] sm:$0xff]  ;;  %v2856_v4 = vld [vmem:[#allocation4 + $0x738] sm:$0xff] }
 0x781   :  { %v1907_v45 = vsel %vm400_vm5, %v1872_v22, %v1893_v23  ;;  %v1908_v5 = vsel %vm400_vm5, %v1876_v32, %v1897_v36  ;;  %v1901_v17 = vrot.slane %v1863_v8, %v7731_v59  ;;  %v9690_v36 = vld [vmem:[#allocation16_spill] sm:$0xff] }
 0x782   :  { %v2858_v33 = vld [vmem:[#allocation4 + $0x748] sm:$0xff] }
 0x783   :  { %5846 = vmatpush1.bf16.msra.mxu0 %v5845_v43  ;;  %5910 = vmatpush1.bf16.msra.mxu1 %v5909_v47  ;;  %v2280_v43 = vld [vmem:[#allocation4 + $0xba8] sm:$0xff]  ;;  %v2282_v47 = vld [vmem:[#allocation4 + $0xbb8] sm:$0xff] }
 0x784   :  { %5848 = vmatprep.subr.bf16.mxu0 %v5847_v0  ;;  %5912 = vmatprep.subr.bf16.mxu1 %v5911_v2  ;;  %v5863_v21 = vpack.c.bf16 %v2280_v43, %v2276_v35  ;;  %v5927_v63 = vpack.c.bf16 %v2282_v47, %v2278_v46  ;;  %v5865_v0 = vpack.c.bf16 %v2279_v61, %v2275_v52 }
 0x785   :  { %v5929_v2 = vpack.c.bf16 %v2281_v24, %v2277_v11 }
 0x787   :  { %5850 = vmatpush1.bf16.msra.mxu0 %v5849_v16  ;;  %5914 = vmatpush1.bf16.msra.mxu1 %v5913_v1  ;;  %v2288_v16 = vld [vmem:[#allocation4 + $0xbe8] sm:$0xff] }
 0x788   :  { %5852 = vmatprep.subr.bf16.mxu0 %v5851_v38  ;;  %5916 = vmatprep.subr.bf16.mxu1 %v5915_v54  ;;  %v5867_v1 = vpack.c.bf16 %v2288_v16, %v2284_v25  ;;  %v2285_v38 = vld [vmem:[#allocation4 + $0xbd0] sm:$0xff]  ;;  %v2292_v54 = vld [vmem:[#allocation4 + $0xc08] sm:$0xff] }
 0x789   :  { %v5933_v20 = vpack.c.bf16 %v2289_v51, %v2285_v38  ;;  %v2127_v38 = vrot.slane %v8234_v34, 6 }
 0x78b   :  { %5854 = vmatpush1.bf16.msra.mxu0 %v5853_v12  ;;  %5918 = vmatpush1.bf16.msra.mxu1 %v5917_v15  ;;  %v2296_v12 = vld [vmem:[#allocation4 + $0xc28] sm:$0xff]  ;;  %v2298_v15 = vld [vmem:[#allocation4 + $0xc38] sm:$0xff] }
 0x78c   :  { %5856 = vmatprep.subr.bf16.mxu0 %v5855_v14  ;;  %5920 = vmatprep.subr.bf16.mxu1 %v5919_v27  ;;  %v5935_v30 = vpack.c.bf16 %v2296_v12, %v2292_v54  ;;  %v5999_v7 = vpack.c.bf16 %v2298_v15, %v2294_v53  ;;  %v1868_v14 = vrot.slane %v1861_v19, %v9683_v39  ;;  %v9688_v53 = vld [vmem:[#allocation51_spill] sm:$0xff]  ;;  %v2862_v39 = vld [vmem:[#allocation4 + $0x768] sm:$0xff] }
 0x78e   :  { %v1906_v27 = vsel %vm400_vm5, %v1868_v14, %v1889_v18 }
 0x78f   :  { %5858 = vmatpush1.bf16.msra.mxu0 %v5857_v31  ;;  %5922 = vmatpush1.bf16.msra.mxu1 %v5921_v40 }
 0x790   :  { %5860 = vmatprep.subr.bf16.mxu0 %v5859_v57  ;;  %5924 = vmatprep.subr.bf16.mxu1 %v5923_v9 }
 0x793   :  { %5862 = vmatpush1.bf16.msra.mxu0 %v5861_v10  ;;  %5926 = vmatpush1.bf16.msra.mxu1 %v5925_v28  ;;  %v1880_v10 = vrot.slane %v1861_v19, %v7731_v59  ;;  %v2107_v19 = vrot.slane %v8234_v34, 7  ;;  %v2291_v34 = vld [vmem:[#allocation4 + $0xc00] sm:$0xff]  ;;  %v2852_v59 = vld [vmem:[#allocation4 + $0x718] sm:$0xff] }
 0x794   :  { %5864 = vmatprep.subr.bf16.mxu0 %v5863_v21  ;;  %5928 = vmatprep.subr.bf16.mxu1 %v5927_v63 }
 0x795   :  { %v1909_v28 = vsel %vm400_vm5, %v1880_v10, %v1901_v17  ;;  %v9692_v17 = vld [vmem:[#allocation49_spill] sm:$0xff] }
 0x797   :  { %5866 = vmatpush1.bf16.msra.mxu0 %v5865_v0  ;;  %5930 = vmatpush1.bf16.msra.mxu1 %v5929_v2 }
 0x798   :  { %5868 = vmatprep.subr.bf16.mxu0 %v5867_v1  ;;  %5932 = vmatprep.subr.bf16.mxu1 %v5931_v55  ;;  %v2089_v1 = vrot.slane %v8328_v29, 2  ;;  %v2152_v55 = vrot.slane %v8328_v29, 3 }
 0x79a   :  { %v2104_v8 = vsel %vm2103_vm10, %v8244_v3, %v2089_v1  ;;  %v2161_v14 = vsel %vm2103_vm10, %v8248_v42, %v2152_v55  ;;  %v2314_v1 = vld [vmem:[#allocation4 + $0xcb8] sm:$0xff] }
 0x79b   :  { %5870 = vmatpush1.bf16.msra.mxu0 %v5869_v6  ;;  %5934 = vmatpush1.bf16.msra.mxu1 %v5933_v20  ;;  %v9686_v6 = vld [vmem:[#allocation50_spill] sm:$0xff] }
 0x79c   :  { %5936 = vmatprep.subr.bf16.mxu0 %v5935_v30  ;;  %6000 = vmatprep.subr.bf16.mxu1 %v5999_v7  ;;  %v2131_v51 = vrot.slane %v9686_v6, 4  ;;  %v2109_v30 = vrot.slane %v9688_v53, 6 }
 0x831   :  { %v1976_v31 = vpop.f32.mrb[14].mxu0  ;;  %v2047_v40 = vpop.f32.mrb[14].mxu1 }
 0x832   :  { %v1977_v44 = vadd.f32 %v1976_v31, %v1906_v27  ;;  %v1978_v49 = vpop.f32.mrb[15].mxu0  ;;  %v2049_v57 = vpop.f32.mrb[15].mxu1  ;;  %v2048_v26 = vadd.f32 %v2047_v40, %v1908_v5  ;;  %v9689_v27 = vrot.slane %v9688_v53, 5  ;;  %v2135_v40 = vrot.slane %v9690_v36, 2  ;;  %v2318_v53 = vld [vmem:[#allocation4 + $0xcd8] sm:$0xff] }
 0x833   :  { %v1979_v58 = vadd.f32 %v1978_v49, %v1907_v45  ;;  %v2050_v35 = vadd.f32 %v2049_v57, %v1909_v28  ;;  %v2293_v45 = vld [vmem:[#allocation4 + $0xc10] sm:$0xff] }
 0x834   :  { %v2052_v62 = vmul.f32 0.5, %v1977_v44  ;;  %v2297_v49 = vld [vmem:[#allocation4 + $0xc30] sm:$0xff] }
 0x835   :  { %v2053_v9 = vmul.f32 0.5, %v1979_v58  ;;  %v2055_v43 = vmul.f32 0.5, %v2050_v35  ;;  %v2113_v58 = vrot.slane %v9690_v36, 3  ;;  %v2304_v35 = vld [vmem:[#allocation4 + $0xc68] sm:$0xff] }
 0x836   :  { %7202 = vtanh.f32 %v2052_v62  ;;  %v9691_v62 = vrot.slane %v9686_v6, 5 }
 0x837   :  { %7204 = vtanh.f32 %v2053_v9  ;;  %v2300_v9 = vld [vmem:[#allocation4 + $0xc48] sm:$0xff] }
 0x838   :  { %7206 = vtanh.f32 %v2048_v26  ;;  %v2116_v26 = vrot.slane %v9692_v17, 2 }
 0x839   :  { %7208 = vtanh.f32 %v2055_v43  ;;  %v2302_v43 = vld [vmem:[#allocation4 + $0xc58] sm:$0xff] }
 0x840   :  { %v7203_v46 = vpop.eup %7202 }
 0x841   :  { %v7205_v21 = vpop.eup %7204  ;;  %v2060_v47 = vmul.f32 0.5, %v7203_v46  ;;  %v2306_v46 = vld [vmem:[#allocation4 + $0xc78] sm:$0xff] }
 0x842   :  { %v2061_v52 = vmul.f32 0.5, %v7205_v21  ;;  %v7207_v63 = vpop.eup %7206 }
 0x843   :  { %v2064_v61 = vadd.f32 0.5, %v2060_v47  ;;  %v7209_v2 = vpop.eup %7208 }
 0x844   :  { %v2065_v0 = vadd.f32 0.5, %v2061_v52  ;;  %v2063_v16 = vmul.f32 0.5, %v7209_v2  ;;  %v6001_v52 = vpack.c.bf16 %v2297_v49, %v2293_v45  ;;  %v5939_v2 = vpack.c.bf16 %v2304_v35, %v2300_v9  ;;  %v2325_v45 = vld [vmem:[#allocation4 + $0xd10] sm:$0xff]  ;;  %v2335_v35 = vld [vmem:[#allocation4 + $0xd60] sm:$0xff] }
 0x845   :  { %v2069_v11 = vmul.f32 %v7207_v63, %v2064_v61  ;;  %v2299_v61 = vld [vmem:[#allocation4 + $0xc40] sm:$0xff]  ;;  %v2329_v49 = vld [vmem:[#allocation4 + $0xd30] sm:$0xff] }
 0x846   :  { %v2068_v24 = vmul.f32 %v2065_v0, %v8325_v56  ;;  %v2067_v50 = vadd.f32 0.5, %v2063_v16  ;;  %v9687_v56 = vld [vmem:[#allocation17_spill] sm:$0xff]  ;;  %v2303_v63 = vld [vmem:[#allocation4 + $0xc60] sm:$0xff]  ;;  %v6003_v16 = vpack.c.bf16 %v2306_v46, %v2302_v43 }
 0x847   :  { %v2133_v20 = vrot.slane %v9687_v56, 3  ;;  %v2111_v42 = vrot.slane %v9687_v56, 4  ;;  %v5941_v55 = vpack.c.bf16 %v2303_v63, %v2299_v61  ;;  %v2309_v56 = vld [vmem:[#allocation4 + $0xc90] sm:$0xff]  ;;  %v2344_v61 = vld [vmem:[#allocation4 + $0xda8] sm:$0xff]  ;;  %v2342_v63 = vld [vmem:[#allocation4 + $0xd98] sm:$0xff] }
 0x848   :  { %v2070_v25 = vadd.f32 %v2069_v11, %v2068_v24  ;;  %v2301_v11 = vld [vmem:[#allocation4 + $0xc50] sm:$0xff] }
 0x849   :  { %v2305_v24 = vld [vmem:[#allocation4 + $0xc70] sm:$0xff] }
 0x84a   :  { %7210 = vtanh.f32 %v2070_v25  ;;  %v2308_v25 = vld [vmem:[#allocation4 + $0xc88] sm:$0xff] }
 0x854   :  { %v7211_v37 = vpop.eup %7210 }
 0x855   :  { %v2072_v13 = vmul.f32 %v7211_v37, %v2067_v50  ;;  %v2312_v50 = vld [vmem:[#allocation4 + $0xca8] sm:$0xff]  ;;  %v2310_v37 = vld [vmem:[#allocation4 + $0xc98] sm:$0xff] }
 0x856   :  { %v5943_v6 = vpack.c.bf16 %v2312_v50, %v2308_v25  ;;  %v2339_v25 = vld [vmem:[#allocation4 + $0xd80] sm:$0xff] }
 0x857   :  { %v2092_v54 = vrot.slane %v2072_v13, 1  ;;  %v2139_v12 = vsel %vm400_vm5, %v2072_v13, %v2125_v48  ;;  %v2154_v15 = vrot.slane %v2072_v13, 2  ;;  %v6005_v13 = vpack.c.bf16 %v2305_v24, %v2301_v11  ;;  %v2307_v48 = vld [vmem:[#allocation4 + $0xc80] sm:$0xff] }
 0x858   :  { %v2140_v7 = vsel %vm2095_vm6, %v2139_v12, %v2127_v38  ;;  %v2311_v38 = vld [vmem:[#allocation4 + $0xca0] sm:$0xff]  ;;  %v2320_v12 = vld [vmem:[#allocation4 + $0xce8] sm:$0xff] }
 0x859   :  { %v2118_v18 = vsel %vm400_vm5, %v2092_v54, %v8328_v29  ;;  %v2106_v22 = vsel %vm2105_vm11, %v2104_v8, %v2092_v54  ;;  %v2162_v23 = vsel %vm2105_vm11, %v2161_v14, %v2154_v15  ;;  %v2141_v31 = vsel %vm2097_vm7, %v2140_v7, %v9689_v27  ;;  %v2295_v29 = vld [vmem:[#allocation4 + $0xc20] sm:$0xff]  ;;  %v2316_v54 = vld [vmem:[#allocation4 + $0xcc8] sm:$0xff] }
 0x85a   :  { %v2119_v32 = vsel %vm2095_vm6, %v2118_v18, %v2107_v19  ;;  %v2142_v3 = vsel %vm2099_vm8, %v2141_v31, %v2131_v51  ;;  %v5937_v47 = vpack.c.bf16 %v2295_v29, %v2291_v34  ;;  %v6007_v51 = vpack.c.bf16 %v2314_v1, %v2310_v37  ;;  %v2315_v19 = vld [vmem:[#allocation4 + $0xcc0] sm:$0xff]  ;;  %v2324_v27 = vld [vmem:[#allocation4 + $0xd08] sm:$0xff]  ;;  %v2330_v34 = vld [vmem:[#allocation4 + $0xd38] sm:$0xff] }
 0x85b   :  { %v2120_v44 = vsel %vm2097_vm7, %v2119_v32, %v2109_v30  ;;  %v2143_v57 = vsel %vm2101_vm9, %v2142_v3, %v2133_v20  ;;  %v2313_v20 = vld [vmem:[#allocation4 + $0xcb0] sm:$0xff]  ;;  %v2322_v30 = vld [vmem:[#allocation4 + $0xcf8] sm:$0xff]  ;;  %v5945_v15 = vpack.c.bf16 %v2311_v38, %v2307_v48  ;;  %v2319_v8 = vld [vmem:[#allocation4 + $0xce0] sm:$0xff]  ;;  %v5947_v14 = vpack.c.bf16 %v2320_v12, %v2316_v54 }
 0x85c   :  { %v2121_v5 = vsel %vm2099_vm8, %v2120_v44, %v9691_v62  ;;  %v8379_v10 = vsel %vm2103_vm10, %v2143_v57, %v2135_v40  ;;  %v6009_v7 = vpack.c.bf16 %v2313_v20, %v2309_v56  ;;  %v6011_v18 = vpack.c.bf16 %v2322_v30, %v2318_v53  ;;  %v2328_v31 = vld [vmem:[#allocation4 + $0xd28] sm:$0xff]  ;;  %v2326_v32 = vld [vmem:[#allocation4 + $0xd18] sm:$0xff]  ;;  %v2323_v3 = vld [vmem:[#allocation4 + $0xd00] sm:$0xff] }
 0x85d   :  { %v2122_v28 = vsel %vm2101_vm9, %v2121_v5, %v2111_v42  ;;  %v5949_v36 = vpack.c.bf16 %v2319_v8, %v2315_v19  ;;  %v2327_v42 = vld [vmem:[#allocation4 + $0xd20] sm:$0xff]  ;;  %v5951_v44 = vpack.c.bf16 %v2328_v31, %v2324_v27  ;;  %v6015_v29 = vpack.c.bf16 %v2330_v34, %v2326_v32  ;;  %v2332_v57 = vld [vmem:[#allocation4 + $0xd48] sm:$0xff]  ;;  %v2334_v62 = vld [vmem:[#allocation4 + $0xd58] sm:$0xff] }
 0x85e   :  { %v2123_v21 = vsel %vm2103_vm10, %v2122_v28, %v2113_v58  ;;  %v2336_v58 = vld [vmem:[#allocation4 + $0xd68] sm:$0xff]  ;;  %v2338_v5 = vld [vmem:[#allocation4 + $0xd78] sm:$0xff]  ;;  %v5953_v9 = vpack.c.bf16 %v2327_v42, %v2323_v3  ;;  %v2331_v28 = vld [vmem:[#allocation4 + $0xd40] sm:$0xff] }
 0x85f   :  { %v2124_v0 = vsel %vm2105_vm11, %v2123_v21, %v2116_v26  ;;  %v6017_v26 = vpack.c.bf16 %v2329_v49, %v2325_v45  ;;  %v5955_v43 = vpack.c.bf16 %v2336_v58, %v2332_v57  ;;  %v6019_v46 = vpack.c.bf16 %v2338_v5, %v2334_v62  ;;  %v2333_v21 = vld [vmem:[#allocation4 + $0xd50] sm:$0xff]  ;;  %v2350_v48 = vld [vmem:[#allocation4 + $0xdd8] sm:$0xff]  ;;  %v2347_v56 = vld [vmem:[#allocation4 + $0xdc0] sm:$0xff] }
 0x860   :  { %2504 = vmatprep.mubr.f32.mxu0 %v2124_v0  ;;  %2575 = vmatprep.mubr.f32.mxu1 %v2124_v0  ;;  %v2346_v0 = vld [vmem:[#allocation4 + $0xdb8] sm:$0xff]  ;;  %v5957_v11 = vpack.c.bf16 %v2335_v35, %v2331_v28  ;;  %v2341_v37 = vld [vmem:[#allocation4 + $0xd90] sm:$0xff]  ;;  %v2351_v20 = vld [vmem:[#allocation4 + $0xde0] sm:$0xff] }
 0x861   :  { %2505 = vmatmul.mubr.f32.vlgmr.msra.gmra.mrb[16].mxu0 %v2106_v22  ;;  %2576 = vmatmul.mubr.f32.vlgmr.msra.gmra.mrb[16].mxu1 %v2106_v22  ;;  %v2317_v22 = vld [vmem:[#allocation4 + $0xcd0] sm:$0xff]  ;;  %v6023_v50 = vpack.c.bf16 %v2346_v0, %v2342_v63  ;;  %v2354_v38 = vld [vmem:[#allocation4 + $0xdf8] sm:$0xff]  ;;  %v2363_v45 = vld [vmem:[#allocation4 + $0xe40] sm:$0xff] }
 0x862   :  { %5938 = vmatpush1.bf16.msra.mxu0 %v5937_v47  ;;  %6002 = vmatpush1.bf16.msra.mxu1 %v6001_v52  ;;  %v2337_v47 = vld [vmem:[#allocation4 + $0xd70] sm:$0xff]  ;;  %v2340_v52 = vld [vmem:[#allocation4 + $0xd88] sm:$0xff]  ;;  %v6027_v12 = vpack.c.bf16 %v2354_v38, %v2350_v48  ;;  %v2358_v19 = vld [vmem:[#allocation4 + $0xe18] sm:$0xff] }
 0x863   :  { %2671 = vmatprep.mubr.f32.mxu0 %v2162_v23  ;;  %2742 = vmatprep.mubr.f32.mxu1 %v2162_v23  ;;  %v2321_v23 = vld [vmem:[#allocation4 + $0xcf0] sm:$0xff]  ;;  %v6021_v24 = vpack.c.bf16 %v2337_v47, %v2333_v21  ;;  %v2362_v8 = vld [vmem:[#allocation4 + $0xe38] sm:$0xff]  ;;  %v2367_v49 = vld [vmem:[#allocation4 + $0xe60] sm:$0xff] }
 0x864   :  { %5940 = vmatprep.subr.bf16.mxu0 %v5939_v2  ;;  %6004 = vmatprep.subr.bf16.mxu1 %v6003_v16  ;;  %v6013_v40 = vpack.c.bf16 %v2321_v23, %v2317_v22  ;;  %v2343_v2 = vld [vmem:[#allocation4 + $0xda0] sm:$0xff]  ;;  %v5959_v16 = vpack.c.bf16 %v2344_v61, %v2340_v52  ;;  %v2345_v1 = vld [vmem:[#allocation4 + $0xdb0] sm:$0xff]  ;;  %v6031_v31 = vpack.c.bf16 %v2362_v8, %v2358_v19  ;;  %v2366_v3 = vld [vmem:[#allocation4 + $0xe58] sm:$0xff] }
 0x865   :  { %v2349_v53 = vld [vmem:[#allocation4 + $0xdd0] sm:$0xff]  ;;  %v2355_v22 = vld [vmem:[#allocation4 + $0xe00] sm:$0xff]  ;;  %v2370_v42 = vld [vmem:[#allocation4 + $0xe78] sm:$0xff] }
 0x866   :  { %5942 = vmatpush1.bf16.msra.mxu0 %v5941_v55  ;;  %6006 = vmatpush1.bf16.msra.mxu1 %v6005_v13  ;;  %v2348_v55 = vld [vmem:[#allocation4 + $0xdc8] sm:$0xff]  ;;  %v2353_v30 = vld [vmem:[#allocation4 + $0xdf0] sm:$0xff]  ;;  %v2359_v23 = vld [vmem:[#allocation4 + $0xe20] sm:$0xff]  ;;  %v6035_v58 = vpack.c.bf16 %v2370_v42, %v2366_v3 }
 0x867   :  { %5944 = vmatprep.subr.bf16.mxu0 %v5943_v6  ;;  %6008 = vmatprep.subr.bf16.mxu1 %v6007_v51  ;;  %v2352_v13 = vld [vmem:[#allocation4 + $0xde8] sm:$0xff]  ;;  %v5961_v6 = vpack.c.bf16 %v2343_v2, %v2339_v25  ;;  %v6025_v51 = vpack.c.bf16 %v2345_v1, %v2341_v37  ;;  %v2357_v32 = vld [vmem:[#allocation4 + $0xe10] sm:$0xff]  ;;  %v2374_v28 = vld [vmem:[#allocation4 + $0xe98] sm:$0xff] }
 0x868   :  { %v5963_v54 = vpack.c.bf16 %v2352_v13, %v2348_v55  ;;  %v2361_v34 = vld [vmem:[#allocation4 + $0xe30] sm:$0xff]  ;;  %v2378_v35 = vld [vmem:[#allocation4 + $0xeb8] sm:$0xff]  ;;  %v2371_v21 = vld [vmem:[#allocation4 + $0xe80] sm:$0xff] }
 0x869   :  { %v2365_v62 = vld [vmem:[#allocation4 + $0xe50] sm:$0xff]  ;;  %v2375_v47 = vld [vmem:[#allocation4 + $0xea0] sm:$0xff]  ;;  %v6039_v61 = vpack.c.bf16 %v2378_v35, %v2374_v28  ;;  %v2382_v25 = vld [vmem:[#allocation4 + $0xed8] sm:$0xff] }
 0x86a   :  { %5946 = vmatpush1.bf16.msra.mxu0 %v5945_v15  ;;  %6010 = vmatpush1.bf16.msra.mxu1 %v6009_v7  ;;  %v2356_v15 = vld [vmem:[#allocation4 + $0xe08] sm:$0xff]  ;;  %v2369_v5 = vld [vmem:[#allocation4 + $0xe70] sm:$0xff]  ;;  %v2386_v2 = vld [vmem:[#allocation4 + $0xef8] sm:$0xff] }
 0x86b   :  { %5948 = vmatprep.subr.bf16.mxu0 %v5947_v14  ;;  %6012 = vmatprep.subr.bf16.mxu1 %v6011_v18  ;;  %v2360_v7 = vld [vmem:[#allocation4 + $0xe28] sm:$0xff]  ;;  %v5965_v14 = vpack.c.bf16 %v2351_v20, %v2347_v56  ;;  %v6029_v18 = vpack.c.bf16 %v2353_v30, %v2349_v53  ;;  %v2373_v63 = vld [vmem:[#allocation4 + $0xe90] sm:$0xff]  ;;  %v2379_v37 = vld [vmem:[#allocation4 + $0xec0] sm:$0xff]  ;;  %v6043_v13 = vpack.c.bf16 %v2386_v2, %v2382_v25 }
 0x86c   :  { %v5967_v27 = vpack.c.bf16 %v2360_v7, %v2356_v15  ;;  %v2377_v0 = vld [vmem:[#allocation4 + $0xeb0] sm:$0xff]  ;;  %v2383_v1 = vld [vmem:[#allocation4 + $0xee0] sm:$0xff]  ;;  %v2390_v56 = vld [vmem:[#allocation4 + $0xf18] sm:$0xff] }
 0x86d   :  { %v2381_v48 = vld [vmem:[#allocation4 + $0xed0] sm:$0xff]  ;;  %v2394_v20 = vld [vmem:[#allocation4 + $0xf38] sm:$0xff]  ;;  %v2387_v53 = vld [vmem:[#allocation4 + $0xf00] sm:$0xff] }
 0x86e   :  { %5950 = vmatpush1.bf16.msra.mxu0 %v5949_v36  ;;  %6014 = vmatpush1.bf16.msra.mxu1 %v6013_v40  ;;  %v2364_v36 = vld [vmem:[#allocation4 + $0xe48] sm:$0xff]  ;;  %v2385_v38 = vld [vmem:[#allocation4 + $0xef0] sm:$0xff]  ;;  %v2391_v30 = vld [vmem:[#allocation4 + $0xf20] sm:$0xff]  ;;  %v6047_v7 = vpack.c.bf16 %v2394_v20, %v2390_v56 }
 0x86f   :  { %5952 = vmatprep.subr.bf16.mxu0 %v5951_v44  ;;  %6016 = vmatprep.subr.bf16.mxu1 %v6015_v29  ;;  %v2368_v40 = vld [vmem:[#allocation4 + $0xe68] sm:$0xff]  ;;  %v5969_v44 = vpack.c.bf16 %v2359_v23, %v2355_v22  ;;  %v6033_v29 = vpack.c.bf16 %v2361_v34, %v2357_v32  ;;  %v2389_v19 = vld [vmem:[#allocation4 + $0xf10] sm:$0xff]  ;;  %v2398_v22 = vld [vmem:[#allocation4 + $0xf58] sm:$0xff] }
 0x870   :  { %v5971_v57 = vpack.c.bf16 %v2368_v40, %v2364_v36  ;;  %v2393_v8 = vld [vmem:[#allocation4 + $0xf30] sm:$0xff]  ;;  %v2402_v23 = vld [vmem:[#allocation4 + $0xf78] sm:$0xff]  ;;  %v2395_v32 = vld [vmem:[#allocation4 + $0xf40] sm:$0xff] }
 0x871   :  { %v2399_v34 = vld [vmem:[#allocation4 + $0xf60] sm:$0xff]  ;;  %v6051_v40 = vpack.c.bf16 %v2402_v23, %v2398_v22  ;;  %v2397_v3 = vld [vmem:[#allocation4 + $0xf50] sm:$0xff] }
 0x872   :  { %5954 = vmatpush1.bf16.msra.mxu0 %v5953_v9  ;;  %6018 = vmatpush1.bf16.msra.mxu1 %v6017_v26  ;;  %v2372_v9 = vld [vmem:[#allocation4 + $0xe88] sm:$0xff]  ;;  %v2401_v42 = vld [vmem:[#allocation4 + $0xf70] sm:$0xff] }
 0x873   :  { %5956 = vmatprep.subr.bf16.mxu0 %v5955_v43  ;;  %6020 = vmatprep.subr.bf16.mxu1 %v6019_v46  ;;  %v2376_v26 = vld [vmem:[#allocation4 + $0xea8] sm:$0xff]  ;;  %v5973_v43 = vpack.c.bf16 %v2367_v49, %v2363_v45  ;;  %v6037_v46 = vpack.c.bf16 %v2369_v5, %v2365_v62  ;;  %v2406_v45 = vld [vmem:[#allocation4 + $0xf98] sm:$0xff]  ;;  %v2403_v62 = vld [vmem:[#allocation4 + $0xf80] sm:$0xff] }
 0x874   :  { %v5975_v52 = vpack.c.bf16 %v2376_v26, %v2372_v9  ;;  %v2410_v49 = vld [vmem:[#allocation4 + $0xfb8] sm:$0xff]  ;;  %v2407_v5 = vld [vmem:[#allocation4 + $0xfa0] sm:$0xff]  ;;  %v2405_v28 = vld [vmem:[#allocation4 + $0xf90] sm:$0xff] }
 0x875   :  { %v6055_v26 = vpack.c.bf16 %v2410_v49, %v2406_v45  ;;  %v2409_v35 = vld [vmem:[#allocation4 + $0xfb0] sm:$0xff] }
 0x876   :  { %5958 = vmatpush1.bf16.msra.mxu0 %v5957_v11  ;;  %6022 = vmatpush1.bf16.msra.mxu1 %v6021_v24  ;;  %v2380_v11 = vld [vmem:[#allocation4 + $0xec8] sm:$0xff]  ;;  %v2413_v25 = vld [vmem:[#allocation4 + $0xfd0] sm:$0xff] }
 0x877   :  { %5960 = vmatprep.subr.bf16.mxu0 %v5959_v16  ;;  %6024 = vmatprep.subr.bf16.mxu1 %v6023_v50  ;;  %v2384_v24 = vld [vmem:[#allocation4 + $0xee8] sm:$0xff]  ;;  %v5977_v16 = vpack.c.bf16 %v2375_v47, %v2371_v21  ;;  %v6041_v50 = vpack.c.bf16 %v2377_v0, %v2373_v63  ;;  %v2414_v21 = vld [vmem:[#allocation4 + $0xfd8] sm:$0xff]  ;;  %v2411_v63 = vld [vmem:[#allocation4 + $0xfc0] sm:$0xff] }
 0x878   :  { %v5979_v55 = vpack.c.bf16 %v2384_v24, %v2380_v11  ;;  %v2418_v47 = vld [vmem:[#allocation4 + $0xff8] sm:$0xff]  ;;  %v2415_v0 = vld [vmem:[#allocation4 + $0xfe0] sm:$0xff]  ;;  %v2417_v2 = vld [vmem:[#allocation4 + $0xff0] sm:$0xff] }
 0x879   :  { %v6059_v24 = vpack.c.bf16 %v2418_v47, %v2414_v21  ;;  %v2755_v56 = vld [vmem:[#allocation4 + $0x410] sm:$0xff] }
 0x87a   :  { %5962 = vmatpush1.bf16.msra.mxu0 %v5961_v6  ;;  %6026 = vmatpush1.bf16.msra.mxu1 %v6025_v51  ;;  %v2388_v6 = vld [vmem:[#allocation4 + $0xf08] sm:$0xff]  ;;  %v2759_v20 = vld [vmem:[#allocation4 + $0x430] sm:$0xff] }
 0x87b   :  { %5964 = vmatprep.subr.bf16.mxu0 %v5963_v54  ;;  %6028 = vmatprep.subr.bf16.mxu1 %v6027_v12  ;;  %v2392_v51 = vld [vmem:[#allocation4 + $0xf28] sm:$0xff]  ;;  %v5981_v54 = vpack.c.bf16 %v2383_v1, %v2379_v37  ;;  %v6045_v12 = vpack.c.bf16 %v2385_v38, %v2381_v48  ;;  %v2756_v37 = vld [vmem:[#allocation4 + $0x418] sm:$0xff]  ;;  %v2753_v48 = vld [vmem:[#allocation4 + $0x400] sm:$0xff] }
 0x87c   :  { %v5983_v15 = vpack.c.bf16 %v2392_v51, %v2388_v6  ;;  %v2760_v1 = vld [vmem:[#allocation4 + $0x438] sm:$0xff]  ;;  %v2757_v38 = vld [vmem:[#allocation4 + $0x420] sm:$0xff]  ;;  %v2763_v22 = vld [vmem:[#allocation4 + $0x450] sm:$0xff] }
 0x87d   :  { %v8387_v51 = vpack.c.bf16 %v2760_v1, %v2756_v37  ;;  %v2767_v23 = vld [vmem:[#allocation4 + $0x470] sm:$0xff] }
 0x87e   :  { %5966 = vmatpush1.bf16.msra.mxu0 %v5965_v14  ;;  %6030 = vmatpush1.bf16.msra.mxu1 %v6029_v18  ;;  %v2396_v14 = vld [vmem:[#allocation4 + $0xf48] sm:$0xff]  ;;  %v2771_v45 = vld [vmem:[#allocation4 + $0x490] sm:$0xff] }
 0x87f   :  { %5968 = vmatprep.subr.bf16.mxu0 %v5967_v27  ;;  %6032 = vmatprep.subr.bf16.mxu1 %v6031_v31  ;;  %v2400_v18 = vld [vmem:[#allocation4 + $0xf68] sm:$0xff]  ;;  %v5985_v27 = vpack.c.bf16 %v2391_v30, %v2387_v53  ;;  %v6049_v31 = vpack.c.bf16 %v2393_v8, %v2389_v19  ;;  %9694 = vst [vmem:[#allocation15_spill] sm:$0xff] %v8387_v51  ;;  %v2764_v53 = vld [vmem:[#allocation4 + $0x458] sm:$0xff]  ;;  %v2761_v19 = vld [vmem:[#allocation4 + $0x440] sm:$0xff] }
 0x880   :  { %v5987_v36 = vpack.c.bf16 %v2400_v18, %v2396_v14  ;;  %v2768_v30 = vld [vmem:[#allocation4 + $0x478] sm:$0xff]  ;;  %v2765_v8 = vld [vmem:[#allocation4 + $0x460] sm:$0xff]  ;;  %v2775_v49 = vld [vmem:[#allocation4 + $0x4b0] sm:$0xff] }
 0x881   :  { %v8397_v18 = vpack.c.bf16 %v2768_v30, %v2764_v53  ;;  %v2779_v47 = vld [vmem:[#allocation4 + $0x4d0] sm:$0xff]  ;;  %v2797_v53 = vld [vmem:[#allocation4 + $0x560] sm:$0xff] }
 0x882   :  { %5970 = vmatpush1.bf16.msra.mxu0 %v5969_v44  ;;  %6034 = vmatpush1.bf16.msra.mxu1 %v6033_v29  ;;  %v2404_v44 = vld [vmem:[#allocation4 + $0xf88] sm:$0xff]  ;;  %v2787_v1 = vld [vmem:[#allocation4 + $0x510] sm:$0xff] }
 0x883   :  { %5972 = vmatprep.subr.bf16.mxu0 %v5971_v57  ;;  %6036 = vmatprep.subr.bf16.mxu1 %v6035_v58  ;;  %v2408_v29 = vld [vmem:[#allocation4 + $0xfa8] sm:$0xff]  ;;  %v5989_v57 = vpack.c.bf16 %v2399_v34, %v2395_v32  ;;  %v6053_v58 = vpack.c.bf16 %v2401_v42, %v2397_v3  ;;  %v8405_v3 = vpack.c.bf16 %v2765_v8, %v2761_v19  ;;  %v2795_v8 = vld [vmem:[#allocation4 + $0x550] sm:$0xff] }
 0x884   :  { %v5991_v9 = vpack.c.bf16 %v2408_v29, %v2404_v44  ;;  %v2774_v34 = vld [vmem:[#allocation4 + $0x4a8] sm:$0xff]  ;;  %v8407_v42 = vpack.c.bf16 %v2767_v23, %v2763_v22  ;;  %v2769_v44 = vld [vmem:[#allocation4 + $0x480] sm:$0xff]  ;;  %v2799_v22 = vld [vmem:[#allocation4 + $0x570] sm:$0xff] }
 0x885   :  { %v2773_v29 = vld [vmem:[#allocation4 + $0x4a0] sm:$0xff]  ;;  %v2802_v23 = vld [vmem:[#allocation4 + $0x588] sm:$0xff] }
 0x886   :  { %5974 = vmatpush1.bf16.msra.mxu0 %v5973_v43  ;;  %6038 = vmatpush1.bf16.msra.mxu1 %v6037_v46  ;;  %v2412_v43 = vld [vmem:[#allocation4 + $0xfc8] sm:$0xff] }
 0x887   :  { %5976 = vmatprep.subr.bf16.mxu0 %v5975_v52  ;;  %6040 = vmatprep.subr.bf16.mxu1 %v6039_v61  ;;  %v2416_v46 = vld [vmem:[#allocation4 + $0xfe8] sm:$0xff]  ;;  %v5993_v52 = vpack.c.bf16 %v2407_v5, %v2403_v62  ;;  %v6057_v61 = vpack.c.bf16 %v2409_v35, %v2405_v28  ;;  %v2780_v62 = vld [vmem:[#allocation4 + $0x4d8] sm:$0xff]  ;;  %v8421_v28 = vpack.c.bf16 %v2775_v49, %v2771_v45  ;;  %v2777_v35 = vld [vmem:[#allocation4 + $0x4c0] sm:$0xff] }
 0x888   :  { %v5995_v11 = vpack.c.bf16 %v2416_v46, %v2412_v43  ;;  %v2784_v5 = vld [vmem:[#allocation4 + $0x4f8] sm:$0xff]  ;;  %v2781_v43 = vld [vmem:[#allocation4 + $0x4e0] sm:$0xff]  ;;  %v2803_v49 = vld [vmem:[#allocation4 + $0x590] sm:$0xff] }
 0x889   :  { %v8427_v21 = vpack.c.bf16 %v2784_v5, %v2780_v62  ;;  %v2814_v62 = vld [vmem:[#allocation4 + $0x5e8] sm:$0xff]  ;;  %v2812_v5 = vld [vmem:[#allocation4 + $0x5d8] sm:$0xff] }
 0x88a   :  { %5978 = vmatpush1.bf16.msra.mxu0 %v5977_v16  ;;  %6042 = vmatpush1.bf16.msra.mxu1 %v6041_v50  ;;  %v2754_v16 = vld [vmem:[#allocation4 + $0x408] sm:$0xff] }
 0x88b   :  { %5980 = vmatprep.subr.bf16.mxu0 %v5979_v55  ;;  %6044 = vmatprep.subr.bf16.mxu1 %v6043_v13  ;;  %v2758_v50 = vld [vmem:[#allocation4 + $0x428] sm:$0xff]  ;;  %v5997_v55 = vpack.c.bf16 %v2415_v0, %v2411_v63  ;;  %v6061_v13 = vpack.c.bf16 %v2417_v2, %v2413_v25  ;;  %v2788_v0 = vld [vmem:[#allocation4 + $0x518] sm:$0xff]  ;;  %v2785_v2 = vld [vmem:[#allocation4 + $0x500] sm:$0xff] }
 0x88c   :  { %v8385_v6 = vpack.c.bf16 %v2758_v50, %v2754_v16  ;;  %v2790_v63 = vld [vmem:[#allocation4 + $0x528] sm:$0xff]  ;;  %v2789_v16 = vld [vmem:[#allocation4 + $0x520] sm:$0xff] }
 0x88e   :  { %5982 = vmatpush1.bf16.msra.mxu0 %v5981_v54  ;;  %6046 = vmatpush1.bf16.msra.mxu1 %v6045_v12  ;;  %9693 = vst [vmem:[#allocation13_spill] sm:$0xff] %v8385_v6  ;;  %v2762_v54 = vld [vmem:[#allocation4 + $0x448] sm:$0xff] }
 0x88f   :  { %5984 = vmatprep.subr.bf16.mxu0 %v5983_v15  ;;  %6048 = vmatprep.subr.bf16.mxu1 %v6047_v7  ;;  %v2766_v12 = vld [vmem:[#allocation4 + $0x468] sm:$0xff]  ;;  %v8389_v15 = vpack.c.bf16 %v2757_v38, %v2753_v48  ;;  %v8391_v7 = vpack.c.bf16 %v2759_v20, %v2755_v56  ;;  %v2796_v38 = vld [vmem:[#allocation4 + $0x558] sm:$0xff]  ;;  %v8443_v20 = vpack.c.bf16 %v2789_v16, %v2785_v2 }
 0x890   :  { %v8395_v14 = vpack.c.bf16 %v2766_v12, %v2762_v54  ;;  %v2798_v48 = vld [vmem:[#allocation4 + $0x568] sm:$0xff]  ;;  %v2800_v56 = vld [vmem:[#allocation4 + $0x578] sm:$0xff]  ;;  %v2793_v12 = vld [vmem:[#allocation4 + $0x540] sm:$0xff] }
 0x891   :  { %v8451_v19 = vpack.c.bf16 %v2800_v56, %v2796_v38  ;;  %v2818_v2 = vld [vmem:[#allocation4 + $0x608] sm:$0xff]  ;;  %v2817_v38 = vld [vmem:[#allocation4 + $0x600] sm:$0xff] }
 0x892   :  { %5986 = vmatpush1.bf16.msra.mxu0 %v5985_v27  ;;  %6050 = vmatpush1.bf16.msra.mxu1 %v6049_v31  ;;  %v2770_v27 = vld [vmem:[#allocation4 + $0x488] sm:$0xff]  ;;  %v9695_v31 = vrot.slane %v9692_v17, 1  ;;  %v2821_v56 = vld [vmem:[#allocation4 + $0x620] sm:$0xff] }
 0x893   :  { %5988 = vmatprep.subr.bf16.mxu0 %v5987_v36  ;;  %6052 = vmatprep.subr.bf16.mxu1 %v6051_v40  ;;  %v2772_v36 = vld [vmem:[#allocation4 + $0x498] sm:$0xff]  ;;  %v2822_v16 = vld [vmem:[#allocation4 + $0x628] sm:$0xff] }
 0x894   :  { %v2145_v32 = vsel %vm2105_vm11, %v8379_v10, %v9695_v31  ;;  %v2776_v40 = vld [vmem:[#allocation4 + $0x4b8] sm:$0xff]  ;;  %v8411_v10 = vpack.c.bf16 %v2774_v34, %v2770_v27  ;;  %v2806_v27 = vld [vmem:[#allocation4 + $0x5a8] sm:$0xff]  ;;  %v8455_v34 = vpack.c.bf16 %v2797_v53, %v2793_v12  ;;  %v8485_v12 = vpack.c.bf16 %v2822_v16, %v2818_v2 }
 0x895   :  { %v8413_v17 = vpack.c.bf16 %v2776_v40, %v2772_v36  ;;  %v2804_v31 = vld [vmem:[#allocation4 + $0x598] sm:$0xff]  ;;  %v8457_v36 = vpack.c.bf16 %v2799_v22, %v2795_v8  ;;  %v2801_v40 = vld [vmem:[#allocation4 + $0x580] sm:$0xff]  ;;  %v2819_v8 = vld [vmem:[#allocation4 + $0x610] sm:$0xff] }
 0x896   :  { %5990 = vmatpush1.bf16.msra.mxu0 %v5989_v57  ;;  %6054 = vmatpush1.bf16.msra.mxu1 %v6053_v58  ;;  %v2778_v57 = vld [vmem:[#allocation4 + $0x4c8] sm:$0xff]  ;;  %v2823_v22 = vld [vmem:[#allocation4 + $0x630] sm:$0xff] }
 0x897   :  { %5992 = vmatprep.subr.bf16.mxu0 %v5991_v9  ;;  %6056 = vmatprep.subr.bf16.mxu1 %v6055_v26  ;;  %v2782_v58 = vld [vmem:[#allocation4 + $0x4e8] sm:$0xff]  ;;  %v9696_v9 = vld [vmem:[#allocation14_spill] sm:$0xff]  ;;  %v8419_v26 = vpack.c.bf16 %v2773_v29, %v2769_v44  ;;  %v2805_v44 = vld [vmem:[#allocation4 + $0x5a0] sm:$0xff]  ;;  %v8461_v29 = vpack.c.bf16 %v2806_v27, %v2802_v23 }
 0x898   :  { %v8425_v46 = vpack.c.bf16 %v2782_v58, %v2778_v57  ;;  %v2807_v57 = vld [vmem:[#allocation4 + $0x5b0] sm:$0xff]  ;;  %v2810_v58 = vld [vmem:[#allocation4 + $0x5c8] sm:$0xff] }
 0x899   :  { %v2826_v23 = vld [vmem:[#allocation4 + $0x648] sm:$0xff] }
 0x89a   :  { %5994 = vmatpush1.bf16.msra.mxu0 %v5993_v52  ;;  %6058 = vmatpush1.bf16.msra.mxu1 %v6057_v61  ;;  %v2783_v52 = vld [vmem:[#allocation4 + $0x4f0] sm:$0xff]  ;;  %v2786_v61 = vld [vmem:[#allocation4 + $0x508] sm:$0xff] }
 0x89b   :  { %5996 = vmatprep.subr.bf16.mxu0 %v5995_v11  ;;  %6060 = vmatprep.subr.bf16.mxu1 %v6059_v24  ;;  %v2792_v11 = vld [vmem:[#allocation4 + $0x538] sm:$0xff]  ;;  %v8431_v24 = vpack.c.bf16 %v2781_v43, %v2777_v35  ;;  %v8433_v25 = vpack.c.bf16 %v2783_v52, %v2779_v47  ;;  %v8437_v50 = vpack.c.bf16 %v2790_v63, %v2786_v61  ;;  %v2809_v47 = vld [vmem:[#allocation4 + $0x5c0] sm:$0xff]  ;;  %v2830_v27 = vld [vmem:[#allocation4 + $0x668] sm:$0xff] }
 0x89c   :  { %v8439_v37 = vpack.c.bf16 %v2792_v11, %v2788_v0  ;;  %v8467_v35 = vpack.c.bf16 %v2805_v44, %v2801_v40  ;;  %v8469_v43 = vpack.c.bf16 %v2807_v57, %v2803_v49  ;;  %v2813_v52 = vld [vmem:[#allocation4 + $0x5e0] sm:$0xff]  ;;  %v8473_v61 = vpack.c.bf16 %v2814_v62, %v2810_v58  ;;  %v2811_v0 = vld [vmem:[#allocation4 + $0x5d0] sm:$0xff] }
 0x89d   :  { %v2815_v11 = vld [vmem:[#allocation4 + $0x5f0] sm:$0xff]  ;;  %v8491_v40 = vpack.c.bf16 %v2821_v56, %v2817_v38  ;;  %v8493_v44 = vpack.c.bf16 %v2823_v22, %v2819_v8  ;;  %v2825_v49 = vld [vmem:[#allocation4 + $0x640] sm:$0xff]  ;;  %v8497_v58 = vpack.c.bf16 %v2830_v27, %v2826_v23  ;;  %v2842_v23 = vld [vmem:[#allocation4 + $0x6c8] sm:$0xff] }
 0x89e   :  { %5998 = vmatpush1.bf16.msra.mxu0 %v5997_v55  ;;  %6062 = vmatpush1.bf16.msra.mxu1 %v6061_v13  ;;  %v2791_v55 = vld [vmem:[#allocation4 + $0x530] sm:$0xff]  ;;  %v2794_v13 = vld [vmem:[#allocation4 + $0x548] sm:$0xff]  ;;  %v2829_v57 = vld [vmem:[#allocation4 + $0x660] sm:$0xff] }
 0x89f   :  { %6064 = vmatprep.subr.bf16.mxu0 %v8385_v6  ;;  %6128 = vmatprep.subr.bf16.mxu1 %v8387_v51  ;;  %v8445_v54 = vpack.c.bf16 %v2791_v55, %v2787_v1  ;;  %v8449_v30 = vpack.c.bf16 %v2798_v48, %v2794_v13  ;;  %v2820_v1 = vld [vmem:[#allocation4 + $0x618] sm:$0xff]  ;;  %v8479_v13 = vpack.c.bf16 %v2813_v52, %v2809_v47  ;;  %v2834_v47 = vld [vmem:[#allocation4 + $0x688] sm:$0xff]  ;;  %v2835_v8 = vld [vmem:[#allocation4 + $0x690] sm:$0xff] }
 0x8a0   :  { %v2824_v55 = vld [vmem:[#allocation4 + $0x638] sm:$0xff]  ;;  %v8481_v48 = vpack.c.bf16 %v2815_v11, %v2811_v0  ;;  %v2838_v52 = vld [vmem:[#allocation4 + $0x6a8] sm:$0xff]  ;;  %v8503_v2 = vpack.c.bf16 %v2829_v57, %v2825_v49  ;;  %v2839_v22 = vld [vmem:[#allocation4 + $0x6b0] sm:$0xff] }
 0x8a1   :  { %2672 = vmatmul.mubr.f32.vlgmr.msra.gmra.mrb[18].mxu0 %v2145_v32  ;;  %2743 = vmatmul.mubr.f32.vlgmr.msra.gmra.mrb[18].mxu1 %v2145_v32  ;;  %v2808_v32 = vld [vmem:[#allocation4 + $0x5b8] sm:$0xff]  ;;  %v8487_v53 = vpack.c.bf16 %v2824_v55, %v2820_v1  ;;  %v2833_v1 = vld [vmem:[#allocation4 + $0x680] sm:$0xff]  ;;  %v8509_v38 = vpack.c.bf16 %v2838_v52, %v2834_v47  ;;  %v2846_v27 = vld [vmem:[#allocation4 + $0x6e8] sm:$0xff]  ;;  %v8517_v57 = vpack.c.bf16 %v2839_v22, %v2835_v8 }
 0x8a2   :  { %6066 = vmatpush1.bf16.msra.mxu0 %v8389_v15  ;;  %6130 = vmatpush1.bf16.msra.mxu1 %v8391_v7  ;;  %v8463_v45 = vpack.c.bf16 %v2808_v32, %v2804_v31  ;;  %v2828_v31 = vld [vmem:[#allocation4 + $0x658] sm:$0xff]  ;;  %v2837_v55 = vld [vmem:[#allocation4 + $0x6a0] sm:$0xff]  ;;  %v8521_v47 = vpack.c.bf16 %v2846_v27, %v2842_v23  ;;  %v8533_v23 = vpack.c.bf16 %v2854_v41, %v2850_v60  ;;  %v2859_v41 = vld [vmem:[#allocation4 + $0x750] sm:$0xff] }
 0x8a3   :  { %6068 = vmatprep.subr.bf16.mxu0 %v8395_v14  ;;  %6132 = vmatprep.subr.bf16.mxu1 %v8397_v18  ;;  %v2832_v32 = vld [vmem:[#allocation4 + $0x678] sm:$0xff]  ;;  %9698 = vst [vmem:[#allocation19_spill] sm:$0xff] %v8509_v38  ;;  %v8515_v49 = vpack.c.bf16 %v2837_v55, %v2833_v1  ;;  %9701 = vst [vmem:[#allocation22_spill] sm:$0xff] %v8517_v57  ;;  %v2849_v8 = vld [vmem:[#allocation4 + $0x700] sm:$0xff]  ;;  %v8535_v27 = vpack.c.bf16 %v2856_v4, %v2852_v59 }
 0x8a4   :  { %2993 = vmatprep.mubr.f32.mxu0 %v9696_v9  ;;  %3064 = vmatprep.mubr.f32.mxu1 %v9696_v9  ;;  %v2816_v9 = vld [vmem:[#allocation4 + $0x5f8] sm:$0xff]  ;;  %v8499_v62 = vpack.c.bf16 %v2832_v32, %v2828_v31  ;;  %9702 = vst [vmem:[#allocation23_spill] sm:$0xff] %v8521_v47  ;;  %v2853_v22 = vld [vmem:[#allocation4 + $0x720] sm:$0xff]  ;;  %9706 = vst [vmem:[#allocation28_spill] sm:$0xff] %v8533_v23  ;;  %v8545_v60 = vpack.c.bf16 %v2862_v39, %v2858_v33 }
 0x8a5   :  { %v8475_v63 = vpack.c.bf16 %v2816_v9, %v2812_v5  ;;  %v2827_v5 = vld [vmem:[#allocation4 + $0x650] sm:$0xff]  ;;  %v2836_v0 = vld [vmem:[#allocation4 + $0x698] sm:$0xff]  ;;  %9700 = vst [vmem:[#allocation21_spill] sm:$0xff] %v8515_v49  ;;  %9707 = vst [vmem:[#allocation29_spill] sm:$0xff] %v8535_v27 }
 0x8a6   :  { %6070 = vmatpush1.bf16.msra.mxu0 %v8405_v3  ;;  %6134 = vmatpush1.bf16.msra.mxu1 %v8407_v42  ;;  %v2831_v9 = vld [vmem:[#allocation4 + $0x670] sm:$0xff]  ;;  %v2840_v11 = vld [vmem:[#allocation4 + $0x6b8] sm:$0xff]  ;;  %9710 = vst [vmem:[#allocation32_spill] sm:$0xff] %v8545_v60 }
 0x8a7   :  { %6072 = vmatprep.subr.bf16.mxu0 %v8411_v10  ;;  %6136 = vmatprep.subr.bf16.mxu1 %v8413_v17  ;;  %v8505_v16 = vpack.c.bf16 %v2831_v9, %v2827_v5  ;;  %v8511_v56 = vpack.c.bf16 %v2840_v11, %v2836_v0  ;;  %v2844_v31 = vld [vmem:[#allocation4 + $0x6d8] sm:$0xff]  ;;  %v2841_v5 = vld [vmem:[#allocation4 + $0x6c0] sm:$0xff]  ;;  %v2843_v0 = vld [vmem:[#allocation4 + $0x6d0] sm:$0xff] }
 0x8a8   :  { %v2848_v32 = vld [vmem:[#allocation4 + $0x6f8] sm:$0xff]  ;;  %v2845_v9 = vld [vmem:[#allocation4 + $0x6e0] sm:$0xff]  ;;  %v2847_v11 = vld [vmem:[#allocation4 + $0x6f0] sm:$0xff] }
 0x8a9   :  { %9697 = vst [vmem:[#allocation18_spill] sm:$0xff] %v8505_v16  ;;  %9699 = vst [vmem:[#allocation20_spill] sm:$0xff] %v8511_v56  ;;  %v8523_v52 = vpack.c.bf16 %v2848_v32, %v2844_v31  ;;  %v8527_v1 = vpack.c.bf16 %v2845_v9, %v2841_v5  ;;  %v8529_v55 = vpack.c.bf16 %v2847_v11, %v2843_v0  ;;  %v2851_v31 = vld [vmem:[#allocation4 + $0x710] sm:$0xff]  ;;  %v2857_v0 = vld [vmem:[#allocation4 + $0x740] sm:$0xff] }
 0x8aa   :  { %6074 = vmatpush1.bf16.msra.mxu0 %v8419_v26  ;;  %6138 = vmatpush1.bf16.msra.mxu1 %v8421_v28  ;;  %v2855_v32 = vld [vmem:[#allocation4 + $0x730] sm:$0xff]  ;;  %v8539_v5 = vpack.c.bf16 %v2853_v22, %v2849_v8  ;;  %v2861_v11 = vld [vmem:[#allocation4 + $0x760] sm:$0xff] }
 0x8ab   :  { %6076 = vmatprep.subr.bf16.mxu0 %v8425_v46  ;;  %6140 = vmatprep.subr.bf16.mxu1 %v8427_v21  ;;  %9703 = vst [vmem:[#allocation24_spill] sm:$0xff] %v8523_v52  ;;  %9704 = vst [vmem:[#allocation25_spill] sm:$0xff] %v8527_v1  ;;  %v8541_v9 = vpack.c.bf16 %v2855_v32, %v2851_v31  ;;  %v2863_v4 = vld [vmem:[#allocation4 + $0x770] sm:$0xff]  ;;  %v8551_v8 = vpack.c.bf16 %v2861_v11, %v2857_v0  ;;  %v2865_v31 = vld [vmem:[#allocation4 + $0x780] sm:$0xff] }
 0x8ac   :  { %9705 = vst [vmem:[#allocation27_spill] sm:$0xff] %v8529_v55  ;;  %9708 = vst [vmem:[#allocation30_spill] sm:$0xff] %v8539_v5  ;;  %v8553_v22 = vpack.c.bf16 %v2863_v4, %v2859_v41  ;;  %v2869_v32 = vld [vmem:[#allocation4 + $0x7a0] sm:$0xff]  ;;  %v2879_v4 = vld [vmem:[#allocation4 + $0x7f0] sm:$0xff] }
 0x8ad   :  { %9709 = vst [vmem:[#allocation31_spill] sm:$0xff] %v8541_v9  ;;  %9712 = vst [vmem:[#allocation34_spill] sm:$0xff] %v8551_v8  ;;  %v8563_v0 = vpack.c.bf16 %v2869_v32, %v2865_v31  ;;  %v2873_v41 = vld [vmem:[#allocation4 + $0x7c0] sm:$0xff] }
 0x8ae   :  { %6078 = vmatpush1.bf16.msra.mxu0 %v8431_v24  ;;  %6142 = vmatpush1.bf16.msra.mxu1 %v8433_v25  ;;  %9713 = vst [vmem:[#allocation35_spill] sm:$0xff] %v8553_v22 }
 0x8af   :  { %6080 = vmatprep.subr.bf16.mxu0 %v8437_v50  ;;  %6144 = vmatprep.subr.bf16.mxu1 %v8439_v37  ;;  %9716 = vst [vmem:[#allocation38_spill] sm:$0xff] %v8563_v0 }
 0x8b2   :  { %6082 = vmatpush1.bf16.msra.mxu0 %v8443_v20  ;;  %6146 = vmatpush1.bf16.msra.mxu1 %v8445_v54 }
 0x8b3   :  { %6084 = vmatprep.subr.bf16.mxu0 %v8449_v30  ;;  %6148 = vmatprep.subr.bf16.mxu1 %v8451_v19 }
 0x8b6   :  { %6086 = vmatpush1.bf16.msra.mxu0 %v8455_v34  ;;  %6150 = vmatpush1.bf16.msra.mxu1 %v8457_v36 }
 0x8b7   :  { %6088 = vmatprep.subr.bf16.mxu0 %v8461_v29  ;;  %6152 = vmatprep.subr.bf16.mxu1 %v8463_v45 }
 0x8ba   :  { %6090 = vmatpush1.bf16.msra.mxu0 %v8467_v35  ;;  %6154 = vmatpush1.bf16.msra.mxu1 %v8469_v43 }
 0x8bb   :  { %6092 = vmatprep.subr.bf16.mxu0 %v8473_v61  ;;  %6156 = vmatprep.subr.bf16.mxu1 %v8475_v63 }
 0x8be   :  { %6094 = vmatpush1.bf16.msra.mxu0 %v8479_v13  ;;  %6158 = vmatpush1.bf16.msra.mxu1 %v8481_v48 }
 0x8bf   :  { %6096 = vmatprep.subr.bf16.mxu0 %v8485_v12  ;;  %6160 = vmatprep.subr.bf16.mxu1 %v8487_v53 }
 0x8c2   :  { %6098 = vmatpush1.bf16.msra.mxu0 %v8491_v40  ;;  %6162 = vmatpush1.bf16.msra.mxu1 %v8493_v44 }
 0x8c3   :  { %6100 = vmatprep.subr.bf16.mxu0 %v8497_v58  ;;  %6164 = vmatprep.subr.bf16.mxu1 %v8499_v62 }
 0x8c6   :  { %6102 = vmatpush1.bf16.msra.mxu0 %v8503_v2  ;;  %6166 = vmatpush1.bf16.msra.mxu1 %v8505_v16 }
 0x8c7   :  { %6104 = vmatprep.subr.bf16.mxu0 %v8509_v38  ;;  %6168 = vmatprep.subr.bf16.mxu1 %v8511_v56 }
 0x8ca   :  { %6106 = vmatpush1.bf16.msra.mxu0 %v8515_v49  ;;  %6170 = vmatpush1.bf16.msra.mxu1 %v8517_v57  ;;  %v2860_v49 = vld [vmem:[#allocation4 + $0x758] sm:$0xff] }
 0x8cb   :  { %6108 = vmatprep.subr.bf16.mxu0 %v8521_v47  ;;  %6172 = vmatprep.subr.bf16.mxu1 %v8523_v52  ;;  %v2864_v57 = vld [vmem:[#allocation4 + $0x778] sm:$0xff]  ;;  %v2866_v52 = vld [vmem:[#allocation4 + $0x788] sm:$0xff] }
 0x8cc   :  { %v8547_v59 = vpack.c.bf16 %v2864_v57, %v2860_v49  ;;  %v2868_v47 = vld [vmem:[#allocation4 + $0x798] sm:$0xff]  ;;  %v2867_v49 = vld [vmem:[#allocation4 + $0x790] sm:$0xff] }
 0x8cd   :  { %v2871_v57 = vld [vmem:[#allocation4 + $0x7b0] sm:$0xff] }
 0x8ce   :  { %6110 = vmatpush1.bf16.msra.mxu0 %v8527_v1  ;;  %6174 = vmatpush1.bf16.msra.mxu1 %v8529_v55  ;;  %9711 = vst [vmem:[#allocation33_spill] sm:$0xff] %v8547_v59  ;;  %v2870_v1 = vld [vmem:[#allocation4 + $0x7a8] sm:$0xff]  ;;  %v2872_v55 = vld [vmem:[#allocation4 + $0x7b8] sm:$0xff]  ;;  %v8565_v11 = vpack.c.bf16 %v2871_v57, %v2867_v49  ;;  %v9727_v57 = vld [vmem:[#allocation25_spill] sm:$0xff] }
 0x8cf   :  { %6112 = vmatprep.subr.bf16.mxu0 %v8533_v23  ;;  %6176 = vmatprep.subr.bf16.mxu1 %v8535_v27  ;;  %v8557_v39 = vpack.c.bf16 %v2870_v1, %v2866_v52  ;;  %v8559_v33 = vpack.c.bf16 %v2872_v55, %v2868_v47  ;;  %v2874_v27 = vld [vmem:[#allocation4 + $0x7c8] sm:$0xff]  ;;  %v2876_v23 = vld [vmem:[#allocation4 + $0x7d8] sm:$0xff]  ;;  %v2877_v1 = vld [vmem:[#allocation4 + $0x7e0] sm:$0xff] }
 0x8d0   :  { %9717 = vst [vmem:[#allocation39_spill] sm:$0xff] %v8565_v11  ;;  %v2875_v55 = vld [vmem:[#allocation4 + $0x7d0] sm:$0xff]  ;;  %v8575_v31 = vpack.c.bf16 %v2877_v1, %v2873_v41  ;;  %v9726_v49 = vld [vmem:[#allocation24_spill] sm:$0xff]  ;;  %v9728_v41 = vld [vmem:[#allocation27_spill] sm:$0xff] }
 0x8d1   :  { %9714 = vst [vmem:[#allocation36_spill] sm:$0xff] %v8557_v39  ;;  %9715 = vst [vmem:[#allocation37_spill] sm:$0xff] %v8559_v33  ;;  %v8577_v32 = vpack.c.bf16 %v2879_v4, %v2875_v55  ;;  %v9729_v1 = vld [vmem:[#allocation28_spill] sm:$0xff]  ;;  %v9730_v55 = vld [vmem:[#allocation29_spill] sm:$0xff] }
 0x8d2   :  { %6114 = vmatpush1.bf16.msra.mxu0 %v8539_v5  ;;  %6178 = vmatpush1.bf16.msra.mxu1 %v8541_v9  ;;  %v2878_v5 = vld [vmem:[#allocation4 + $0x7e8] sm:$0xff]  ;;  %v2880_v9 = vld [vmem:[#allocation4 + $0x7f8] sm:$0xff]  ;;  %9720 = vst [vmem:[#allocation42_spill] sm:$0xff] %v8575_v31 }
 0x8d3   :  { %6116 = vmatprep.subr.bf16.mxu0 %v8545_v60  ;;  %6180 = vmatprep.subr.bf16.mxu1 %v8547_v59  ;;  %v8569_v47 = vpack.c.bf16 %v2878_v5, %v2874_v27  ;;  %v8571_v52 = vpack.c.bf16 %v2880_v9, %v2876_v23  ;;  %9721 = vst [vmem:[#allocation43_spill] sm:$0xff] %v8577_v32  ;;  %v9722_v23 = vld [vmem:[#allocation45_spill] sm:$0xff]  ;;  %v9724_v5 = vld [vmem:[#allocation22_spill] sm:$0xff]  ;;  %v9725_v9 = vld [vmem:[#allocation23_spill] sm:$0xff] }
 0x8d4   :  { %v9723_v27 = vld [vmem:[#allocation21_spill] sm:$0xff]  ;;  %v9731_v4 = vld [vmem:[#allocation30_spill] sm:$0xff] }
 0x8d5   :  { %9718 = vst [vmem:[#allocation40_spill] sm:$0xff] %v8569_v47  ;;  %9719 = vst [vmem:[#allocation41_spill] sm:$0xff] %v8571_v52 }
 0x8d6   :  { %6118 = vmatpush1.bf16.msra.mxu0 %v8551_v8  ;;  %6182 = vmatpush1.bf16.msra.mxu1 %v8553_v22 }
 0x8d7   :  { %6120 = vmatprep.subr.bf16.mxu0 %v8557_v39  ;;  %6184 = vmatprep.subr.bf16.mxu1 %v8559_v33 }
 0x8da   :  { %6122 = vmatpush1.bf16.msra.mxu0 %v8563_v0  ;;  %6186 = vmatpush1.bf16.msra.mxu1 %v8565_v11 }
 0x8db   :  { %6124 = vmatprep.subr.bf16.mxu0 %v8569_v47  ;;  %6188 = vmatprep.subr.bf16.mxu1 %v8571_v52 }
 0x8de   :  { %6126 = vmatpush1.bf16.msra.mxu0 %v8575_v31  ;;  %6190 = vmatpush1.bf16.msra.mxu1 %v8577_v32 }
 0x8df   :  { %6192 = vmatprep.subr.bf16.mxu0 %v8385_v6  ;;  %6256 = vmatprep.subr.bf16.mxu1 %v8387_v51 }
 0x8e1   :  { %2994 = vmatmul.mubr.f32.vlgmr.msra.gmra.mrb[20].mxu0 %v9722_v23  ;;  %3065 = vmatmul.mubr.f32.vlgmr.msra.gmra.mrb[20].mxu1 %v9722_v23  ;;  %v9732_v23 = vld [vmem:[#allocation31_spill] sm:$0xff] }
 0x8e2   :  { %6194 = vmatpush1.bf16.msra.mxu0 %v8389_v15  ;;  %6258 = vmatpush1.bf16.msra.mxu1 %v8391_v7 }
 0x8e3   :  { %6196 = vmatprep.subr.bf16.mxu0 %v8395_v14  ;;  %6260 = vmatprep.subr.bf16.mxu1 %v8397_v18 }
 0x8e6   :  { %6198 = vmatpush1.bf16.msra.mxu0 %v8405_v3  ;;  %6262 = vmatpush1.bf16.msra.mxu1 %v8407_v42 }
 0x8e7   :  { %6200 = vmatprep.subr.bf16.mxu0 %v8411_v10  ;;  %6264 = vmatprep.subr.bf16.mxu1 %v8413_v17 }
 0x8ea   :  { %6202 = vmatpush1.bf16.msra.mxu0 %v8419_v26  ;;  %6266 = vmatpush1.bf16.msra.mxu1 %v8421_v28 }
 0x8eb   :  { %6204 = vmatprep.subr.bf16.mxu0 %v8425_v46  ;;  %6268 = vmatprep.subr.bf16.mxu1 %v8427_v21 }
 0x8ee   :  { %6206 = vmatpush1.bf16.msra.mxu0 %v8431_v24  ;;  %6270 = vmatpush1.bf16.msra.mxu1 %v8433_v25 }
 0x8ef   :  { %6208 = vmatprep.subr.bf16.mxu0 %v8437_v50  ;;  %6272 = vmatprep.subr.bf16.mxu1 %v8439_v37 }
 0x8f2   :  { %6210 = vmatpush1.bf16.msra.mxu0 %v8443_v20  ;;  %6274 = vmatpush1.bf16.msra.mxu1 %v8445_v54 }
 0x8f3   :  { %6212 = vmatprep.subr.bf16.mxu0 %v8449_v30  ;;  %6276 = vmatprep.subr.bf16.mxu1 %v8451_v19 }
 0x8f6   :  { %6214 = vmatpush1.bf16.msra.mxu0 %v8455_v34  ;;  %6278 = vmatpush1.bf16.msra.mxu1 %v8457_v36 }
 0x8f7   :  { %6216 = vmatprep.subr.bf16.mxu0 %v8461_v29  ;;  %6280 = vmatprep.subr.bf16.mxu1 %v8463_v45 }
 0x8fa   :  { %6218 = vmatpush1.bf16.msra.mxu0 %v8467_v35  ;;  %6282 = vmatpush1.bf16.msra.mxu1 %v8469_v43 }
 0x8fb   :  { %6220 = vmatprep.subr.bf16.mxu0 %v8473_v61  ;;  %6284 = vmatprep.subr.bf16.mxu1 %v8475_v63 }
 0x8fe   :  { %6222 = vmatpush1.bf16.msra.mxu0 %v8479_v13  ;;  %6286 = vmatpush1.bf16.msra.mxu1 %v8481_v48 }
 0x8ff   :  { %6224 = vmatprep.subr.bf16.mxu0 %v8485_v12  ;;  %6288 = vmatprep.subr.bf16.mxu1 %v8487_v53 }
 0x902   :  { %6226 = vmatpush1.bf16.msra.mxu0 %v8491_v40  ;;  %6290 = vmatpush1.bf16.msra.mxu1 %v8493_v44 }
 0x903   :  { %6228 = vmatprep.subr.bf16.mxu0 %v8497_v58  ;;  %6292 = vmatprep.subr.bf16.mxu1 %v8499_v62 }
 0x906   :  { %6230 = vmatpush1.bf16.msra.mxu0 %v8503_v2  ;;  %6294 = vmatpush1.bf16.msra.mxu1 %v8505_v16 }
 0x907   :  { %6232 = vmatprep.subr.bf16.mxu0 %v8509_v38  ;;  %6296 = vmatprep.subr.bf16.mxu1 %v8511_v56 }
 0x90a   :  { %6234 = vmatpush1.bf16.msra.mxu0 %v9723_v27  ;;  %6298 = vmatpush1.bf16.msra.mxu1 %v9724_v5 }
 0x90b   :  { %6236 = vmatprep.subr.bf16.mxu0 %v9725_v9  ;;  %6300 = vmatprep.subr.bf16.mxu1 %v9726_v49 }
 0x90e   :  { %6238 = vmatpush1.bf16.msra.mxu0 %v9727_v57  ;;  %6302 = vmatpush1.bf16.msra.mxu1 %v9728_v41 }
 0x90f   :  { %6240 = vmatprep.subr.bf16.mxu0 %v9729_v1  ;;  %6304 = vmatprep.subr.bf16.mxu1 %v9730_v55 }
 0x912   :  { %6242 = vmatpush1.bf16.msra.mxu0 %v9731_v4  ;;  %6306 = vmatpush1.bf16.msra.mxu1 %v9732_v23 }
 0x913   :  { %6244 = vmatprep.subr.bf16.mxu0 %v8545_v60  ;;  %6308 = vmatprep.subr.bf16.mxu1 %v8547_v59 }
 0x916   :  { %6246 = vmatpush1.bf16.msra.mxu0 %v8551_v8  ;;  %6310 = vmatpush1.bf16.msra.mxu1 %v8553_v22  ;;  %v102_v22 = vld [vmem:[#allocation8 + $0x4] ss:$8 sm:$0xf] }
 0x917   :  { %6248 = vmatprep.subr.bf16.mxu0 %v8557_v39  ;;  %6312 = vmatprep.subr.bf16.mxu1 %v8559_v33  ;;  %v9733_v39 = vld [vmem:[#allocation11_spill] sm:$0xff] }
 0x918   :  { %v2423_v8 = vrot.slane %v102_v22, %v9733_v39  ;;  %v9734_v33 = vld [vmem:[#allocation47_spill] sm:$0xff] }
 0x919   :  { %v2431_v59 = vrot.slane %v102_v22, %v9734_v33 }
 0x91a   :  { %6250 = vmatpush1.bf16.msra.mxu0 %v8563_v0  ;;  %6314 = vmatpush1.bf16.msra.mxu1 %v8565_v11  ;;  %v9735_v0 = vld [vmem:[#allocation46_spill] sm:$0xff]  ;;  %v9736_v11 = vld [vmem:[#allocation48_spill] sm:$0xff] }
 0x91b   :  { %6252 = vmatprep.subr.bf16.mxu0 %v8569_v47  ;;  %6316 = vmatprep.subr.bf16.mxu1 %v8571_v52  ;;  %v2427_v60 = vrot.slane %v102_v22, %v9735_v0  ;;  %v2435_v23 = vrot.slane %v102_v22, %v9736_v11 }
 0x91e   :  { %6254 = vmatpush1.bf16.msra.mxu0 %v8575_v31  ;;  %6318 = vmatpush1.bf16.msra.mxu1 %v8577_v32 }
 0x91f   :  { %6320 = vmatprep.subr.bf16.mxu0 %v8385_v6  ;;  %6384 = vmatprep.subr.bf16.mxu1 %v8387_v51  ;;  %v104_v51 = vld [vmem:[#allocation8 + $0x5] ss:$8 sm:$0xf] }
 0x920   :  { %v2590_v6 = vrot.slane %v104_v51, %v9733_v39  ;;  %v2598_v57 = vrot.slane %v104_v51, %v9734_v33  ;;  %v2594_v49 = vrot.slane %v104_v51, %v9735_v0  ;;  %v2602_v22 = vrot.slane %v104_v51, %v9736_v11 }
 0x934   :  { %v2506_v47 = vpop.f32.mrb[16].mxu0  ;;  %v2577_v4 = vpop.f32.mrb[16].mxu1 }
 0x935   :  { %v2507_v52 = vadd.f32 %v2506_v47, %v2423_v8  ;;  %v2578_v55 = vadd.f32 %v2577_v4, %v2431_v59  ;;  %v2508_v31 = vpop.f32.mrb[17].mxu0  ;;  %v2579_v1 = vpop.f32.mrb[17].mxu1 }
 0x936   :  { %v2509_v32 = vadd.f32 %v2508_v31, %v2427_v60  ;;  %v2580_v41 = vadd.f32 %v2579_v1, %v2435_v23 }
 0x937   :  { %2582 = vst [vmem:[#allocation2] sm:$0xff] %v2507_v52  ;;  %2584 = vst [vmem:[#allocation2 + $0x10] sm:$0xff] %v2578_v55 }
 0x938   :  { %2583 = vst [vmem:[#allocation2 + $0x8] sm:$0xff] %v2509_v32  ;;  %2585 = vst [vmem:[#allocation2 + $0x18] sm:$0xff] %v2580_v41 }
 0x93f   :  { %v2881_v41 = vld [vmem:[#allocation2] ss:$8 sm:$0xf] }
 0x940   :  { %v2887_v51 = vrot.slane %v2881_v41, %v9733_v39  ;;  %v2891_v23 = vrot.slane %v2881_v41, %v9735_v0 }
 0x974   :  { %v2673_v9 = vpop.f32.mrb[18].mxu0  ;;  %v2744_v8 = vpop.f32.mrb[18].mxu1 }
 0x975   :  { %v2674_v59 = vadd.f32 %v2673_v9, %v2590_v6  ;;  %v2745_v47 = vadd.f32 %v2744_v8, %v2598_v57  ;;  %v2675_v4 = vpop.f32.mrb[19].mxu0  ;;  %v2746_v60 = vpop.f32.mrb[19].mxu1 }
 0x976   :  { %v2676_v31 = vadd.f32 %v2675_v4, %v2594_v49  ;;  %v2747_v52 = vadd.f32 %v2746_v60, %v2602_v22  ;;  %v2895_v4 = vrot.slane %v2881_v41, %v9734_v33 }
 0x977   :  { %2749 = vst [vmem:[#allocation3] sm:$0xff] %v2674_v59  ;;  %2751 = vst [vmem:[#allocation3 + $0x10] sm:$0xff] %v2745_v47 }
 0x978   :  { %2750 = vst [vmem:[#allocation3 + $0x8] sm:$0xff] %v2676_v31  ;;  %2752 = vst [vmem:[#allocation3 + $0x18] sm:$0xff] %v2747_v52 }
 0x97f   :  { %v2882_v32 = vld [vmem:[#allocation3] ss:$8 sm:$0xf] }
 0x980   :  { %v2908_v1 = vrot.slane %v2882_v32, %v9733_v39  ;;  %v2912_v55 = vrot.slane %v2882_v32, %v9735_v0  ;;  %v2916_v49 = vrot.slane %v2882_v32, %v9734_v33  ;;  %v2920_v0 = vrot.slane %v2882_v32, %v9736_v11 }
 0x982   :  { %v2925_v6 = vsel %vm400_vm5, %v2887_v51, %v2908_v1  ;;  %v2926_v8 = vsel %vm400_vm5, %v2891_v23, %v2912_v55  ;;  %v2927_v52 = vsel %vm400_vm5, %v2895_v4, %v2916_v49  ;;  %v2899_v51 = vrot.slane %v2881_v41, %v9736_v11 }
 0x9b4   :  { %v2995_v9 = vpop.f32.mrb[20].mxu0  ;;  %v3066_v57 = vpop.f32.mrb[20].mxu1 }
 0x9b5   :  { %v2996_v22 = vadd.f32 %v2995_v9, %v2925_v6  ;;  %v2997_v59 = vpop.f32.mrb[21].mxu0  ;;  %v3068_v47 = vpop.f32.mrb[21].mxu1  ;;  %v3067_v1 = vadd.f32 %v3066_v57, %v2927_v52  ;;  %v2928_v6 = vsel %vm400_vm5, %v2899_v51, %v2920_v0  ;;  %v9741_v51 = vld [vmem:[#allocation23_spill] sm:$0xff] }
 0x9b6   :  { %v2998_v60 = vadd.f32 %v2997_v59, %v2926_v8  ;;  %v3069_v55 = vadd.f32 %v3068_v47, %v2928_v6  ;;  %v9742_v6 = vld [vmem:[#allocation24_spill] sm:$0xff] }
 0x9b7   :  { %v3071_v31 = vmul.f32 0.5, %v2996_v22 }
 0x9b8   :  { %v3072_v39 = vmul.f32 0.5, %v2998_v60  ;;  %v3074_v23 = vmul.f32 0.5, %v3069_v55  ;;  %v9743_v55 = vld [vmem:[#allocation25_spill] sm:$0xff] }
 0x9b9   :  { %7212 = vtanh.f32 %v3071_v31  ;;  %v9738_v31 = vld [vmem:[#allocation12_spill] sm:$0xff] }
 0x9ba   :  { %7214 = vtanh.f32 %v3072_v39 }
 0x9bb   :  { %7216 = vtanh.f32 %v3067_v1  ;;  %v9740_v1 = vld [vmem:[#allocation22_spill] sm:$0xff] }
 0x9bc   :  { %7218 = vtanh.f32 %v3074_v23  ;;  %v9744_v23 = vld [vmem:[#allocation27_spill] sm:$0xff] }
 0x9c3   :  { %v7213_v9 = vpop.eup %7212 }
 0x9c4   :  { %v7215_v5 = vpop.eup %7214  ;;  %v3079_v33 = vmul.f32 0.5, %v7213_v9  ;;  %v9745_v9 = vld [vmem:[#allocation28_spill] sm:$0xff] }
 0x9c5   :  { %v3080_v8 = vmul.f32 0.5, %v7215_v5  ;;  %v7217_v49 = vpop.eup %7216  ;;  %v9739_v5 = vld [vmem:[#allocation26_spill] sm:$0xff] }
 0x9c6   :  { %v3083_v22 = vadd.f32 0.5, %v3079_v33  ;;  %v7219_v39 = vpop.eup %7218 }
 0x9c7   :  { %v3084_v59 = vadd.f32 0.5, %v3080_v8  ;;  %v3082_v41 = vmul.f32 0.5, %v7219_v39  ;;  %v9746_v8 = vld [vmem:[#allocation29_spill] sm:$0xff]  ;;  %v9752_v39 = vld [vmem:[#allocation35_spill] sm:$0xff] }
 0x9c8   :  { %v3088_v4 = vmul.f32 %v7217_v49, %v3083_v22  ;;  %v9747_v22 = vld [vmem:[#allocation30_spill] sm:$0xff]  ;;  %v9748_v49 = vld [vmem:[#allocation31_spill] sm:$0xff] }
 0x9c9   :  { %v3087_v32 = vmul.f32 0.0, %v3084_v59  ;;  %v3086_v0 = vadd.f32 0.5, %v3082_v41  ;;  %v9749_v59 = vld [vmem:[#allocation32_spill] sm:$0xff] }
 0x9ca   :  { %v9753_v41 = vld [vmem:[#allocation36_spill] sm:$0xff] }
 0x9cb   :  { %v8671_v60 = vadd.f32 %v3088_v4, %v3087_v32  ;;  %v9750_v4 = vld [vmem:[#allocation33_spill] sm:$0xff]  ;;  %v9751_v32 = vld [vmem:[#allocation34_spill] sm:$0xff] }
 0x9cd   :  { %7220 = vtanh.f32 %v8671_v60 }
 0x9d7   :  { %v7221_v57 = vpop.eup %7220 }
 0x9d8   :  { %v8674_v47 = vmul.f32 %v7221_v57, %v3086_v0  ;;  %v9754_v0 = vld [vmem:[#allocation37_spill] sm:$0xff]  ;;  %v9755_v57 = vld [vmem:[#allocation38_spill] sm:$0xff] }
 0x9da   :  { %9737 = vst [vmem:[#allocation44_spill] sm:$0xff] %v8674_v47  ;;  %v3093_v52 = vmul.f32 %v9738_v31, %v8674_v47  ;;  %v3092_v33 = vmul.f32 %v9739_v5, %v8674_v47  ;;  %v9758_v47 = vld [vmem:[#allocation41_spill] sm:$0xff] }
 0x9dc   :  { %3206 = vmatprep.mubr.f32.mxu0 %v3093_v52  ;;  %3277 = vmatprep.mubr.f32.mxu1 %v3093_v52  ;;  %v9756_v52 = vld [vmem:[#allocation39_spill] sm:$0xff] }
 0x9dd   :  { %3207 = vmatmul.mubr.f32.vlgmr.msra.gmra.mrb[22].mxu0 %v3092_v33  ;;  %3278 = vmatmul.mubr.f32.vlgmr.msra.gmra.mrb[22].mxu1 %v3092_v33  ;;  %v9757_v33 = vld [vmem:[#allocation40_spill] sm:$0xff] }
 0x9de   :  { %6322 = vmatpush1.bf16.msra.mxu0 %v8389_v15  ;;  %6386 = vmatpush1.bf16.msra.mxu1 %v8391_v7 }
 0x9df   :  { %6324 = vmatprep.subr.bf16.mxu0 %v8395_v14  ;;  %6388 = vmatprep.subr.bf16.mxu1 %v8397_v18 }
 0x9e2   :  { %6326 = vmatpush1.bf16.msra.mxu0 %v8405_v3  ;;  %6390 = vmatpush1.bf16.msra.mxu1 %v8407_v42 }
 0x9e3   :  { %6328 = vmatprep.subr.bf16.mxu0 %v8411_v10  ;;  %6392 = vmatprep.subr.bf16.mxu1 %v8413_v17 }
 0x9e6   :  { %6330 = vmatpush1.bf16.msra.mxu0 %v8419_v26  ;;  %6394 = vmatpush1.bf16.msra.mxu1 %v8421_v28 }
 0x9e7   :  { %6332 = vmatprep.subr.bf16.mxu0 %v8425_v46  ;;  %6396 = vmatprep.subr.bf16.mxu1 %v8427_v21 }
 0x9ea   :  { %6334 = vmatpush1.bf16.msra.mxu0 %v8431_v24  ;;  %6398 = vmatpush1.bf16.msra.mxu1 %v8433_v25 }
 0x9eb   :  { %6336 = vmatprep.subr.bf16.mxu0 %v8437_v50  ;;  %6400 = vmatprep.subr.bf16.mxu1 %v8439_v37 }
 0x9ee   :  { %6338 = vmatpush1.bf16.msra.mxu0 %v8443_v20  ;;  %6402 = vmatpush1.bf16.msra.mxu1 %v8445_v54 }
 0x9ef   :  { %6340 = vmatprep.subr.bf16.mxu0 %v8449_v30  ;;  %6404 = vmatprep.subr.bf16.mxu1 %v8451_v19 }
 0x9f2   :  { %6342 = vmatpush1.bf16.msra.mxu0 %v8455_v34  ;;  %6406 = vmatpush1.bf16.msra.mxu1 %v8457_v36 }
 0x9f3   :  { %6344 = vmatprep.subr.bf16.mxu0 %v8461_v29  ;;  %6408 = vmatprep.subr.bf16.mxu1 %v8463_v45 }
 0x9f6   :  { %6346 = vmatpush1.bf16.msra.mxu0 %v8467_v35  ;;  %6410 = vmatpush1.bf16.msra.mxu1 %v8469_v43 }
 0x9f7   :  { %6348 = vmatprep.subr.bf16.mxu0 %v8473_v61  ;;  %6412 = vmatprep.subr.bf16.mxu1 %v8475_v63 }
 0x9fa   :  { %6350 = vmatpush1.bf16.msra.mxu0 %v8479_v13  ;;  %6414 = vmatpush1.bf16.msra.mxu1 %v8481_v48 }
 0x9fb   :  { %6352 = vmatprep.subr.bf16.mxu0 %v8485_v12  ;;  %6416 = vmatprep.subr.bf16.mxu1 %v8487_v53 }
 0x9fe   :  { %6354 = vmatpush1.bf16.msra.mxu0 %v8491_v40  ;;  %6418 = vmatpush1.bf16.msra.mxu1 %v8493_v44 }
 0x9ff   :  { %6356 = vmatprep.subr.bf16.mxu0 %v8497_v58  ;;  %6420 = vmatprep.subr.bf16.mxu1 %v8499_v62 }
 0xa02   :  { %6358 = vmatpush1.bf16.msra.mxu0 %v8503_v2  ;;  %6422 = vmatpush1.bf16.msra.mxu1 %v8505_v16 }
 0xa03   :  { %6360 = vmatprep.subr.bf16.mxu0 %v8509_v38  ;;  %6424 = vmatprep.subr.bf16.mxu1 %v8511_v56 }
 0xa06   :  { %6362 = vmatpush1.bf16.msra.mxu0 %v9723_v27  ;;  %6426 = vmatpush1.bf16.msra.mxu1 %v9740_v1 }
 0xa07   :  { %6364 = vmatprep.subr.bf16.mxu0 %v9741_v51  ;;  %6428 = vmatprep.subr.bf16.mxu1 %v9742_v6 }
 0xa0a   :  { %6366 = vmatpush1.bf16.msra.mxu0 %v9743_v55  ;;  %6430 = vmatpush1.bf16.msra.mxu1 %v9744_v23 }
 0xa0b   :  { %6368 = vmatprep.subr.bf16.mxu0 %v9745_v9  ;;  %6432 = vmatprep.subr.bf16.mxu1 %v9746_v8  ;;  %v9764_v8 = vld [vmem:[#allocation46_spill] sm:$0xff] }
 0xa0e   :  { %6370 = vmatpush1.bf16.msra.mxu0 %v9747_v22  ;;  %6434 = vmatpush1.bf16.msra.mxu1 %v9748_v49  ;;  %v9759_v49 = vld [vmem:[#allocation42_spill] sm:$0xff]  ;;  %v9763_v22 = vld [vmem:[#allocation11_spill] sm:$0xff] }
 0xa0f   :  { %6372 = vmatprep.subr.bf16.mxu0 %v9749_v59  ;;  %6436 = vmatprep.subr.bf16.mxu1 %v9750_v4  ;;  %v9760_v59 = vld [vmem:[#allocation43_spill] sm:$0xff]  ;;  %v9761_v4 = vld [vmem:[#allocation13_spill] sm:$0xff] }
 0xa12   :  { %6374 = vmatpush1.bf16.msra.mxu0 %v9751_v32  ;;  %6438 = vmatpush1.bf16.msra.mxu1 %v9752_v39  ;;  %v9762_v32 = vld [vmem:[#allocation15_spill] sm:$0xff] }
 0xa13   :  { %6376 = vmatprep.subr.bf16.mxu0 %v9753_v41  ;;  %6440 = vmatprep.subr.bf16.mxu1 %v9754_v0  ;;  %v3095_v39 = vld [vmem:[#allocation3 + $0x1] ss:$8 sm:$0xf] }
 0xa14   :  { %v3094_v41 = vld [vmem:[#allocation2 + $0x1] ss:$8 sm:$0xf]  ;;  %v3121_v0 = vrot.slane %v3095_v39, %v9763_v22 }
 0xa16   :  { %6378 = vmatpush1.bf16.msra.mxu0 %v9755_v57  ;;  %6442 = vmatpush1.bf16.msra.mxu1 %v9756_v52  ;;  %v3125_v57 = vrot.slane %v3095_v39, %v9764_v8  ;;  %v3100_v52 = vrot.slane %v3094_v41, %v9763_v22 }
 0xa17   :  { %6380 = vmatprep.subr.bf16.mxu0 %v9757_v33  ;;  %6444 = vmatprep.subr.bf16.mxu1 %v9758_v47  ;;  %v3104_v33 = vrot.slane %v3094_v41, %v9764_v8  ;;  %v3133_v8 = vrot.slane %v3095_v39, %v9736_v11 }
 0xa18   :  { %v3138_v47 = vsel %vm400_vm5, %v3100_v52, %v3121_v0  ;;  %v3112_v52 = vrot.slane %v3094_v41, %v9736_v11 }
 0xa1a   :  { %6382 = vmatpush1.bf16.msra.mxu0 %v9759_v49  ;;  %6446 = vmatpush1.bf16.msra.mxu1 %v9760_v59  ;;  %v9765_v49 = vld [vmem:[#allocation47_spill] sm:$0xff] }
 0xa1b   :  { %6448 = vmatprep.subr.bf16.mxu0 %v9761_v4  ;;  %6512 = vmatprep.subr.bf16.mxu1 %v9762_v32  ;;  %v3129_v23 = vrot.slane %v3095_v39, %v9765_v49  ;;  %v3139_v4 = vsel %vm400_vm5, %v3104_v33, %v3125_v57  ;;  %v3108_v51 = vrot.slane %v3094_v41, %v9765_v49  ;;  %v9768_v39 = vld [vmem:[#allocation20_spill] sm:$0xff]  ;;  %v9769_v41 = vld [vmem:[#allocation21_spill] sm:$0xff] }
 0xa1d   :  { %v3140_v56 = vsel %vm400_vm5, %v3108_v51, %v3129_v23 }
 0xab0   :  { %v3208_v9 = vpop.f32.mrb[22].mxu0  ;;  %v3279_v59 = vpop.f32.mrb[22].mxu1 }
 0xab1   :  { %v3209_v55 = vadd.f32 %v3208_v9, %v3138_v47  ;;  %v3210_v32 = vpop.f32.mrb[23].mxu0  ;;  %v3281_v6 = vpop.f32.mrb[23].mxu1  ;;  %v3280_v0 = vadd.f32 %v3279_v59, %v3140_v56  ;;  %v3141_v47 = vsel %vm400_vm5, %v3112_v52, %v3133_v8  ;;  %v9771_v52 = vld [vmem:[#allocation23_spill] sm:$0xff] }
 0xab2   :  { %v3211_v1 = vadd.f32 %v3210_v32, %v3139_v4  ;;  %v3282_v9 = vadd.f32 %v3281_v6, %v3141_v47  ;;  %v9772_v47 = vld [vmem:[#allocation24_spill] sm:$0xff] }
 0xab3   :  { %v3284_v27 = vmul.f32 0.5, %v3209_v55 }
 0xab4   :  { %v3285_v22 = vmul.f32 0.5, %v3211_v1  ;;  %v3287_v57 = vmul.f32 0.5, %v3282_v9  ;;  %v9773_v9 = vld [vmem:[#allocation25_spill] sm:$0xff] }
 0xab5   :  { %7222 = vtanh.f32 %v3284_v27 }
 0xab6   :  { %7224 = vtanh.f32 %v3285_v22 }
 0xab7   :  { %7226 = vtanh.f32 %v3280_v0  ;;  %v9770_v0 = vld [vmem:[#allocation22_spill] sm:$0xff] }
 0xab8   :  { %7228 = vtanh.f32 %v3287_v57  ;;  %v9774_v57 = vld [vmem:[#allocation27_spill] sm:$0xff] }
 0xabf   :  { %v7223_v33 = vpop.eup %7222 }
 0xac0   :  { %v7225_v38 = vpop.eup %7224  ;;  %v3292_v49 = vmul.f32 0.5, %v7223_v33  ;;  %v9775_v33 = vld [vmem:[#allocation28_spill] sm:$0xff] }
 0xac1   :  { %v3293_v4 = vmul.f32 0.5, %v7225_v38  ;;  %v7227_v51 = vpop.eup %7226 }
 0xac2   :  { %v3296_v55 = vadd.f32 0.5, %v3292_v49  ;;  %v7229_v22 = vpop.eup %7228 }
 0xac3   :  { %v3297_v1 = vadd.f32 0.5, %v3293_v4  ;;  %v3295_v8 = vmul.f32 0.5, %v7229_v22  ;;  %v9776_v4 = vld [vmem:[#allocation29_spill] sm:$0xff]  ;;  %v9782_v22 = vld [vmem:[#allocation35_spill] sm:$0xff] }
 0xac4   :  { %v3301_v23 = vmul.f32 %v7227_v51, %v3296_v55  ;;  %v9777_v55 = vld [vmem:[#allocation30_spill] sm:$0xff]  ;;  %v9778_v51 = vld [vmem:[#allocation31_spill] sm:$0xff] }
 0xac5   :  { %v3300_v27 = vmul.f32 %v3297_v1, %v8671_v60  ;;  %v3299_v59 = vadd.f32 0.5, %v3295_v8  ;;  %v9767_v60 = vld [vmem:[#allocation19_spill] sm:$0xff]  ;;  %v9779_v1 = vld [vmem:[#allocation32_spill] sm:$0xff] }
 0xac6   :  { %v9783_v8 = vld [vmem:[#allocation36_spill] sm:$0xff] }
 0xac7   :  { %v8757_v56 = vadd.f32 %v3301_v23, %v3300_v27  ;;  %v9780_v23 = vld [vmem:[#allocation33_spill] sm:$0xff]  ;;  %v9781_v27 = vld [vmem:[#allocation34_spill] sm:$0xff] }
 0xac9   :  { %7230 = vtanh.f32 %v8757_v56 }
 0xad3   :  { %v7231_v6 = vpop.eup %7230 }
 0xad4   :  { %v8760_v32 = vmul.f32 %v7231_v6, %v3299_v59  ;;  %v9784_v59 = vld [vmem:[#allocation37_spill] sm:$0xff]  ;;  %v9785_v6 = vld [vmem:[#allocation38_spill] sm:$0xff] }
 0xad6   :  { %9766 = vst [vmem:[#allocation50_spill] sm:$0xff] %v8760_v32  ;;  %v3306_v38 = vmul.f32 %v9738_v31, %v8760_v32  ;;  %v3305_v49 = vmul.f32 %v9739_v5, %v8760_v32 }
 0xad8   :  { %3419 = vmatprep.mubr.f32.mxu0 %v3306_v38  ;;  %3490 = vmatprep.mubr.f32.mxu1 %v3306_v38  ;;  %v9786_v38 = vld [vmem:[#allocation39_spill] sm:$0xff] }
 0xad9   :  { %3420 = vmatmul.mubr.f32.vlgmr.msra.gmra.mrb[24].mxu0 %v3305_v49  ;;  %3491 = vmatmul.mubr.f32.vlgmr.msra.gmra.mrb[24].mxu1 %v3305_v49  ;;  %v9787_v49 = vld [vmem:[#allocation40_spill] sm:$0xff] }
 0xada   :  { %6450 = vmatpush1.bf16.msra.mxu0 %v8389_v15  ;;  %6514 = vmatpush1.bf16.msra.mxu1 %v8391_v7 }
 0xadb   :  { %6452 = vmatprep.subr.bf16.mxu0 %v8395_v14  ;;  %6516 = vmatprep.subr.bf16.mxu1 %v8397_v18 }
 0xade   :  { %6454 = vmatpush1.bf16.msra.mxu0 %v8405_v3  ;;  %6518 = vmatpush1.bf16.msra.mxu1 %v8407_v42 }
 0xadf   :  { %6456 = vmatprep.subr.bf16.mxu0 %v8411_v10  ;;  %6520 = vmatprep.subr.bf16.mxu1 %v8413_v17 }
 0xae2   :  { %6458 = vmatpush1.bf16.msra.mxu0 %v8419_v26  ;;  %6522 = vmatpush1.bf16.msra.mxu1 %v8421_v28 }
 0xae3   :  { %6460 = vmatprep.subr.bf16.mxu0 %v8425_v46  ;;  %6524 = vmatprep.subr.bf16.mxu1 %v8427_v21 }
 0xae6   :  { %6462 = vmatpush1.bf16.msra.mxu0 %v8431_v24  ;;  %6526 = vmatpush1.bf16.msra.mxu1 %v8433_v25 }
 0xae7   :  { %6464 = vmatprep.subr.bf16.mxu0 %v8437_v50  ;;  %6528 = vmatprep.subr.bf16.mxu1 %v8439_v37 }
 0xaea   :  { %6466 = vmatpush1.bf16.msra.mxu0 %v8443_v20  ;;  %6530 = vmatpush1.bf16.msra.mxu1 %v8445_v54 }
 0xaeb   :  { %6468 = vmatprep.subr.bf16.mxu0 %v8449_v30  ;;  %6532 = vmatprep.subr.bf16.mxu1 %v8451_v19 }
 0xaee   :  { %6470 = vmatpush1.bf16.msra.mxu0 %v8455_v34  ;;  %6534 = vmatpush1.bf16.msra.mxu1 %v8457_v36 }
 0xaef   :  { %6472 = vmatprep.subr.bf16.mxu0 %v8461_v29  ;;  %6536 = vmatprep.subr.bf16.mxu1 %v8463_v45 }
 0xaf2   :  { %6474 = vmatpush1.bf16.msra.mxu0 %v8467_v35  ;;  %6538 = vmatpush1.bf16.msra.mxu1 %v8469_v43 }
 0xaf3   :  { %6476 = vmatprep.subr.bf16.mxu0 %v8473_v61  ;;  %6540 = vmatprep.subr.bf16.mxu1 %v8475_v63 }
 0xaf6   :  { %6478 = vmatpush1.bf16.msra.mxu0 %v8479_v13  ;;  %6542 = vmatpush1.bf16.msra.mxu1 %v8481_v48 }
 0xaf7   :  { %6480 = vmatprep.subr.bf16.mxu0 %v8485_v12  ;;  %6544 = vmatprep.subr.bf16.mxu1 %v8487_v53 }
 0xafa   :  { %6482 = vmatpush1.bf16.msra.mxu0 %v8491_v40  ;;  %6546 = vmatpush1.bf16.msra.mxu1 %v8493_v44 }
 0xafb   :  { %6484 = vmatprep.subr.bf16.mxu0 %v8497_v58  ;;  %6548 = vmatprep.subr.bf16.mxu1 %v8499_v62 }
 0xafe   :  { %6486 = vmatpush1.bf16.msra.mxu0 %v8503_v2  ;;  %6550 = vmatpush1.bf16.msra.mxu1 %v8505_v16 }
 0xaff   :  { %6488 = vmatprep.subr.bf16.mxu0 %v9767_v60  ;;  %6552 = vmatprep.subr.bf16.mxu1 %v9768_v39 }
 0xb02   :  { %6490 = vmatpush1.bf16.msra.mxu0 %v9769_v41  ;;  %6554 = vmatpush1.bf16.msra.mxu1 %v9770_v0 }
 0xb03   :  { %6492 = vmatprep.subr.bf16.mxu0 %v9771_v52  ;;  %6556 = vmatprep.subr.bf16.mxu1 %v9772_v47 }
 0xb06   :  { %6494 = vmatpush1.bf16.msra.mxu0 %v9773_v9  ;;  %6558 = vmatpush1.bf16.msra.mxu1 %v9774_v57 }
 0xb07   :  { %6496 = vmatprep.subr.bf16.mxu0 %v9775_v33  ;;  %6560 = vmatprep.subr.bf16.mxu1 %v9776_v4  ;;  %v9793_v4 = vld [vmem:[#allocation11_spill] sm:$0xff]  ;;  %v9794_v33 = vld [vmem:[#allocation46_spill] sm:$0xff] }
 0xb0a   :  { %6498 = vmatpush1.bf16.msra.mxu0 %v9777_v55  ;;  %6562 = vmatpush1.bf16.msra.mxu1 %v9778_v51  ;;  %v9788_v55 = vld [vmem:[#allocation41_spill] sm:$0xff]  ;;  %v9789_v51 = vld [vmem:[#allocation42_spill] sm:$0xff] }
 0xb0b   :  { %6500 = vmatprep.subr.bf16.mxu0 %v9779_v1  ;;  %6564 = vmatprep.subr.bf16.mxu1 %v9780_v23  ;;  %v9790_v1 = vld [vmem:[#allocation43_spill] sm:$0xff]  ;;  %v9791_v23 = vld [vmem:[#allocation13_spill] sm:$0xff] }
 0xb0e   :  { %6502 = vmatpush1.bf16.msra.mxu0 %v9781_v27  ;;  %6566 = vmatpush1.bf16.msra.mxu1 %v9782_v22  ;;  %v9792_v27 = vld [vmem:[#allocation15_spill] sm:$0xff] }
 0xb0f   :  { %6504 = vmatprep.subr.bf16.mxu0 %v9783_v8  ;;  %6568 = vmatprep.subr.bf16.mxu1 %v9784_v59  ;;  %v3308_v22 = vld [vmem:[#allocation3 + $0x2] ss:$8 sm:$0xf] }
 0xb10   :  { %v3307_v8 = vld [vmem:[#allocation2 + $0x2] ss:$8 sm:$0xf]  ;;  %v3334_v59 = vrot.slane %v3308_v22, %v9793_v4 }
 0xb12   :  { %6506 = vmatpush1.bf16.msra.mxu0 %v9785_v6  ;;  %6570 = vmatpush1.bf16.msra.mxu1 %v9786_v38  ;;  %v3338_v6 = vrot.slane %v3308_v22, %v9794_v33  ;;  %v3313_v38 = vrot.slane %v3307_v8, %v9793_v4 }
 0xb13   :  { %6508 = vmatprep.subr.bf16.mxu0 %v9787_v49  ;;  %6572 = vmatprep.subr.bf16.mxu1 %v9788_v55  ;;  %v3317_v49 = vrot.slane %v3307_v8, %v9794_v33  ;;  %v3346_v33 = vrot.slane %v3308_v22, %v9736_v11 }
 0xb14   :  { %v3351_v55 = vsel %vm400_vm5, %v3313_v38, %v3334_v59  ;;  %v3325_v38 = vrot.slane %v3307_v8, %v9736_v11 }
 0xb16   :  { %6510 = vmatpush1.bf16.msra.mxu0 %v9789_v51  ;;  %6574 = vmatpush1.bf16.msra.mxu1 %v9790_v1  ;;  %v9795_v51 = vld [vmem:[#allocation47_spill] sm:$0xff] }
 0xb17   :  { %6576 = vmatprep.subr.bf16.mxu0 %v9791_v23  ;;  %6640 = vmatprep.subr.bf16.mxu1 %v9792_v27  ;;  %v3342_v9 = vrot.slane %v3308_v22, %v9795_v51  ;;  %v3352_v23 = vsel %vm400_vm5, %v3317_v49, %v3338_v6  ;;  %v3321_v0 = vrot.slane %v3307_v8, %v9795_v51  ;;  %v9797_v8 = vld [vmem:[#allocation44_spill] sm:$0xff] }
 0xb19   :  { %v3353_v60 = vsel %vm400_vm5, %v3321_v0, %v3342_v9 }
 0xbac   :  { %v3421_v57 = vpop.f32.mrb[24].mxu0  ;;  %v3492_v1 = vpop.f32.mrb[24].mxu1 }
 0xbad   :  { %v3422_v47 = vadd.f32 %v3421_v57, %v3351_v55  ;;  %v3423_v27 = vpop.f32.mrb[25].mxu0  ;;  %v3494_v52 = vpop.f32.mrb[25].mxu1  ;;  %v3493_v59 = vadd.f32 %v3492_v1, %v3353_v60  ;;  %v3354_v57 = vsel %vm400_vm5, %v3325_v38, %v3346_v33 }
 0xbae   :  { %v3424_v41 = vadd.f32 %v3423_v27, %v3352_v23  ;;  %v3495_v55 = vadd.f32 %v3494_v52, %v3354_v57  ;;  %v4584_v27 = vrot.slane %v8760_v32, 7  ;;  %v9798_v57 = vld [vmem:[#allocation18_spill] sm:$0xff]  ;;  %v9818_v32 = vld [vmem:[#allocation39_spill] sm:$0xff] }
 0xbaf   :  { %v3497_v39 = vmul.f32 0.5, %v3422_v47 }
 0xbb0   :  { %v3498_v4 = vmul.f32 0.5, %v3424_v41  ;;  %v3500_v6 = vmul.f32 0.5, %v3495_v55  ;;  %v9799_v55 = vld [vmem:[#allocation19_spill] sm:$0xff] }
 0xbb1   :  { %7232 = vtanh.f32 %v3497_v39 }
 0xbb2   :  { %7234 = vtanh.f32 %v3498_v4 }
 0xbb3   :  { %7236 = vtanh.f32 %v3493_v59  ;;  %v4604_v59 = vsel %vm400_vm5, %v9797_v8, %v4584_v27  ;;  %v9812_v27 = vld [vmem:[#allocation33_spill] sm:$0xff]  ;;  %v9817_v8 = vld [vmem:[#allocation38_spill] sm:$0xff] }
 0xbb4   :  { %7238 = vtanh.f32 %v3500_v6  ;;  %v9800_v6 = vld [vmem:[#allocation20_spill] sm:$0xff] }
 0xbbb   :  { %v7233_v49 = vpop.eup %7232 }
 0xbbc   :  { %v7235_v16 = vpop.eup %7234  ;;  %v3505_v51 = vmul.f32 0.5, %v7233_v49  ;;  %v9801_v49 = vld [vmem:[#allocation21_spill] sm:$0xff] }
 0xbbd   :  { %v3506_v23 = vmul.f32 0.5, %v7235_v16  ;;  %v7237_v0 = vpop.eup %7236 }
 0xbbe   :  { %v3509_v47 = vadd.f32 0.5, %v3505_v51  ;;  %v7239_v4 = vpop.eup %7238 }
 0xbbf   :  { %v3510_v41 = vadd.f32 0.5, %v3506_v23  ;;  %v3508_v33 = vmul.f32 0.5, %v7239_v4  ;;  %v9802_v23 = vld [vmem:[#allocation22_spill] sm:$0xff]  ;;  %v9808_v4 = vld [vmem:[#allocation29_spill] sm:$0xff] }
 0xbc0   :  { %v3514_v9 = vmul.f32 %v7237_v0, %v3509_v47  ;;  %v9803_v47 = vld [vmem:[#allocation23_spill] sm:$0xff]  ;;  %v9804_v0 = vld [vmem:[#allocation24_spill] sm:$0xff] }
 0xbc1   :  { %v3513_v39 = vmul.f32 %v3510_v41, %v8757_v56  ;;  %v3512_v1 = vadd.f32 0.5, %v3508_v33  ;;  %v9805_v41 = vld [vmem:[#allocation25_spill] sm:$0xff]  ;;  %v9809_v33 = vld [vmem:[#allocation30_spill] sm:$0xff] }
 0xbc3   :  { %v8843_v60 = vadd.f32 %v3514_v9, %v3513_v39  ;;  %v9806_v9 = vld [vmem:[#allocation27_spill] sm:$0xff]  ;;  %v9807_v39 = vld [vmem:[#allocation28_spill] sm:$0xff] }
 0xbc5   :  { %7240 = vtanh.f32 %v8843_v60 }
 0xbcf   :  { %v7241_v52 = vpop.eup %7240 }
 0xbd0   :  { %v8847_v22 = vmul.f32 %v7241_v52, %v3512_v1  ;;  %v9810_v1 = vld [vmem:[#allocation31_spill] sm:$0xff]  ;;  %v9811_v52 = vld [vmem:[#allocation32_spill] sm:$0xff] }
 0xbd2   :  { %9796 = vst [vmem:[#allocation17_spill] sm:$0xff] %v8847_v22  ;;  %v4587_v16 = vrot.slane %v8847_v22, 6  ;;  %v3519_v51 = vmul.f32 %v9738_v31, %v8847_v22  ;;  %v3518_v56 = vmul.f32 %v9739_v5, %v8847_v22  ;;  %v9819_v22 = vld [vmem:[#allocation40_spill] sm:$0xff] }
 0xbd4   :  { %3632 = vmatprep.mubr.f32.mxu0 %v3519_v51  ;;  %3703 = vmatprep.mubr.f32.mxu1 %v3519_v51  ;;  %v8857_v38 = vsel %vm2095_vm6, %v4604_v59, %v4587_v16  ;;  %v9813_v16 = vld [vmem:[#allocation34_spill] sm:$0xff]  ;;  %v9814_v51 = vld [vmem:[#allocation35_spill] sm:$0xff]  ;;  %v9816_v59 = vld [vmem:[#allocation37_spill] sm:$0xff] }
 0xbd5   :  { %3633 = vmatmul.mubr.f32.vlgmr.msra.gmra.mrb[26].mxu0 %v3518_v56  ;;  %3704 = vmatmul.mubr.f32.vlgmr.msra.gmra.mrb[26].mxu1 %v3518_v56  ;;  %v9815_v56 = vld [vmem:[#allocation36_spill] sm:$0xff] }
 0xbd6   :  { %6578 = vmatpush1.bf16.msra.mxu0 %v8389_v15  ;;  %6642 = vmatpush1.bf16.msra.mxu1 %v8391_v7 }
 0xbd7   :  { %6580 = vmatprep.subr.bf16.mxu0 %v8395_v14  ;;  %6644 = vmatprep.subr.bf16.mxu1 %v8397_v18 }
 0xbda   :  { %6582 = vmatpush1.bf16.msra.mxu0 %v8405_v3  ;;  %6646 = vmatpush1.bf16.msra.mxu1 %v8407_v42 }
 0xbdb   :  { %6584 = vmatprep.subr.bf16.mxu0 %v8411_v10  ;;  %6648 = vmatprep.subr.bf16.mxu1 %v8413_v17 }
 0xbde   :  { %6586 = vmatpush1.bf16.msra.mxu0 %v8419_v26  ;;  %6650 = vmatpush1.bf16.msra.mxu1 %v8421_v28 }
 0xbdf   :  { %6588 = vmatprep.subr.bf16.mxu0 %v8425_v46  ;;  %6652 = vmatprep.subr.bf16.mxu1 %v8427_v21 }
 0xbe2   :  { %6590 = vmatpush1.bf16.msra.mxu0 %v8431_v24  ;;  %6654 = vmatpush1.bf16.msra.mxu1 %v8433_v25 }
 0xbe3   :  { %6592 = vmatprep.subr.bf16.mxu0 %v8437_v50  ;;  %6656 = vmatprep.subr.bf16.mxu1 %v8439_v37 }
 0xbe6   :  { %6594 = vmatpush1.bf16.msra.mxu0 %v8443_v20  ;;  %6658 = vmatpush1.bf16.msra.mxu1 %v8445_v54 }
 0xbe7   :  { %6596 = vmatprep.subr.bf16.mxu0 %v8449_v30  ;;  %6660 = vmatprep.subr.bf16.mxu1 %v8451_v19 }
 0xbea   :  { %6598 = vmatpush1.bf16.msra.mxu0 %v8455_v34  ;;  %6662 = vmatpush1.bf16.msra.mxu1 %v8457_v36 }
 0xbeb   :  { %6600 = vmatprep.subr.bf16.mxu0 %v8461_v29  ;;  %6664 = vmatprep.subr.bf16.mxu1 %v8463_v45 }
 0xbee   :  { %6602 = vmatpush1.bf16.msra.mxu0 %v8467_v35  ;;  %6666 = vmatpush1.bf16.msra.mxu1 %v8469_v43 }
 0xbef   :  { %6604 = vmatprep.subr.bf16.mxu0 %v8473_v61  ;;  %6668 = vmatprep.subr.bf16.mxu1 %v8475_v63 }
 0xbf2   :  { %6606 = vmatpush1.bf16.msra.mxu0 %v8479_v13  ;;  %6670 = vmatpush1.bf16.msra.mxu1 %v8481_v48 }
 0xbf3   :  { %6608 = vmatprep.subr.bf16.mxu0 %v8485_v12  ;;  %6672 = vmatprep.subr.bf16.mxu1 %v8487_v53 }
 0xbf6   :  { %6610 = vmatpush1.bf16.msra.mxu0 %v8491_v40  ;;  %6674 = vmatpush1.bf16.msra.mxu1 %v8493_v44 }
 0xbf7   :  { %6612 = vmatprep.subr.bf16.mxu0 %v8497_v58  ;;  %6676 = vmatprep.subr.bf16.mxu1 %v8499_v62 }
 0xbfa   :  { %6614 = vmatpush1.bf16.msra.mxu0 %v8503_v2  ;;  %6678 = vmatpush1.bf16.msra.mxu1 %v9798_v57 }
 0xbfb   :  { %6616 = vmatprep.subr.bf16.mxu0 %v9799_v55  ;;  %6680 = vmatprep.subr.bf16.mxu1 %v9800_v6 }
 0xbfe   :  { %6618 = vmatpush1.bf16.msra.mxu0 %v9801_v49  ;;  %6682 = vmatpush1.bf16.msra.mxu1 %v9802_v23 }
 0xbff   :  { %6620 = vmatprep.subr.bf16.mxu0 %v9803_v47  ;;  %6684 = vmatprep.subr.bf16.mxu1 %v9804_v0 }
 0xc02   :  { %6622 = vmatpush1.bf16.msra.mxu0 %v9805_v41  ;;  %6686 = vmatpush1.bf16.msra.mxu1 %v9806_v9 }
 0xc03   :  { %6624 = vmatprep.subr.bf16.mxu0 %v9807_v39  ;;  %6688 = vmatprep.subr.bf16.mxu1 %v9808_v4  ;;  %v9825_v4 = vld [vmem:[#allocation11_spill] sm:$0xff]  ;;  %v9826_v39 = vld [vmem:[#allocation46_spill] sm:$0xff] }
 0xc06   :  { %6626 = vmatpush1.bf16.msra.mxu0 %v9809_v33  ;;  %6690 = vmatpush1.bf16.msra.mxu1 %v9810_v1  ;;  %v9820_v33 = vld [vmem:[#allocation41_spill] sm:$0xff]  ;;  %v9821_v1 = vld [vmem:[#allocation42_spill] sm:$0xff] }
 0xc07   :  { %6628 = vmatprep.subr.bf16.mxu0 %v9811_v52  ;;  %6692 = vmatprep.subr.bf16.mxu1 %v9812_v27  ;;  %v9822_v52 = vld [vmem:[#allocation43_spill] sm:$0xff]  ;;  %v9823_v27 = vld [vmem:[#allocation13_spill] sm:$0xff] }
 0xc0a   :  { %6630 = vmatpush1.bf16.msra.mxu0 %v9813_v16  ;;  %6694 = vmatpush1.bf16.msra.mxu1 %v9814_v51  ;;  %v9824_v16 = vld [vmem:[#allocation15_spill] sm:$0xff] }
 0xc0b   :  { %6632 = vmatprep.subr.bf16.mxu0 %v9815_v56  ;;  %6696 = vmatprep.subr.bf16.mxu1 %v9816_v59  ;;  %v3521_v51 = vld [vmem:[#allocation3 + $0x3] ss:$8 sm:$0xf] }
 0xc0c   :  { %v3520_v56 = vld [vmem:[#allocation2 + $0x3] ss:$8 sm:$0xf]  ;;  %v3547_v59 = vrot.slane %v3521_v51, %v9825_v4 }
 0xc0e   :  { %6634 = vmatpush1.bf16.msra.mxu0 %v9817_v8  ;;  %6698 = vmatpush1.bf16.msra.mxu1 %v9818_v32  ;;  %v3551_v8 = vrot.slane %v3521_v51, %v9826_v39  ;;  %v3526_v32 = vrot.slane %v3520_v56, %v9825_v4 }
 0xc0f   :  { %6636 = vmatprep.subr.bf16.mxu0 %v9819_v22  ;;  %6700 = vmatprep.subr.bf16.mxu1 %v9820_v33  ;;  %v3530_v22 = vrot.slane %v3520_v56, %v9826_v39  ;;  %v3559_v39 = vrot.slane %v3521_v51, %v9736_v11 }
 0xc10   :  { %v3564_v33 = vsel %vm400_vm5, %v3526_v32, %v3547_v59  ;;  %v3538_v59 = vrot.slane %v3520_v56, %v9736_v11 }
 0xc12   :  { %6638 = vmatpush1.bf16.msra.mxu0 %v9821_v1  ;;  %6702 = vmatpush1.bf16.msra.mxu1 %v9822_v52  ;;  %v9827_v1 = vld [vmem:[#allocation47_spill] sm:$0xff] }
 0xc13   :  { %6704 = vmatprep.subr.bf16.mxu0 %v9823_v27  ;;  %6768 = vmatprep.subr.bf16.mxu1 %v9824_v16  ;;  %v3555_v41 = vrot.slane %v3521_v51, %v9827_v1  ;;  %v3565_v27 = vsel %vm400_vm5, %v3530_v22, %v3551_v8  ;;  %v3534_v23 = vrot.slane %v3520_v56, %v9827_v1  ;;  %v9830_v56 = vld [vmem:[#allocation19_spill] sm:$0xff] }
 0xc15   :  { %v3566_v55 = vsel %vm400_vm5, %v3534_v23, %v3555_v41 }
 0xca8   :  { %v3634_v9 = vpop.f32.mrb[26].mxu0  ;;  %v3705_v52 = vpop.f32.mrb[26].mxu1 }
 0xca9   :  { %v3635_v0 = vadd.f32 %v3634_v9, %v3564_v33  ;;  %v3636_v16 = vpop.f32.mrb[27].mxu0  ;;  %v3707_v47 = vpop.f32.mrb[27].mxu1  ;;  %v3706_v32 = vadd.f32 %v3705_v52, %v3566_v55  ;;  %v3567_v9 = vsel %vm400_vm5, %v3538_v59, %v3559_v39  ;;  %v9832_v59 = vld [vmem:[#allocation21_spill] sm:$0xff] }
 0xcaa   :  { %v3637_v49 = vadd.f32 %v3636_v16, %v3565_v27  ;;  %v3708_v22 = vadd.f32 %v3707_v47, %v3567_v9  ;;  %v9833_v9 = vld [vmem:[#allocation22_spill] sm:$0xff] }
 0xcab   :  { %v3710_v6 = vmul.f32 0.5, %v3635_v0 }
 0xcac   :  { %v3711_v4 = vmul.f32 0.5, %v3637_v49  ;;  %v3713_v8 = vmul.f32 0.5, %v3708_v22  ;;  %v9834_v22 = vld [vmem:[#allocation23_spill] sm:$0xff] }
 0xcad   :  { %7242 = vtanh.f32 %v3710_v6 }
 0xcae   :  { %7244 = vtanh.f32 %v3711_v4 }
 0xcaf   :  { %7246 = vtanh.f32 %v3706_v32  ;;  %v9831_v32 = vld [vmem:[#allocation20_spill] sm:$0xff] }
 0xcb0   :  { %7248 = vtanh.f32 %v3713_v8  ;;  %v9835_v8 = vld [vmem:[#allocation24_spill] sm:$0xff] }
 0xcb7   :  { %v7243_v33 = vpop.eup %7242 }
 0xcb8   :  { %v7245_v57 = vpop.eup %7244  ;;  %v3718_v1 = vmul.f32 0.5, %v7243_v33  ;;  %v9836_v33 = vld [vmem:[#allocation25_spill] sm:$0xff] }
 0xcb9   :  { %v3719_v27 = vmul.f32 0.5, %v7245_v57  ;;  %v7247_v23 = vpop.eup %7246 }
 0xcba   :  { %v3722_v0 = vadd.f32 0.5, %v3718_v1  ;;  %v7249_v4 = vpop.eup %7248 }
 0xcbb   :  { %v3723_v49 = vadd.f32 0.5, %v3719_v27  ;;  %v3721_v39 = vmul.f32 0.5, %v7249_v4  ;;  %v9837_v27 = vld [vmem:[#allocation27_spill] sm:$0xff]  ;;  %v9843_v4 = vld [vmem:[#allocation33_spill] sm:$0xff] }
 0xcbc   :  { %v3727_v41 = vmul.f32 %v7247_v23, %v3722_v0  ;;  %v9838_v0 = vld [vmem:[#allocation28_spill] sm:$0xff]  ;;  %v9839_v23 = vld [vmem:[#allocation29_spill] sm:$0xff] }
 0xcbd   :  { %v3726_v6 = vmul.f32 %v3723_v49, %v8843_v60  ;;  %v3725_v52 = vadd.f32 0.5, %v3721_v39  ;;  %v9840_v49 = vld [vmem:[#allocation30_spill] sm:$0xff] }
 0xcbe   :  { %v9844_v39 = vld [vmem:[#allocation34_spill] sm:$0xff] }
 0xcbf   :  { %v8936_v55 = vadd.f32 %v3727_v41, %v3726_v6  ;;  %v9841_v41 = vld [vmem:[#allocation31_spill] sm:$0xff]  ;;  %v9842_v6 = vld [vmem:[#allocation32_spill] sm:$0xff] }
 0xcc1   :  { %7250 = vtanh.f32 %v8936_v55 }
 0xccb   :  { %v7251_v47 = vpop.eup %7250 }
 0xccc   :  { %v8939_v16 = vmul.f32 %v7251_v47, %v3725_v52  ;;  %v9845_v52 = vld [vmem:[#allocation35_spill] sm:$0xff]  ;;  %v9846_v47 = vld [vmem:[#allocation36_spill] sm:$0xff] }
 0xcce   :  { %9828 = vst [vmem:[#allocation51_spill] sm:$0xff] %v8939_v16  ;;  %v9439_v51 = vrot.slane %v8939_v16, 5  ;;  %v3732_v57 = vmul.f32 %v9738_v31, %v8939_v16  ;;  %v3731_v1 = vmul.f32 %v9739_v5, %v8939_v16  ;;  %v9850_v16 = vld [vmem:[#allocation40_spill] sm:$0xff] }
 0xcd0   :  { %3845 = vmatprep.mubr.f32.mxu0 %v3732_v57  ;;  %3916 = vmatprep.mubr.f32.mxu1 %v3732_v57  ;;  %v8950_v60 = vsel %vm2097_vm7, %v8857_v38, %v9439_v51  ;;  %v9829_v38 = vld [vmem:[#allocation18_spill] sm:$0xff]  ;;  %v9847_v57 = vld [vmem:[#allocation37_spill] sm:$0xff]  ;;  %v9849_v51 = vld [vmem:[#allocation39_spill] sm:$0xff] }
 0xcd1   :  { %3846 = vmatmul.mubr.f32.vlgmr.msra.gmra.mrb[28].mxu0 %v3731_v1  ;;  %3917 = vmatmul.mubr.f32.vlgmr.msra.gmra.mrb[28].mxu1 %v3731_v1  ;;  %v9848_v1 = vld [vmem:[#allocation38_spill] sm:$0xff] }
 0xcd2   :  { %6706 = vmatpush1.bf16.msra.mxu0 %v8389_v15  ;;  %6770 = vmatpush1.bf16.msra.mxu1 %v8391_v7 }
 0xcd3   :  { %6708 = vmatprep.subr.bf16.mxu0 %v8395_v14  ;;  %6772 = vmatprep.subr.bf16.mxu1 %v8397_v18 }
 0xcd6   :  { %6710 = vmatpush1.bf16.msra.mxu0 %v8405_v3  ;;  %6774 = vmatpush1.bf16.msra.mxu1 %v8407_v42 }
 0xcd7   :  { %6712 = vmatprep.subr.bf16.mxu0 %v8411_v10  ;;  %6776 = vmatprep.subr.bf16.mxu1 %v8413_v17 }
 0xcda   :  { %6714 = vmatpush1.bf16.msra.mxu0 %v8419_v26  ;;  %6778 = vmatpush1.bf16.msra.mxu1 %v8421_v28 }
 0xcdb   :  { %6716 = vmatprep.subr.bf16.mxu0 %v8425_v46  ;;  %6780 = vmatprep.subr.bf16.mxu1 %v8427_v21 }
 0xcde   :  { %6718 = vmatpush1.bf16.msra.mxu0 %v8431_v24  ;;  %6782 = vmatpush1.bf16.msra.mxu1 %v8433_v25 }
 0xcdf   :  { %6720 = vmatprep.subr.bf16.mxu0 %v8437_v50  ;;  %6784 = vmatprep.subr.bf16.mxu1 %v8439_v37 }
 0xce2   :  { %6722 = vmatpush1.bf16.msra.mxu0 %v8443_v20  ;;  %6786 = vmatpush1.bf16.msra.mxu1 %v8445_v54 }
 0xce3   :  { %6724 = vmatprep.subr.bf16.mxu0 %v8449_v30  ;;  %6788 = vmatprep.subr.bf16.mxu1 %v8451_v19 }
 0xce6   :  { %6726 = vmatpush1.bf16.msra.mxu0 %v8455_v34  ;;  %6790 = vmatpush1.bf16.msra.mxu1 %v8457_v36 }
 0xce7   :  { %6728 = vmatprep.subr.bf16.mxu0 %v8461_v29  ;;  %6792 = vmatprep.subr.bf16.mxu1 %v8463_v45 }
 0xcea   :  { %6730 = vmatpush1.bf16.msra.mxu0 %v8467_v35  ;;  %6794 = vmatpush1.bf16.msra.mxu1 %v8469_v43 }
 0xceb   :  { %6732 = vmatprep.subr.bf16.mxu0 %v8473_v61  ;;  %6796 = vmatprep.subr.bf16.mxu1 %v8475_v63 }
 0xcee   :  { %6734 = vmatpush1.bf16.msra.mxu0 %v8479_v13  ;;  %6798 = vmatpush1.bf16.msra.mxu1 %v8481_v48 }
 0xcef   :  { %6736 = vmatprep.subr.bf16.mxu0 %v8485_v12  ;;  %6800 = vmatprep.subr.bf16.mxu1 %v8487_v53 }
 0xcf2   :  { %6738 = vmatpush1.bf16.msra.mxu0 %v8491_v40  ;;  %6802 = vmatpush1.bf16.msra.mxu1 %v8493_v44 }
 0xcf3   :  { %6740 = vmatprep.subr.bf16.mxu0 %v8497_v58  ;;  %6804 = vmatprep.subr.bf16.mxu1 %v8499_v62 }
 0xcf6   :  { %6742 = vmatpush1.bf16.msra.mxu0 %v8503_v2  ;;  %6806 = vmatpush1.bf16.msra.mxu1 %v9829_v38 }
 0xcf7   :  { %6744 = vmatprep.subr.bf16.mxu0 %v9830_v56  ;;  %6808 = vmatprep.subr.bf16.mxu1 %v9831_v32 }
 0xcfa   :  { %6746 = vmatpush1.bf16.msra.mxu0 %v9832_v59  ;;  %6810 = vmatpush1.bf16.msra.mxu1 %v9833_v9 }
 0xcfb   :  { %6748 = vmatprep.subr.bf16.mxu0 %v9834_v22  ;;  %6812 = vmatprep.subr.bf16.mxu1 %v9835_v8 }
 0xcfe   :  { %6750 = vmatpush1.bf16.msra.mxu0 %v9836_v33  ;;  %6814 = vmatpush1.bf16.msra.mxu1 %v9837_v27 }
 0xcff   :  { %6752 = vmatprep.subr.bf16.mxu0 %v9838_v0  ;;  %6816 = vmatprep.subr.bf16.mxu1 %v9839_v23  ;;  %v9856_v23 = vld [vmem:[#allocation11_spill] sm:$0xff]  ;;  %v9857_v0 = vld [vmem:[#allocation46_spill] sm:$0xff] }
 0xd02   :  { %6754 = vmatpush1.bf16.msra.mxu0 %v9840_v49  ;;  %6818 = vmatpush1.bf16.msra.mxu1 %v9841_v41  ;;  %v9851_v49 = vld [vmem:[#allocation41_spill] sm:$0xff]  ;;  %v9852_v41 = vld [vmem:[#allocation42_spill] sm:$0xff] }
 0xd03   :  { %6756 = vmatprep.subr.bf16.mxu0 %v9842_v6  ;;  %6820 = vmatprep.subr.bf16.mxu1 %v9843_v4  ;;  %v9853_v6 = vld [vmem:[#allocation43_spill] sm:$0xff]  ;;  %v9854_v4 = vld [vmem:[#allocation13_spill] sm:$0xff] }
 0xd06   :  { %6758 = vmatpush1.bf16.msra.mxu0 %v9844_v39  ;;  %6822 = vmatpush1.bf16.msra.mxu1 %v9845_v52  ;;  %v9855_v39 = vld [vmem:[#allocation15_spill] sm:$0xff] }
 0xd07   :  { %6760 = vmatprep.subr.bf16.mxu0 %v9846_v47  ;;  %6824 = vmatprep.subr.bf16.mxu1 %v9847_v57  ;;  %v3734_v52 = vld [vmem:[#allocation3 + $0x4] ss:$8 sm:$0xf] }
 0xd08   :  { %v3733_v47 = vld [vmem:[#allocation2 + $0x4] ss:$8 sm:$0xf]  ;;  %v3760_v57 = vrot.slane %v3734_v52, %v9856_v23 }
 0xd0a   :  { %6762 = vmatpush1.bf16.msra.mxu0 %v9848_v1  ;;  %6826 = vmatpush1.bf16.msra.mxu1 %v9849_v51  ;;  %v3764_v1 = vrot.slane %v3734_v52, %v9857_v0  ;;  %v3739_v51 = vrot.slane %v3733_v47, %v9856_v23 }
 0xd0b   :  { %6764 = vmatprep.subr.bf16.mxu0 %v9850_v16  ;;  %6828 = vmatprep.subr.bf16.mxu1 %v9851_v49  ;;  %v3743_v16 = vrot.slane %v3733_v47, %v9857_v0  ;;  %v3772_v0 = vrot.slane %v3734_v52, %v9736_v11 }
 0xd0c   :  { %v3777_v49 = vsel %vm400_vm5, %v3739_v51, %v3760_v57  ;;  %v3751_v57 = vrot.slane %v3733_v47, %v9736_v11 }
 0xd0e   :  { %6766 = vmatpush1.bf16.msra.mxu0 %v9852_v41  ;;  %6830 = vmatpush1.bf16.msra.mxu1 %v9853_v6  ;;  %v9858_v41 = vld [vmem:[#allocation47_spill] sm:$0xff] }
 0xd0f   :  { %6832 = vmatprep.subr.bf16.mxu0 %v9854_v4  ;;  %6896 = vmatprep.subr.bf16.mxu1 %v9855_v39  ;;  %v3768_v33 = vrot.slane %v3734_v52, %v9858_v41  ;;  %v3778_v4 = vsel %vm400_vm5, %v3743_v16, %v3764_v1  ;;  %v3747_v9 = vrot.slane %v3733_v47, %v9858_v41  ;;  %v9861_v47 = vld [vmem:[#allocation19_spill] sm:$0xff] }
 0xd11   :  { %v3779_v56 = vsel %vm400_vm5, %v3747_v9, %v3768_v33 }
 0xda4   :  { %v3847_v27 = vpop.f32.mrb[28].mxu0  ;;  %v3918_v6 = vpop.f32.mrb[28].mxu1 }
 0xda5   :  { %v3848_v8 = vadd.f32 %v3847_v27, %v3777_v49  ;;  %v3849_v39 = vpop.f32.mrb[29].mxu0  ;;  %v3920_v22 = vpop.f32.mrb[29].mxu1  ;;  %v3919_v51 = vadd.f32 %v3918_v6, %v3779_v56  ;;  %v3780_v27 = vsel %vm400_vm5, %v3751_v57, %v3772_v0  ;;  %v9863_v57 = vld [vmem:[#allocation21_spill] sm:$0xff] }
 0xda6   :  { %v3850_v59 = vadd.f32 %v3849_v39, %v3778_v4  ;;  %v3921_v16 = vadd.f32 %v3920_v22, %v3780_v27  ;;  %v9864_v27 = vld [vmem:[#allocation22_spill] sm:$0xff] }
 0xda7   :  { %v3923_v32 = vmul.f32 0.5, %v3848_v8 }
 0xda8   :  { %v3924_v23 = vmul.f32 0.5, %v3850_v59  ;;  %v3926_v49 = vmul.f32 0.5, %v3921_v16  ;;  %v9865_v16 = vld [vmem:[#allocation23_spill] sm:$0xff] }
 0xda9   :  { %7252 = vtanh.f32 %v3923_v32 }
 0xdaa   :  { %7254 = vtanh.f32 %v3924_v23 }
 0xdab   :  { %7256 = vtanh.f32 %v3919_v51  ;;  %v9862_v51 = vld [vmem:[#allocation20_spill] sm:$0xff] }
 0xdac   :  { %7258 = vtanh.f32 %v3926_v49  ;;  %v9866_v49 = vld [vmem:[#allocation24_spill] sm:$0xff] }
 0xdb3   :  { %v7253_v1 = vpop.eup %7252 }
 0xdb4   :  { %v7255_v38 = vpop.eup %7254  ;;  %v3931_v41 = vmul.f32 0.5, %v7253_v1  ;;  %v9867_v1 = vld [vmem:[#allocation25_spill] sm:$0xff] }
 0xdb5   :  { %v3932_v4 = vmul.f32 0.5, %v7255_v38  ;;  %v7257_v9 = vpop.eup %7256 }
 0xdb6   :  { %v3935_v8 = vadd.f32 0.5, %v3931_v41  ;;  %v7259_v23 = vpop.eup %7258 }
 0xdb7   :  { %v3936_v59 = vadd.f32 0.5, %v3932_v4  ;;  %v3934_v0 = vmul.f32 0.5, %v7259_v23  ;;  %v9868_v4 = vld [vmem:[#allocation27_spill] sm:$0xff]  ;;  %v9874_v23 = vld [vmem:[#allocation33_spill] sm:$0xff] }
 0xdb8   :  { %v3940_v33 = vmul.f32 %v7257_v9, %v3935_v8  ;;  %v9869_v8 = vld [vmem:[#allocation28_spill] sm:$0xff]  ;;  %v9870_v9 = vld [vmem:[#allocation29_spill] sm:$0xff] }
 0xdb9   :  { %v3939_v32 = vmul.f32 %v3936_v59, %v8936_v55  ;;  %v3938_v6 = vadd.f32 0.5, %v3934_v0  ;;  %v9871_v59 = vld [vmem:[#allocation30_spill] sm:$0xff] }
 0xdba   :  { %v9875_v0 = vld [vmem:[#allocation34_spill] sm:$0xff] }
 0xdbb   :  { %v9029_v56 = vadd.f32 %v3940_v33, %v3939_v32  ;;  %v9872_v33 = vld [vmem:[#allocation31_spill] sm:$0xff]  ;;  %v9873_v32 = vld [vmem:[#allocation32_spill] sm:$0xff] }
 0xdbd   :  { %7260 = vtanh.f32 %v9029_v56 }
 0xdc7   :  { %v7261_v22 = vpop.eup %7260 }
 0xdc8   :  { %v9032_v39 = vmul.f32 %v7261_v22, %v3938_v6  ;;  %v9876_v6 = vld [vmem:[#allocation35_spill] sm:$0xff]  ;;  %v9877_v22 = vld [vmem:[#allocation36_spill] sm:$0xff] }
 0xdca   :  { %9859 = vst [vmem:[#allocation16_spill] sm:$0xff] %v9032_v39  ;;  %v3945_v38 = vmul.f32 %v9738_v31, %v9032_v39  ;;  %v3944_v41 = vmul.f32 %v9739_v5, %v9032_v39  ;;  %v4593_v52 = vrot.slane %v9032_v39, 4  ;;  %v9881_v39 = vld [vmem:[#allocation40_spill] sm:$0xff] }
 0xdcc   :  { %4058 = vmatprep.mubr.f32.mxu0 %v3945_v38  ;;  %4129 = vmatprep.mubr.f32.mxu1 %v3945_v38  ;;  %v9041_v55 = vsel %vm2099_vm8, %v8950_v60, %v4593_v52  ;;  %v9860_v60 = vld [vmem:[#allocation18_spill] sm:$0xff]  ;;  %v9878_v38 = vld [vmem:[#allocation37_spill] sm:$0xff]  ;;  %v9880_v52 = vld [vmem:[#allocation39_spill] sm:$0xff] }
 0xdcd   :  { %4059 = vmatmul.mubr.f32.vlgmr.msra.gmra.mrb[30].mxu0 %v3944_v41  ;;  %4130 = vmatmul.mubr.f32.vlgmr.msra.gmra.mrb[30].mxu1 %v3944_v41  ;;  %v9879_v41 = vld [vmem:[#allocation38_spill] sm:$0xff] }
 0xdce   :  { %6834 = vmatpush1.bf16.msra.mxu0 %v8389_v15  ;;  %6898 = vmatpush1.bf16.msra.mxu1 %v8391_v7 }
 0xdcf   :  { %6836 = vmatprep.subr.bf16.mxu0 %v8395_v14  ;;  %6900 = vmatprep.subr.bf16.mxu1 %v8397_v18 }
 0xdd2   :  { %6838 = vmatpush1.bf16.msra.mxu0 %v8405_v3  ;;  %6902 = vmatpush1.bf16.msra.mxu1 %v8407_v42 }
 0xdd3   :  { %6840 = vmatprep.subr.bf16.mxu0 %v8411_v10  ;;  %6904 = vmatprep.subr.bf16.mxu1 %v8413_v17 }
 0xdd6   :  { %6842 = vmatpush1.bf16.msra.mxu0 %v8419_v26  ;;  %6906 = vmatpush1.bf16.msra.mxu1 %v8421_v28 }
 0xdd7   :  { %6844 = vmatprep.subr.bf16.mxu0 %v8425_v46  ;;  %6908 = vmatprep.subr.bf16.mxu1 %v8427_v21 }
 0xdda   :  { %6846 = vmatpush1.bf16.msra.mxu0 %v8431_v24  ;;  %6910 = vmatpush1.bf16.msra.mxu1 %v8433_v25 }
 0xddb   :  { %6848 = vmatprep.subr.bf16.mxu0 %v8437_v50  ;;  %6912 = vmatprep.subr.bf16.mxu1 %v8439_v37 }
 0xdde   :  { %6850 = vmatpush1.bf16.msra.mxu0 %v8443_v20  ;;  %6914 = vmatpush1.bf16.msra.mxu1 %v8445_v54 }
 0xddf   :  { %6852 = vmatprep.subr.bf16.mxu0 %v8449_v30  ;;  %6916 = vmatprep.subr.bf16.mxu1 %v8451_v19 }
 0xde2   :  { %6854 = vmatpush1.bf16.msra.mxu0 %v8455_v34  ;;  %6918 = vmatpush1.bf16.msra.mxu1 %v8457_v36 }
 0xde3   :  { %6856 = vmatprep.subr.bf16.mxu0 %v8461_v29  ;;  %6920 = vmatprep.subr.bf16.mxu1 %v8463_v45 }
 0xde6   :  { %6858 = vmatpush1.bf16.msra.mxu0 %v8467_v35  ;;  %6922 = vmatpush1.bf16.msra.mxu1 %v8469_v43 }
 0xde7   :  { %6860 = vmatprep.subr.bf16.mxu0 %v8473_v61  ;;  %6924 = vmatprep.subr.bf16.mxu1 %v8475_v63 }
 0xdea   :  { %6862 = vmatpush1.bf16.msra.mxu0 %v8479_v13  ;;  %6926 = vmatpush1.bf16.msra.mxu1 %v8481_v48 }
 0xdeb   :  { %6864 = vmatprep.subr.bf16.mxu0 %v8485_v12  ;;  %6928 = vmatprep.subr.bf16.mxu1 %v8487_v53 }
 0xdee   :  { %6866 = vmatpush1.bf16.msra.mxu0 %v8491_v40  ;;  %6930 = vmatpush1.bf16.msra.mxu1 %v8493_v44 }
 0xdef   :  { %6868 = vmatprep.subr.bf16.mxu0 %v8497_v58  ;;  %6932 = vmatprep.subr.bf16.mxu1 %v8499_v62 }
 0xdf2   :  { %6870 = vmatpush1.bf16.msra.mxu0 %v8503_v2  ;;  %6934 = vmatpush1.bf16.msra.mxu1 %v9860_v60 }
 0xdf3   :  { %6872 = vmatprep.subr.bf16.mxu0 %v9861_v47  ;;  %6936 = vmatprep.subr.bf16.mxu1 %v9862_v51 }
 0xdf6   :  { %6874 = vmatpush1.bf16.msra.mxu0 %v9863_v57  ;;  %6938 = vmatpush1.bf16.msra.mxu1 %v9864_v27 }
 0xdf7   :  { %6876 = vmatprep.subr.bf16.mxu0 %v9865_v16  ;;  %6940 = vmatprep.subr.bf16.mxu1 %v9866_v49 }
 0xdfa   :  { %6878 = vmatpush1.bf16.msra.mxu0 %v9867_v1  ;;  %6942 = vmatpush1.bf16.msra.mxu1 %v9868_v4 }
 0xdfb   :  { %6880 = vmatprep.subr.bf16.mxu0 %v9869_v8  ;;  %6944 = vmatprep.subr.bf16.mxu1 %v9870_v9  ;;  %v9887_v9 = vld [vmem:[#allocation11_spill] sm:$0xff]  ;;  %v9888_v8 = vld [vmem:[#allocation46_spill] sm:$0xff] }
 0xdfe   :  { %6882 = vmatpush1.bf16.msra.mxu0 %v9871_v59  ;;  %6946 = vmatpush1.bf16.msra.mxu1 %v9872_v33  ;;  %v9882_v59 = vld [vmem:[#allocation41_spill] sm:$0xff]  ;;  %v9883_v33 = vld [vmem:[#allocation42_spill] sm:$0xff] }
 0xdff   :  { %6884 = vmatprep.subr.bf16.mxu0 %v9873_v32  ;;  %6948 = vmatprep.subr.bf16.mxu1 %v9874_v23  ;;  %v9884_v32 = vld [vmem:[#allocation43_spill] sm:$0xff]  ;;  %v9885_v23 = vld [vmem:[#allocation13_spill] sm:$0xff] }
 0xe02   :  { %6886 = vmatpush1.bf16.msra.mxu0 %v9875_v0  ;;  %6950 = vmatpush1.bf16.msra.mxu1 %v9876_v6  ;;  %v9886_v0 = vld [vmem:[#allocation15_spill] sm:$0xff] }
 0xe03   :  { %6888 = vmatprep.subr.bf16.mxu0 %v9877_v22  ;;  %6952 = vmatprep.subr.bf16.mxu1 %v9878_v38  ;;  %v3947_v6 = vld [vmem:[#allocation3 + $0x5] ss:$8 sm:$0xf] }
 0xe04   :  { %v3946_v22 = vld [vmem:[#allocation2 + $0x5] ss:$8 sm:$0xf]  ;;  %v3973_v38 = vrot.slane %v3947_v6, %v9887_v9 }
 0xe06   :  { %6890 = vmatpush1.bf16.msra.mxu0 %v9879_v41  ;;  %6954 = vmatpush1.bf16.msra.mxu1 %v9880_v52  ;;  %v3977_v41 = vrot.slane %v3947_v6, %v9888_v8  ;;  %v3952_v52 = vrot.slane %v3946_v22, %v9887_v9 }
 0xe07   :  { %6892 = vmatprep.subr.bf16.mxu0 %v9881_v39  ;;  %6956 = vmatprep.subr.bf16.mxu1 %v9882_v59  ;;  %v3956_v39 = vrot.slane %v3946_v22, %v9888_v8  ;;  %v3985_v8 = vrot.slane %v3947_v6, %v9736_v11 }
 0xe08   :  { %v3990_v59 = vsel %vm400_vm5, %v3952_v52, %v3973_v38  ;;  %v3964_v52 = vrot.slane %v3946_v22, %v9736_v11 }
 0xe0a   :  { %6894 = vmatpush1.bf16.msra.mxu0 %v9883_v33  ;;  %6958 = vmatpush1.bf16.msra.mxu1 %v9884_v32  ;;  %v9889_v33 = vld [vmem:[#allocation47_spill] sm:$0xff] }
 0xe0b   :  { %6960 = vmatprep.subr.bf16.mxu0 %v9885_v23  ;;  %7024 = vmatprep.subr.bf16.mxu1 %v9886_v0  ;;  %v3981_v1 = vrot.slane %v3947_v6, %v9889_v33  ;;  %v3991_v23 = vsel %vm400_vm5, %v3956_v39, %v3977_v41  ;;  %v3960_v27 = vrot.slane %v3946_v22, %v9889_v33 }
 0xe0d   :  { %v3992_v47 = vsel %vm400_vm5, %v3960_v27, %v3981_v1 }
 0xea0   :  { %v4060_v4 = vpop.f32.mrb[30].mxu0  ;;  %v4131_v32 = vpop.f32.mrb[30].mxu1 }
 0xea1   :  { %v4061_v49 = vadd.f32 %v4060_v4, %v3990_v59  ;;  %v4062_v0 = vpop.f32.mrb[31].mxu0  ;;  %v4133_v16 = vpop.f32.mrb[31].mxu1  ;;  %v4132_v38 = vadd.f32 %v4131_v32, %v3992_v47  ;;  %v3993_v4 = vsel %vm400_vm5, %v3964_v52, %v3985_v8 }
 0xea2   :  { %v4063_v57 = vadd.f32 %v4062_v0, %v3991_v23  ;;  %v4134_v39 = vadd.f32 %v4133_v16, %v3993_v4 }
 0xea3   :  { %v4136_v51 = vmul.f32 0.5, %v4061_v49 }
 0xea4   :  { %v4137_v9 = vmul.f32 0.5, %v4063_v57  ;;  %v4139_v59 = vmul.f32 0.5, %v4134_v39 }
 0xea5   :  { %7262 = vtanh.f32 %v4136_v51 }
 0xea6   :  { %7264 = vtanh.f32 %v4137_v9 }
 0xea7   :  { %7266 = vtanh.f32 %v4132_v38 }
 0xea8   :  { %7268 = vtanh.f32 %v4139_v59 }
 0xeaf   :  { %v7263_v41 = vpop.eup %7262 }
 0xeb0   :  { %v7265_v60 = vpop.eup %7264  ;;  %v4144_v33 = vmul.f32 0.5, %v7263_v41 }
 0xeb1   :  { %v4145_v23 = vmul.f32 0.5, %v7265_v60  ;;  %v7267_v27 = vpop.eup %7266 }
 0xeb2   :  { %v4148_v49 = vadd.f32 0.5, %v4144_v33  ;;  %v7269_v9 = vpop.eup %7268 }
 0xeb3   :  { %v4149_v57 = vadd.f32 0.5, %v4145_v23  ;;  %v4147_v8 = vmul.f32 0.5, %v7269_v9 }
 0xeb4   :  { %v4153_v1 = vmul.f32 %v7267_v27, %v4148_v49 }
 0xeb5   :  { %v4152_v51 = vmul.f32 %v4149_v57, %v9029_v56  ;;  %v4151_v32 = vadd.f32 0.5, %v4147_v8 }
 0xeb7   :  { %v9120_v47 = vadd.f32 %v4153_v1, %v4152_v51 }
 0xeb9   :  { %7270 = vtanh.f32 %v9120_v47 }
 0xec3   :  { %v7271_v16 = vpop.eup %7270 }
 0xec4   :  { %v9123_v6 = vmul.f32 %v7271_v16, %v4151_v32 }
 0xec6   :  { %v4158_v60 = vmul.f32 %v9738_v31, %v9123_v6  ;;  %v4157_v33 = vmul.f32 %v9739_v5, %v9123_v6  ;;  %v4596_v22 = vrot.slane %v9123_v6, 3 }
 0xec8   :  { %4271 = vmatprep.mubr.f32.mxu0 %v4158_v60  ;;  %4342 = vmatprep.mubr.f32.mxu1 %v4158_v60  ;;  %v9132_v56 = vsel %vm2101_vm9, %v9041_v55, %v4596_v22 }
 0xec9   :  { %4272 = vmatmul.mubr.f32.vlgmr.msra.gmra.mrb[32].mxu0 %v4157_v33  ;;  %4343 = vmatmul.mubr.f32.vlgmr.msra.gmra.mrb[32].mxu1 %v4157_v33 }
 0xeca   :  { %6962 = vmatpush1.bf16.msra.mxu0 %v8389_v15  ;;  %7026 = vmatpush1.bf16.msra.mxu1 %v8391_v7  ;;  %v9890_v15 = vld [vmem:[#allocation18_spill] sm:$0xff]  ;;  %v9891_v7 = vld [vmem:[#allocation19_spill] sm:$0xff] }
 0xecb   :  { %6964 = vmatprep.subr.bf16.mxu0 %v8395_v14  ;;  %7028 = vmatprep.subr.bf16.mxu1 %v8397_v18  ;;  %v9892_v14 = vld [vmem:[#allocation20_spill] sm:$0xff]  ;;  %v9893_v18 = vld [vmem:[#allocation21_spill] sm:$0xff] }
 0xece   :  { %6966 = vmatpush1.bf16.msra.mxu0 %v8405_v3  ;;  %7030 = vmatpush1.bf16.msra.mxu1 %v8407_v42  ;;  %v9894_v3 = vld [vmem:[#allocation22_spill] sm:$0xff]  ;;  %v9895_v42 = vld [vmem:[#allocation23_spill] sm:$0xff] }
 0xecf   :  { %6968 = vmatprep.subr.bf16.mxu0 %v8411_v10  ;;  %7032 = vmatprep.subr.bf16.mxu1 %v8413_v17  ;;  %v9896_v10 = vld [vmem:[#allocation24_spill] sm:$0xff]  ;;  %v9897_v17 = vld [vmem:[#allocation25_spill] sm:$0xff] }
 0xed2   :  { %6970 = vmatpush1.bf16.msra.mxu0 %v8419_v26  ;;  %7034 = vmatpush1.bf16.msra.mxu1 %v8421_v28  ;;  %v9898_v26 = vld [vmem:[#allocation27_spill] sm:$0xff]  ;;  %v9899_v28 = vld [vmem:[#allocation28_spill] sm:$0xff] }
 0xed3   :  { %6972 = vmatprep.subr.bf16.mxu0 %v8425_v46  ;;  %7036 = vmatprep.subr.bf16.mxu1 %v8427_v21  ;;  %v9900_v46 = vld [vmem:[#allocation29_spill] sm:$0xff]  ;;  %v9901_v21 = vld [vmem:[#allocation30_spill] sm:$0xff] }
 0xed6   :  { %6974 = vmatpush1.bf16.msra.mxu0 %v8431_v24  ;;  %7038 = vmatpush1.bf16.msra.mxu1 %v8433_v25  ;;  %v9902_v24 = vld [vmem:[#allocation31_spill] sm:$0xff]  ;;  %v9903_v25 = vld [vmem:[#allocation32_spill] sm:$0xff] }
 0xed7   :  { %6976 = vmatprep.subr.bf16.mxu0 %v8437_v50  ;;  %7040 = vmatprep.subr.bf16.mxu1 %v8439_v37  ;;  %v9904_v50 = vld [vmem:[#allocation33_spill] sm:$0xff]  ;;  %v9905_v37 = vld [vmem:[#allocation34_spill] sm:$0xff] }
 0xeda   :  { %6978 = vmatpush1.bf16.msra.mxu0 %v8443_v20  ;;  %7042 = vmatpush1.bf16.msra.mxu1 %v8445_v54  ;;  %v9906_v20 = vld [vmem:[#allocation35_spill] sm:$0xff]  ;;  %v9907_v54 = vld [vmem:[#allocation36_spill] sm:$0xff] }
 0xedb   :  { %6980 = vmatprep.subr.bf16.mxu0 %v8449_v30  ;;  %7044 = vmatprep.subr.bf16.mxu1 %v8451_v19  ;;  %v9908_v30 = vld [vmem:[#allocation37_spill] sm:$0xff]  ;;  %v9909_v19 = vld [vmem:[#allocation38_spill] sm:$0xff] }
 0xede   :  { %6982 = vmatpush1.bf16.msra.mxu0 %v8455_v34  ;;  %7046 = vmatpush1.bf16.msra.mxu1 %v8457_v36  ;;  %v9910_v34 = vld [vmem:[#allocation39_spill] sm:$0xff]  ;;  %v9911_v36 = vld [vmem:[#allocation40_spill] sm:$0xff] }
 0xedf   :  { %6984 = vmatprep.subr.bf16.mxu0 %v8461_v29  ;;  %7048 = vmatprep.subr.bf16.mxu1 %v8463_v45  ;;  %v9912_v29 = vld [vmem:[#allocation41_spill] sm:$0xff]  ;;  %v9913_v45 = vld [vmem:[#allocation42_spill] sm:$0xff] }
 0xee2   :  { %6986 = vmatpush1.bf16.msra.mxu0 %v8467_v35  ;;  %7050 = vmatpush1.bf16.msra.mxu1 %v8469_v43  ;;  %v9914_v35 = vld [vmem:[#allocation43_spill] sm:$0xff] }
 0xee3   :  { %6988 = vmatprep.subr.bf16.mxu0 %v8473_v61  ;;  %7052 = vmatprep.subr.bf16.mxu1 %v8475_v63  ;;  %v4160_v43 = vld [vmem:[#allocation3 + $0x6] ss:$8 sm:$0xf] }
 0xee4   :  { %v4159_v61 = vld [vmem:[#allocation2 + $0x6] ss:$8 sm:$0xf]  ;;  %v4198_v27 = vrot.slane %v4160_v43, %v9736_v11 }
 0xee5   :  { %v9915_v63 = vld [vmem:[#allocation11_spill] sm:$0xff]  ;;  %v4177_v1 = vrot.slane %v4159_v61, %v9736_v11 }
 0xee6   :  { %6990 = vmatpush1.bf16.msra.mxu0 %v8479_v13  ;;  %7054 = vmatpush1.bf16.msra.mxu1 %v8481_v48  ;;  %v4186_v13 = vrot.slane %v4160_v43, %v9915_v63  ;;  %v9916_v48 = vld [vmem:[#allocation46_spill] sm:$0xff] }
 0xee7   :  { %6992 = vmatprep.subr.bf16.mxu0 %v8485_v12  ;;  %7056 = vmatprep.subr.bf16.mxu1 %v8487_v53  ;;  %v4190_v12 = vrot.slane %v4160_v43, %v9916_v48  ;;  %v4165_v53 = vrot.slane %v4159_v61, %v9915_v63  ;;  %v4206_v51 = vsel %vm400_vm5, %v4177_v1, %v4198_v27  ;;  %v4657_v27 = vld [vmem:[#allocation6 + $0xe0] sm:$0xff] }
 0xeea   :  { %6994 = vmatpush1.bf16.msra.mxu0 %v8491_v40  ;;  %7058 = vmatpush1.bf16.msra.mxu1 %v8493_v44  ;;  %v4169_v40 = vrot.slane %v4159_v61, %v9916_v48  ;;  %v4203_v44 = vsel %vm400_vm5, %v4165_v53, %v4186_v13  ;;  %v4651_v13 = vld [vmem:[#allocation6 + $0xb0] sm:$0xff] }
 0xeeb   :  { %6996 = vmatprep.subr.bf16.mxu0 %v8497_v58  ;;  %7060 = vmatprep.subr.bf16.mxu1 %v8499_v62  ;;  %v9917_v62 = vld [vmem:[#allocation47_spill] sm:$0xff] }
 0xeec   :  { %v4204_v38 = vsel %vm400_vm5, %v4169_v40, %v4190_v12  ;;  %v4173_v39 = vrot.slane %v4159_v61, %v9917_v62  ;;  %v4652_v12 = vld [vmem:[#allocation6 + $0xb8] sm:$0xff]  ;;  %v4635_v40 = vld [vmem:[#allocation6 + $0x30] sm:$0xff] }
 0xeed   :  { %v7099_v53 = vpack.c.bf16 %v4652_v12, %v4651_v13 }
 0xeee   :  { %6998 = vmatpush1.bf16.msra.mxu0 %v8503_v2  ;;  %7062 = vmatpush1.bf16.msra.mxu1 %v9890_v15  ;;  %v4194_v2 = vrot.slane %v4160_v43, %v9917_v62  ;;  %v4634_v43 = vld [vmem:[#allocation6 + $0x28] sm:$0xff] }
 0xeef   :  { %7000 = vmatprep.subr.bf16.mxu0 %v9891_v7  ;;  %7064 = vmatprep.subr.bf16.mxu1 %v9892_v14 }
 0xef0   :  { %v4205_v23 = vsel %vm400_vm5, %v4173_v39, %v4194_v2  ;;  %v4653_v2 = vld [vmem:[#allocation6 + $0xc0] sm:$0xff]  ;;  %v4656_v39 = vld [vmem:[#allocation6 + $0xd8] sm:$0xff] }
 0xef2   :  { %7002 = vmatpush1.bf16.msra.mxu0 %v9893_v18  ;;  %7066 = vmatpush1.bf16.msra.mxu1 %v9894_v3 }
 0xef3   :  { %7004 = vmatprep.subr.bf16.mxu0 %v9895_v42  ;;  %7068 = vmatprep.subr.bf16.mxu1 %v9896_v10 }
 0xef6   :  { %7006 = vmatpush1.bf16.msra.mxu0 %v9897_v17  ;;  %7070 = vmatpush1.bf16.msra.mxu1 %v9898_v26 }
 0xef7   :  { %7008 = vmatprep.subr.bf16.mxu0 %v9899_v28  ;;  %7072 = vmatprep.subr.bf16.mxu1 %v9900_v46 }
 0xefa   :  { %7010 = vmatpush1.bf16.msra.mxu0 %v9901_v21  ;;  %7074 = vmatpush1.bf16.msra.mxu1 %v9902_v24  ;;  %v4646_v24 = vld [vmem:[#allocation6 + $0x88] sm:$0xff] }
 0xefb   :  { %7012 = vmatprep.subr.bf16.mxu0 %v9903_v25  ;;  %7076 = vmatprep.subr.bf16.mxu1 %v9904_v50  ;;  %v4629_v50 = vld [vmem:[#allocation6] sm:$0xff] }
 0xefe   :  { %7014 = vmatpush1.bf16.msra.mxu0 %v9905_v37  ;;  %7078 = vmatpush1.bf16.msra.mxu1 %v9906_v20  ;;  %v4630_v37 = vld [vmem:[#allocation6 + $0x8] sm:$0xff] }
 0xeff   :  { %7016 = vmatprep.subr.bf16.mxu0 %v9907_v54  ;;  %7080 = vmatprep.subr.bf16.mxu1 %v9908_v30  ;;  %v7089_v20 = vpack.c.bf16 %v4630_v37, %v4629_v50  ;;  %v4647_v54 = vld [vmem:[#allocation6 + $0x90] sm:$0xff]  ;;  %v4648_v30 = vld [vmem:[#allocation6 + $0x98] sm:$0xff] }
 0xf02   :  { %7018 = vmatpush1.bf16.msra.mxu0 %v9909_v19  ;;  %7082 = vmatpush1.bf16.msra.mxu1 %v9910_v34  ;;  %v7091_v19 = vpack.c.bf16 %v4648_v30, %v4647_v54  ;;  %v4631_v34 = vld [vmem:[#allocation6 + $0x10] sm:$0xff] }
 0xf03   :  { %7020 = vmatprep.subr.bf16.mxu0 %v9911_v36  ;;  %7084 = vmatprep.subr.bf16.mxu1 %v9912_v29  ;;  %v4650_v29 = vld [vmem:[#allocation6 + $0xa8] sm:$0xff] }
 0xf06   :  { %7022 = vmatpush1.bf16.msra.mxu0 %v9913_v45  ;;  %7086 = vmatpush1.bf16.msra.mxu1 %v9914_v35  ;;  %v4633_v35 = vld [vmem:[#allocation6 + $0x20] sm:$0xff] }
 0xf07   :  { %v7097_v61 = vpack.c.bf16 %v4634_v43, %v4633_v35 }
 0xf9c   :  { %v4273_v58 = vpop.f32.mrb[32].mxu0  ;;  %v4344_v55 = vpop.f32.mrb[32].mxu1 }
 0xf9d   :  { %v4274_v0 = vadd.f32 %v4273_v58, %v4203_v44  ;;  %v4275_v52 = vpop.f32.mrb[33].mxu0  ;;  %v4346_v4 = vpop.f32.mrb[33].mxu1  ;;  %v4345_v57 = vadd.f32 %v4344_v55, %v4205_v23  ;;  %v4636_v44 = vld [vmem:[#allocation6 + $0x38] sm:$0xff]  ;;  %v4654_v55 = vld [vmem:[#allocation6 + $0xc8] sm:$0xff]  ;;  %v4639_v23 = vld [vmem:[#allocation6 + $0x50] sm:$0xff] }
 0xf9e   :  { %v4276_v59 = vadd.f32 %v4275_v52, %v4204_v38  ;;  %v4347_v9 = vadd.f32 %v4346_v4, %v4206_v51  ;;  %v7101_v58 = vpack.c.bf16 %v4636_v44, %v4635_v40  ;;  %v7103_v38 = vpack.c.bf16 %v4654_v55, %v4653_v2  ;;  %v4638_v52 = vld [vmem:[#allocation6 + $0x48] sm:$0xff]  ;;  %v4655_v4 = vld [vmem:[#allocation6 + $0xd0] sm:$0xff] }
 0xf9f   :  { %v4349_v41 = vmul.f32 0.5, %v4274_v0  ;;  %v4637_v0 = vld [vmem:[#allocation6 + $0x40] sm:$0xff] }
 0xfa0   :  { %v4350_v49 = vmul.f32 0.5, %v4276_v59  ;;  %v4352_v8 = vmul.f32 0.5, %v4347_v9  ;;  %v7105_v59 = vpack.c.bf16 %v4638_v52, %v4637_v0  ;;  %v4641_v9 = vld [vmem:[#allocation6 + $0x60] sm:$0xff] }
 0xfa1   :  { %7272 = vtanh.f32 %v4349_v41  ;;  %v7107_v41 = vpack.c.bf16 %v4656_v39, %v4655_v4  ;;  %v4611_v39 = vrot.slane %v9123_v6, 7 }
 0xfa2   :  { %7274 = vtanh.f32 %v4350_v49  ;;  %v4640_v49 = vld [vmem:[#allocation6 + $0x58] sm:$0xff] }
 0xfa3   :  { %7276 = vtanh.f32 %v4345_v57  ;;  %v4658_v57 = vld [vmem:[#allocation6 + $0xe8] sm:$0xff]  ;;  %v7109_v1 = vpack.c.bf16 %v4640_v49, %v4639_v23 }
 0xfa4   :  { %7278 = vtanh.f32 %v4352_v8  ;;  %v7111_v51 = vpack.c.bf16 %v4658_v57, %v4657_v27  ;;  %v4642_v8 = vld [vmem:[#allocation6 + $0x68] sm:$0xff]  ;;  %v9919_v57 = vld [vmem:[#allocation17_spill] sm:$0xff] }
 0xfab   :  { %v7273_v32 = vpop.eup %7272 }
 0xfac   :  { %v7275_v16 = vpop.eup %7274  ;;  %v4357_v60 = vmul.f32 0.5, %v7273_v32  ;;  %v4659_v32 = vld [vmem:[#allocation6 + $0xf0] sm:$0xff] }
 0xfad   :  { %v4358_v33 = vmul.f32 0.5, %v7275_v16  ;;  %v7277_v15 = vpop.eup %7276  ;;  %v4660_v16 = vld [vmem:[#allocation6 + $0xf8] sm:$0xff] }
 0xfae   :  { %v4361_v22 = vadd.f32 0.5, %v4357_v60  ;;  %v7279_v42 = vpop.eup %7278  ;;  %v7113_v60 = vpack.c.bf16 %v4642_v8, %v4641_v9  ;;  %v9920_v9 = vld [vmem:[#allocation50_spill] sm:$0xff] }
 0xfaf   :  { %v4362_v7 = vadd.f32 0.5, %v4358_v33  ;;  %v4360_v10 = vmul.f32 0.5, %v7279_v42  ;;  %v7115_v33 = vpack.c.bf16 %v4660_v16, %v4659_v32  ;;  %v4617_v8 = vrot.slane %v9920_v9, 3  ;;  %v9921_v32 = vld [vmem:[#allocation51_spill] sm:$0xff] }
 0xfb0   :  { %v4366_v14 = vmul.f32 %v7277_v15, %v4361_v22  ;;  %v4643_v22 = vld [vmem:[#allocation6 + $0x70] sm:$0xff]  ;;  %v4644_v15 = vld [vmem:[#allocation6 + $0x78] sm:$0xff]  ;;  %v9922_v6 = vrot.slane %v9921_v32, 5 }
 0xfb1   :  { %v4365_v18 = vmul.f32 %v4362_v7, %v9120_v47  ;;  %v4364_v17 = vadd.f32 0.5, %v4360_v10  ;;  %v4645_v47 = vld [vmem:[#allocation6 + $0x80] sm:$0xff]  ;;  %v7117_v7 = vpack.c.bf16 %v4644_v15, %v4643_v22 }
 0xfb2   :  { %v7087_v25 = vpack.c.bf16 %v4646_v24, %v4645_v47 }
 0xfb3   :  { %v9209_v3 = vadd.f32 %v4366_v14, %v4365_v18  ;;  %v4373_v14 = vld [vmem:[#allocation3 + $0x7] ss:$8 sm:$0xf] }
 0xfb4   :  { %7088 = vmatprep.subr.bf16.mxu0 %v7087_v25  ;;  %v4372_v18 = vld [vmem:[#allocation2 + $0x7] ss:$8 sm:$0xf]  ;;  %v4399_v42 = vrot.slane %v4373_v14, %v9915_v63  ;;  %v4403_v10 = vrot.slane %v4373_v14, %v9916_v48  ;;  %v4407_v47 = vrot.slane %v4373_v14, %v9917_v62 }
 0xfb5   :  { %7280 = vtanh.f32 %v9209_v3  ;;  %v4386_v54 = vrot.slane %v4372_v18, %v9917_v62 }
 0xfbf   :  { %v7281_v26 = vpop.eup %7280 }
 0xfc0   :  { %v9212_v28 = vmul.f32 %v7281_v26, %v4364_v17  ;;  %v4378_v17 = vrot.slane %v4372_v18, %v9915_v63  ;;  %v4382_v26 = vrot.slane %v4372_v18, %v9916_v48  ;;  %v4411_v48 = vrot.slane %v4373_v14, %v9736_v11 }
 0xfc2   :  { %v4371_v46 = vmul.f32 %v9738_v31, %v9212_v28  ;;  %v4370_v21 = vmul.f32 %v9739_v5, %v9212_v28  ;;  %v4632_v31 = vld [vmem:[#allocation6 + $0x18] sm:$0xff]  ;;  %v4649_v5 = vld [vmem:[#allocation6 + $0xa0] sm:$0xff]  ;;  %v4417_v50 = vsel %vm400_vm5, %v4382_v26, %v4403_v10 }
 0xfc3   :  { %v7093_v36 = vpack.c.bf16 %v4632_v31, %v4631_v34  ;;  %v7095_v45 = vpack.c.bf16 %v4650_v29, %v4649_v5  ;;  %v4418_v34 = vsel %vm400_vm5, %v4386_v54, %v4407_v47  ;;  %v107_v10 = vld [vmem:[#allocation8 + $0x7] ss:$0 sm:$0xff] }
 0xfc4   :  { %4484 = vmatprep.mubr.f32.mxu0 %v4371_v46  ;;  %4555 = vmatprep.mubr.f32.mxu1 %v4371_v46  ;;  %v4416_v46 = vsel %vm400_vm5, %v4378_v17, %v4399_v42 }
 0xfc5   :  { %4485 = vmatmul.mubr.f32.vlgmr.msra.gmra.mrb[34].mxu0 %v4370_v21  ;;  %4556 = vmatmul.mubr.f32.vlgmr.msra.gmra.mrb[34].mxu1 %v4370_v21 }
 0xfc6   :  { %7090 = vmatpush3.bf16.msra.mxu0 %v7089_v20 }
 0xfc7   :  { %7092 = vmatprep.subr.bf16.mxu0 %v7091_v19 }
 0xfca   :  { %7094 = vmatpush3.bf16.msra.mxu0 %v7093_v36  ;;  %v4390_v36 = vrot.slane %v4372_v18, %v9736_v11 }
 0xfcb   :  { %7096 = vmatprep.subr.bf16.mxu0 %v7095_v45 }
 0xfcc   :  { %v4419_v5 = vsel %vm400_vm5, %v4390_v36, %v4411_v48 }
 0xfce   :  { %7098 = vmatpush3.bf16.msra.mxu0 %v7097_v61 }
 0xfcf   :  { %7100 = vmatprep.subr.bf16.mxu0 %v7099_v53 }
 0xfd2   :  { %7102 = vmatpush3.bf16.msra.mxu0 %v7101_v58 }
 0xfd3   :  { %7104 = vmatprep.subr.bf16.mxu0 %v7103_v38  ;;  %v4599_v38 = vrot.slane %v9212_v28, 2 }
 0xfd6   :  { %7106 = vmatpush3.bf16.msra.mxu0 %v7105_v59  ;;  %v4609_v59 = vsel %vm2103_vm10, %v9132_v56, %v4599_v38  ;;  %v9923_v56 = vld [vmem:[#allocation44_spill] sm:$0xff] }
 0xfd7   :  { %7108 = vmatprep.subr.bf16.mxu0 %v7107_v41  ;;  %v9918_v41 = vld [vmem:[#allocation16_spill] sm:$0xff] }
 0xfd8   :  { %v4613_v23 = vrot.slane %v9918_v41, 6 }
 0xfda   :  { %7110 = vmatpush3.bf16.msra.mxu0 %v7109_v1  ;;  %v4615_v1 = vrot.slane %v9919_v57, 4 }
 0xfdb   :  { %7112 = vmatprep.subr.bf16.mxu0 %v7111_v51 }
 0xfde   :  { %7114 = vmatpush3.bf16.msra.mxu0 %v7113_v60  ;;  %v4620_v60 = vrot.slane %v9923_v56, 2 }
 0xfdf   :  { %7116 = vmatprep.subr.bf16.mxu0 %v7115_v33 }
 0xfe2   :  { %7118 = vmatpush3.bf16.msra.mxu0 %v7117_v7  ;;  %v105_v7 = vld [vmem:[#allocation8 + $0x6] ss:$0 sm:$0xff] }
0x1098   :  { %v4486_v21 = vpop.f32.mrb[34].mxu0  ;;  %v4557_v24 = vpop.f32.mrb[34].mxu1 }
0x1099   :  { %v4487_v25 = vadd.f32 %v4486_v21, %v4416_v46  ;;  %v4488_v37 = vpop.f32.mrb[35].mxu0  ;;  %v4559_v20 = vpop.f32.mrb[35].mxu1  ;;  %v4558_v31 = vadd.f32 %v4557_v24, %v4418_v34  ;;  %v106_v21 = vld [vmem:[#allocation8 + $0xe] ss:$0 sm:$0xff] }
0x109a   :  { %v4489_v30 = vadd.f32 %v4488_v37, %v4417_v50  ;;  %v4560_v29 = vadd.f32 %v4559_v20, %v4419_v5 }
0x109b   :  { %v4562_v19 = vmul.f32 0.5, %v4487_v25 }
0x109c   :  { %v4563_v63 = vmul.f32 0.5, %v4489_v30  ;;  %v4565_v45 = vmul.f32 0.5, %v4560_v29 }
0x109d   :  { %7282 = vtanh.f32 %v4562_v19 }
0x109e   :  { %7284 = vtanh.f32 %v4563_v63 }
0x109f   :  { %7286 = vtanh.f32 %v4558_v31 }
0x10a0   :  { %7288 = vtanh.f32 %v4565_v45 }
0x10a7   :  { %v7283_v35 = vpop.eup %7282 }
0x10a8   :  { %v7285_v43 = vpop.eup %7284  ;;  %v4570_v62 = vmul.f32 0.5, %v7283_v35 }
0x10a9   :  { %v4571_v61 = vmul.f32 0.5, %v7285_v43  ;;  %v7287_v12 = vpop.eup %7286 }
0x10aa   :  { %v4574_v13 = vadd.f32 0.5, %v4570_v62  ;;  %v7289_v2 = vpop.eup %7288 }
0x10ab   :  { %v4575_v53 = vadd.f32 0.5, %v4571_v61  ;;  %v4573_v11 = vmul.f32 0.5, %v7289_v2 }
0x10ac   :  { %v4579_v40 = vmul.f32 %v7287_v12, %v4574_v13 }
0x10ad   :  { %v4578_v44 = vmul.f32 %v4575_v53, %v9209_v3  ;;  %v4577_v55 = vadd.f32 0.5, %v4573_v11 }
0x10af   :  { %v4580_v58 = vadd.f32 %v4579_v40, %v4578_v44 }
0x10b1   :  { %7290 = vtanh.f32 %v4580_v58 }
0x10bb   :  { %v7291_v0 = vpop.eup %7290 }
0x10bc   :  { %v4582_v52 = vmul.f32 %v7291_v0, %v4577_v55 }
0x10be   :  { %v4602_v4 = vrot.slane %v4582_v52, 1 }
0x10c0   :  { %v4622_v3 = vsel %vm400_vm5, %v4602_v4, %v9212_v28  ;;  %v4610_v49 = vsel %vm2105_vm11, %v4609_v59, %v4602_v4 }
0x10c1   :  { %v4623_v27 = vsel %vm2095_vm6, %v4622_v3, %v4611_v39 }
0x10c2   :  { %v4624_v51 = vsel %vm2097_vm7, %v4623_v27, %v4613_v23 }
0x10c3   :  { %v4625_v16 = vsel %vm2099_vm8, %v4624_v51, %v9922_v6 }
0x10c4   :  { %v4626_v33 = vsel %vm2101_vm9, %v4625_v16, %v4615_v1 }
0x10c5   :  { %v4627_v28 = vsel %vm2103_vm10, %v4626_v33, %v4617_v8 }
0x10c6   :  { %v4628_v22 = vsel %vm2105_vm11, %v4627_v28, %v4620_v60 }
0x10c7   :  { %4725 = vmatprep.mubr.f32.mxu0 %v4628_v22 }
0x10c8   :  { %4726 = vmatmul.mubr.f32.vlgmr.msra.gmra.mrb[36].mxu0 %v4610_v49 }
0x119b   :  { %v4780_v15 = vpop.f32.mrb[36].mxu0 }
0x119c   :  { %v4781_v14 = vpop.f32.mrb[37].mxu0 }
0x119d   :  { %v4782_v18 = vadd.f32 %v4781_v14, %v4780_v15 }
0x119f   :  { %v4728_v42 = vadd.f32 %v4782_v18, %v105_v7 }
0x11a1   :  { %vm4731_vm12 = vcmp.gt.f32.partialorder %v4728_v42, 0.0  ;;  %v4732_v17 = vmul.f32 0.01, %v4728_v42 }
0x11a3   :  { %v4733_v26 = vsel %vm4731_vm12, %v4728_v42, %v4732_v17 }
0x11a4   :  { %v4734_v46 = vmul.f32 %v4733_v26, %v107_v10 }
0x11a6   :  { %4735 = vadd.xlane.f32.xlu1 %v4734_v46 }
0x1233   :  { %v4736_v47 = vpop.xlane.xlu1 %4735 }
0x1234   :  { %v4737_v24 = vadd.f32 %v4736_v47, %v106_v21 }
0x1236   :  { %4739 = vst.msk [vmem:[%s9257_s4] sm:$0xff] %vm4738_vm13, %v4737_v24 }
0x1237   :  { %4744 = vsyncpa [#allocation5], 1 }
0x1238   :  { %4745 = vsyncpa [#allocation7], 1 }

</bundles_post_ra>
